<compile_context>
chip_gen: v5e
topology: v5e:2x2
jax: 0.10.0
libtpu: 0.0.40
codegen_flags: <defaults>
</compile_context>

<pallas_src>
import jax
import jax.numpy as jnp
from jax import lax
from jax.experimental import pallas as pl
from jax.experimental.pallas import tpu as pltpu


# ----------------------------------------------------------------------------
# Helpers
# ----------------------------------------------------------------------------
def _vmem_capacity():
    try:
        return int(pltpu.get_tpu_info().vmem_capacity_bytes)
    except Exception:
        return 64 << 20                       # conservative v7x fallback


def _usable_vmem():
    # 20% headroom for Mosaic internal scratch / semaphores (binding on v7x).
    return int(0.8 * _vmem_capacity())


def _pick_tile(n, *, budget_bytes, bytes_per_col, prefer_max):
    """Largest lane-dense tile (multiple of 128) dividing n whose per-column
    cost fits budget_bytes.  Bounded: never silently blows past the budget
    (fixes the old `else N` escape hatch)."""
    best = 0
    t = 128
    limit = min(n, max(128, prefer_max))
    while t <= limit:
        if n % t == 0 and t * bytes_per_col <= budget_bytes:
            best = t
        t += 128
    if best == 0:
        best = 128 if n % 128 == 0 else n     # tiny / demo shapes
    return best


def _pick_batch_tile(b):
    # TODO(synk): at production scale pad B to a multiple of 8 so every
    # (h, b)-row slab is sublane-aligned (bf16 packs 16 rows per vreg).
    return b if b <= 8 else next(c for c in (8, 4, 2, 1) if b % c == 0)


# ----------------------------------------------------------------------------
# Kernel 1: conv0 (3x3) with in-kernel im2col + bias + ReLU + 3x3 max-pool
# ----------------------------------------------------------------------------
def _conv0_relu_pool_kernel(x_ref, w_ref, b_ref, o_ref):
    """x_ref: (8, 8, tb, C)  activations, (h, w, b, cin) layout
       w_ref: (9, C, tn)     conv0 weight, index kh*3+kw, (cin, cout) inside
       b_ref: (1, tn) f32    conv0 bias
       o_ref: (4, tb, tn)    pooled output, first dim = ph*2 + pw
    """
    tb = x_ref.shape[2]
    cin = x_ref.shape[3]
    bias = b_ref[...]                                     # (1, tn) f32

    # Hoist the 8 input columns once per grid step; each is a lane-dense
    # (8*tb, C) slab with rows ordered (h, b).  Every conv LHS below is a
    # static row-slice of one of these -- no im2col matrix is materialized.
    cols = [x_ref[:, v].reshape(8 * tb, cin) for v in range(8)]

    for pw in range(2):                                   # pooled column
        colmax = None
        for oj in range(3):                               # conv column in pool
            ow = 3 * pw + oj
            acc = None
            for di in range(3):
                for dj in range(3):
                    lhs = cols[ow + dj][di * tb:di * tb + 6 * tb]   # (6*tb, C)
                    part = jnp.dot(lhs, w_ref[di * 3 + dj],
                                   preferred_element_type=jnp.float32)
                    acc = part if acc is None else acc + part
            a = jnp.maximum(acc + bias, 0.0)              # (6*tb, tn), rows (oh, b)
            colmax = a if colmax is None else jnp.maximum(colmax, a)
        for ph in range(2):                               # pooled row: max over 3 oh
            p0 = colmax[(3 * ph + 0) * tb:(3 * ph + 1) * tb]
            p1 = colmax[(3 * ph + 1) * tb:(3 * ph + 2) * tb]
            p2 = colmax[(3 * ph + 2) * tb:(3 * ph + 3) * tb]
            o_ref[2 * ph + pw] = jnp.maximum(jnp.maximum(p0, p1),
                                             p2).astype(o_ref.dtype)


def conv0_relu_pool(x_hwbc, w_r, bias, *, tn=None, tb=None):
    """maxpool3x3(relu(conv3x3(x) + bias)); returns (4, B, N) (dim0 = ph*2+pw)."""
    hh, ww, B, C = x_hwbc.shape
    assert (hh, ww) == (8, 8), "DomainDis expects an 8x8 spatial input"
    nine, C2, N = w_r.shape
    assert nine == 9 and C2 == C
    dtype = x_hwbc.dtype
    itemsize = jnp.dtype(dtype).itemsize

    usable = _usable_vmem()
    if tn is None:
        # budget the double-buffered (9C, tn) weight tile against VMEM; prefer
        # >= 2 N tiles so the "parallel" N axis can feed both v7x TensorCores.
        tn = _pick_tile(N, budget_bytes=usable // 2,
                        bytes_per_col=2 * 9 * C * itemsize,
                        prefer_max=max(128, N // 2))
    if tb is None:
        tb = _pick_batch_tile(B)
    assert N % tn == 0 and B % tb == 0

    need = (2 * 64 * tb * C * itemsize        # x block (double-buffered)
            + 2 * 9 * C * tn * itemsize       # weight block (double-buffered)
            + 2 * tn * 4                      # bias block
            + 2 * 4 * tb * tn * itemsize      # output block
            + 64 * tb * C * itemsize          # in-kernel column slabs
            + 36 * tb * tn * 4)               # f32 acc/colmax temporaries
    vmem_limit = int(min(usable, max(need + (8 << 20), 24 << 20)))

    cost = pl.CostEstimate(
        flops=2 * B * 36 * 9 * C * N,
        transcendentals=0,
        bytes_accessed=(x_hwbc.size * itemsize + w_r.size * itemsize
                        + N * 4 + 4 * B * N * itemsize))

    return pl.pallas_call(
        _conv0_relu_pool_kernel,
        out_shape=jax.ShapeDtypeStruct((4, B, N), dtype),
        grid_spec=pltpu.PrefetchScalarGridSpec(
            num_scalar_prefetch=0,
            # N OUTER: the big weight tile is DMA'd once per N tile; only the
            # tiny activation slab is re-streamed on the inner batch axis.
            grid=(N // tn, B // tb),
            in_specs=[
                pl.BlockSpec((8, 8, tb, C), lambda j, b: (0, 0, b, 0)),
                pl.BlockSpec((9, C, tn), lambda j, b: (0, 0, j)),
                pl.BlockSpec((1, tn), lambda j, b: (0, j)),
            ],
            out_specs=pl.BlockSpec((4, tb, tn), lambda j, b: (0, b, j)),
        ),
        compiler_params=pltpu.CompilerParams(
            dimension_semantics=("parallel", "arbitrary"),
            vmem_limit_bytes=vmem_limit),
        cost_estimate=cost,
    )(x_hwbc, w_r, bias.reshape(1, N).astype(jnp.float32))


# ----------------------------------------------------------------------------
# Kernel 2: tail = conv1 (2x2 -> 1x1) + fc0 + fc1, tiled over the shared C
#           contraction with an f32 accumulator; emits per-core partial logits.
# ----------------------------------------------------------------------------
def _tail_kernel(p_ref, w1_ref, b1_ref, wf0_ref, wf1_ref, o_ref, acc_ref):
    """p_ref:   (4, B, C0)   pooled conv0 output (dim0 = kh*2+kw)
       w1_ref:  (4, C0, tc)  conv1 weight slab (output-channel tile)
       b1_ref:  (1, tc) f32
       wf0_ref: (tc, H1)     fc0 weight rows for this tile
       wf1_ref: (1, H1) f32  fc1 weight
       o_ref:   (1, B, 1) f32 partial logit for this parallel slice
       acc_ref: (B, H1) f32  fc0 partial accumulator
    """
    c = pl.program_id(1)

    @pl.when(c == 0)
    def _():
        acc_ref[...] = jnp.zeros_like(acc_ref)

    # conv1 over the 2x2 pooled map: 4 accumulated taps (no activation
    # transpose needed -- the weight was reordered instead).
    y1 = None
    for s in range(4):
        part = jnp.dot(p_ref[s], w1_ref[s], preferred_element_type=jnp.float32)
        y1 = part if y1 is None else y1 + part
    y1 = jnp.maximum(y1 + b1_ref[...], 0.0)               # (B, tc) f32

    # fc0 partial for this C tile.
    acc_ref[...] += jnp.dot(y1.astype(wf0_ref.dtype), wf0_ref[...],
                            preferred_element_type=jnp.float32)

    # fc1 (out_features == 1): VPU multiply + lane reduction on the last step.
    @pl.when(c == pl.num_programs(1) - 1)
    def _():
        logit = jnp.sum(acc_ref[...] * wf1_ref[...], axis=-1, keepdims=True)
        o_ref[...] = logit.reshape(o_ref.shape)


def tail_partial_logits(pooled, w1_r, b1_row, wf0_t, wf1_row, *,
                        tc=None, n_par=None):
    """Returns (n_par, B, 1) f32 partial logits (fc0/fc1 biases NOT included)."""
    four, B, C0 = pooled.shape
    assert four == 4
    _, C0b, C1 = w1_r.shape
    C1b, H1 = wf0_t.shape
    assert C0 == C0b and C1 == C1b
    dtype = pooled.dtype
    itemsize = jnp.dtype(dtype).itemsize

    usable = _usable_vmem()
    if tc is None:
        tc = _pick_tile(C1, budget_bytes=usable // 2,
                        bytes_per_col=2 * (4 * C0 + H1) * itemsize,
                        prefer_max=max(128, C1 // 2))
    assert C1 % tc == 0
    n_c = C1 // tc
    if n_par is None:
        # v7x: split the bandwidth-bound weight streaming across both
        # TensorCores; each core emits a partial logit (combined in wrapper).
        n_par = 2 if n_c % 2 == 0 else 1
    n_steps = n_c // n_par

    need = (2 * 4 * B * C0 * itemsize         # pooled (constant index map)
            + 2 * 4 * C0 * tc * itemsize      # w1 slab (double-buffered)
            + 2 * tc * 4                      # b1 slab
            + 2 * tc * H1 * itemsize          # wf0 slab (double-buffered)
            + 2 * H1 * 4                      # wf1
            + 2 * B * 4                       # out block
            + B * H1 * 4                      # acc scratch
            + 4 * B * max(tc, H1) * 4)        # temporaries
    vmem_limit = int(min(usable, max(need + (8 << 20), 24 << 20)))

    cost = pl.CostEstimate(
        flops=2 * B * (4 * C0 * C1 + C1 * H1 + H1),
        transcendentals=0,
        bytes_accessed=((pooled.size + w1_r.size + wf0_t.size) * itemsize
                        + (C1 + H1) * 4 + n_par * B * 4))

    return pl.pallas_call(
        _tail_kernel,
        out_shape=jax.ShapeDtypeStruct((n_par, B, 1), jnp.float32),
        grid_spec=pltpu.PrefetchScalarGridSpec(
            num_scalar_prefetch=0,
            grid=(n_par, n_steps),
            in_specs=[
                pl.BlockSpec((4, B, C0), lambda h, c: (0, 0, 0)),
                pl.BlockSpec((4, C0, tc), lambda h, c: (0, 0, h * n_steps + c)),
                pl.BlockSpec((1, tc), lambda h, c: (0, h * n_steps + c)),
                pl.BlockSpec((tc, H1), lambda h, c: (h * n_steps + c, 0)),
                pl.BlockSpec((1, H1), lambda h, c: (0, 0)),
            ],
            out_specs=pl.BlockSpec((1, B, 1), lambda h, c: (h, 0, 0)),
            scratch_shapes=[pltpu.VMEM((B, H1), jnp.float32)],
        ),
        compiler_params=pltpu.CompilerParams(
            dimension_semantics=("parallel", "arbitrary"),
            vmem_limit_bytes=vmem_limit),
        cost_estimate=cost,
    )(pooled, w1_r, b1_row, wf0_t, wf1_row)


# ----------------------------------------------------------------------------
# Forward pass (wrapper glue: tiny layout transposes + weight reordering only)
# ----------------------------------------------------------------------------
def domain_dis_forward(x, params, *, compute_dtype=jnp.bfloat16):
    """Pallas implementation of DomainDis.forward.  x: (B, C, 8, 8) float32."""
    (w0, b0), (w1, b1), (wf0, bf0), (wf1, bf1) = params
    B, C, H, W = x.shape
    assert (H, W) == (8, 8), "DomainDis expects an 8x8 spatial input"
    N0 = w0.shape[0]          # conv0 out channels
    C1 = w1.shape[0]          # conv1 out channels (== fc0 in features)
    H1 = wf0.shape[0]

    # (B, C, 8, 8) -> (8, 8, B, C): only the raw 64*C-per-image activation is
    # moved; im2col happens inside the conv0 kernel (no HBM patch matrix).
    x_hwbc = jnp.transpose(x, (2, 3, 0, 1)).astype(compute_dtype)

    # conv0 weight OIHW -> (kh, kw, cin, cout) -> (9, cin, cout)
    w0_r = jnp.transpose(w0, (2, 3, 1, 0)).reshape(9, C, N0).astype(compute_dtype)

    pooled = conv0_relu_pool(x_hwbc, w0_r, b0)            # (4, B, N0)

    # conv1 weight OIHW(2x2) -> (kh, kw, cin, cout) -> (4, cin, cout); keeps the
    # pooled activations in their (kh*2+kw, B, C) kernel-native layout.
    w1_r = jnp.transpose(w1, (2, 3, 1, 0)).reshape(4, N0, C1).astype(compute_dtype)

    partials = tail_partial_logits(
        pooled,
        w1_r,
        b1.reshape(1, C1).astype(jnp.float32),
        wf0.T.astype(compute_dtype),                      # (C1, H1)
        wf1.reshape(1, H1).astype(jnp.float32))           # (n_par, B, 1)

    # Combine the per-core partial logits; the fc0/fc1 bias contribution is a
    # data-independent constant and the whole epilogue is B scalars.
    c0 = (jnp.dot(wf1.reshape(-1).astype(jnp.float32), bf0.astype(jnp.float32))
          + bf1.astype(jnp.float32)[0])
    return jax.nn.sigmoid(jnp.sum(partials, axis=0) + c0)  # (B, 1) f32


# ----------------------------------------------------------------------------
# Pure-JAX reference (module semantics, full f32)
# ----------------------------------------------------------------------------
def ref_forward(x, params):
    (w0, b0), (w1, b1), (wf0, bf0), (wf1, bf1) = params
    dn = ("NCHW", "OIHW", "NCHW")
    y = lax.conv_general_dilated(x, w0, (1, 1), "VALID", dimension_numbers=dn,
                                 precision=lax.Precision.HIGHEST)
    y = jnp.maximum(y + b0[None, :, None, None], 0.0)
    B, C, H, W = y.shape
    y = y.reshape(B, C, H // 3, 3, W // 3, 3).max(axis=(3, 5))
    y = lax.conv_general_dilated(y, w1, (1, 1), "VALID", dimension_numbers=dn,
                                 precision=lax.Precision.HIGHEST)
    y = jnp.maximum(y + b1[None, :, None, None], 0.0)
    y = y.reshape(B, -1)
    y = jnp.dot(y, wf0.T, precision=lax.Precision.HIGHEST) + bf0
    y = jnp.dot(y, wf1.T, precision=lax.Precision.HIGHEST) + bf1
    return jax.nn.sigmoid(y)


# ----------------------------------------------------------------------------
# Driver
# ----------------------------------------------------------------------------
if __name__ == "__main__":
    B, C, H1 = 2, 256, 128          # scaled-down stand-ins for 2048 / 1024
    key = jax.random.PRNGKey(0)
    ks = jax.random.split(key, 9)

    def init(k, shape, fan_in):
        return jax.random.normal(k, shape, jnp.float32) / jnp.sqrt(fan_in)

    params = (
        (init(ks[0], (C, C, 3, 3), C * 9), init(ks[1], (C,), C * 9)),   # conv0
        (init(ks[2], (C, C, 2, 2), C * 4), init(ks[3], (C,), C * 4)),   # conv1
        (init(ks[4], (H1, C), C),          init(ks[5], (H1,), C)),      # fc0
        (init(ks[6], (1, H1), H1),         init(ks[7], (1,), H1)),      # fc1
    )
    x = jax.random.normal(ks[8], (B, C, 8, 8), jnp.float32)

    fwd = jax.jit(domain_dis_forward, static_argnames=("compute_dtype",))

    out = jax.block_until_ready(fwd(x, params, compute_dtype=jnp.bfloat16))
    ref = jax.block_until_ready(ref_forward(x, params))

    assert out.shape == (B, 1), out.shape
    assert bool(jnp.all(jnp.isfinite(out)))
    # bf16 matmul inputs (f32 accumulation) vs full-f32 reference
    assert bool(jnp.allclose(out, ref, rtol=2e-2, atol=2e-2)), (out, ref)

    # tight structural check with f32 matmul inputs
    out_f32 = jax.block_until_ready(fwd(x, params, compute_dtype=jnp.float32))
    assert bool(jnp.allclose(out_f32, ref, rtol=2e-3, atol=2e-3)), (out_f32, ref)

    print("KERNEL_OK")
</pallas_src>

<mosaic_0001>
module attributes {stable_mosaic.version = 11 : i64} {
  func.func @_conv0_relu_pool_kernel(%arg0: i32, %arg1: i32, %arg2: memref<8x8x2x256xbf16, #tpu.memory_space<vmem>>, %arg3: memref<9x256x128xbf16, #tpu.memory_space<vmem>>, %arg4: memref<1x128xf32, #tpu.memory_space<vmem>>, %arg5: memref<4x2x128xbf16, #tpu.memory_space<vmem>>) attributes {dimension_semantics = [#tpu.dimension_semantics<parallel>, #tpu.dimension_semantics<arbitrary>], iteration_bounds = array<i64: 2, 1>, scalar_prefetch = 0 : i64, scratch_operands = 0 : i64, tpu.core_type = #tpu.core_type<tc>, window_params = [{transform_indices = @transform_0, window_bounds = array<i64: 8, 8, 2, 256>}, {transform_indices = @transform_1, window_bounds = array<i64: 9, 256, 128>}, {transform_indices = @transform_2, window_bounds = array<i64: 1, 128>}, {transform_indices = @transform_3, window_bounds = array<i64: 4, 2, 128>}]} {
    %c0 = arith.constant 0 : index
    %c0_0 = arith.constant 0 : index
    %0 = vector.load %arg4[%c0, %c0_0] : memref<1x128xf32, #tpu.memory_space<vmem>>, vector<1x128xf32>
    %c0_1 = arith.constant 0 : index
    %c0_2 = arith.constant 0 : index
    %c0_3 = arith.constant 0 : index
    %c0_4 = arith.constant 0 : index
    %1 = vector.load %arg2[%c0_1, %c0_2, %c0_3, %c0_4] : memref<8x8x2x256xbf16, #tpu.memory_space<vmem>>, vector<8x1x2x256xbf16>
    %2 = vector.shape_cast %1 : vector<8x1x2x256xbf16> to vector<8x2x256xbf16>
    %3 = vector.shape_cast %2 : vector<8x2x256xbf16> to vector<16x256xbf16>
    %c0_5 = arith.constant 0 : index
    %c1 = arith.constant 1 : index
    %c0_6 = arith.constant 0 : index
    %c0_7 = arith.constant 0 : index
    %4 = vector.load %arg2[%c0_5, %c1, %c0_6, %c0_7] : memref<8x8x2x256xbf16, #tpu.memory_space<vmem>>, vector<8x1x2x256xbf16>
    %5 = vector.shape_cast %4 : vector<8x1x2x256xbf16> to vector<8x2x256xbf16>
    %6 = vector.shape_cast %5 : vector<8x2x256xbf16> to vector<16x256xbf16>
    %c0_8 = arith.constant 0 : index
    %c2 = arith.constant 2 : index
    %c0_9 = arith.constant 0 : index
    %c0_10 = arith.constant 0 : index
    %7 = vector.load %arg2[%c0_8, %c2, %c0_9, %c0_10] : memref<8x8x2x256xbf16, #tpu.memory_space<vmem>>, vector<8x1x2x256xbf16>
    %8 = vector.shape_cast %7 : vector<8x1x2x256xbf16> to vector<8x2x256xbf16>
    %9 = vector.shape_cast %8 : vector<8x2x256xbf16> to vector<16x256xbf16>
    %c0_11 = arith.constant 0 : index
    %c3 = arith.constant 3 : index
    %c0_12 = arith.constant 0 : index
    %c0_13 = arith.constant 0 : index
    %10 = vector.load %arg2[%c0_11, %c3, %c0_12, %c0_13] : memref<8x8x2x256xbf16, #tpu.memory_space<vmem>>, vector<8x1x2x256xbf16>
    %11 = vector.shape_cast %10 : vector<8x1x2x256xbf16> to vector<8x2x256xbf16>
    %12 = vector.shape_cast %11 : vector<8x2x256xbf16> to vector<16x256xbf16>
    %c0_14 = arith.constant 0 : index
    %c4 = arith.constant 4 : index
    %c0_15 = arith.constant 0 : index
    %c0_16 = arith.constant 0 : index
    %13 = vector.load %arg2[%c0_14, %c4, %c0_15, %c0_16] : memref<8x8x2x256xbf16, #tpu.memory_space<vmem>>, vector<8x1x2x256xbf16>
    %14 = vector.shape_cast %13 : vector<8x1x2x256xbf16> to vector<8x2x256xbf16>
    %15 = vector.shape_cast %14 : vector<8x2x256xbf16> to vector<16x256xbf16>
    %c0_17 = arith.constant 0 : index
    %c5 = arith.constant 5 : index
    %c0_18 = arith.constant 0 : index
    %c0_19 = arith.constant 0 : index
    %16 = vector.load %arg2[%c0_17, %c5, %c0_18, %c0_19] : memref<8x8x2x256xbf16, #tpu.memory_space<vmem>>, vector<8x1x2x256xbf16>
    %17 = vector.shape_cast %16 : vector<8x1x2x256xbf16> to vector<8x2x256xbf16>
    %18 = vector.shape_cast %17 : vector<8x2x256xbf16> to vector<16x256xbf16>
    %c0_20 = arith.constant 0 : index
    %c6 = arith.constant 6 : index
    %c0_21 = arith.constant 0 : index
    %c0_22 = arith.constant 0 : index
    %19 = vector.load %arg2[%c0_20, %c6, %c0_21, %c0_22] : memref<8x8x2x256xbf16, #tpu.memory_space<vmem>>, vector<8x1x2x256xbf16>
    %20 = vector.shape_cast %19 : vector<8x1x2x256xbf16> to vector<8x2x256xbf16>
    %21 = vector.shape_cast %20 : vector<8x2x256xbf16> to vector<16x256xbf16>
    %c0_23 = arith.constant 0 : index
    %c7 = arith.constant 7 : index
    %c0_24 = arith.constant 0 : index
    %c0_25 = arith.constant 0 : index
    %22 = vector.load %arg2[%c0_23, %c7, %c0_24, %c0_25] : memref<8x8x2x256xbf16, #tpu.memory_space<vmem>>, vector<8x1x2x256xbf16>
    %23 = vector.shape_cast %22 : vector<8x1x2x256xbf16> to vector<8x2x256xbf16>
    %24 = vector.shape_cast %23 : vector<8x2x256xbf16> to vector<16x256xbf16>
    %25 = vector.extract_strided_slice %3 {offsets = [0, 0], sizes = [12, 256], strides = [1, 1]} : vector<16x256xbf16> to vector<12x256xbf16>
    %c0_26 = arith.constant 0 : index
    %c0_27 = arith.constant 0 : index
    %c0_28 = arith.constant 0 : index
    %26 = vector.load %arg3[%c0_26, %c0_27, %c0_28] : memref<9x256x128xbf16, #tpu.memory_space<vmem>>, vector<1x256x128xbf16>
    %27 = vector.shape_cast %26 : vector<1x256x128xbf16> to vector<256x128xbf16>
    %cst = arith.constant dense<0.000000e+00> : vector<12x128xf32>
    %28 = tpu.matmul %25, %27, %cst {dimension_numbers = #tpu.dot_dimension_numbers<[1], [0], [0], [1], [0, 0, 1, 1], [], []>} : vector<12x256xbf16>, vector<256x128xbf16>, vector<12x128xf32> -> vector<12x128xf32>
    %29 = vector.extract_strided_slice %6 {offsets = [0, 0], sizes = [12, 256], strides = [1, 1]} : vector<16x256xbf16> to vector<12x256xbf16>
    %c1_29 = arith.constant 1 : index
    %c0_30 = arith.constant 0 : index
    %c0_31 = arith.constant 0 : index
    %30 = vector.load %arg3[%c1_29, %c0_30, %c0_31] : memref<9x256x128xbf16, #tpu.memory_space<vmem>>, vector<1x256x128xbf16>
    %31 = vector.shape_cast %30 : vector<1x256x128xbf16> to vector<256x128xbf16>
    %cst_32 = arith.constant dense<0.000000e+00> : vector<12x128xf32>
    %32 = tpu.matmul %29, %31, %cst_32 {dimension_numbers = #tpu.dot_dimension_numbers<[1], [0], [0], [1], [0, 0, 1, 1], [], []>} : vector<12x256xbf16>, vector<256x128xbf16>, vector<12x128xf32> -> vector<12x128xf32>
    %33 = arith.addf %28, %32 : vector<12x128xf32>
    %34 = vector.extract_strided_slice %9 {offsets = [0, 0], sizes = [12, 256], strides = [1, 1]} : vector<16x256xbf16> to vector<12x256xbf16>
    %c2_33 = arith.constant 2 : index
    %c0_34 = arith.constant 0 : index
    %c0_35 = arith.constant 0 : index
    %35 = vector.load %arg3[%c2_33, %c0_34, %c0_35] : memref<9x256x128xbf16, #tpu.memory_space<vmem>>, vector<1x256x128xbf16>
    %36 = vector.shape_cast %35 : vector<1x256x128xbf16> to vector<256x128xbf16>
    %cst_36 = arith.constant dense<0.000000e+00> : vector<12x128xf32>
    %37 = tpu.matmul %34, %36, %cst_36 {dimension_numbers = #tpu.dot_dimension_numbers<[1], [0], [0], [1], [0, 0, 1, 1], [], []>} : vector<12x256xbf16>, vector<256x128xbf16>, vector<12x128xf32> -> vector<12x128xf32>
    %38 = arith.addf %33, %37 : vector<12x128xf32>
    %39 = vector.extract_strided_slice %3 {offsets = [2, 0], sizes = [12, 256], strides = [1, 1]} : vector<16x256xbf16> to vector<12x256xbf16>
    %c3_37 = arith.constant 3 : index
    %c0_38 = arith.constant 0 : index
    %c0_39 = arith.constant 0 : index
    %40 = vector.load %arg3[%c3_37, %c0_38, %c0_39] : memref<9x256x128xbf16, #tpu.memory_space<vmem>>, vector<1x256x128xbf16>
    %41 = vector.shape_cast %40 : vector<1x256x128xbf16> to vector<256x128xbf16>
    %cst_40 = arith.constant dense<0.000000e+00> : vector<12x128xf32>
    %42 = tpu.matmul %39, %41, %cst_40 {dimension_numbers = #tpu.dot_dimension_numbers<[1], [0], [0], [1], [0, 0, 1, 1], [], []>} : vector<12x256xbf16>, vector<256x128xbf16>, vector<12x128xf32> -> vector<12x128xf32>
    %43 = arith.addf %38, %42 : vector<12x128xf32>
    %44 = vector.extract_strided_slice %6 {offsets = [2, 0], sizes = [12, 256], strides = [1, 1]} : vector<16x256xbf16> to vector<12x256xbf16>
    %c4_41 = arith.constant 4 : index
    %c0_42 = arith.constant 0 : index
    %c0_43 = arith.constant 0 : index
    %45 = vector.load %arg3[%c4_41, %c0_42, %c0_43] : memref<9x256x128xbf16, #tpu.memory_space<vmem>>, vector<1x256x128xbf16>
    %46 = vector.shape_cast %45 : vector<1x256x128xbf16> to vector<256x128xbf16>
    %cst_44 = arith.constant dense<0.000000e+00> : vector<12x128xf32>
    %47 = tpu.matmul %44, %46, %cst_44 {dimension_numbers = #tpu.dot_dimension_numbers<[1], [0], [0], [1], [0, 0, 1, 1], [], []>} : vector<12x256xbf16>, vector<256x128xbf16>, vector<12x128xf32> -> vector<12x128xf32>
    %48 = arith.addf %43, %47 : vector<12x128xf32>
    %49 = vector.extract_strided_slice %9 {offsets = [2, 0], sizes = [12, 256], strides = [1, 1]} : vector<16x256xbf16> to vector<12x256xbf16>
    %c5_45 = arith.constant 5 : index
    %c0_46 = arith.constant 0 : index
    %c0_47 = arith.constant 0 : index
    %50 = vector.load %arg3[%c5_45, %c0_46, %c0_47] : memref<9x256x128xbf16, #tpu.memory_space<vmem>>, vector<1x256x128xbf16>
    %51 = vector.shape_cast %50 : vector<1x256x128xbf16> to vector<256x128xbf16>
    %cst_48 = arith.constant dense<0.000000e+00> : vector<12x128xf32>
    %52 = tpu.matmul %49, %51, %cst_48 {dimension_numbers = #tpu.dot_dimension_numbers<[1], [0], [0], [1], [0, 0, 1, 1], [], []>} : vector<12x256xbf16>, vector<256x128xbf16>, vector<12x128xf32> -> vector<12x128xf32>
    %53 = arith.addf %48, %52 : vector<12x128xf32>
    %54 = vector.extract_strided_slice %3 {offsets = [4, 0], sizes = [12, 256], strides = [1, 1]} : vector<16x256xbf16> to vector<12x256xbf16>
    %c6_49 = arith.constant 6 : index
    %c0_50 = arith.constant 0 : index
    %c0_51 = arith.constant 0 : index
    %55 = vector.load %arg3[%c6_49, %c0_50, %c0_51] : memref<9x256x128xbf16, #tpu.memory_space<vmem>>, vector<1x256x128xbf16>
    %56 = vector.shape_cast %55 : vector<1x256x128xbf16> to vector<256x128xbf16>
    %cst_52 = arith.constant dense<0.000000e+00> : vector<12x128xf32>
    %57 = tpu.matmul %54, %56, %cst_52 {dimension_numbers = #tpu.dot_dimension_numbers<[1], [0], [0], [1], [0, 0, 1, 1], [], []>} : vector<12x256xbf16>, vector<256x128xbf16>, vector<12x128xf32> -> vector<12x128xf32>
    %58 = arith.addf %53, %57 : vector<12x128xf32>
    %59 = vector.extract_strided_slice %6 {offsets = [4, 0], sizes = [12, 256], strides = [1, 1]} : vector<16x256xbf16> to vector<12x256xbf16>
    %c7_53 = arith.constant 7 : index
    %c0_54 = arith.constant 0 : index
    %c0_55 = arith.constant 0 : index
    %60 = vector.load %arg3[%c7_53, %c0_54, %c0_55] : memref<9x256x128xbf16, #tpu.memory_space<vmem>>, vector<1x256x128xbf16>
    %61 = vector.shape_cast %60 : vector<1x256x128xbf16> to vector<256x128xbf16>
    %cst_56 = arith.constant dense<0.000000e+00> : vector<12x128xf32>
    %62 = tpu.matmul %59, %61, %cst_56 {dimension_numbers = #tpu.dot_dimension_numbers<[1], [0], [0], [1], [0, 0, 1, 1], [], []>} : vector<12x256xbf16>, vector<256x128xbf16>, vector<12x128xf32> -> vector<12x128xf32>
    %63 = arith.addf %58, %62 : vector<12x128xf32>
    %64 = vector.extract_strided_slice %9 {offsets = [4, 0], sizes = [12, 256], strides = [1, 1]} : vector<16x256xbf16> to vector<12x256xbf16>
    %c8 = arith.constant 8 : index
    %c0_57 = arith.constant 0 : index
    %c0_58 = arith.constant 0 : index
    %65 = vector.load %arg3[%c8, %c0_57, %c0_58] : memref<9x256x128xbf16, #tpu.memory_space<vmem>>, vector<1x256x128xbf16>
    %66 = vector.shape_cast %65 : vector<1x256x128xbf16> to vector<256x128xbf16>
    %cst_59 = arith.constant dense<0.000000e+00> : vector<12x128xf32>
    %67 = tpu.matmul %64, %66, %cst_59 {dimension_numbers = #tpu.dot_dimension_numbers<[1], [0], [0], [1], [0, 0, 1, 1], [], []>} : vector<12x256xbf16>, vector<256x128xbf16>, vector<12x128xf32> -> vector<12x128xf32>
    %68 = arith.addf %63, %67 : vector<12x128xf32>
    %69 = vector.broadcast %0 : vector<1x128xf32> to vector<12x128xf32>
    %70 = arith.addf %68, %69 : vector<12x128xf32>
    %cst_60 = arith.constant 0.000000e+00 : f32
    %71 = vector.broadcast %cst_60 : f32 to vector<12x128xf32>
    %72 = arith.maximumf %70, %71 : vector<12x128xf32>
    %73 = vector.extract_strided_slice %6 {offsets = [0, 0], sizes = [12, 256], strides = [1, 1]} : vector<16x256xbf16> to vector<12x256xbf16>
    %c0_61 = arith.constant 0 : index
    %c0_62 = arith.constant 0 : index
    %c0_63 = arith.constant 0 : index
    %74 = vector.load %arg3[%c0_61, %c0_62, %c0_63] : memref<9x256x128xbf16, #tpu.memory_space<vmem>>, vector<1x256x128xbf16>
    %75 = vector.shape_cast %74 : vector<1x256x128xbf16> to vector<256x128xbf16>
    %cst_64 = arith.constant dense<0.000000e+00> : vector<12x128xf32>
    %76 = tpu.matmul %73, %75, %cst_64 {dimension_numbers = #tpu.dot_dimension_numbers<[1], [0], [0], [1], [0, 0, 1, 1], [], []>} : vector<12x256xbf16>, vector<256x128xbf16>, vector<12x128xf32> -> vector<12x128xf32>
    %77 = vector.extract_strided_slice %9 {offsets = [0, 0], sizes = [12, 256], strides = [1, 1]} : vector<16x256xbf16> to vector<12x256xbf16>
    %c1_65 = arith.constant 1 : index
    %c0_66 = arith.constant 0 : index
    %c0_67 = arith.constant 0 : index
    %78 = vector.load %arg3[%c1_65, %c0_66, %c0_67] : memref<9x256x128xbf16, #tpu.memory_space<vmem>>, vector<1x256x128xbf16>
    %79 = vector.shape_cast %78 : vector<1x256x128xbf16> to vector<256x128xbf16>
    %cst_68 = arith.constant dense<0.000000e+00> : vector<12x128xf32>
    %80 = tpu.matmul %77, %79, %cst_68 {dimension_numbers = #tpu.dot_dimension_numbers<[1], [0], [0], [1], [0, 0, 1, 1], [], []>} : vector<12x256xbf16>, vector<256x128xbf16>, vector<12x128xf32> -> vector<12x128xf32>
    %81 = arith.addf %76, %80 : vector<12x128xf32>
    %82 = vector.extract_strided_slice %12 {offsets = [0, 0], sizes = [12, 256], strides = [1, 1]} : vector<16x256xbf16> to vector<12x256xbf16>
    %c2_69 = arith.constant 2 : index
    %c0_70 = arith.constant 0 : index
    %c0_71 = arith.constant 0 : index
    %83 = vector.load %arg3[%c2_69, %c0_70, %c0_71] : memref<9x256x128xbf16, #tpu.memory_space<vmem>>, vector<1x256x128xbf16>
    %84 = vector.shape_cast %83 : vector<1x256x128xbf16> to vector<256x128xbf16>
    %cst_72 = arith.constant dense<0.000000e+00> : vector<12x128xf32>
    %85 = tpu.matmul %82, %84, %cst_72 {dimension_numbers = #tpu.dot_dimension_numbers<[1], [0], [0], [1], [0, 0, 1, 1], [], []>} : vector<12x256xbf16>, vector<256x128xbf16>, vector<12x128xf32> -> vector<12x128xf32>
    %86 = arith.addf %81, %85 : vector<12x128xf32>
    %87 = vector.extract_strided_slice %6 {offsets = [2, 0], sizes = [12, 256], strides = [1, 1]} : vector<16x256xbf16> to vector<12x256xbf16>
    %c3_73 = arith.constant 3 : index
    %c0_74 = arith.constant 0 : index
    %c0_75 = arith.constant 0 : index
    %88 = vector.load %arg3[%c3_73, %c0_74, %c0_75] : memref<9x256x128xbf16, #tpu.memory_space<vmem>>, vector<1x256x128xbf16>
    %89 = vector.shape_cast %88 : vector<1x256x128xbf16> to vector<256x128xbf16>
    %cst_76 = arith.constant dense<0.000000e+00> : vector<12x128xf32>
    %90 = tpu.matmul %87, %89, %cst_76 {dimension_numbers = #tpu.dot_dimension_numbers<[1], [0], [0], [1], [0, 0, 1, 1], [], []>} : vector<12x256xbf16>, vector<256x128xbf16>, vector<12x128xf32> -> vector<12x128xf32>
    %91 = arith.addf %86, %90 : vector<12x128xf32>
    %92 = vector.extract_strided_slice %9 {offsets = [2, 0], sizes = [12, 256], strides = [1, 1]} : vector<16x256xbf16> to vector<12x256xbf16>
    %c4_77 = arith.constant 4 : index
    %c0_78 = arith.constant 0 : index
    %c0_79 = arith.constant 0 : index
    %93 = vector.load %arg3[%c4_77, %c0_78, %c0_79] : memref<9x256x128xbf16, #tpu.memory_space<vmem>>, vector<1x256x128xbf16>
    %94 = vector.shape_cast %93 : vector<1x256x128xbf16> to vector<256x128xbf16>
    %cst_80 = arith.constant dense<0.000000e+00> : vector<12x128xf32>
    %95 = tpu.matmul %92, %94, %cst_80 {dimension_numbers = #tpu.dot_dimension_numbers<[1], [0], [0], [1], [0, 0, 1, 1], [], []>} : vector<12x256xbf16>, vector<256x128xbf16>, vector<12x128xf32> -> vector<12x128xf32>
    %96 = arith.addf %91, %95 : vector<12x128xf32>
    %97 = vector.extract_strided_slice %12 {offsets = [2, 0], sizes = [12, 256], strides = [1, 1]} : vector<16x256xbf16> to vector<12x256xbf16>
    %c5_81 = arith.constant 5 : index
    %c0_82 = arith.constant 0 : index
    %c0_83 = arith.constant 0 : index
    %98 = vector.load %arg3[%c5_81, %c0_82, %c0_83] : memref<9x256x128xbf16, #tpu.memory_space<vmem>>, vector<1x256x128xbf16>
    %99 = vector.shape_cast %98 : vector<1x256x128xbf16> to vector<256x128xbf16>
    %cst_84 = arith.constant dense<0.000000e+00> : vector<12x128xf32>
    %100 = tpu.matmul %97, %99, %cst_84 {dimension_numbers = #tpu.dot_dimension_numbers<[1], [0], [0], [1], [0, 0, 1, 1], [], []>} : vector<12x256xbf16>, vector<256x128xbf16>, vector<12x128xf32> -> vector<12x128xf32>
    %101 = arith.addf %96, %100 : vector<12x128xf32>
    %102 = vector.extract_strided_slice %6 {offsets = [4, 0], sizes = [12, 256], strides = [1, 1]} : vector<16x256xbf16> to vector<12x256xbf16>
    %c6_85 = arith.constant 6 : index
    %c0_86 = arith.constant 0 : index
    %c0_87 = arith.constant 0 : index
    %103 = vector.load %arg3[%c6_85, %c0_86, %c0_87] : memref<9x256x128xbf16, #tpu.memory_space<vmem>>, vector<1x256x128xbf16>
    %104 = vector.shape_cast %103 : vector<1x256x128xbf16> to vector<256x128xbf16>
    %cst_88 = arith.constant dense<0.000000e+00> : vector<12x128xf32>
    %105 = tpu.matmul %102, %104, %cst_88 {dimension_numbers = #tpu.dot_dimension_numbers<[1], [0], [0], [1], [0, 0, 1, 1], [], []>} : vector<12x256xbf16>, vector<256x128xbf16>, vector<12x128xf32> -> vector<12x128xf32>
    %106 = arith.addf %101, %105 : vector<12x128xf32>
    %107 = vector.extract_strided_slice %9 {offsets = [4, 0], sizes = [12, 256], strides = [1, 1]} : vector<16x256xbf16> to vector<12x256xbf16>
    %c7_89 = arith.constant 7 : index
    %c0_90 = arith.constant 0 : index
    %c0_91 = arith.constant 0 : index
    %108 = vector.load %arg3[%c7_89, %c0_90, %c0_91] : memref<9x256x128xbf16, #tpu.memory_space<vmem>>, vector<1x256x128xbf16>
    %109 = vector.shape_cast %108 : vector<1x256x128xbf16> to vector<256x128xbf16>
    %cst_92 = arith.constant dense<0.000000e+00> : vector<12x128xf32>
    %110 = tpu.matmul %107, %109, %cst_92 {dimension_numbers = #tpu.dot_dimension_numbers<[1], [0], [0], [1], [0, 0, 1, 1], [], []>} : vector<12x256xbf16>, vector<256x128xbf16>, vector<12x128xf32> -> vector<12x128xf32>
    %111 = arith.addf %106, %110 : vector<12x128xf32>
    %112 = vector.extract_strided_slice %12 {offsets = [4, 0], sizes = [12, 256], strides = [1, 1]} : vector<16x256xbf16> to vector<12x256xbf16>
    %c8_93 = arith.constant 8 : index
    %c0_94 = arith.constant 0 : index
    %c0_95 = arith.constant 0 : index
    %113 = vector.load %arg3[%c8_93, %c0_94, %c0_95] : memref<9x256x128xbf16, #tpu.memory_space<vmem>>, vector<1x256x128xbf16>
    %114 = vector.shape_cast %113 : vector<1x256x128xbf16> to vector<256x128xbf16>
    %cst_96 = arith.constant dense<0.000000e+00> : vector<12x128xf32>
    %115 = tpu.matmul %112, %114, %cst_96 {dimension_numbers = #tpu.dot_dimension_numbers<[1], [0], [0], [1], [0, 0, 1, 1], [], []>} : vector<12x256xbf16>, vector<256x128xbf16>, vector<12x128xf32> -> vector<12x128xf32>
    %116 = arith.addf %111, %115 : vector<12x128xf32>
    %117 = vector.broadcast %0 : vector<1x128xf32> to vector<12x128xf32>
    %118 = arith.addf %116, %117 : vector<12x128xf32>
    %cst_97 = arith.constant 0.000000e+00 : f32
    %119 = vector.broadcast %cst_97 : f32 to vector<12x128xf32>
    %120 = arith.maximumf %118, %119 : vector<12x128xf32>
    %121 = arith.maximumf %72, %120 : vector<12x128xf32>
    %122 = vector.extract_strided_slice %9 {offsets = [0, 0], sizes = [12, 256], strides = [1, 1]} : vector<16x256xbf16> to vector<12x256xbf16>
    %c0_98 = arith.constant 0 : index
    %c0_99 = arith.constant 0 : index
    %c0_100 = arith.constant 0 : index
    %123 = vector.load %arg3[%c0_98, %c0_99, %c0_100] : memref<9x256x128xbf16, #tpu.memory_space<vmem>>, vector<1x256x128xbf16>
    %124 = vector.shape_cast %123 : vector<1x256x128xbf16> to vector<256x128xbf16>
    %cst_101 = arith.constant dense<0.000000e+00> : vector<12x128xf32>
    %125 = tpu.matmul %122, %124, %cst_101 {dimension_numbers = #tpu.dot_dimension_numbers<[1], [0], [0], [1], [0, 0, 1, 1], [], []>} : vector<12x256xbf16>, vector<256x128xbf16>, vector<12x128xf32> -> vector<12x128xf32>
    %126 = vector.extract_strided_slice %12 {offsets = [0, 0], sizes = [12, 256], strides = [1, 1]} : vector<16x256xbf16> to vector<12x256xbf16>
    %c1_102 = arith.constant 1 : index
    %c0_103 = arith.constant 0 : index
    %c0_104 = arith.constant 0 : index
    %127 = vector.load %arg3[%c1_102, %c0_103, %c0_104] : memref<9x256x128xbf16, #tpu.memory_space<vmem>>, vector<1x256x128xbf16>
    %128 = vector.shape_cast %127 : vector<1x256x128xbf16> to vector<256x128xbf16>
    %cst_105 = arith.constant dense<0.000000e+00> : vector<12x128xf32>
    %129 = tpu.matmul %126, %128, %cst_105 {dimension_numbers = #tpu.dot_dimension_numbers<[1], [0], [0], [1], [0, 0, 1, 1], [], []>} : vector<12x256xbf16>, vector<256x128xbf16>, vector<12x128xf32> -> vector<12x128xf32>
    %130 = arith.addf %125, %129 : vector<12x128xf32>
    %131 = vector.extract_strided_slice %15 {offsets = [0, 0], sizes = [12, 256], strides = [1, 1]} : vector<16x256xbf16> to vector<12x256xbf16>
    %c2_106 = arith.constant 2 : index
    %c0_107 = arith.constant 0 : index
    %c0_108 = arith.constant 0 : index
    %132 = vector.load %arg3[%c2_106, %c0_107, %c0_108] : memref<9x256x128xbf16, #tpu.memory_space<vmem>>, vector<1x256x128xbf16>
    %133 = vector.shape_cast %132 : vector<1x256x128xbf16> to vector<256x128xbf16>
    %cst_109 = arith.constant dense<0.000000e+00> : vector<12x128xf32>
    %134 = tpu.matmul %131, %133, %cst_109 {dimension_numbers = #tpu.dot_dimension_numbers<[1], [0], [0], [1], [0, 0, 1, 1], [], []>} : vector<12x256xbf16>, vector<256x128xbf16>, vector<12x128xf32> -> vector<12x128xf32>
    %135 = arith.addf %130, %134 : vector<12x128xf32>
    %136 = vector.extract_strided_slice %9 {offsets = [2, 0], sizes = [12, 256], strides = [1, 1]} : vector<16x256xbf16> to vector<12x256xbf16>
    %c3_110 = arith.constant 3 : index
    %c0_111 = arith.constant 0 : index
    %c0_112 = arith.constant 0 : index
    %137 = vector.load %arg3[%c3_110, %c0_111, %c0_112] : memref<9x256x128xbf16, #tpu.memory_space<vmem>>, vector<1x256x128xbf16>
    %138 = vector.shape_cast %137 : vector<1x256x128xbf16> to vector<256x128xbf16>
    %cst_113 = arith.constant dense<0.000000e+00> : vector<12x128xf32>
    %139 = tpu.matmul %136, %138, %cst_113 {dimension_numbers = #tpu.dot_dimension_numbers<[1], [0], [0], [1], [0, 0, 1, 1], [], []>} : vector<12x256xbf16>, vector<256x128xbf16>, vector<12x128xf32> -> vector<12x128xf32>
    %140 = arith.addf %135, %139 : vector<12x128xf32>
    %141 = vector.extract_strided_slice %12 {offsets = [2, 0], sizes = [12, 256], strides = [1, 1]} : vector<16x256xbf16> to vector<12x256xbf16>
    %c4_114 = arith.constant 4 : index
    %c0_115 = arith.constant 0 : index
    %c0_116 = arith.constant 0 : index
    %142 = vector.load %arg3[%c4_114, %c0_115, %c0_116] : memref<9x256x128xbf16, #tpu.memory_space<vmem>>, vector<1x256x128xbf16>
    %143 = vector.shape_cast %142 : vector<1x256x128xbf16> to vector<256x128xbf16>
    %cst_117 = arith.constant dense<0.000000e+00> : vector<12x128xf32>
    %144 = tpu.matmul %141, %143, %cst_117 {dimension_numbers = #tpu.dot_dimension_numbers<[1], [0], [0], [1], [0, 0, 1, 1], [], []>} : vector<12x256xbf16>, vector<256x128xbf16>, vector<12x128xf32> -> vector<12x128xf32>
    %145 = arith.addf %140, %144 : vector<12x128xf32>
    %146 = vector.extract_strided_slice %15 {offsets = [2, 0], sizes = [12, 256], strides = [1, 1]} : vector<16x256xbf16> to vector<12x256xbf16>
    %c5_118 = arith.constant 5 : index
    %c0_119 = arith.constant 0 : index
    %c0_120 = arith.constant 0 : index
    %147 = vector.load %arg3[%c5_118, %c0_119, %c0_120] : memref<9x256x128xbf16, #tpu.memory_space<vmem>>, vector<1x256x128xbf16>
    %148 = vector.shape_cast %147 : vector<1x256x128xbf16> to vector<256x128xbf16>
    %cst_121 = arith.constant dense<0.000000e+00> : vector<12x128xf32>
    %149 = tpu.matmul %146, %148, %cst_121 {dimension_numbers = #tpu.dot_dimension_numbers<[1], [0], [0], [1], [0, 0, 1, 1], [], []>} : vector<12x256xbf16>, vector<256x128xbf16>, vector<12x128xf32> -> vector<12x128xf32>
    %150 = arith.addf %145, %149 : vector<12x128xf32>
    %151 = vector.extract_strided_slice %9 {offsets = [4, 0], sizes = [12, 256], strides = [1, 1]} : vector<16x256xbf16> to vector<12x256xbf16>
    %c6_122 = arith.constant 6 : index
    %c0_123 = arith.constant 0 : index
    %c0_124 = arith.constant 0 : index
    %152 = vector.load %arg3[%c6_122, %c0_123, %c0_124] : memref<9x256x128xbf16, #tpu.memory_space<vmem>>, vector<1x256x128xbf16>
    %153 = vector.shape_cast %152 : vector<1x256x128xbf16> to vector<256x128xbf16>
    %cst_125 = arith.constant dense<0.000000e+00> : vector<12x128xf32>
    %154 = tpu.matmul %151, %153, %cst_125 {dimension_numbers = #tpu.dot_dimension_numbers<[1], [0], [0], [1], [0, 0, 1, 1], [], []>} : vector<12x256xbf16>, vector<256x128xbf16>, vector<12x128xf32> -> vector<12x128xf32>
    %155 = arith.addf %150, %154 : vector<12x128xf32>
    %156 = vector.extract_strided_slice %12 {offsets = [4, 0], sizes = [12, 256], strides = [1, 1]} : vector<16x256xbf16> to vector<12x256xbf16>
    %c7_126 = arith.constant 7 : index
    %c0_127 = arith.constant 0 : index
    %c0_128 = arith.constant 0 : index
    %157 = vector.load %arg3[%c7_126, %c0_127, %c0_128] : memref<9x256x128xbf16, #tpu.memory_space<vmem>>, vector<1x256x128xbf16>
    %158 = vector.shape_cast %157 : vector<1x256x128xbf16> to vector<256x128xbf16>
    %cst_129 = arith.constant dense<0.000000e+00> : vector<12x128xf32>
    %159 = tpu.matmul %156, %158, %cst_129 {dimension_numbers = #tpu.dot_dimension_numbers<[1], [0], [0], [1], [0, 0, 1, 1], [], []>} : vector<12x256xbf16>, vector<256x128xbf16>, vector<12x128xf32> -> vector<12x128xf32>
    %160 = arith.addf %155, %159 : vector<12x128xf32>
    %161 = vector.extract_strided_slice %15 {offsets = [4, 0], sizes = [12, 256], strides = [1, 1]} : vector<16x256xbf16> to vector<12x256xbf16>
    %c8_130 = arith.constant 8 : index
    %c0_131 = arith.constant 0 : index
    %c0_132 = arith.constant 0 : index
    %162 = vector.load %arg3[%c8_130, %c0_131, %c0_132] : memref<9x256x128xbf16, #tpu.memory_space<vmem>>, vector<1x256x128xbf16>
    %163 = vector.shape_cast %162 : vector<1x256x128xbf16> to vector<256x128xbf16>
    %cst_133 = arith.constant dense<0.000000e+00> : vector<12x128xf32>
    %164 = tpu.matmul %161, %163, %cst_133 {dimension_numbers = #tpu.dot_dimension_numbers<[1], [0], [0], [1], [0, 0, 1, 1], [], []>} : vector<12x256xbf16>, vector<256x128xbf16>, vector<12x128xf32> -> vector<12x128xf32>
    %165 = arith.addf %160, %164 : vector<12x128xf32>
    %166 = vector.broadcast %0 : vector<1x128xf32> to vector<12x128xf32>
    %167 = arith.addf %165, %166 : vector<12x128xf32>
    %cst_134 = arith.constant 0.000000e+00 : f32
    %168 = vector.broadcast %cst_134 : f32 to vector<12x128xf32>
    %169 = arith.maximumf %167, %168 : vector<12x128xf32>
    %170 = arith.maximumf %121, %169 : vector<12x128xf32>
    %171 = vector.extract_strided_slice %170 {offsets = [0, 0], sizes = [2, 128], strides = [1, 1]} : vector<12x128xf32> to vector<2x128xf32>
    %172 = vector.extract_strided_slice %170 {offsets = [2, 0], sizes = [2, 128], strides = [1, 1]} : vector<12x128xf32> to vector<2x128xf32>
    %173 = vector.extract_strided_slice %170 {offsets = [4, 0], sizes = [2, 128], strides = [1, 1]} : vector<12x128xf32> to vector<2x128xf32>
    %174 = arith.maximumf %171, %172 : vector<2x128xf32>
    %175 = arith.maximumf %174, %173 : vector<2x128xf32>
    %176 = arith.truncf %175 : vector<2x128xf32> to vector<2x128xbf16>
    %c0_135 = arith.constant 0 : index
    %c0_136 = arith.constant 0 : index
    %c0_137 = arith.constant 0 : index
    %177 = vector.load %arg5[%c0_135, %c0_136, %c0_137] : memref<4x2x128xbf16, #tpu.memory_space<vmem>>, vector<1x2x128xbf16>
    %178 = vector.shape_cast %177 : vector<1x2x128xbf16> to vector<2x128xbf16>
    %179 = vector.shape_cast %176 : vector<2x128xbf16> to vector<1x2x128xbf16>
    tpu.vector_store %arg5[%c0_135, %c0_136, %c0_137], %179 {strides = array<i32>} : memref<4x2x128xbf16, #tpu.memory_space<vmem>>, vector<1x2x128xbf16>,
    %180 = vector.extract_strided_slice %170 {offsets = [6, 0], sizes = [2, 128], strides = [1, 1]} : vector<12x128xf32> to vector<2x128xf32>
    %181 = vector.extract_strided_slice %170 {offsets = [8, 0], sizes = [2, 128], strides = [1, 1]} : vector<12x128xf32> to vector<2x128xf32>
    %182 = vector.extract_strided_slice %170 {offsets = [10, 0], sizes = [2, 128], strides = [1, 1]} : vector<12x128xf32> to vector<2x128xf32>
    %183 = arith.maximumf %180, %181 : vector<2x128xf32>
    %184 = arith.maximumf %183, %182 : vector<2x128xf32>
    %185 = arith.truncf %184 : vector<2x128xf32> to vector<2x128xbf16>
    %c2_138 = arith.constant 2 : index
    %c0_139 = arith.constant 0 : index
    %c0_140 = arith.constant 0 : index
    %186 = vector.load %arg5[%c2_138, %c0_139, %c0_140] : memref<4x2x128xbf16, #tpu.memory_space<vmem>>, vector<1x2x128xbf16>
    %187 = vector.shape_cast %186 : vector<1x2x128xbf16> to vector<2x128xbf16>
    %188 = vector.shape_cast %185 : vector<2x128xbf16> to vector<1x2x128xbf16>
    tpu.vector_store %arg5[%c2_138, %c0_139, %c0_140], %188 {strides = array<i32>} : memref<4x2x128xbf16, #tpu.memory_space<vmem>>, vector<1x2x128xbf16>,
    %189 = vector.extract_strided_slice %12 {offsets = [0, 0], sizes = [12, 256], strides = [1, 1]} : vector<16x256xbf16> to vector<12x256xbf16>
    %c0_141 = arith.constant 0 : index
    %c0_142 = arith.constant 0 : index
    %c0_143 = arith.constant 0 : index
    %190 = vector.load %arg3[%c0_141, %c0_142, %c0_143] : memref<9x256x128xbf16, #tpu.memory_space<vmem>>, vector<1x256x128xbf16>
    %191 = vector.shape_cast %190 : vector<1x256x128xbf16> to vector<256x128xbf16>
    %cst_144 = arith.constant dense<0.000000e+00> : vector<12x128xf32>
    %192 = tpu.matmul %189, %191, %cst_144 {dimension_numbers = #tpu.dot_dimension_numbers<[1], [0], [0], [1], [0, 0, 1, 1], [], []>} : vector<12x256xbf16>, vector<256x128xbf16>, vector<12x128xf32> -> vector<12x128xf32>
    %193 = vector.extract_strided_slice %15 {offsets = [0, 0], sizes = [12, 256], strides = [1, 1]} : vector<16x256xbf16> to vector<12x256xbf16>
    %c1_145 = arith.constant 1 : index
    %c0_146 = arith.constant 0 : index
    %c0_147 = arith.constant 0 : index
    %194 = vector.load %arg3[%c1_145, %c0_146, %c0_147] : memref<9x256x128xbf16, #tpu.memory_space<vmem>>, vector<1x256x128xbf16>
    %195 = vector.shape_cast %194 : vector<1x256x128xbf16> to vector<256x128xbf16>
    %cst_148 = arith.constant dense<0.000000e+00> : vector<12x128xf32>
    %196 = tpu.matmul %193, %195, %cst_148 {dimension_numbers = #tpu.dot_dimension_numbers<[1], [0], [0], [1], [0, 0, 1, 1], [], []>} : vector<12x256xbf16>, vector<256x128xbf16>, vector<12x128xf32> -> vector<12x128xf32>
    %197 = arith.addf %192, %196 : vector<12x128xf32>
    %198 = vector.extract_strided_slice %18 {offsets = [0, 0], sizes = [12, 256], strides = [1, 1]} : vector<16x256xbf16> to vector<12x256xbf16>
    %c2_149 = arith.constant 2 : index
    %c0_150 = arith.constant 0 : index
    %c0_151 = arith.constant 0 : index
    %199 = vector.load %arg3[%c2_149, %c0_150, %c0_151] : memref<9x256x128xbf16, #tpu.memory_space<vmem>>, vector<1x256x128xbf16>
    %200 = vector.shape_cast %199 : vector<1x256x128xbf16> to vector<256x128xbf16>
    %cst_152 = arith.constant dense<0.000000e+00> : vector<12x128xf32>
    %201 = tpu.matmul %198, %200, %cst_152 {dimension_numbers = #tpu.dot_dimension_numbers<[1], [0], [0], [1], [0, 0, 1, 1], [], []>} : vector<12x256xbf16>, vector<256x128xbf16>, vector<12x128xf32> -> vector<12x128xf32>
    %202 = arith.addf %197, %201 : vector<12x128xf32>
    %203 = vector.extract_strided_slice %12 {offsets = [2, 0], sizes = [12, 256], strides = [1, 1]} : vector<16x256xbf16> to vector<12x256xbf16>
    %c3_153 = arith.constant 3 : index
    %c0_154 = arith.constant 0 : index
    %c0_155 = arith.constant 0 : index
    %204 = vector.load %arg3[%c3_153, %c0_154, %c0_155] : memref<9x256x128xbf16, #tpu.memory_space<vmem>>, vector<1x256x128xbf16>
    %205 = vector.shape_cast %204 : vector<1x256x128xbf16> to vector<256x128xbf16>
    %cst_156 = arith.constant dense<0.000000e+00> : vector<12x128xf32>
    %206 = tpu.matmul %203, %205, %cst_156 {dimension_numbers = #tpu.dot_dimension_numbers<[1], [0], [0], [1], [0, 0, 1, 1], [], []>} : vector<12x256xbf16>, vector<256x128xbf16>, vector<12x128xf32> -> vector<12x128xf32>
    %207 = arith.addf %202, %206 : vector<12x128xf32>
    %208 = vector.extract_strided_slice %15 {offsets = [2, 0], sizes = [12, 256], strides = [1, 1]} : vector<16x256xbf16> to vector<12x256xbf16>
    %c4_157 = arith.constant 4 : index
    %c0_158 = arith.constant 0 : index
    %c0_159 = arith.constant 0 : index
    %209 = vector.load %arg3[%c4_157, %c0_158, %c0_159] : memref<9x256x128xbf16, #tpu.memory_space<vmem>>, vector<1x256x128xbf16>
    %210 = vector.shape_cast %209 : vector<1x256x128xbf16> to vector<256x128xbf16>
    %cst_160 = arith.constant dense<0.000000e+00> : vector<12x128xf32>
    %211 = tpu.matmul %208, %210, %cst_160 {dimension_numbers = #tpu.dot_dimension_numbers<[1], [0], [0], [1], [0, 0, 1, 1], [], []>} : vector<12x256xbf16>, vector<256x128xbf16>, vector<12x128xf32> -> vector<12x128xf32>
    %212 = arith.addf %207, %211 : vector<12x128xf32>
    %213 = vector.extract_strided_slice %18 {offsets = [2, 0], sizes = [12, 256], strides = [1, 1]} : vector<16x256xbf16> to vector<12x256xbf16>
    %c5_161 = arith.constant 5 : index
    %c0_162 = arith.constant 0 : index
    %c0_163 = arith.constant 0 : index
    %214 = vector.load %arg3[%c5_161, %c0_162, %c0_163] : memref<9x256x128xbf16, #tpu.memory_space<vmem>>, vector<1x256x128xbf16>
    %215 = vector.shape_cast %214 : vector<1x256x128xbf16> to vector<256x128xbf16>
    %cst_164 = arith.constant dense<0.000000e+00> : vector<12x128xf32>
    %216 = tpu.matmul %213, %215, %cst_164 {dimension_numbers = #tpu.dot_dimension_numbers<[1], [0], [0], [1], [0, 0, 1, 1], [], []>} : vector<12x256xbf16>, vector<256x128xbf16>, vector<12x128xf32> -> vector<12x128xf32>
    %217 = arith.addf %212, %216 : vector<12x128xf32>
    %218 = vector.extract_strided_slice %12 {offsets = [4, 0], sizes = [12, 256], strides = [1, 1]} : vector<16x256xbf16> to vector<12x256xbf16>
    %c6_165 = arith.constant 6 : index
    %c0_166 = arith.constant 0 : index
    %c0_167 = arith.constant 0 : index
    %219 = vector.load %arg3[%c6_165, %c0_166, %c0_167] : memref<9x256x128xbf16, #tpu.memory_space<vmem>>, vector<1x256x128xbf16>
    %220 = vector.shape_cast %219 : vector<1x256x128xbf16> to vector<256x128xbf16>
    %cst_168 = arith.constant dense<0.000000e+00> : vector<12x128xf32>
    %221 = tpu.matmul %218, %220, %cst_168 {dimension_numbers = #tpu.dot_dimension_numbers<[1], [0], [0], [1], [0, 0, 1, 1], [], []>} : vector<12x256xbf16>, vector<256x128xbf16>, vector<12x128xf32> -> vector<12x128xf32>
    %222 = arith.addf %217, %221 : vector<12x128xf32>
    %223 = vector.extract_strided_slice %15 {offsets = [4, 0], sizes = [12, 256], strides = [1, 1]} : vector<16x256xbf16> to vector<12x256xbf16>
    %c7_169 = arith.constant 7 : index
    %c0_170 = arith.constant 0 : index
    %c0_171 = arith.constant 0 : index
    %224 = vector.load %arg3[%c7_169, %c0_170, %c0_171] : memref<9x256x128xbf16, #tpu.memory_space<vmem>>, vector<1x256x128xbf16>
    %225 = vector.shape_cast %224 : vector<1x256x128xbf16> to vector<256x128xbf16>
    %cst_172 = arith.constant dense<0.000000e+00> : vector<12x128xf32>
    %226 = tpu.matmul %223, %225, %cst_172 {dimension_numbers = #tpu.dot_dimension_numbers<[1], [0], [0], [1], [0, 0, 1, 1], [], []>} : vector<12x256xbf16>, vector<256x128xbf16>, vector<12x128xf32> -> vector<12x128xf32>
    %227 = arith.addf %222, %226 : vector<12x128xf32>
    %228 = vector.extract_strided_slice %18 {offsets = [4, 0], sizes = [12, 256], strides = [1, 1]} : vector<16x256xbf16> to vector<12x256xbf16>
    %c8_173 = arith.constant 8 : index
    %c0_174 = arith.constant 0 : index
    %c0_175 = arith.constant 0 : index
    %229 = vector.load %arg3[%c8_173, %c0_174, %c0_175] : memref<9x256x128xbf16, #tpu.memory_space<vmem>>, vector<1x256x128xbf16>
    %230 = vector.shape_cast %229 : vector<1x256x128xbf16> to vector<256x128xbf16>
    %cst_176 = arith.constant dense<0.000000e+00> : vector<12x128xf32>
    %231 = tpu.matmul %228, %230, %cst_176 {dimension_numbers = #tpu.dot_dimension_numbers<[1], [0], [0], [1], [0, 0, 1, 1], [], []>} : vector<12x256xbf16>, vector<256x128xbf16>, vector<12x128xf32> -> vector<12x128xf32>
    %232 = arith.addf %227, %231 : vector<12x128xf32>
    %233 = vector.broadcast %0 : vector<1x128xf32> to vector<12x128xf32>
    %234 = arith.addf %232, %233 : vector<12x128xf32>
    %cst_177 = arith.constant 0.000000e+00 : f32
    %235 = vector.broadcast %cst_177 : f32 to vector<12x128xf32>
    %236 = arith.maximumf %234, %235 : vector<12x128xf32>
    %237 = vector.extract_strided_slice %15 {offsets = [0, 0], sizes = [12, 256], strides = [1, 1]} : vector<16x256xbf16> to vector<12x256xbf16>
    %c0_178 = arith.constant 0 : index
    %c0_179 = arith.constant 0 : index
    %c0_180 = arith.constant 0 : index
    %238 = vector.load %arg3[%c0_178, %c0_179, %c0_180] : memref<9x256x128xbf16, #tpu.memory_space<vmem>>, vector<1x256x128xbf16>
    %239 = vector.shape_cast %238 : vector<1x256x128xbf16> to vector<256x128xbf16>
    %cst_181 = arith.constant dense<0.000000e+00> : vector<12x128xf32>
    %240 = tpu.matmul %237, %239, %cst_181 {dimension_numbers = #tpu.dot_dimension_numbers<[1], [0], [0], [1], [0, 0, 1, 1], [], []>} : vector<12x256xbf16>, vector<256x128xbf16>, vector<12x128xf32> -> vector<12x128xf32>
    %241 = vector.extract_strided_slice %18 {offsets = [0, 0], sizes = [12, 256], strides = [1, 1]} : vector<16x256xbf16> to vector<12x256xbf16>
    %c1_182 = arith.constant 1 : index
    %c0_183 = arith.constant 0 : index
    %c0_184 = arith.constant 0 : index
    %242 = vector.load %arg3[%c1_182, %c0_183, %c0_184] : memref<9x256x128xbf16, #tpu.memory_space<vmem>>, vector<1x256x128xbf16>
    %243 = vector.shape_cast %242 : vector<1x256x128xbf16> to vector<256x128xbf16>
    %cst_185 = arith.constant dense<0.000000e+00> : vector<12x128xf32>
    %244 = tpu.matmul %241, %243, %cst_185 {dimension_numbers = #tpu.dot_dimension_numbers<[1], [0], [0], [1], [0, 0, 1, 1], [], []>} : vector<12x256xbf16>, vector<256x128xbf16>, vector<12x128xf32> -> vector<12x128xf32>
    %245 = arith.addf %240, %244 : vector<12x128xf32>
    %246 = vector.extract_strided_slice %21 {offsets = [0, 0], sizes = [12, 256], strides = [1, 1]} : vector<16x256xbf16> to vector<12x256xbf16>
    %c2_186 = arith.constant 2 : index
    %c0_187 = arith.constant 0 : index
    %c0_188 = arith.constant 0 : index
    %247 = vector.load %arg3[%c2_186, %c0_187, %c0_188] : memref<9x256x128xbf16, #tpu.memory_space<vmem>>, vector<1x256x128xbf16>
    %248 = vector.shape_cast %247 : vector<1x256x128xbf16> to vector<256x128xbf16>
    %cst_189 = arith.constant dense<0.000000e+00> : vector<12x128xf32>
    %249 = tpu.matmul %246, %248, %cst_189 {dimension_numbers = #tpu.dot_dimension_numbers<[1], [0], [0], [1], [0, 0, 1, 1], [], []>} : vector<12x256xbf16>, vector<256x128xbf16>, vector<12x128xf32> -> vector<12x128xf32>
    %250 = arith.addf %245, %249 : vector<12x128xf32>
    %251 = vector.extract_strided_slice %15 {offsets = [2, 0], sizes = [12, 256], strides = [1, 1]} : vector<16x256xbf16> to vector<12x256xbf16>
    %c3_190 = arith.constant 3 : index
    %c0_191 = arith.constant 0 : index
    %c0_192 = arith.constant 0 : index
    %252 = vector.load %arg3[%c3_190, %c0_191, %c0_192] : memref<9x256x128xbf16, #tpu.memory_space<vmem>>, vector<1x256x128xbf16>
    %253 = vector.shape_cast %252 : vector<1x256x128xbf16> to vector<256x128xbf16>
    %cst_193 = arith.constant dense<0.000000e+00> : vector<12x128xf32>
    %254 = tpu.matmul %251, %253, %cst_193 {dimension_numbers = #tpu.dot_dimension_numbers<[1], [0], [0], [1], [0, 0, 1, 1], [], []>} : vector<12x256xbf16>, vector<256x128xbf16>, vector<12x128xf32> -> vector<12x128xf32>
    %255 = arith.addf %250, %254 : vector<12x128xf32>
    %256 = vector.extract_strided_slice %18 {offsets = [2, 0], sizes = [12, 256], strides = [1, 1]} : vector<16x256xbf16> to vector<12x256xbf16>
    %c4_194 = arith.constant 4 : index
    %c0_195 = arith.constant 0 : index
    %c0_196 = arith.constant 0 : index
    %257 = vector.load %arg3[%c4_194, %c0_195, %c0_196] : memref<9x256x128xbf16, #tpu.memory_space<vmem>>, vector<1x256x128xbf16>
    %258 = vector.shape_cast %257 : vector<1x256x128xbf16> to vector<256x128xbf16>
    %cst_197 = arith.constant dense<0.000000e+00> : vector<12x128xf32>
    %259 = tpu.matmul %256, %258, %cst_197 {dimension_numbers = #tpu.dot_dimension_numbers<[1], [0], [0], [1], [0, 0, 1, 1], [], []>} : vector<12x256xbf16>, vector<256x128xbf16>, vector<12x128xf32> -> vector<12x128xf32>
    %260 = arith.addf %255, %259 : vector<12x128xf32>
    %261 = vector.extract_strided_slice %21 {offsets = [2, 0], sizes = [12, 256], strides = [1, 1]} : vector<16x256xbf16> to vector<12x256xbf16>
    %c5_198 = arith.constant 5 : index
    %c0_199 = arith.constant 0 : index
    %c0_200 = arith.constant 0 : index
    %262 = vector.load %arg3[%c5_198, %c0_199, %c0_200] : memref<9x256x128xbf16, #tpu.memory_space<vmem>>, vector<1x256x128xbf16>
    %263 = vector.shape_cast %262 : vector<1x256x128xbf16> to vector<256x128xbf16>
    %cst_201 = arith.constant dense<0.000000e+00> : vector<12x128xf32>
    %264 = tpu.matmul %261, %263, %cst_201 {dimension_numbers = #tpu.dot_dimension_numbers<[1], [0], [0], [1], [0, 0, 1, 1], [], []>} : vector<12x256xbf16>, vector<256x128xbf16>, vector<12x128xf32> -> vector<12x128xf32>
    %265 = arith.addf %260, %264 : vector<12x128xf32>
    %266 = vector.extract_strided_slice %15 {offsets = [4, 0], sizes = [12, 256], strides = [1, 1]} : vector<16x256xbf16> to vector<12x256xbf16>
    %c6_202 = arith.constant 6 : index
    %c0_203 = arith.constant 0 : index
    %c0_204 = arith.constant 0 : index
    %267 = vector.load %arg3[%c6_202, %c0_203, %c0_204] : memref<9x256x128xbf16, #tpu.memory_space<vmem>>, vector<1x256x128xbf16>
    %268 = vector.shape_cast %267 : vector<1x256x128xbf16> to vector<256x128xbf16>
    %cst_205 = arith.constant dense<0.000000e+00> : vector<12x128xf32>
    %269 = tpu.matmul %266, %268, %cst_205 {dimension_numbers = #tpu.dot_dimension_numbers<[1], [0], [0], [1], [0, 0, 1, 1], [], []>} : vector<12x256xbf16>, vector<256x128xbf16>, vector<12x128xf32> -> vector<12x128xf32>
    %270 = arith.addf %265, %269 : vector<12x128xf32>
    %271 = vector.extract_strided_slice %18 {offsets = [4, 0], sizes = [12, 256], strides = [1, 1]} : vector<16x256xbf16> to vector<12x256xbf16>
    %c7_206 = arith.constant 7 : index
    %c0_207 = arith.constant 0 : index
    %c0_208 = arith.constant 0 : index
    %272 = vector.load %arg3[%c7_206, %c0_207, %c0_208] : memref<9x256x128xbf16, #tpu.memory_space<vmem>>, vector<1x256x128xbf16>
    %273 = vector.shape_cast %272 : vector<1x256x128xbf16> to vector<256x128xbf16>
    %cst_209 = arith.constant dense<0.000000e+00> : vector<12x128xf32>
    %274 = tpu.matmul %271, %273, %cst_209 {dimension_numbers = #tpu.dot_dimension_numbers<[1], [0], [0], [1], [0, 0, 1, 1], [], []>} : vector<12x256xbf16>, vector<256x128xbf16>, vector<12x128xf32> -> vector<12x128xf32>
    %275 = arith.addf %270, %274 : vector<12x128xf32>
    %276 = vector.extract_strided_slice %21 {offsets = [4, 0], sizes = [12, 256], strides = [1, 1]} : vector<16x256xbf16> to vector<12x256xbf16>
    %c8_210 = arith.constant 8 : index
    %c0_211 = arith.constant 0 : index
    %c0_212 = arith.constant 0 : index
    %277 = vector.load %arg3[%c8_210, %c0_211, %c0_212] : memref<9x256x128xbf16, #tpu.memory_space<vmem>>, vector<1x256x128xbf16>
    %278 = vector.shape_cast %277 : vector<1x256x128xbf16> to vector<256x128xbf16>
    %cst_213 = arith.constant dense<0.000000e+00> : vector<12x128xf32>
    %279 = tpu.matmul %276, %278, %cst_213 {dimension_numbers = #tpu.dot_dimension_numbers<[1], [0], [0], [1], [0, 0, 1, 1], [], []>} : vector<12x256xbf16>, vector<256x128xbf16>, vector<12x128xf32> -> vector<12x128xf32>
    %280 = arith.addf %275, %279 : vector<12x128xf32>
    %281 = vector.broadcast %0 : vector<1x128xf32> to vector<12x128xf32>
    %282 = arith.addf %280, %281 : vector<12x128xf32>
    %cst_214 = arith.constant 0.000000e+00 : f32
    %283 = vector.broadcast %cst_214 : f32 to vector<12x128xf32>
    %284 = arith.maximumf %282, %283 : vector<12x128xf32>
    %285 = arith.maximumf %236, %284 : vector<12x128xf32>
    %286 = vector.extract_strided_slice %18 {offsets = [0, 0], sizes = [12, 256], strides = [1, 1]} : vector<16x256xbf16> to vector<12x256xbf16>
    %c0_215 = arith.constant 0 : index
    %c0_216 = arith.constant 0 : index
    %c0_217 = arith.constant 0 : index
    %287 = vector.load %arg3[%c0_215, %c0_216, %c0_217] : memref<9x256x128xbf16, #tpu.memory_space<vmem>>, vector<1x256x128xbf16>
    %288 = vector.shape_cast %287 : vector<1x256x128xbf16> to vector<256x128xbf16>
    %cst_218 = arith.constant dense<0.000000e+00> : vector<12x128xf32>
    %289 = tpu.matmul %286, %288, %cst_218 {dimension_numbers = #tpu.dot_dimension_numbers<[1], [0], [0], [1], [0, 0, 1, 1], [], []>} : vector<12x256xbf16>, vector<256x128xbf16>, vector<12x128xf32> -> vector<12x128xf32>
    %290 = vector.extract_strided_slice %21 {offsets = [0, 0], sizes = [12, 256], strides = [1, 1]} : vector<16x256xbf16> to vector<12x256xbf16>
    %c1_219 = arith.constant 1 : index
    %c0_220 = arith.constant 0 : index
    %c0_221 = arith.constant 0 : index
    %291 = vector.load %arg3[%c1_219, %c0_220, %c0_221] : memref<9x256x128xbf16, #tpu.memory_space<vmem>>, vector<1x256x128xbf16>
    %292 = vector.shape_cast %291 : vector<1x256x128xbf16> to vector<256x128xbf16>
    %cst_222 = arith.constant dense<0.000000e+00> : vector<12x128xf32>
    %293 = tpu.matmul %290, %292, %cst_222 {dimension_numbers = #tpu.dot_dimension_numbers<[1], [0], [0], [1], [0, 0, 1, 1], [], []>} : vector<12x256xbf16>, vector<256x128xbf16>, vector<12x128xf32> -> vector<12x128xf32>
    %294 = arith.addf %289, %293 : vector<12x128xf32>
    %295 = vector.extract_strided_slice %24 {offsets = [0, 0], sizes = [12, 256], strides = [1, 1]} : vector<16x256xbf16> to vector<12x256xbf16>
    %c2_223 = arith.constant 2 : index
    %c0_224 = arith.constant 0 : index
    %c0_225 = arith.constant 0 : index
    %296 = vector.load %arg3[%c2_223, %c0_224, %c0_225] : memref<9x256x128xbf16, #tpu.memory_space<vmem>>, vector<1x256x128xbf16>
    %297 = vector.shape_cast %296 : vector<1x256x128xbf16> to vector<256x128xbf16>
    %cst_226 = arith.constant dense<0.000000e+00> : vector<12x128xf32>
    %298 = tpu.matmul %295, %297, %cst_226 {dimension_numbers = #tpu.dot_dimension_numbers<[1], [0], [0], [1], [0, 0, 1, 1], [], []>} : vector<12x256xbf16>, vector<256x128xbf16>, vector<12x128xf32> -> vector<12x128xf32>
    %299 = arith.addf %294, %298 : vector<12x128xf32>
    %300 = vector.extract_strided_slice %18 {offsets = [2, 0], sizes = [12, 256], strides = [1, 1]} : vector<16x256xbf16> to vector<12x256xbf16>
    %c3_227 = arith.constant 3 : index
    %c0_228 = arith.constant 0 : index
    %c0_229 = arith.constant 0 : index
    %301 = vector.load %arg3[%c3_227, %c0_228, %c0_229] : memref<9x256x128xbf16, #tpu.memory_space<vmem>>, vector<1x256x128xbf16>
    %302 = vector.shape_cast %301 : vector<1x256x128xbf16> to vector<256x128xbf16>
    %cst_230 = arith.constant dense<0.000000e+00> : vector<12x128xf32>
    %303 = tpu.matmul %300, %302, %cst_230 {dimension_numbers = #tpu.dot_dimension_numbers<[1], [0], [0], [1], [0, 0, 1, 1], [], []>} : vector<12x256xbf16>, vector<256x128xbf16>, vector<12x128xf32> -> vector<12x128xf32>
    %304 = arith.addf %299, %303 : vector<12x128xf32>
    %305 = vector.extract_strided_slice %21 {offsets = [2, 0], sizes = [12, 256], strides = [1, 1]} : vector<16x256xbf16> to vector<12x256xbf16>
    %c4_231 = arith.constant 4 : index
    %c0_232 = arith.constant 0 : index
    %c0_233 = arith.constant 0 : index
    %306 = vector.load %arg3[%c4_231, %c0_232, %c0_233] : memref<9x256x128xbf16, #tpu.memory_space<vmem>>, vector<1x256x128xbf16>
    %307 = vector.shape_cast %306 : vector<1x256x128xbf16> to vector<256x128xbf16>
    %cst_234 = arith.constant dense<0.000000e+00> : vector<12x128xf32>
    %308 = tpu.matmul %305, %307, %cst_234 {dimension_numbers = #tpu.dot_dimension_numbers<[1], [0], [0], [1], [0, 0, 1, 1], [], []>} : vector<12x256xbf16>, vector<256x128xbf16>, vector<12x128xf32> -> vector<12x128xf32>
    %309 = arith.addf %304, %308 : vector<12x128xf32>
    %310 = vector.extract_strided_slice %24 {offsets = [2, 0], sizes = [12, 256], strides = [1, 1]} : vector<16x256xbf16> to vector<12x256xbf16>
    %c5_235 = arith.constant 5 : index
    %c0_236 = arith.constant 0 : index
    %c0_237 = arith.constant 0 : index
    %311 = vector.load %arg3[%c5_235, %c0_236, %c0_237] : memref<9x256x128xbf16, #tpu.memory_space<vmem>>, vector<1x256x128xbf16>
    %312 = vector.shape_cast %311 : vector<1x256x128xbf16> to vector<256x128xbf16>
    %cst_238 = arith.constant dense<0.000000e+00> : vector<12x128xf32>
    %313 = tpu.matmul %310, %312, %cst_238 {dimension_numbers = #tpu.dot_dimension_numbers<[1], [0], [0], [1], [0, 0, 1, 1], [], []>} : vector<12x256xbf16>, vector<256x128xbf16>, vector<12x128xf32> -> vector<12x128xf32>
    %314 = arith.addf %309, %313 : vector<12x128xf32>
    %315 = vector.extract_strided_slice %18 {offsets = [4, 0], sizes = [12, 256], strides = [1, 1]} : vector<16x256xbf16> to vector<12x256xbf16>
    %c6_239 = arith.constant 6 : index
    %c0_240 = arith.constant 0 : index
    %c0_241 = arith.constant 0 : index
    %316 = vector.load %arg3[%c6_239, %c0_240, %c0_241] : memref<9x256x128xbf16, #tpu.memory_space<vmem>>, vector<1x256x128xbf16>
    %317 = vector.shape_cast %316 : vector<1x256x128xbf16> to vector<256x128xbf16>
    %cst_242 = arith.constant dense<0.000000e+00> : vector<12x128xf32>
    %318 = tpu.matmul %315, %317, %cst_242 {dimension_numbers = #tpu.dot_dimension_numbers<[1], [0], [0], [1], [0, 0, 1, 1], [], []>} : vector<12x256xbf16>, vector<256x128xbf16>, vector<12x128xf32> -> vector<12x128xf32>
    %319 = arith.addf %314, %318 : vector<12x128xf32>
    %320 = vector.extract_strided_slice %21 {offsets = [4, 0], sizes = [12, 256], strides = [1, 1]} : vector<16x256xbf16> to vector<12x256xbf16>
    %c7_243 = arith.constant 7 : index
    %c0_244 = arith.constant 0 : index
    %c0_245 = arith.constant 0 : index
    %321 = vector.load %arg3[%c7_243, %c0_244, %c0_245] : memref<9x256x128xbf16, #tpu.memory_space<vmem>>, vector<1x256x128xbf16>
    %322 = vector.shape_cast %321 : vector<1x256x128xbf16> to vector<256x128xbf16>
    %cst_246 = arith.constant dense<0.000000e+00> : vector<12x128xf32>
    %323 = tpu.matmul %320, %322, %cst_246 {dimension_numbers = #tpu.dot_dimension_numbers<[1], [0], [0], [1], [0, 0, 1, 1], [], []>} : vector<12x256xbf16>, vector<256x128xbf16>, vector<12x128xf32> -> vector<12x128xf32>
    %324 = arith.addf %319, %323 : vector<12x128xf32>
    %325 = vector.extract_strided_slice %24 {offsets = [4, 0], sizes = [12, 256], strides = [1, 1]} : vector<16x256xbf16> to vector<12x256xbf16>
    %c8_247 = arith.constant 8 : index
    %c0_248 = arith.constant 0 : index
    %c0_249 = arith.constant 0 : index
    %326 = vector.load %arg3[%c8_247, %c0_248, %c0_249] : memref<9x256x128xbf16, #tpu.memory_space<vmem>>, vector<1x256x128xbf16>
    %327 = vector.shape_cast %326 : vector<1x256x128xbf16> to vector<256x128xbf16>
    %cst_250 = arith.constant dense<0.000000e+00> : vector<12x128xf32>
    %328 = tpu.matmul %325, %327, %cst_250 {dimension_numbers = #tpu.dot_dimension_numbers<[1], [0], [0], [1], [0, 0, 1, 1], [], []>} : vector<12x256xbf16>, vector<256x128xbf16>, vector<12x128xf32> -> vector<12x128xf32>
    %329 = arith.addf %324, %328 : vector<12x128xf32>
    %330 = vector.broadcast %0 : vector<1x128xf32> to vector<12x128xf32>
    %331 = arith.addf %329, %330 : vector<12x128xf32>
    %cst_251 = arith.constant 0.000000e+00 : f32
    %332 = vector.broadcast %cst_251 : f32 to vector<12x128xf32>
    %333 = arith.maximumf %331, %332 : vector<12x128xf32>
    %334 = arith.maximumf %285, %333 : vector<12x128xf32>
    %335 = vector.extract_strided_slice %334 {offsets = [0, 0], sizes = [2, 128], strides = [1, 1]} : vector<12x128xf32> to vector<2x128xf32>
    %336 = vector.extract_strided_slice %334 {offsets = [2, 0], sizes = [2, 128], strides = [1, 1]} : vector<12x128xf32> to vector<2x128xf32>
    %337 = vector.extract_strided_slice %334 {offsets = [4, 0], sizes = [2, 128], strides = [1, 1]} : vector<12x128xf32> to vector<2x128xf32>
    %338 = arith.maximumf %335, %336 : vector<2x128xf32>
    %339 = arith.maximumf %338, %337 : vector<2x128xf32>
    %340 = arith.truncf %339 : vector<2x128xf32> to vector<2x128xbf16>
    %c1_252 = arith.constant 1 : index
    %c0_253 = arith.constant 0 : index
    %c0_254 = arith.constant 0 : index
    %341 = vector.load %arg5[%c1_252, %c0_253, %c0_254] : memref<4x2x128xbf16, #tpu.memory_space<vmem>>, vector<1x2x128xbf16>
    %342 = vector.shape_cast %341 : vector<1x2x128xbf16> to vector<2x128xbf16>
    %343 = vector.shape_cast %340 : vector<2x128xbf16> to vector<1x2x128xbf16>
    tpu.vector_store %arg5[%c1_252, %c0_253, %c0_254], %343 {strides = array<i32>} : memref<4x2x128xbf16, #tpu.memory_space<vmem>>, vector<1x2x128xbf16>,
    %344 = vector.extract_strided_slice %334 {offsets = [6, 0], sizes = [2, 128], strides = [1, 1]} : vector<12x128xf32> to vector<2x128xf32>
    %345 = vector.extract_strided_slice %334 {offsets = [8, 0], sizes = [2, 128], strides = [1, 1]} : vector<12x128xf32> to vector<2x128xf32>
    %346 = vector.extract_strided_slice %334 {offsets = [10, 0], sizes = [2, 128], strides = [1, 1]} : vector<12x128xf32> to vector<2x128xf32>
    %347 = arith.maximumf %344, %345 : vector<2x128xf32>
    %348 = arith.maximumf %347, %346 : vector<2x128xf32>
    %349 = arith.truncf %348 : vector<2x128xf32> to vector<2x128xbf16>
    %c3_255 = arith.constant 3 : index
    %c0_256 = arith.constant 0 : index
    %c0_257 = arith.constant 0 : index
    %350 = vector.load %arg5[%c3_255, %c0_256, %c0_257] : memref<4x2x128xbf16, #tpu.memory_space<vmem>>, vector<1x2x128xbf16>
    %351 = vector.shape_cast %350 : vector<1x2x128xbf16> to vector<2x128xbf16>
    %352 = vector.shape_cast %349 : vector<2x128xbf16> to vector<1x2x128xbf16>
    tpu.vector_store %arg5[%c3_255, %c0_256, %c0_257], %352 {strides = array<i32>} : memref<4x2x128xbf16, #tpu.memory_space<vmem>>, vector<1x2x128xbf16>,
    return
  }
  func.func @transform_0(%arg0: i32, %arg1: i32) -> (i32, i32, i32, i32) {
    %c0_i32 = arith.constant 0 : i32
    %c0_i32_0 = arith.constant 0 : i32
    %c0_i32_1 = arith.constant 0 : i32
    %c0_i32_2 = arith.constant 0 : i32
    return %c0_i32, %c0_i32_0, %arg1, %c0_i32_1 : i32, i32, i32, i32
  }
  func.func @transform_1(%arg0: i32, %arg1: i32) -> (i32, i32, i32) {
    %c0_i32 = arith.constant 0 : i32
    %c0_i32_0 = arith.constant 0 : i32
    %c0_i32_1 = arith.constant 0 : i32
    return %c0_i32, %c0_i32_0, %arg0 : i32, i32, i32
  }
  func.func @transform_2(%arg0: i32, %arg1: i32) -> (i32, i32) {
    %c0_i32 = arith.constant 0 : i32
    %c0_i32_0 = arith.constant 0 : i32
    return %c0_i32, %arg0 : i32, i32
  }
  func.func @transform_3(%arg0: i32, %arg1: i32) -> (i32, i32, i32) {
    %c0_i32 = arith.constant 0 : i32
    %c0_i32_0 = arith.constant 0 : i32
    return %c0_i32, %arg1, %arg0 : i32, i32, i32
  }
}

module attributes {stable_mosaic.version = 11 : i64} {
  func.func @_tail_kernel(%arg0: i32, %arg1: i32, %arg2: memref<4x2x256xbf16, #tpu.memory_space<vmem>>, %arg3: memref<4x256x128xbf16, #tpu.memory_space<vmem>>, %arg4: memref<1x128xf32, #tpu.memory_space<vmem>>, %arg5: memref<128x128xbf16, #tpu.memory_space<vmem>>, %arg6: memref<1x128xf32, #tpu.memory_space<vmem>>, %arg7: memref<1x2x1xf32, #tpu.memory_space<vmem>>, %arg8: memref<2x128xf32, #tpu.memory_space<vmem>>) attributes {dimension_semantics = [#tpu.dimension_semantics<parallel>, #tpu.dimension_semantics<arbitrary>], iteration_bounds = array<i64: 2, 1>, scalar_prefetch = 0 : i64, scratch_operands = 1 : i64, tpu.core_type = #tpu.core_type<tc>, window_params = [{pipeline_mode = #tpu.pipeline_mode<synchronous>, transform_indices = @transform_0, window_bounds = array<i64: 4, 2, 256>}, {transform_indices = @transform_1, window_bounds = array<i64: 4, 256, 128>}, {transform_indices = @transform_2, window_bounds = array<i64: 1, 128>}, {transform_indices = @transform_3, window_bounds = array<i64: 128, 128>}, {pipeline_mode = #tpu.pipeline_mode<synchronous>, transform_indices = @transform_4, window_bounds = array<i64: 1, 128>}, {transform_indices = @transform_5, window_bounds = array<i64: 1, 2, 1>}]} {
    %c0_i32 = arith.constant 0 : i32
    %0 = arith.cmpi eq, %arg1, %c0_i32 : i32
    %1 = arith.extui %0 : i1 to i32
    %c0_i32_0 = arith.constant 0 : i32
    %2 = arith.cmpi ne, %1, %c0_i32_0 : i32
    scf.if %2 {
      %cst_36 = arith.constant 0.000000e+00 : f32
      %40 = vector.broadcast %cst_36 : f32 to vector<2x128xf32>
      %c0_37 = arith.constant 0 : index
      %c0_38 = arith.constant 0 : index
      %41 = vector.load %arg8[%c0_37, %c0_38] : memref<2x128xf32, #tpu.memory_space<vmem>>, vector<2x128xf32>
      tpu.vector_store %arg8[%c0_37, %c0_38], %40 {strides = array<i32>} : memref<2x128xf32, #tpu.memory_space<vmem>>, vector<2x128xf32>,
    } else {
    }
    %c0 = arith.constant 0 : index
    %c0_1 = arith.constant 0 : index
    %c0_2 = arith.constant 0 : index
    %3 = vector.load %arg2[%c0, %c0_1, %c0_2] : memref<4x2x256xbf16, #tpu.memory_space<vmem>>, vector<1x2x256xbf16>
    %4 = vector.shape_cast %3 : vector<1x2x256xbf16> to vector<2x256xbf16>
    %c0_3 = arith.constant 0 : index
    %c0_4 = arith.constant 0 : index
    %c0_5 = arith.constant 0 : index
    %5 = vector.load %arg3[%c0_3, %c0_4, %c0_5] : memref<4x256x128xbf16, #tpu.memory_space<vmem>>, vector<1x256x128xbf16>
    %6 = vector.shape_cast %5 : vector<1x256x128xbf16> to vector<256x128xbf16>
    %cst = arith.constant dense<0.000000e+00> : vector<2x128xf32>
    %7 = tpu.matmul %4, %6, %cst {dimension_numbers = #tpu.dot_dimension_numbers<[1], [0], [0], [1], [0, 0, 1, 1], [], []>} : vector<2x256xbf16>, vector<256x128xbf16>, vector<2x128xf32> -> vector<2x128xf32>
    %c1 = arith.constant 1 : index
    %c0_6 = arith.constant 0 : index
    %c0_7 = arith.constant 0 : index
    %8 = vector.load %arg2[%c1, %c0_6, %c0_7] : memref<4x2x256xbf16, #tpu.memory_space<vmem>>, vector<1x2x256xbf16>
    %9 = vector.shape_cast %8 : vector<1x2x256xbf16> to vector<2x256xbf16>
    %c1_8 = arith.constant 1 : index
    %c0_9 = arith.constant 0 : index
    %c0_10 = arith.constant 0 : index
    %10 = vector.load %arg3[%c1_8, %c0_9, %c0_10] : memref<4x256x128xbf16, #tpu.memory_space<vmem>>, vector<1x256x128xbf16>
    %11 = vector.shape_cast %10 : vector<1x256x128xbf16> to vector<256x128xbf16>
    %cst_11 = arith.constant dense<0.000000e+00> : vector<2x128xf32>
    %12 = tpu.matmul %9, %11, %cst_11 {dimension_numbers = #tpu.dot_dimension_numbers<[1], [0], [0], [1], [0, 0, 1, 1], [], []>} : vector<2x256xbf16>, vector<256x128xbf16>, vector<2x128xf32> -> vector<2x128xf32>
    %13 = arith.addf %7, %12 : vector<2x128xf32>
    %c2 = arith.constant 2 : index
    %c0_12 = arith.constant 0 : index
    %c0_13 = arith.constant 0 : index
    %14 = vector.load %arg2[%c2, %c0_12, %c0_13] : memref<4x2x256xbf16, #tpu.memory_space<vmem>>, vector<1x2x256xbf16>
    %15 = vector.shape_cast %14 : vector<1x2x256xbf16> to vector<2x256xbf16>
    %c2_14 = arith.constant 2 : index
    %c0_15 = arith.constant 0 : index
    %c0_16 = arith.constant 0 : index
    %16 = vector.load %arg3[%c2_14, %c0_15, %c0_16] : memref<4x256x128xbf16, #tpu.memory_space<vmem>>, vector<1x256x128xbf16>
    %17 = vector.shape_cast %16 : vector<1x256x128xbf16> to vector<256x128xbf16>
    %cst_17 = arith.constant dense<0.000000e+00> : vector<2x128xf32>
    %18 = tpu.matmul %15, %17, %cst_17 {dimension_numbers = #tpu.dot_dimension_numbers<[1], [0], [0], [1], [0, 0, 1, 1], [], []>} : vector<2x256xbf16>, vector<256x128xbf16>, vector<2x128xf32> -> vector<2x128xf32>
    %19 = arith.addf %13, %18 : vector<2x128xf32>
    %c3 = arith.constant 3 : index
    %c0_18 = arith.constant 0 : index
    %c0_19 = arith.constant 0 : index
    %20 = vector.load %arg2[%c3, %c0_18, %c0_19] : memref<4x2x256xbf16, #tpu.memory_space<vmem>>, vector<1x2x256xbf16>
    %21 = vector.shape_cast %20 : vector<1x2x256xbf16> to vector<2x256xbf16>
    %c3_20 = arith.constant 3 : index
    %c0_21 = arith.constant 0 : index
    %c0_22 = arith.constant 0 : index
    %22 = vector.load %arg3[%c3_20, %c0_21, %c0_22] : memref<4x256x128xbf16, #tpu.memory_space<vmem>>, vector<1x256x128xbf16>
    %23 = vector.shape_cast %22 : vector<1x256x128xbf16> to vector<256x128xbf16>
    %cst_23 = arith.constant dense<0.000000e+00> : vector<2x128xf32>
    %24 = tpu.matmul %21, %23, %cst_23 {dimension_numbers = #tpu.dot_dimension_numbers<[1], [0], [0], [1], [0, 0, 1, 1], [], []>} : vector<2x256xbf16>, vector<256x128xbf16>, vector<2x128xf32> -> vector<2x128xf32>
    %25 = arith.addf %19, %24 : vector<2x128xf32>
    %c0_24 = arith.constant 0 : index
    %c0_25 = arith.constant 0 : index
    %26 = vector.load %arg4[%c0_24, %c0_25] : memref<1x128xf32, #tpu.memory_space<vmem>>, vector<1x128xf32>
    %27 = vector.broadcast %26 : vector<1x128xf32> to vector<2x128xf32>
    %28 = arith.addf %25, %27 : vector<2x128xf32>
    %cst_26 = arith.constant 0.000000e+00 : f32
    %29 = vector.broadcast %cst_26 : f32 to vector<2x128xf32>
    %30 = arith.maximumf %28, %29 : vector<2x128xf32>
    %c0_27 = arith.constant 0 : index
    %c0_28 = arith.constant 0 : index
    %31 = vector.load %arg8[%c0_27, %c0_28] : memref<2x128xf32, #tpu.memory_space<vmem>>, vector<2x128xf32>
    %32 = arith.truncf %30 : vector<2x128xf32> to vector<2x128xbf16>
    %c0_29 = arith.constant 0 : index
    %c0_30 = arith.constant 0 : index
    %33 = vector.load %arg5[%c0_29, %c0_30] : memref<128x128xbf16, #tpu.memory_space<vmem>>, vector<128x128xbf16>
    %cst_31 = arith.constant dense<0.000000e+00> : vector<2x128xf32>
    %34 = tpu.matmul %32, %33, %cst_31 {dimension_numbers = #tpu.dot_dimension_numbers<[1], [0], [0], [1], [0, 0, 1, 1], [], []>} : vector<2x128xbf16>, vector<128x128xbf16>, vector<2x128xf32> -> vector<2x128xf32>
    %35 = arith.addf %31, %34 : vector<2x128xf32>
    %c0_32 = arith.constant 0 : index
    %c0_33 = arith.constant 0 : index
    %36 = vector.load %arg8[%c0_32, %c0_33] : memref<2x128xf32, #tpu.memory_space<vmem>>, vector<2x128xf32>
    tpu.vector_store %arg8[%c0_32, %c0_33], %35 {strides = array<i32>} : memref<2x128xf32, #tpu.memory_space<vmem>>, vector<2x128xf32>,
    %c0_i32_34 = arith.constant 0 : i32
    %37 = arith.cmpi eq, %arg1, %c0_i32_34 : i32
    %38 = arith.extui %37 : i1 to i32
    %c0_i32_35 = arith.constant 0 : i32
    %39 = arith.cmpi ne, %38, %c0_i32_35 : i32
    scf.if %39 {
      %c0_36 = arith.constant 0 : index
      %c0_37 = arith.constant 0 : index
      %40 = vector.load %arg8[%c0_36, %c0_37] : memref<2x128xf32, #tpu.memory_space<vmem>>, vector<2x128xf32>
      %c0_38 = arith.constant 0 : index
      %c0_39 = arith.constant 0 : index
      %41 = vector.load %arg6[%c0_38, %c0_39] : memref<1x128xf32, #tpu.memory_space<vmem>>, vector<1x128xf32>
      %42 = vector.broadcast %41 : vector<1x128xf32> to vector<2x128xf32>
      %43 = arith.mulf %40, %42 : vector<2x128xf32>
      %cst_40 = arith.constant dense<0.000000e+00> : vector<2xf32>
      %44 = vector.multi_reduction <add>, %43, %cst_40 [1] : vector<2x128xf32> to vector<2xf32>
      %45 = vector.shape_cast %44 : vector<2xf32> to vector<2x1xf32>
      %46 = vector.shape_cast %45 : vector<2x1xf32> to vector<1x2x1xf32>
      %c0_41 = arith.constant 0 : index
      %c0_42 = arith.constant 0 : index
      %c0_43 = arith.constant 0 : index
      %47 = vector.load %arg7[%c0_41, %c0_42, %c0_43] : memref<1x2x1xf32, #tpu.memory_space<vmem>>, vector<1x2x1xf32>
      tpu.vector_store %arg7[%c0_41, %c0_42, %c0_43], %46 {strides = array<i32>} : memref<1x2x1xf32, #tpu.memory_space<vmem>>, vector<1x2x1xf32>,
    } else {
    }
    return
  }
  func.func @transform_0(%arg0: i32, %arg1: i32) -> (i32, i32, i32) {
    %c0_i32 = arith.constant 0 : i32
    %c0_i32_0 = arith.constant 0 : i32
    %c0_i32_1 = arith.constant 0 : i32
    %c0_i32_2 = arith.constant 0 : i32
    return %c0_i32, %c0_i32_0, %c0_i32_1 : i32, i32, i32
  }
  func.func @transform_1(%arg0: i32, %arg1: i32) -> (i32, i32, i32) {
    %c1_i32 = arith.constant 1 : i32
    %0 = arith.muli %arg0, %c1_i32 : i32
    %1 = arith.addi %0, %arg1 : i32
    %c0_i32 = arith.constant 0 : i32
    %c0_i32_0 = arith.constant 0 : i32
    %c0_i32_1 = arith.constant 0 : i32
    return %c0_i32, %c0_i32_0, %1 : i32, i32, i32
  }
  func.func @transform_2(%arg0: i32, %arg1: i32) -> (i32, i32) {
    %c1_i32 = arith.constant 1 : i32
    %0 = arith.muli %arg0, %c1_i32 : i32
    %1 = arith.addi %0, %arg1 : i32
    %c0_i32 = arith.constant 0 : i32
    %c0_i32_0 = arith.constant 0 : i32
    return %c0_i32, %1 : i32, i32
  }
  func.func @transform_3(%arg0: i32, %arg1: i32) -> (i32, i32) {
    %c1_i32 = arith.constant 1 : i32
    %0 = arith.muli %arg0, %c1_i32 : i32
    %1 = arith.addi %0, %arg1 : i32
    %c0_i32 = arith.constant 0 : i32
    %c0_i32_0 = arith.constant 0 : i32
    return %1, %c0_i32 : i32, i32
  }
  func.func @transform_4(%arg0: i32, %arg1: i32) -> (i32, i32) {
    %c0_i32 = arith.constant 0 : i32
    %c0_i32_0 = arith.constant 0 : i32
    %c0_i32_1 = arith.constant 0 : i32
    return %c0_i32, %c0_i32_0 : i32, i32
  }
  func.func @transform_5(%arg0: i32, %arg1: i32) -> (i32, i32, i32) {
    %c0_i32 = arith.constant 0 : i32
    %c0_i32_0 = arith.constant 0 : i32
    %c0_i32_1 = arith.constant 0 : i32
    return %arg0, %c0_i32, %c0_i32_0 : i32, i32, i32
  }
}

</mosaic_0001>

<bundles_post_ra>
// kernel: domain_dis_forward.3
= control target key start
LH: loop header
LB: loop body
LE: loop exit
PB: predicated region body
PF: predicated region fallthrough
CT: control target
= control target key end

     0   :  { %s2274_s18 = smov 0   ;;  %s2276_s19 = smov 0   ;;  %s2703_s0 = inlined_call_operand.vmem [shape: bf16[4,2,256], index: 0, kind: input, shape index: {}]   ;;  %s2704_s1 = inlined_call_operand.vmem [shape: bf16[4,256,256], index: 1, kind: input, shape index: {}]   ;;  %s2705_s2 = inlined_call_operand.vmem [shape: f32[1,256], index: 2, kind: input, shape index: {}]   ;;  %s2706_s3 = inlined_call_operand.vmem [shape: bf16[256,128], index: 3, kind: input, shape index: {}]   ;;  %s2707_s4 = inlined_call_operand.vmem [shape: f32[1,128], index: 4, kind: input, shape index: {}]   ;;  %s2708_s5 = inlined_call_operand.vmem [shape: f32[2,2,1], index: 5, kind: output, shape index: {}]  }
   0x1   :  { %s2278_s20 = smov 0   ;;  %s2280_s21 = smov 0  }
   0x2   :  { %s2282_s22 = smov 0  }
   0x3 LB: > { %s27_s23 = sadd.s32 1, %s2237_s21  ;;  %p64_p1 = scmp.ne.s32.totalorder %s2229_s19, %s2225_s18  ;;  %s2241_s22 = sphi %s2282_s22, %s15_s22   ;;  %s2237_s21 = sphi %s2280_s21, %s2712_s21   ;;  %s2233_s20 = sphi %s2278_s20, %s2711_s20   ;;  %s2229_s19 = sphi %s2276_s19, %s2710_s19   ;;  %s2225_s18 = sphi %s2274_s18, %s2709_s18  }
   0x4   : > { %p29_p0 = scmp.ge.s32.totalorder %s27_s23, 2  ;;  %p65_p2 = scmp.eq.s32.totalorder %s2241_s22, 0 }
   0x5   : > { %s57_s25 = sadd.s32 1, %s2229_s19  ;;  %p1691_p5 = scmp.ge.s32.totalorder %s2241_s22, 2 }
   0x6   : > { %s2714_s23 = smov (%p29_p0, %s27_s23), 0  ;;  %p66_p3 = por %p65_p2, %p64_p1 }
   0x7   : > { %s54_s24 = ssub.s32 %s2237_s21, %s2714_s23  ;;  %199 = sbr.rel (%p1691_p5) target bundleno = 144 (0x90), region = 24 }
   0x8   : > { %p55_p4 = scmp.eq.s32.totalorder %s54_s24, 0 }
   0xa   : > { %s2309_s26 = scalar_select %p55_p4, %s2229_s19, %s57_s25  }
   0xc   : > { %202 = sbr.rel (!%p66_p3) target bundleno = 144 (0x90), region = 28  ;;  %s204_s27 = sand.u32 (%p66_p3), 1, %s2229_s19  }
   0xd   : > { %s1693_s28 = sshll.u32 (%p66_p3), %s2237_s21, 2  ;;  %s1692_s29 = sshll.u32 (%p66_p3), %s204_s27, 9 }
   0xe   : > { %s2317_s7 = scalar_lea.vmem (%p66_p3), %s2704_s1, %s1693_s28  ;;  %s2321_s8 = scalar_lea.vmem (%p66_p3), [#allocation3], %s1692_s29 }
   0xf   : > { %v226_v0 = vld [vmem:[%s2317_s7] sm:$0xf] (%p66_p3)  ;;  %v228_v1 = vld [vmem:[%s2317_s7 + $0x8] sm:$0xf] (%p66_p3)  ;;  %v230_v2 = vld [vmem:[%s2317_s7 + $0x10] sm:$0xf] (%p66_p3) }
  0x10   : > { %227 = vst [vmem:[%s2321_s8] sm:$0xf] (%p66_p3), %v226_v0  ;;  %v232_v3 = vld [vmem:[%s2317_s7 + $0x18] sm:$0xf] (%p66_p3)  ;;  %v234_v4 = vld [vmem:[%s2317_s7 + $0x20] sm:$0xf] (%p66_p3) }
  0x11   : > { %229 = vst [vmem:[%s2321_s8 + $0x4] sm:$0xf] %v228_v1  ;;  %v236_v5 = vld [vmem:[%s2317_s7 + $0x28] sm:$0xf]  ;;  %v238_v6 = vld [vmem:[%s2317_s7 + $0x30] sm:$0xf] }
  0x12   : > { %231 = vst [vmem:[%s2321_s8 + $0x8] sm:$0xf] %v230_v2  ;;  %v240_v7 = vld [vmem:[%s2317_s7 + $0x38] sm:$0xf]  ;;  %v242_v8 = vld [vmem:[%s2317_s7 + $0x40] sm:$0xf] }
  0x13   : > { %233 = vst [vmem:[%s2321_s8 + $0xc] sm:$0xf] %v232_v3  ;;  %v244_v9 = vld [vmem:[%s2317_s7 + $0x48] sm:$0xf]  ;;  %v246_v10 = vld [vmem:[%s2317_s7 + $0x50] sm:$0xf] }
  0x14   : > { %235 = vst [vmem:[%s2321_s8 + $0x10] sm:$0xf] %v234_v4  ;;  %v248_v11 = vld [vmem:[%s2317_s7 + $0x58] sm:$0xf]  ;;  %v250_v12 = vld [vmem:[%s2317_s7 + $0x60] sm:$0xf] }
  0x15   : > { %237 = vst [vmem:[%s2321_s8 + $0x14] sm:$0xf] %v236_v5  ;;  %v252_v13 = vld [vmem:[%s2317_s7 + $0x68] sm:$0xf]  ;;  %v254_v14 = vld [vmem:[%s2317_s7 + $0x70] sm:$0xf] }
  0x16   : > { %239 = vst [vmem:[%s2321_s8 + $0x18] sm:$0xf] %v238_v6  ;;  %v256_v15 = vld [vmem:[%s2317_s7 + $0x78] sm:$0xf]  ;;  %v258_v16 = vld [vmem:[%s2317_s7 + $0x80] sm:$0xf] }
  0x17   : > { %241 = vst [vmem:[%s2321_s8 + $0x1c] sm:$0xf] %v240_v7  ;;  %v260_v17 = vld [vmem:[%s2317_s7 + $0x88] sm:$0xf]  ;;  %v262_v18 = vld [vmem:[%s2317_s7 + $0x90] sm:$0xf] }
  0x18   : > { %243 = vst [vmem:[%s2321_s8 + $0x20] sm:$0xf] %v242_v8  ;;  %v264_v19 = vld [vmem:[%s2317_s7 + $0x98] sm:$0xf]  ;;  %v266_v20 = vld [vmem:[%s2317_s7 + $0xa0] sm:$0xf] }
  0x19   : > { %245 = vst [vmem:[%s2321_s8 + $0x24] sm:$0xf] %v244_v9  ;;  %v268_v21 = vld [vmem:[%s2317_s7 + $0xa8] sm:$0xf]  ;;  %v270_v22 = vld [vmem:[%s2317_s7 + $0xb0] sm:$0xf] }
  0x1a   : > { %247 = vst [vmem:[%s2321_s8 + $0x28] sm:$0xf] %v246_v10  ;;  %v272_v23 = vld [vmem:[%s2317_s7 + $0xb8] sm:$0xf]  ;;  %v274_v24 = vld [vmem:[%s2317_s7 + $0xc0] sm:$0xf] }
  0x1b   : > { %249 = vst [vmem:[%s2321_s8 + $0x2c] sm:$0xf] %v248_v11  ;;  %v276_v25 = vld [vmem:[%s2317_s7 + $0xc8] sm:$0xf]  ;;  %v278_v26 = vld [vmem:[%s2317_s7 + $0xd0] sm:$0xf] }
  0x1c   : > { %251 = vst [vmem:[%s2321_s8 + $0x30] sm:$0xf] %v250_v12  ;;  %v280_v27 = vld [vmem:[%s2317_s7 + $0xd8] sm:$0xf]  ;;  %v282_v28 = vld [vmem:[%s2317_s7 + $0xe0] sm:$0xf] }
  0x1d   : > { %253 = vst [vmem:[%s2321_s8 + $0x34] sm:$0xf] %v252_v13  ;;  %v284_v29 = vld [vmem:[%s2317_s7 + $0xe8] sm:$0xf]  ;;  %v286_v30 = vld [vmem:[%s2317_s7 + $0xf0] sm:$0xf] }
  0x1e   : > { %255 = vst [vmem:[%s2321_s8 + $0x38] sm:$0xf] %v254_v14  ;;  %v288_v31 = vld [vmem:[%s2317_s7 + $0xf8] sm:$0xf]  ;;  %v290_v32 = vld [vmem:[%s2317_s7 + $0x100] sm:$0xf] }
  0x1f   : > { %257 = vst [vmem:[%s2321_s8 + $0x3c] sm:$0xf] %v256_v15  ;;  %v292_v33 = vld [vmem:[%s2317_s7 + $0x108] sm:$0xf]  ;;  %v294_v34 = vld [vmem:[%s2317_s7 + $0x110] sm:$0xf] }
  0x20   : > { %259 = vst [vmem:[%s2321_s8 + $0x40] sm:$0xf] %v258_v16  ;;  %v296_v35 = vld [vmem:[%s2317_s7 + $0x118] sm:$0xf]  ;;  %v298_v36 = vld [vmem:[%s2317_s7 + $0x120] sm:$0xf] }
  0x21   : > { %261 = vst [vmem:[%s2321_s8 + $0x44] sm:$0xf] %v260_v17  ;;  %v300_v37 = vld [vmem:[%s2317_s7 + $0x128] sm:$0xf]  ;;  %v302_v38 = vld [vmem:[%s2317_s7 + $0x130] sm:$0xf] }
  0x22   : > { %263 = vst [vmem:[%s2321_s8 + $0x48] sm:$0xf] %v262_v18  ;;  %v304_v39 = vld [vmem:[%s2317_s7 + $0x138] sm:$0xf]  ;;  %v306_v40 = vld [vmem:[%s2317_s7 + $0x140] sm:$0xf] }
  0x23   : > { %265 = vst [vmem:[%s2321_s8 + $0x4c] sm:$0xf] %v264_v19  ;;  %v308_v41 = vld [vmem:[%s2317_s7 + $0x148] sm:$0xf]  ;;  %v310_v42 = vld [vmem:[%s2317_s7 + $0x150] sm:$0xf] }
  0x24   : > { %267 = vst [vmem:[%s2321_s8 + $0x50] sm:$0xf] %v266_v20  ;;  %v312_v43 = vld [vmem:[%s2317_s7 + $0x158] sm:$0xf]  ;;  %v314_v44 = vld [vmem:[%s2317_s7 + $0x160] sm:$0xf] }
  0x25   : > { %269 = vst [vmem:[%s2321_s8 + $0x54] sm:$0xf] %v268_v21  ;;  %v316_v45 = vld [vmem:[%s2317_s7 + $0x168] sm:$0xf]  ;;  %v318_v46 = vld [vmem:[%s2317_s7 + $0x170] sm:$0xf] }
  0x26   : > { %271 = vst [vmem:[%s2321_s8 + $0x58] sm:$0xf] %v270_v22  ;;  %v320_v47 = vld [vmem:[%s2317_s7 + $0x178] sm:$0xf]  ;;  %v322_v48 = vld [vmem:[%s2317_s7 + $0x180] sm:$0xf] }
  0x27   : > { %273 = vst [vmem:[%s2321_s8 + $0x5c] sm:$0xf] %v272_v23  ;;  %v324_v49 = vld [vmem:[%s2317_s7 + $0x188] sm:$0xf]  ;;  %v326_v50 = vld [vmem:[%s2317_s7 + $0x190] sm:$0xf] }
  0x28   : > { %275 = vst [vmem:[%s2321_s8 + $0x60] sm:$0xf] %v274_v24  ;;  %v328_v51 = vld [vmem:[%s2317_s7 + $0x198] sm:$0xf]  ;;  %v330_v52 = vld [vmem:[%s2317_s7 + $0x1a0] sm:$0xf] }
  0x29   : > { %277 = vst [vmem:[%s2321_s8 + $0x64] sm:$0xf] %v276_v25  ;;  %v332_v53 = vld [vmem:[%s2317_s7 + $0x1a8] sm:$0xf]  ;;  %v334_v54 = vld [vmem:[%s2317_s7 + $0x1b0] sm:$0xf] }
  0x2a   : > { %279 = vst [vmem:[%s2321_s8 + $0x68] sm:$0xf] %v278_v26  ;;  %v336_v55 = vld [vmem:[%s2317_s7 + $0x1b8] sm:$0xf]  ;;  %v338_v56 = vld [vmem:[%s2317_s7 + $0x1c0] sm:$0xf] }
  0x2b   : > { %281 = vst [vmem:[%s2321_s8 + $0x6c] sm:$0xf] %v280_v27  ;;  %v340_v57 = vld [vmem:[%s2317_s7 + $0x1c8] sm:$0xf]  ;;  %v342_v58 = vld [vmem:[%s2317_s7 + $0x1d0] sm:$0xf] }
  0x2c   : > { %283 = vst [vmem:[%s2321_s8 + $0x70] sm:$0xf] %v282_v28  ;;  %v344_v59 = vld [vmem:[%s2317_s7 + $0x1d8] sm:$0xf]  ;;  %v346_v60 = vld [vmem:[%s2317_s7 + $0x1e0] sm:$0xf] }
  0x2d   : > { %285 = vst [vmem:[%s2321_s8 + $0x74] sm:$0xf] %v284_v29  ;;  %v348_v61 = vld [vmem:[%s2317_s7 + $0x1e8] sm:$0xf]  ;;  %v350_v62 = vld [vmem:[%s2317_s7 + $0x1f0] sm:$0xf] }
  0x2e   : > { %287 = vst [vmem:[%s2321_s8 + $0x78] sm:$0xf] %v286_v30  ;;  %v352_v63 = vld [vmem:[%s2317_s7 + $0x1f8] sm:$0xf]  ;;  %v354_v0 = vld [vmem:[%s2317_s7 + $0x200] sm:$0xf] }
  0x2f   : > { %289 = vst [vmem:[%s2321_s8 + $0x7c] sm:$0xf] %v288_v31  ;;  %v356_v1 = vld [vmem:[%s2317_s7 + $0x208] sm:$0xf]  ;;  %v358_v2 = vld [vmem:[%s2317_s7 + $0x210] sm:$0xf] }
  0x30   : > { %291 = vst [vmem:[%s2321_s8 + $0x80] sm:$0xf] %v290_v32  ;;  %v360_v3 = vld [vmem:[%s2317_s7 + $0x218] sm:$0xf]  ;;  %v362_v4 = vld [vmem:[%s2317_s7 + $0x220] sm:$0xf] }
  0x31   : > { %293 = vst [vmem:[%s2321_s8 + $0x84] sm:$0xf] %v292_v33  ;;  %v364_v5 = vld [vmem:[%s2317_s7 + $0x228] sm:$0xf]  ;;  %v366_v6 = vld [vmem:[%s2317_s7 + $0x230] sm:$0xf] }
  0x32   : > { %295 = vst [vmem:[%s2321_s8 + $0x88] sm:$0xf] %v294_v34  ;;  %v368_v7 = vld [vmem:[%s2317_s7 + $0x238] sm:$0xf]  ;;  %v370_v8 = vld [vmem:[%s2317_s7 + $0x240] sm:$0xf] }
  0x33   : > { %297 = vst [vmem:[%s2321_s8 + $0x8c] sm:$0xf] %v296_v35  ;;  %v372_v9 = vld [vmem:[%s2317_s7 + $0x248] sm:$0xf]  ;;  %v374_v10 = vld [vmem:[%s2317_s7 + $0x250] sm:$0xf] }
  0x34   : > { %299 = vst [vmem:[%s2321_s8 + $0x90] sm:$0xf] %v298_v36  ;;  %v376_v11 = vld [vmem:[%s2317_s7 + $0x258] sm:$0xf]  ;;  %v378_v12 = vld [vmem:[%s2317_s7 + $0x260] sm:$0xf] }
  0x35   : > { %301 = vst [vmem:[%s2321_s8 + $0x94] sm:$0xf] %v300_v37  ;;  %v380_v13 = vld [vmem:[%s2317_s7 + $0x268] sm:$0xf]  ;;  %v382_v14 = vld [vmem:[%s2317_s7 + $0x270] sm:$0xf] }
  0x36   : > { %303 = vst [vmem:[%s2321_s8 + $0x98] sm:$0xf] %v302_v38  ;;  %v384_v15 = vld [vmem:[%s2317_s7 + $0x278] sm:$0xf]  ;;  %v386_v16 = vld [vmem:[%s2317_s7 + $0x280] sm:$0xf] }
  0x37   : > { %305 = vst [vmem:[%s2321_s8 + $0x9c] sm:$0xf] %v304_v39  ;;  %v388_v17 = vld [vmem:[%s2317_s7 + $0x288] sm:$0xf]  ;;  %v390_v18 = vld [vmem:[%s2317_s7 + $0x290] sm:$0xf] }
  0x38   : > { %307 = vst [vmem:[%s2321_s8 + $0xa0] sm:$0xf] %v306_v40  ;;  %v392_v19 = vld [vmem:[%s2317_s7 + $0x298] sm:$0xf]  ;;  %v394_v20 = vld [vmem:[%s2317_s7 + $0x2a0] sm:$0xf] }
  0x39   : > { %309 = vst [vmem:[%s2321_s8 + $0xa4] sm:$0xf] %v308_v41  ;;  %v396_v21 = vld [vmem:[%s2317_s7 + $0x2a8] sm:$0xf]  ;;  %v398_v22 = vld [vmem:[%s2317_s7 + $0x2b0] sm:$0xf] }
  0x3a   : > { %311 = vst [vmem:[%s2321_s8 + $0xa8] sm:$0xf] %v310_v42  ;;  %v400_v23 = vld [vmem:[%s2317_s7 + $0x2b8] sm:$0xf]  ;;  %v402_v24 = vld [vmem:[%s2317_s7 + $0x2c0] sm:$0xf] }
  0x3b   : > { %313 = vst [vmem:[%s2321_s8 + $0xac] sm:$0xf] %v312_v43  ;;  %v404_v25 = vld [vmem:[%s2317_s7 + $0x2c8] sm:$0xf]  ;;  %v406_v26 = vld [vmem:[%s2317_s7 + $0x2d0] sm:$0xf] }
  0x3c   : > { %315 = vst [vmem:[%s2321_s8 + $0xb0] sm:$0xf] %v314_v44  ;;  %v408_v27 = vld [vmem:[%s2317_s7 + $0x2d8] sm:$0xf]  ;;  %v410_v28 = vld [vmem:[%s2317_s7 + $0x2e0] sm:$0xf] }
  0x3d   : > { %317 = vst [vmem:[%s2321_s8 + $0xb4] sm:$0xf] %v316_v45  ;;  %v412_v29 = vld [vmem:[%s2317_s7 + $0x2e8] sm:$0xf]  ;;  %v414_v30 = vld [vmem:[%s2317_s7 + $0x2f0] sm:$0xf] }
  0x3e   : > { %319 = vst [vmem:[%s2321_s8 + $0xb8] sm:$0xf] %v318_v46  ;;  %v416_v31 = vld [vmem:[%s2317_s7 + $0x2f8] sm:$0xf]  ;;  %v418_v32 = vld [vmem:[%s2317_s7 + $0x300] sm:$0xf] }
  0x3f   : > { %321 = vst [vmem:[%s2321_s8 + $0xbc] sm:$0xf] %v320_v47  ;;  %v420_v33 = vld [vmem:[%s2317_s7 + $0x308] sm:$0xf]  ;;  %v422_v34 = vld [vmem:[%s2317_s7 + $0x310] sm:$0xf] }
  0x40   : > { %323 = vst [vmem:[%s2321_s8 + $0xc0] sm:$0xf] %v322_v48  ;;  %v424_v35 = vld [vmem:[%s2317_s7 + $0x318] sm:$0xf]  ;;  %v426_v36 = vld [vmem:[%s2317_s7 + $0x320] sm:$0xf] }
  0x41   : > { %325 = vst [vmem:[%s2321_s8 + $0xc4] sm:$0xf] %v324_v49  ;;  %v428_v37 = vld [vmem:[%s2317_s7 + $0x328] sm:$0xf]  ;;  %v430_v38 = vld [vmem:[%s2317_s7 + $0x330] sm:$0xf] }
  0x42   : > { %327 = vst [vmem:[%s2321_s8 + $0xc8] sm:$0xf] %v326_v50  ;;  %v432_v39 = vld [vmem:[%s2317_s7 + $0x338] sm:$0xf]  ;;  %v434_v40 = vld [vmem:[%s2317_s7 + $0x340] sm:$0xf] }
  0x43   : > { %329 = vst [vmem:[%s2321_s8 + $0xcc] sm:$0xf] %v328_v51  ;;  %v436_v41 = vld [vmem:[%s2317_s7 + $0x348] sm:$0xf]  ;;  %v438_v42 = vld [vmem:[%s2317_s7 + $0x350] sm:$0xf] }
  0x44   : > { %331 = vst [vmem:[%s2321_s8 + $0xd0] sm:$0xf] %v330_v52  ;;  %v440_v43 = vld [vmem:[%s2317_s7 + $0x358] sm:$0xf]  ;;  %v442_v44 = vld [vmem:[%s2317_s7 + $0x360] sm:$0xf] }
  0x45   : > { %333 = vst [vmem:[%s2321_s8 + $0xd4] sm:$0xf] %v332_v53  ;;  %v444_v45 = vld [vmem:[%s2317_s7 + $0x368] sm:$0xf]  ;;  %v446_v46 = vld [vmem:[%s2317_s7 + $0x370] sm:$0xf] }
  0x46   : > { %335 = vst [vmem:[%s2321_s8 + $0xd8] sm:$0xf] %v334_v54  ;;  %v448_v47 = vld [vmem:[%s2317_s7 + $0x378] sm:$0xf]  ;;  %v450_v48 = vld [vmem:[%s2317_s7 + $0x380] sm:$0xf] }
  0x47   : > { %337 = vst [vmem:[%s2321_s8 + $0xdc] sm:$0xf] %v336_v55  ;;  %v452_v49 = vld [vmem:[%s2317_s7 + $0x388] sm:$0xf]  ;;  %v454_v50 = vld [vmem:[%s2317_s7 + $0x390] sm:$0xf] }
  0x48   : > { %339 = vst [vmem:[%s2321_s8 + $0xe0] sm:$0xf] %v338_v56  ;;  %v456_v51 = vld [vmem:[%s2317_s7 + $0x398] sm:$0xf]  ;;  %v458_v52 = vld [vmem:[%s2317_s7 + $0x3a0] sm:$0xf] }
  0x49   : > { %341 = vst [vmem:[%s2321_s8 + $0xe4] sm:$0xf] %v340_v57  ;;  %v460_v53 = vld [vmem:[%s2317_s7 + $0x3a8] sm:$0xf]  ;;  %v462_v54 = vld [vmem:[%s2317_s7 + $0x3b0] sm:$0xf] }
  0x4a   : > { %343 = vst [vmem:[%s2321_s8 + $0xe8] sm:$0xf] %v342_v58  ;;  %v464_v55 = vld [vmem:[%s2317_s7 + $0x3b8] sm:$0xf]  ;;  %v466_v56 = vld [vmem:[%s2317_s7 + $0x3c0] sm:$0xf] }
  0x4b   : > { %345 = vst [vmem:[%s2321_s8 + $0xec] sm:$0xf] %v344_v59  ;;  %v468_v57 = vld [vmem:[%s2317_s7 + $0x3c8] sm:$0xf]  ;;  %v470_v58 = vld [vmem:[%s2317_s7 + $0x3d0] sm:$0xf] }
  0x4c   : > { %347 = vst [vmem:[%s2321_s8 + $0xf0] sm:$0xf] %v346_v60  ;;  %v472_v59 = vld [vmem:[%s2317_s7 + $0x3d8] sm:$0xf]  ;;  %v474_v60 = vld [vmem:[%s2317_s7 + $0x3e0] sm:$0xf] }
  0x4d   : > { %349 = vst [vmem:[%s2321_s8 + $0xf4] sm:$0xf] %v348_v61  ;;  %v476_v61 = vld [vmem:[%s2317_s7 + $0x3e8] sm:$0xf] }
  0x4e   : > { %351 = vst [vmem:[%s2321_s8 + $0xf8] sm:$0xf] %v350_v62  ;;  %v478_v62 = vld [vmem:[%s2317_s7 + $0x3f0] sm:$0xf] }
  0x4f   : > { %353 = vst [vmem:[%s2321_s8 + $0xfc] sm:$0xf] %v352_v63  ;;  %v480_v63 = vld [vmem:[%s2317_s7 + $0x3f8] sm:$0xf] }
  0x50   : > { %355 = vst [vmem:[%s2321_s8 + $0x100] sm:$0xf] %v354_v0 }
  0x51   : > { %357 = vst [vmem:[%s2321_s8 + $0x104] sm:$0xf] %v356_v1 }
  0x52   : > { %359 = vst [vmem:[%s2321_s8 + $0x108] sm:$0xf] %v358_v2 }
  0x53   : > { %361 = vst [vmem:[%s2321_s8 + $0x10c] sm:$0xf] %v360_v3 }
  0x54   : > { %363 = vst [vmem:[%s2321_s8 + $0x110] sm:$0xf] %v362_v4 }
  0x55   : > { %365 = vst [vmem:[%s2321_s8 + $0x114] sm:$0xf] %v364_v5 }
  0x56   : > { %367 = vst [vmem:[%s2321_s8 + $0x118] sm:$0xf] %v366_v6 }
  0x57   : > { %369 = vst [vmem:[%s2321_s8 + $0x11c] sm:$0xf] %v368_v7 }
  0x58   : > { %371 = vst [vmem:[%s2321_s8 + $0x120] sm:$0xf] %v370_v8 }
  0x59   : > { %373 = vst [vmem:[%s2321_s8 + $0x124] sm:$0xf] %v372_v9 }
  0x5a   : > { %375 = vst [vmem:[%s2321_s8 + $0x128] sm:$0xf] %v374_v10 }
  0x5b   : > { %377 = vst [vmem:[%s2321_s8 + $0x12c] sm:$0xf] %v376_v11 }
  0x5c   : > { %379 = vst [vmem:[%s2321_s8 + $0x130] sm:$0xf] %v378_v12 }
  0x5d   : > { %381 = vst [vmem:[%s2321_s8 + $0x134] sm:$0xf] %v380_v13 }
  0x5e   : > { %383 = vst [vmem:[%s2321_s8 + $0x138] sm:$0xf] %v382_v14 }
  0x5f   : > { %385 = vst [vmem:[%s2321_s8 + $0x13c] sm:$0xf] %v384_v15 }
  0x60   : > { %387 = vst [vmem:[%s2321_s8 + $0x140] sm:$0xf] %v386_v16 }
  0x61   : > { %389 = vst [vmem:[%s2321_s8 + $0x144] sm:$0xf] %v388_v17 }
  0x62   : > { %391 = vst [vmem:[%s2321_s8 + $0x148] sm:$0xf] %v390_v18 }
  0x63   : > { %393 = vst [vmem:[%s2321_s8 + $0x14c] sm:$0xf] %v392_v19 }
  0x64   : > { %395 = vst [vmem:[%s2321_s8 + $0x150] sm:$0xf] %v394_v20 }
  0x65   : > { %397 = vst [vmem:[%s2321_s8 + $0x154] sm:$0xf] %v396_v21 }
  0x66   : > { %399 = vst [vmem:[%s2321_s8 + $0x158] sm:$0xf] %v398_v22 }
  0x67   : > { %401 = vst [vmem:[%s2321_s8 + $0x15c] sm:$0xf] %v400_v23 }
  0x68   : > { %403 = vst [vmem:[%s2321_s8 + $0x160] sm:$0xf] %v402_v24 }
  0x69   : > { %405 = vst [vmem:[%s2321_s8 + $0x164] sm:$0xf] %v404_v25 }
  0x6a   : > { %407 = vst [vmem:[%s2321_s8 + $0x168] sm:$0xf] %v406_v26 }
  0x6b   : > { %409 = vst [vmem:[%s2321_s8 + $0x16c] sm:$0xf] %v408_v27 }
  0x6c   : > { %411 = vst [vmem:[%s2321_s8 + $0x170] sm:$0xf] %v410_v28 }
  0x6d   : > { %413 = vst [vmem:[%s2321_s8 + $0x174] sm:$0xf] %v412_v29 }
  0x6e   : > { %415 = vst [vmem:[%s2321_s8 + $0x178] sm:$0xf] %v414_v30 }
  0x6f   : > { %417 = vst [vmem:[%s2321_s8 + $0x17c] sm:$0xf] %v416_v31 }
  0x70   : > { %419 = vst [vmem:[%s2321_s8 + $0x180] sm:$0xf] %v418_v32 }
  0x71   : > { %421 = vst [vmem:[%s2321_s8 + $0x184] sm:$0xf] %v420_v33 }
  0x72   : > { %423 = vst [vmem:[%s2321_s8 + $0x188] sm:$0xf] %v422_v34 }
  0x73   : > { %425 = vst [vmem:[%s2321_s8 + $0x18c] sm:$0xf] %v424_v35 }
  0x74   : > { %427 = vst [vmem:[%s2321_s8 + $0x190] sm:$0xf] %v426_v36 }
  0x75   : > { %429 = vst [vmem:[%s2321_s8 + $0x194] sm:$0xf] %v428_v37 }
  0x76   : > { %431 = vst [vmem:[%s2321_s8 + $0x198] sm:$0xf] %v430_v38 }
  0x77   : > { %433 = vst [vmem:[%s2321_s8 + $0x19c] sm:$0xf] %v432_v39 }
  0x78   : > { %435 = vst [vmem:[%s2321_s8 + $0x1a0] sm:$0xf] %v434_v40 }
  0x79   : > { %437 = vst [vmem:[%s2321_s8 + $0x1a4] sm:$0xf] %v436_v41 }
  0x7a   : > { %439 = vst [vmem:[%s2321_s8 + $0x1a8] sm:$0xf] %v438_v42 }
  0x7b   : > { %441 = vst [vmem:[%s2321_s8 + $0x1ac] sm:$0xf] %v440_v43 }
  0x7c   : > { %443 = vst [vmem:[%s2321_s8 + $0x1b0] sm:$0xf] %v442_v44 }
  0x7d   : > { %445 = vst [vmem:[%s2321_s8 + $0x1b4] sm:$0xf] %v444_v45 }
  0x7e   : > { %447 = vst [vmem:[%s2321_s8 + $0x1b8] sm:$0xf] %v446_v46 }
  0x7f   : > { %449 = vst [vmem:[%s2321_s8 + $0x1bc] sm:$0xf] %v448_v47 }
  0x80   : > { %451 = vst [vmem:[%s2321_s8 + $0x1c0] sm:$0xf] %v450_v48 }
  0x81   : > { %453 = vst [vmem:[%s2321_s8 + $0x1c4] sm:$0xf] %v452_v49 }
  0x82   : > { %455 = vst [vmem:[%s2321_s8 + $0x1c8] sm:$0xf] %v454_v50 }
  0x83   : > { %457 = vst [vmem:[%s2321_s8 + $0x1cc] sm:$0xf] %v456_v51 }
  0x84   : > { %459 = vst [vmem:[%s2321_s8 + $0x1d0] sm:$0xf] %v458_v52 }
  0x85   : > { %461 = vst [vmem:[%s2321_s8 + $0x1d4] sm:$0xf] %v460_v53 }
  0x86   : > { %463 = vst [vmem:[%s2321_s8 + $0x1d8] sm:$0xf] %v462_v54 }
  0x87   : > { %465 = vst [vmem:[%s2321_s8 + $0x1dc] sm:$0xf] %v464_v55 }
  0x88   : > { %467 = vst [vmem:[%s2321_s8 + $0x1e0] sm:$0xf] %v466_v56 }
  0x89   : > { %469 = vst [vmem:[%s2321_s8 + $0x1e4] sm:$0xf] %v468_v57 }
  0x8a   : > { %471 = vst [vmem:[%s2321_s8 + $0x1e8] sm:$0xf] %v470_v58 }
  0x8b   : > { %473 = vst [vmem:[%s2321_s8 + $0x1ec] sm:$0xf] %v472_v59 }
  0x8c   : > { %475 = vst [vmem:[%s2321_s8 + $0x1f0] sm:$0xf] %v474_v60 }
  0x8d   : > { %477 = vst [vmem:[%s2321_s8 + $0x1f4] sm:$0xf] %v476_v61 }
  0x8e   : > { %479 = vst [vmem:[%s2321_s8 + $0x1f8] sm:$0xf] %v478_v62 }
  0x8f   : > { %481 = vst [vmem:[%s2321_s8 + $0x1fc] sm:$0xf] %v480_v63 }
  0x90 PF: > { %p1694_p6 = scmp.ge.s32.totalorder %s2241_s22, 1  ;;  %p779_p7 = scmp.lt.s32.totalorder %s2241_s22, 3 }
  0x92   : > { %p780_p8 = pnand %p1694_p6, %p779_p7 }
  0x93   : > { %s786_s9 = sand.u32 (!%p780_p8), 1, %s2225_s18   ;;  %p824_p9 = scmp.lt.s32.totalorder (!%p780_p8), %s2233_s20, 1 }
  0x94   : > { %783 = sbr.rel (%p780_p8) target bundleno = 619 (0x26b), region = 77  ;;  %s1695_s12 = sshll.u32 (!%p780_p8), %s786_s9, 9 }
  0x95   : > { %s2583_s13 = scalar_lea.vmem (!%p780_p8), [#allocation3], %s1695_s12  ;;  %s1696_s30 = sshll.u32 (!%p780_p8), %s2233_s20, 4 }
  0x96   : > { %p830_p10 = scmp.lt.s32.totalorder (!%p780_p8), %s1696_s30, 31 }
  0x99   : > { %v1699_v0 = vld [vmem:[%s2703_s0 + $0x2] sm:$0x3]  ;;  %v2110_v5 = vld [vmem:[%s2583_s13 + $0xb0] sm:$0xff]  ;;  %v2109_v9 = vld [vmem:[%s2583_s13 + $0xa8] sm:$0xff]  ;;  %s2666_s25 = scalar_select %p824_p9, %s2233_s20, 1  ;;  %vm1593_vm0 = vcmask 1041408  }
  0x9a   : > { %914 = vst [vmem:[#allocation1] ss:$9 sm:$0xff] %v1699_v0  ;;  %v2111_v1 = vld [vmem:[%s2583_s13 + $0xb8] sm:$0xff]  ;;  %v2118_v6 = vld [vmem:[%s2583_s13 + $0xf0] sm:$0xff]  ;;  %v2117_v10 = vld [vmem:[%s2583_s13 + $0xe8] sm:$0xff]  ;;  %s2716_s30 = smov (!%p830_p10, %s1696_s30), 31 }
  0x9b   : > { %v2119_v2 = vld [vmem:[%s2583_s13 + $0xf8] sm:$0xff]  ;;  %1015 = vmatpush.bf16.msra.mxu0 %v2111_v1  ;;  %v2094_v7 = vld [vmem:[%s2583_s13 + $0x30] sm:$0xff]  ;;  %v2093_v11 = vld [vmem:[%s2583_s13 + $0x28] sm:$0xff]  ;;  %s826_s29 = scalar_lea.vmem %s2705_s2, %s2666_s25  ;;  %s1697_s6 = sshll.u32 %s2716_s30, 2  ;;  %vm1597_vm1 = vcmask 1024  }
  0x9c   : > { %v2095_v3 = vld [vmem:[%s2583_s13 + $0x38] sm:$0xff]  ;;  %1028 = vmatpush.bf16.msra.mxu1 %v2119_v2  ;;  %v2102_v8 = vld [vmem:[%s2583_s13 + $0x70] sm:$0xff]  ;;  %v2101_v12 = vld [vmem:[%s2583_s13 + $0x68] sm:$0xff]  ;;  %s833_s9 = scalar_lea.vmem %s2706_s3, %s1697_s6 }
  0x9d   : > { %v2103_v4 = vld [vmem:[%s2583_s13 + $0x78] sm:$0xff]  ;;  %1143 = vmatpush.bf16.msra.mxu2 %v2095_v3  ;;  %v2108_v13 = vld [vmem:[%s2583_s13 + $0xa0] sm:$0xff]  ;;  %v845_v17 = vld [vmem:[%s2703_s0] sm:$0x3] }
  0x9e   : > { %1156 = vmatpush.bf16.msra.mxu3 %v2103_v4  ;;  %v2116_v14 = vld [vmem:[%s2583_s13 + $0xe0] sm:$0xff]  ;;  %v2107_v20 = vld [vmem:[%s2583_s13 + $0x98] sm:$0xff]  ;;  %v2106_v24 = vld [vmem:[%s2583_s13 + $0x90] sm:$0xff] }
  0x9f   : > { %1016 = vmatpush.bf16.msra.mxu0 %v2110_v5  ;;  %v2092_v15 = vld [vmem:[%s2583_s13 + $0x20] sm:$0xff]  ;;  %v2115_v21 = vld [vmem:[%s2583_s13 + $0xd8] sm:$0xff]  ;;  %v2114_v25 = vld [vmem:[%s2583_s13 + $0xd0] sm:$0xff] }
  0xa0   : > { %1029 = vmatpush.bf16.msra.mxu1 %v2118_v6  ;;  %v2100_v16 = vld [vmem:[%s2583_s13 + $0x60] sm:$0xff]  ;;  %v2091_v22 = vld [vmem:[%s2583_s13 + $0x18] sm:$0xff]  ;;  %v2090_v26 = vld [vmem:[%s2583_s13 + $0x10] sm:$0xff] }
  0xa1   : > { %1144 = vmatpush.bf16.msra.mxu2 %v2094_v7  ;;  %v915_v18 = vld [vmem:[#allocation1] sm:$0xff]  ;;  %v916_v19 = vld [vmem:[#allocation1 + $0x9] sm:$0xff]  ;;  %v2105_v31 = vld [vmem:[%s2583_s13 + $0x88] sm:$0xff] }
  0xa2   : > { %1157 = vmatpush.bf16.msra.mxu3 %v2102_v8  ;;  %1042 = vst [vmem:[#allocation1] ss:$9 sm:$0xff] %v845_v17  ;;  %v2099_v23 = vld [vmem:[%s2583_s13 + $0x58] sm:$0xff]  ;;  %v2098_v27 = vld [vmem:[%s2583_s13 + $0x50] sm:$0xff]  ;;  %v2113_v32 = vld [vmem:[%s2583_s13 + $0xc8] sm:$0xff] }
  0xa3   : > { %1017 = vmatpush.bf16.msra.mxu0 %v2109_v9  ;;  %v1860_v28 = vld [vmem:[%s2703_s0 + $0x4] sm:$0x3]  ;;  %v2089_v33 = vld [vmem:[%s2583_s13 + $0x8] sm:$0xff]  ;;  %v2104_v35 = vld [vmem:[%s2583_s13 + $0x80] sm:$0xff] }
  0xa4   : > { %1030 = vmatpush.bf16.msra.mxu1 %v2117_v10  ;;  %v2097_v34 = vld [vmem:[%s2583_s13 + $0x48] sm:$0xff]  ;;  %v2112_v36 = vld [vmem:[%s2583_s13 + $0xc0] sm:$0xff]  ;;  %v1957_v39 = vld [vmem:[%s2703_s0 + $0x6] sm:$0x3] }
  0xa5   : > { %1145 = vmatpush.bf16.msra.mxu2 %v2093_v11  ;;  %v2088_v37 = vld [vmem:[%s2583_s13] sm:$0xff]  ;;  %v2127_v40 = vld [vmem:[%s2583_s13 + $0x138] sm:$0xff]  ;;  %v2126_v46 = vld [vmem:[%s2583_s13 + $0x130] sm:$0xff] }
  0xa6   : > { %1158 = vmatpush.bf16.msra.mxu3 %v2101_v12  ;;  %v2096_v38 = vld [vmem:[%s2583_s13 + $0x40] sm:$0xff]  ;;  %v2135_v41 = vld [vmem:[%s2583_s13 + $0x178] sm:$0xff]  ;;  %v2134_v47 = vld [vmem:[%s2583_s13 + $0x170] sm:$0xff] }
  0xa7   : > { %1018 = vmatpush.bf16.msra.mxu0 %v2108_v13  ;;  %v2143_v42 = vld [vmem:[%s2583_s13 + $0x1b8] sm:$0xff]  ;;  %v2142_v48 = vld [vmem:[%s2583_s13 + $0x1b0] sm:$0xff]  ;;  %v2125_v50 = vld [vmem:[%s2583_s13 + $0x128] sm:$0xff] }
  0xa8   : > { %1031 = vmatpush.bf16.msra.mxu1 %v2116_v14  ;;  %v2151_v43 = vld [vmem:[%s2583_s13 + $0x1f8] sm:$0xff]  ;;  %v2150_v49 = vld [vmem:[%s2583_s13 + $0x1f0] sm:$0xff]  ;;  %v2133_v51 = vld [vmem:[%s2583_s13 + $0x168] sm:$0xff] }
  0xa9   : > { %1146 = vmatpush.bf16.msra.mxu2 %v2092_v15  ;;  %v1043_v29 = vld [vmem:[#allocation1] sm:$0xff]  ;;  %v1044_v30 = vld [vmem:[#allocation1 + $0x9] sm:$0xff]  ;;  %v2141_v52 = vld [vmem:[%s2583_s13 + $0x1a8] sm:$0xff] }
  0xaa   : > { %1159 = vmatpush.bf16.msra.mxu3 %v2100_v16  ;;  %1205 = vst [vmem:[#allocation1] ss:$9 sm:$0xff] %v1860_v28  ;;  %v2149_v53 = vld [vmem:[%s2583_s13 + $0x1e8] sm:$0xff]  ;;  %v2124_v54 = vld [vmem:[%s2583_s13 + $0x120] sm:$0xff]  ;;  %v2123_v58 = vld [vmem:[%s2583_s13 + $0x118] sm:$0xff]  ;;  %v2243_v28 = vmov 0.0  }
  0xab   : > { %1019 = vmatpush.bf16.msra.mxu0 %v2107_v20  ;;  %v2132_v55 = vld [vmem:[%s2583_s13 + $0x160] sm:$0xff]  ;;  %v2131_v59 = vld [vmem:[%s2583_s13 + $0x158] sm:$0xff]  ;;  %v2122_v62 = vld [vmem:[%s2583_s13 + $0x110] sm:$0xff]  ;;  %844 = vst [vmem:[#allocation2] sm:$0x3] %v2243_v28 }
  0xac   : > { %1032 = vmatpush.bf16.msra.mxu1 %v2115_v21  ;;  %v2140_v56 = vld [vmem:[%s2583_s13 + $0x1a0] sm:$0xff]  ;;  %v2139_v60 = vld [vmem:[%s2583_s13 + $0x198] sm:$0xff]  ;;  %v2130_v63 = vld [vmem:[%s2583_s13 + $0x150] sm:$0xff] }
  0xad   : > { %1147 = vmatpush.bf16.msra.mxu2 %v2091_v22  ;;  %v2148_v57 = vld [vmem:[%s2583_s13 + $0x1e0] sm:$0xff]  ;;  %v2147_v61 = vld [vmem:[%s2583_s13 + $0x1d8] sm:$0xff]  ;;  %v2138_v0 = vld [vmem:[%s2583_s13 + $0x190] sm:$0xff] }
  0xae   : > { %1160 = vmatpush.bf16.msra.mxu3 %v2099_v23  ;;  %v2146_v1 = vld [vmem:[%s2583_s13 + $0x1d0] sm:$0xff]  ;;  %v2121_v2 = vld [vmem:[%s2583_s13 + $0x108] sm:$0xff]  ;;  %v2120_v6 = vld [vmem:[%s2583_s13 + $0x100] sm:$0xff] }
  0xaf   : > { %1020 = vmatpush.bf16.msra.mxu0 %v2106_v24  ;;  %v2129_v3 = vld [vmem:[%s2583_s13 + $0x148] sm:$0xff]  ;;  %v2128_v7 = vld [vmem:[%s2583_s13 + $0x140] sm:$0xff]  ;;  %v2156_v15 = vld [vmem:[%s833_s9 + $0x20] sm:$0xff] }
  0xb0   : > { %1033 = vmatpush.bf16.msra.mxu1 %v2114_v25  ;;  %v2137_v4 = vld [vmem:[%s2583_s13 + $0x188] sm:$0xff]  ;;  %v2136_v8 = vld [vmem:[%s2583_s13 + $0x180] sm:$0xff]  ;;  %v2152_v25 = vld [vmem:[%s833_s9] sm:$0xff] }
  0xb1   : > { %1148 = vmatpush.bf16.msra.mxu2 %v2090_v26  ;;  %v2630_v44 = vld [vmem:[#allocation1] sm:$0xff]  ;;  %v2632_v45 = vld [vmem:[#allocation1 + $0x9] sm:$0xff]  ;;  %v2145_v5 = vld [vmem:[%s2583_s13 + $0x1c8] sm:$0xff] }
  0xb2   : > { %1161 = vmatpush.bf16.msra.mxu3 %v2098_v27  ;;  %1369 = vst [vmem:[#allocation1] ss:$9 sm:$0xff] %v1957_v39  ;;  %v2144_v9 = vld [vmem:[%s2583_s13 + $0x1c0] sm:$0xff]  ;;  %v2159_v12 = vld [vmem:[%s833_s9 + $0x38] sm:$0xff]  ;;  %v2201_v39 = vld [vmem:[%s826_s29] ss:$0 sm:$0xff] }
  0xb3   : > { %1021 = vmatpush.bf16.msra.mxu0 %v2105_v31  ;;  %v2158_v13 = vld [vmem:[%s833_s9 + $0x30] sm:$0xff]  ;;  %v2157_v14 = vld [vmem:[%s833_s9 + $0x28] sm:$0xff]  ;;  %v2155_v16 = vld [vmem:[%s833_s9 + $0x18] sm:$0xff]  ;;  %s1698_s13 = sshll.u32 %s2666_s25, 1 }
  0xb4   : > { %1034 = vmatpush.bf16.msra.mxu1 %v2113_v32  ;;  %v2153_v22 = vld [vmem:[%s833_s9 + $0x8] sm:$0xff]  ;;  %s839_s16 = scalar_lea.vmem %s2708_s5, %s1698_s13 }
  0xb5   : > { %1149 = vmatpush.bf16.msra.mxu2 %v2089_v33 }
  0xb6   : > { %1162 = vmatpush.bf16.msra.mxu3 %v2097_v34 }
  0xb7   : > { %1022 = vmatpush.bf16.msra.mxu0 %v2104_v35 }
  0xb8   : > { %1035 = vmatpush.bf16.msra.mxu1 %v2112_v36 }
  0xb9   : > { %1150 = vmatpush.bf16.msra.mxu2 %v2088_v37  ;;  %v1370_v10 = vld [vmem:[#allocation1] sm:$0xff]  ;;  %v1371_v11 = vld [vmem:[#allocation1 + $0x9] sm:$0xff] }
  0xba   : > { %1163 = vmatpush.bf16.msra.mxu3 %v2096_v38  ;;  %1023 = vmatmul.bf16.vlgmr.msra.gmra.mxu0 %v915_v18 }
  0xbb   : > { %1306 = vmatpush.bf16.msrb.mxu0 %v2127_v40  ;;  %1036 = vmatmul.bf16.vlgmr.msra.gmra.mxu1 %v916_v19  ;;  %v2154_v19 = vld [vmem:[%s833_s9 + $0x10] sm:$0xff] }
  0xbc   : > { %1319 = vmatpush.bf16.msrb.mxu1 %v2135_v41  ;;  %1151 = vmatmul.bf16.vlgmr.msra.gmra.mxu2 %v1043_v29 }
  0xbd   : > { %1470 = vmatpush.bf16.msrb.mxu2 %v2143_v42  ;;  %1164 = vmatmul.bf16.vlgmr.msra.gmra.mxu3 %v1044_v30 }
  0xbe   : > { %1483 = vmatpush.bf16.msrb.mxu3 %v2151_v43 }
  0xbf   : > { %1307 = vmatpush.bf16.msrb.mxu0 %v2126_v46 }
  0xc0   : > { %1320 = vmatpush.bf16.msrb.mxu1 %v2134_v47 }
  0xc1   : > { %1471 = vmatpush.bf16.msrb.mxu2 %v2142_v48  ;;  %v1503_v48 = vld [vmem:[#allocation2] sm:$0x3] }
  0xc2   : > { %1484 = vmatpush.bf16.msrb.mxu3 %v2150_v49 }
  0xc3   : > { %1308 = vmatpush.bf16.msrb.mxu0 %v2125_v50 }
  0xc4   : > { %1321 = vmatpush.bf16.msrb.mxu1 %v2133_v51  ;;  %v2202_v51 = vld [vmem:[%s2707_s4] ss:$0 sm:$0xff] }
  0xc5   : > { %1472 = vmatpush.bf16.msrb.mxu2 %v2141_v52 }
  0xc6   : > { %1485 = vmatpush.bf16.msrb.mxu3 %v2149_v53 }
  0xc7   : > { %1309 = vmatpush.bf16.msrb.mxu0 %v2124_v54 }
  0xc8   : > { %1322 = vmatpush.bf16.msrb.mxu1 %v2132_v55 }
  0xc9   : > { %1473 = vmatpush.bf16.msrb.mxu2 %v2140_v56 }
  0xca   : > { %1486 = vmatpush.bf16.msrb.mxu3 %v2148_v57 }
  0xcb   : > { %1310 = vmatpush.bf16.msrb.mxu0 %v2123_v58 }
  0xcc   : > { %1323 = vmatpush.bf16.msrb.mxu1 %v2131_v59 }
  0xcd   : > { %1474 = vmatpush.bf16.msrb.mxu2 %v2139_v60 }
  0xce   : > { %1487 = vmatpush.bf16.msrb.mxu3 %v2147_v61 }
  0xcf   : > { %1311 = vmatpush.bf16.msrb.mxu0 %v2122_v62 }
  0xd0   : > { %1324 = vmatpush.bf16.msrb.mxu1 %v2130_v63 }
  0xd1   : > { %1475 = vmatpush.bf16.msrb.mxu2 %v2138_v0 }
  0xd2   : > { %1488 = vmatpush.bf16.msrb.mxu3 %v2146_v1 }
  0xd3   : > { %1312 = vmatpush.bf16.msrb.mxu0 %v2121_v2 }
  0xd4   : > { %1325 = vmatpush.bf16.msrb.mxu1 %v2129_v3 }
  0xd5   : > { %1476 = vmatpush.bf16.msrb.mxu2 %v2137_v4 }
  0xd6   : > { %1489 = vmatpush.bf16.msrb.mxu3 %v2145_v5 }
  0xd7   : > { %1313 = vmatpush.bf16.msrb.mxu0 %v2120_v6 }
  0xd8   : > { %1326 = vmatpush.bf16.msrb.mxu1 %v2128_v7 }
  0xd9   : > { %1477 = vmatpush.bf16.msrb.mxu2 %v2136_v8 }
  0xda   : > { %1490 = vmatpush.bf16.msrb.mxu3 %v2144_v9  ;;  %1314 = vmatmul.bf16.vlgmr.msrb.gmra.mxu0 %v2630_v44 }
  0xdb   : > { %1327 = vmatmul.bf16.vlgmr.msrb.gmra.mxu1 %v2632_v45  ;;  %1569 = vmatpush.bf16.msra.mxu0 %v2159_v12 }
  0xdc   : > { %1478 = vmatmul.bf16.vlgmr.msrb.gmra.mxu2 %v1370_v10 }
  0xdd   : > { %1491 = vmatmul.bf16.vlgmr.msrb.gmra.mxu3 %v1371_v11 }
  0xdf   : > { %1570 = vmatpush.bf16.msra.mxu0 %v2158_v13 }
  0xe3   : > { %1571 = vmatpush.bf16.msra.mxu0 %v2157_v14 }
  0xe7   : > { %1572 = vmatpush.bf16.msra.mxu0 %v2156_v15 }
  0xeb   : > { %1573 = vmatpush.bf16.msra.mxu0 %v2155_v16 }
  0xef   : > { %1574 = vmatpush.bf16.msra.mxu0 %v2154_v19 }
  0xf3   : > { %1575 = vmatpush.bf16.msra.mxu0 %v2153_v22 }
  0xf7   : > { %1576 = vmatpush.bf16.msra.mxu0 %v2152_v25 }
 0x137   : > { %v1024_v17 = vpop.f32.mrf.mxu0 }
 0x138   : > { %v1037_v18 = vpop.f32.mrf.mxu1 }
 0x139   : > { %v1038_v29 = vadd.f32 %v1037_v18, %v1024_v17 }
 0x13f   : > { %v1152_v20 = vpop.f32.mrf.mxu2  ;;  %v1026_v23 = vpop.f32.mrf.mxu0 }
 0x140   : > { %v1165_v21 = vpop.f32.mrf.mxu3  ;;  %v1039_v24 = vpop.f32.mrf.mxu1  ;;  %v1153_v32 = vadd.f32 %v1152_v20, %v1038_v29 }
 0x142   : > { %v1166_v34 = vadd.f32 %v1165_v21, %v1153_v32 }
 0x147   : > { %v1154_v26 = vpop.f32.mrf.mxu2 }
 0x148   : > { %v1167_v27 = vpop.f32.mrf.mxu3 }
 0x157   : > { %v1315_v30 = vpop.f32.mrf.mxu0 }
 0x158   : > { %v1328_v31 = vpop.f32.mrf.mxu1 }
 0x159   : > { %v1329_v33 = vadd.f32 %v1328_v31, %v1315_v30 }
 0x15b   : > { %v1332_v37 = vadd.f32 %v1329_v33, %v1166_v34 }
 0x15f   : > { %v1479_v35 = vpop.f32.mrf.mxu2  ;;  %v1317_v40 = vpop.f32.mrf.mxu0 }
 0x160   : > { %v1492_v36 = vpop.f32.mrf.mxu3  ;;  %v1330_v41 = vpop.f32.mrf.mxu1 }
 0x161   : > { %v1493_v38 = vadd.f32 %v1492_v36, %v1479_v35 }
 0x163   : > { %v1496_v42 = vadd.f32 %v1493_v38, %v1332_v37 }
 0x165   : > { %v1501_v43 = vadd.f32 %v2201_v39, %v1496_v42 }
 0x167   : > { %v1502_v44 = vmax.f32 %v1501_v43, 0.0  ;;  %v1481_v45 = vpop.f32.mrf.mxu2 }
 0x168   : > { %v1494_v46 = vpop.f32.mrf.mxu3 }
 0x169   : > { %v1504_v47 = vpack.c.bf16 %v1502_v44, %v1502_v44 }
 0x16b   : > { %1577 = vmatmul.bf16.vlgmr.msra.gmra.mxu0 %v1504_v47 }
 0x1e8   : > { %v1578_v49 = vpop.f32.mrf.mxu0 }
 0x1e9   : > { %v1582_v50 = vadd.f32 %v1578_v49, %v1503_v48 }
 0x1eb   : > { %1583 = vst [vmem:[#allocation2] sm:$0x3] %v1582_v50 }
 0x1f0   : > { %v1580_v52 = vpop.f32.mrf.mxu0 }
 0x1f2   : > { %v1587_v53 = vld [vmem:[#allocation2] sm:$0x3] }
 0x1f3   : > { %v1592_v54 = vmul.f32 %v2202_v51, %v1587_v53 }
 0x1f5   : > { %v1594_v55 = vsel %vm1593_vm0, %v1592_v54, 0.0 }
 0x1f6   : > { %1595 = vadd.xlane.f32.xlu0 %v1594_v55 }
 0x269   : > { %v1596_v56 = vpop.xlane.xlu0 %1595 }
 0x26a   : > { %1598 = vst.msk [vmem:[%s839_s16] sm:$0x3] %vm1597_vm1, %v1596_v56 }
 0x26b PF: > { %s15_s22 = sadd.s32 1, %s2241_s22   ;;  %s2709_s18 = smov %s2229_s19 }
 0x26c   : > { %p12_p11 = scmp.ge.s32.totalorder %s15_s22, 4   ;;  %s2710_s19 = smov %s2309_s26 }
 0x26d   : > { %s2711_s20 = smov %s2237_s21  ;;  %s2712_s21 = smov %s2714_s23 }
 0x26e   :  { %14 = sbr.rel (!%p12_p11) target bundleno = 3 (0x3), region = 136 }

// kernel: domain_dis_forward.2
= control target key start
LH: loop header
LB: loop body
LE: loop exit
PB: predicated region body
PF: predicated region fallthrough
CT: control target
= control target key end

     0   :  { %s10083_s12 = smov 0   ;;  %s10085_s13 = smov 0   ;;  %s13473_s0 = inlined_call_operand.vmem [shape: bf16[8,8,2,256], index: 0, kind: input, shape index: {}]   ;;  %s13474_s1 = inlined_call_operand.vmem [shape: bf16[9,256,256], index: 1, kind: input, shape index: {}]   ;;  %s13475_s2 = inlined_call_operand.vmem [shape: f32[1,256], index: 2, kind: input, shape index: {}]   ;;  %s13476_s3 = inlined_call_operand.vmem [shape: bf16[4,2,256], index: 3, kind: output, shape index: {}]  }
   0x1   :  { %s10087_s14 = smov 0   ;;  %s10089_s15 = smov 0  }
   0x2   :  { %s10091_s16 = smov 0  }
   0x3 LB: > { %s25_s17 = sadd.s32 1, %s10057_s15  ;;  %s7670_s18 = sadd.s32 4294967295, %s10061_s16   ;;  %s10061_s16 = sphi %s10091_s16, %s13_s16   ;;  %s10057_s15 = sphi %s10089_s15, %s14133_s15   ;;  %s10053_s14 = sphi %s10087_s14, %s14132_s14   ;;  %s10049_s13 = sphi %s10085_s13, %s14131_s13   ;;  %s10045_s12 = sphi %s10083_s12, %s14130_s12  }
   0x4   : > { %p27_p0 = scmp.ge.s32.totalorder %s25_s17, 2  ;;  %p65_p1 = scmp.ne.s32.totalorder %s10049_s13, %s10045_s12 }
   0x5   : > { %p66_p2 = scmp.eq.s32.totalorder %s10061_s16, 0  ;;  %p123_p4 = scmp.eq.s32.totalorder %s7670_s18, 1 }
   0x6   : > { %s14135_s17 = smov (%p27_p0, %s25_s17), 0  ;;  %s58_s20 = sadd.s32 1, %s10049_s13 }
   0x7   : > { %p67_p3 = por %p66_p2, %p65_p1  ;;  %s55_s19 = ssub.s32 %s10057_s15, %s14135_s17 }
   0x8   : > { %p56_p5 = scmp.eq.s32.totalorder %s55_s19, 0  ;;  %p10118_p6 = por %p123_p4, %p65_p1 }
   0x9   : > { %p7674_p7 = scmp.ge.s32.totalorder %s10061_s16, 2 }
   0xa   : > { %s10123_s22 = scalar_select %p56_p5, %s10049_s13, %s58_s20  }
   0xb   : > { %152 = sbr.rel (%p7674_p7) target bundleno = 309 (0x135), region = 20 }
  0x10   : > { %155 = sbr.rel (!%p67_p3) target bundleno = 309 (0x135), region = 24  ;;  %s157_s23 = sand.u32 (%p67_p3), 1, %s10049_s13  }
  0x11   : > { %s7675_s24 = sshll.u32 (%p67_p3), %s10057_s15, 2  ;;  %s9692_s25 = smul.u32 (%p67_p3), 1152, %s157_s23 }
  0x12   : > { %s10131_s28 = scalar_lea.vmem (%p67_p3), %s13474_s1, %s7675_s24 }
  0x13   : > { %v178_v0 = vld [vmem:[%s10131_s28] sm:$0xf] (%p67_p3)  ;;  %v180_v1 = vld [vmem:[%s10131_s28 + $0x8] sm:$0xf] (%p67_p3)  ;;  %v182_v2 = vld [vmem:[%s10131_s28 + $0x10] sm:$0xf] (%p67_p3) }
  0x14   : > { %s10136_s29 = scalar_lea.vmem (%p67_p3), [#allocation2], %s9692_s25  ;;  %v184_v3 = vld [vmem:[%s10131_s28 + $0x18] sm:$0xf] (%p67_p3)  ;;  %v186_v4 = vld [vmem:[%s10131_s28 + $0x20] sm:$0xf] (%p67_p3) }
  0x15   : > { %179 = vst [vmem:[%s10136_s29] sm:$0xf] %v178_v0  ;;  %v188_v5 = vld [vmem:[%s10131_s28 + $0x28] sm:$0xf]  ;;  %v190_v6 = vld [vmem:[%s10131_s28 + $0x30] sm:$0xf] }
  0x16   : > { %181 = vst [vmem:[%s10136_s29 + $0x4] sm:$0xf] %v180_v1  ;;  %v192_v7 = vld [vmem:[%s10131_s28 + $0x38] sm:$0xf]  ;;  %v194_v8 = vld [vmem:[%s10131_s28 + $0x40] sm:$0xf] }
  0x17   : > { %183 = vst [vmem:[%s10136_s29 + $0x8] sm:$0xf] %v182_v2  ;;  %v196_v9 = vld [vmem:[%s10131_s28 + $0x48] sm:$0xf]  ;;  %v198_v10 = vld [vmem:[%s10131_s28 + $0x50] sm:$0xf] }
  0x18   : > { %185 = vst [vmem:[%s10136_s29 + $0xc] sm:$0xf] %v184_v3  ;;  %v200_v11 = vld [vmem:[%s10131_s28 + $0x58] sm:$0xf]  ;;  %v202_v12 = vld [vmem:[%s10131_s28 + $0x60] sm:$0xf] }
  0x19   : > { %187 = vst [vmem:[%s10136_s29 + $0x10] sm:$0xf] %v186_v4  ;;  %v204_v13 = vld [vmem:[%s10131_s28 + $0x68] sm:$0xf]  ;;  %v206_v14 = vld [vmem:[%s10131_s28 + $0x70] sm:$0xf] }
  0x1a   : > { %189 = vst [vmem:[%s10136_s29 + $0x14] sm:$0xf] %v188_v5  ;;  %v208_v15 = vld [vmem:[%s10131_s28 + $0x78] sm:$0xf]  ;;  %v210_v16 = vld [vmem:[%s10131_s28 + $0x80] sm:$0xf] }
  0x1b   : > { %191 = vst [vmem:[%s10136_s29 + $0x18] sm:$0xf] %v190_v6  ;;  %v212_v17 = vld [vmem:[%s10131_s28 + $0x88] sm:$0xf]  ;;  %v214_v18 = vld [vmem:[%s10131_s28 + $0x90] sm:$0xf] }
  0x1c   : > { %193 = vst [vmem:[%s10136_s29 + $0x1c] sm:$0xf] %v192_v7  ;;  %v216_v19 = vld [vmem:[%s10131_s28 + $0x98] sm:$0xf]  ;;  %v218_v20 = vld [vmem:[%s10131_s28 + $0xa0] sm:$0xf] }
  0x1d   : > { %195 = vst [vmem:[%s10136_s29 + $0x20] sm:$0xf] %v194_v8  ;;  %v220_v21 = vld [vmem:[%s10131_s28 + $0xa8] sm:$0xf]  ;;  %v222_v22 = vld [vmem:[%s10131_s28 + $0xb0] sm:$0xf] }
  0x1e   : > { %197 = vst [vmem:[%s10136_s29 + $0x24] sm:$0xf] %v196_v9  ;;  %v224_v23 = vld [vmem:[%s10131_s28 + $0xb8] sm:$0xf]  ;;  %v226_v24 = vld [vmem:[%s10131_s28 + $0xc0] sm:$0xf] }
  0x1f   : > { %199 = vst [vmem:[%s10136_s29 + $0x28] sm:$0xf] %v198_v10  ;;  %v228_v25 = vld [vmem:[%s10131_s28 + $0xc8] sm:$0xf]  ;;  %v230_v26 = vld [vmem:[%s10131_s28 + $0xd0] sm:$0xf] }
  0x20   : > { %201 = vst [vmem:[%s10136_s29 + $0x2c] sm:$0xf] %v200_v11  ;;  %v232_v27 = vld [vmem:[%s10131_s28 + $0xd8] sm:$0xf]  ;;  %v234_v28 = vld [vmem:[%s10131_s28 + $0xe0] sm:$0xf] }
  0x21   : > { %203 = vst [vmem:[%s10136_s29 + $0x30] sm:$0xf] %v202_v12  ;;  %v236_v29 = vld [vmem:[%s10131_s28 + $0xe8] sm:$0xf]  ;;  %v238_v30 = vld [vmem:[%s10131_s28 + $0xf0] sm:$0xf] }
  0x22   : > { %205 = vst [vmem:[%s10136_s29 + $0x34] sm:$0xf] %v204_v13  ;;  %v240_v31 = vld [vmem:[%s10131_s28 + $0xf8] sm:$0xf]  ;;  %v242_v32 = vld [vmem:[%s10131_s28 + $0x100] sm:$0xf] }
  0x23   : > { %207 = vst [vmem:[%s10136_s29 + $0x38] sm:$0xf] %v206_v14  ;;  %v244_v33 = vld [vmem:[%s10131_s28 + $0x108] sm:$0xf]  ;;  %v246_v34 = vld [vmem:[%s10131_s28 + $0x110] sm:$0xf] }
  0x24   : > { %209 = vst [vmem:[%s10136_s29 + $0x3c] sm:$0xf] %v208_v15  ;;  %v248_v35 = vld [vmem:[%s10131_s28 + $0x118] sm:$0xf]  ;;  %v250_v36 = vld [vmem:[%s10131_s28 + $0x120] sm:$0xf] }
  0x25   : > { %211 = vst [vmem:[%s10136_s29 + $0x40] sm:$0xf] %v210_v16  ;;  %v252_v37 = vld [vmem:[%s10131_s28 + $0x128] sm:$0xf]  ;;  %v254_v38 = vld [vmem:[%s10131_s28 + $0x130] sm:$0xf] }
  0x26   : > { %213 = vst [vmem:[%s10136_s29 + $0x44] sm:$0xf] %v212_v17  ;;  %v256_v39 = vld [vmem:[%s10131_s28 + $0x138] sm:$0xf]  ;;  %v258_v40 = vld [vmem:[%s10131_s28 + $0x140] sm:$0xf] }
  0x27   : > { %215 = vst [vmem:[%s10136_s29 + $0x48] sm:$0xf] %v214_v18  ;;  %v260_v41 = vld [vmem:[%s10131_s28 + $0x148] sm:$0xf]  ;;  %v262_v42 = vld [vmem:[%s10131_s28 + $0x150] sm:$0xf] }
  0x28   : > { %217 = vst [vmem:[%s10136_s29 + $0x4c] sm:$0xf] %v216_v19  ;;  %v264_v43 = vld [vmem:[%s10131_s28 + $0x158] sm:$0xf]  ;;  %v266_v44 = vld [vmem:[%s10131_s28 + $0x160] sm:$0xf] }
  0x29   : > { %219 = vst [vmem:[%s10136_s29 + $0x50] sm:$0xf] %v218_v20  ;;  %v268_v45 = vld [vmem:[%s10131_s28 + $0x168] sm:$0xf]  ;;  %v270_v46 = vld [vmem:[%s10131_s28 + $0x170] sm:$0xf] }
  0x2a   : > { %221 = vst [vmem:[%s10136_s29 + $0x54] sm:$0xf] %v220_v21  ;;  %v272_v47 = vld [vmem:[%s10131_s28 + $0x178] sm:$0xf]  ;;  %v274_v48 = vld [vmem:[%s10131_s28 + $0x180] sm:$0xf] }
  0x2b   : > { %223 = vst [vmem:[%s10136_s29 + $0x58] sm:$0xf] %v222_v22  ;;  %v276_v49 = vld [vmem:[%s10131_s28 + $0x188] sm:$0xf]  ;;  %v278_v50 = vld [vmem:[%s10131_s28 + $0x190] sm:$0xf] }
  0x2c   : > { %225 = vst [vmem:[%s10136_s29 + $0x5c] sm:$0xf] %v224_v23  ;;  %v280_v51 = vld [vmem:[%s10131_s28 + $0x198] sm:$0xf]  ;;  %v282_v52 = vld [vmem:[%s10131_s28 + $0x1a0] sm:$0xf] }
  0x2d   : > { %227 = vst [vmem:[%s10136_s29 + $0x60] sm:$0xf] %v226_v24  ;;  %v284_v53 = vld [vmem:[%s10131_s28 + $0x1a8] sm:$0xf]  ;;  %v286_v54 = vld [vmem:[%s10131_s28 + $0x1b0] sm:$0xf] }
  0x2e   : > { %229 = vst [vmem:[%s10136_s29 + $0x64] sm:$0xf] %v228_v25  ;;  %v288_v55 = vld [vmem:[%s10131_s28 + $0x1b8] sm:$0xf]  ;;  %v290_v56 = vld [vmem:[%s10131_s28 + $0x1c0] sm:$0xf] }
  0x2f   : > { %231 = vst [vmem:[%s10136_s29 + $0x68] sm:$0xf] %v230_v26  ;;  %v292_v57 = vld [vmem:[%s10131_s28 + $0x1c8] sm:$0xf]  ;;  %v294_v58 = vld [vmem:[%s10131_s28 + $0x1d0] sm:$0xf] }
  0x30   : > { %233 = vst [vmem:[%s10136_s29 + $0x6c] sm:$0xf] %v232_v27  ;;  %v296_v59 = vld [vmem:[%s10131_s28 + $0x1d8] sm:$0xf]  ;;  %v298_v60 = vld [vmem:[%s10131_s28 + $0x1e0] sm:$0xf] }
  0x31   : > { %235 = vst [vmem:[%s10136_s29 + $0x70] sm:$0xf] %v234_v28  ;;  %v300_v61 = vld [vmem:[%s10131_s28 + $0x1e8] sm:$0xf]  ;;  %v302_v62 = vld [vmem:[%s10131_s28 + $0x1f0] sm:$0xf] }
  0x32   : > { %237 = vst [vmem:[%s10136_s29 + $0x74] sm:$0xf] %v236_v29  ;;  %v304_v63 = vld [vmem:[%s10131_s28 + $0x1f8] sm:$0xf]  ;;  %v306_v0 = vld [vmem:[%s10131_s28 + $0x200] sm:$0xf] }
  0x33   : > { %239 = vst [vmem:[%s10136_s29 + $0x78] sm:$0xf] %v238_v30  ;;  %v308_v1 = vld [vmem:[%s10131_s28 + $0x208] sm:$0xf]  ;;  %v310_v2 = vld [vmem:[%s10131_s28 + $0x210] sm:$0xf] }
  0x34   : > { %241 = vst [vmem:[%s10136_s29 + $0x7c] sm:$0xf] %v240_v31  ;;  %v312_v3 = vld [vmem:[%s10131_s28 + $0x218] sm:$0xf]  ;;  %v314_v4 = vld [vmem:[%s10131_s28 + $0x220] sm:$0xf] }
  0x35   : > { %243 = vst [vmem:[%s10136_s29 + $0x80] sm:$0xf] %v242_v32  ;;  %v316_v5 = vld [vmem:[%s10131_s28 + $0x228] sm:$0xf]  ;;  %v318_v6 = vld [vmem:[%s10131_s28 + $0x230] sm:$0xf] }
  0x36   : > { %245 = vst [vmem:[%s10136_s29 + $0x84] sm:$0xf] %v244_v33  ;;  %v320_v7 = vld [vmem:[%s10131_s28 + $0x238] sm:$0xf]  ;;  %v322_v8 = vld [vmem:[%s10131_s28 + $0x240] sm:$0xf] }
  0x37   : > { %247 = vst [vmem:[%s10136_s29 + $0x88] sm:$0xf] %v246_v34  ;;  %v324_v9 = vld [vmem:[%s10131_s28 + $0x248] sm:$0xf]  ;;  %v326_v10 = vld [vmem:[%s10131_s28 + $0x250] sm:$0xf] }
  0x38   : > { %249 = vst [vmem:[%s10136_s29 + $0x8c] sm:$0xf] %v248_v35  ;;  %v328_v11 = vld [vmem:[%s10131_s28 + $0x258] sm:$0xf]  ;;  %v330_v12 = vld [vmem:[%s10131_s28 + $0x260] sm:$0xf] }
  0x39   : > { %251 = vst [vmem:[%s10136_s29 + $0x90] sm:$0xf] %v250_v36  ;;  %v332_v13 = vld [vmem:[%s10131_s28 + $0x268] sm:$0xf]  ;;  %v334_v14 = vld [vmem:[%s10131_s28 + $0x270] sm:$0xf] }
  0x3a   : > { %253 = vst [vmem:[%s10136_s29 + $0x94] sm:$0xf] %v252_v37  ;;  %v336_v15 = vld [vmem:[%s10131_s28 + $0x278] sm:$0xf]  ;;  %v338_v16 = vld [vmem:[%s10131_s28 + $0x280] sm:$0xf] }
  0x3b   : > { %255 = vst [vmem:[%s10136_s29 + $0x98] sm:$0xf] %v254_v38  ;;  %v340_v17 = vld [vmem:[%s10131_s28 + $0x288] sm:$0xf]  ;;  %v342_v18 = vld [vmem:[%s10131_s28 + $0x290] sm:$0xf] }
  0x3c   : > { %257 = vst [vmem:[%s10136_s29 + $0x9c] sm:$0xf] %v256_v39  ;;  %v344_v19 = vld [vmem:[%s10131_s28 + $0x298] sm:$0xf]  ;;  %v346_v20 = vld [vmem:[%s10131_s28 + $0x2a0] sm:$0xf] }
  0x3d   : > { %259 = vst [vmem:[%s10136_s29 + $0xa0] sm:$0xf] %v258_v40  ;;  %v348_v21 = vld [vmem:[%s10131_s28 + $0x2a8] sm:$0xf]  ;;  %v350_v22 = vld [vmem:[%s10131_s28 + $0x2b0] sm:$0xf] }
  0x3e   : > { %261 = vst [vmem:[%s10136_s29 + $0xa4] sm:$0xf] %v260_v41  ;;  %v352_v23 = vld [vmem:[%s10131_s28 + $0x2b8] sm:$0xf]  ;;  %v354_v24 = vld [vmem:[%s10131_s28 + $0x2c0] sm:$0xf] }
  0x3f   : > { %263 = vst [vmem:[%s10136_s29 + $0xa8] sm:$0xf] %v262_v42  ;;  %v356_v25 = vld [vmem:[%s10131_s28 + $0x2c8] sm:$0xf]  ;;  %v358_v26 = vld [vmem:[%s10131_s28 + $0x2d0] sm:$0xf] }
  0x40   : > { %265 = vst [vmem:[%s10136_s29 + $0xac] sm:$0xf] %v264_v43  ;;  %v360_v27 = vld [vmem:[%s10131_s28 + $0x2d8] sm:$0xf]  ;;  %v362_v28 = vld [vmem:[%s10131_s28 + $0x2e0] sm:$0xf] }
  0x41   : > { %267 = vst [vmem:[%s10136_s29 + $0xb0] sm:$0xf] %v266_v44  ;;  %v364_v29 = vld [vmem:[%s10131_s28 + $0x2e8] sm:$0xf]  ;;  %v366_v30 = vld [vmem:[%s10131_s28 + $0x2f0] sm:$0xf] }
  0x42   : > { %269 = vst [vmem:[%s10136_s29 + $0xb4] sm:$0xf] %v268_v45  ;;  %v368_v31 = vld [vmem:[%s10131_s28 + $0x2f8] sm:$0xf]  ;;  %v370_v32 = vld [vmem:[%s10131_s28 + $0x300] sm:$0xf] }
  0x43   : > { %271 = vst [vmem:[%s10136_s29 + $0xb8] sm:$0xf] %v270_v46  ;;  %v372_v33 = vld [vmem:[%s10131_s28 + $0x308] sm:$0xf]  ;;  %v374_v34 = vld [vmem:[%s10131_s28 + $0x310] sm:$0xf] }
  0x44   : > { %273 = vst [vmem:[%s10136_s29 + $0xbc] sm:$0xf] %v272_v47  ;;  %v376_v35 = vld [vmem:[%s10131_s28 + $0x318] sm:$0xf]  ;;  %v378_v36 = vld [vmem:[%s10131_s28 + $0x320] sm:$0xf] }
  0x45   : > { %275 = vst [vmem:[%s10136_s29 + $0xc0] sm:$0xf] %v274_v48  ;;  %v380_v37 = vld [vmem:[%s10131_s28 + $0x328] sm:$0xf]  ;;  %v382_v38 = vld [vmem:[%s10131_s28 + $0x330] sm:$0xf] }
  0x46   : > { %277 = vst [vmem:[%s10136_s29 + $0xc4] sm:$0xf] %v276_v49  ;;  %v384_v39 = vld [vmem:[%s10131_s28 + $0x338] sm:$0xf]  ;;  %v386_v40 = vld [vmem:[%s10131_s28 + $0x340] sm:$0xf] }
  0x47   : > { %279 = vst [vmem:[%s10136_s29 + $0xc8] sm:$0xf] %v278_v50  ;;  %v388_v41 = vld [vmem:[%s10131_s28 + $0x348] sm:$0xf]  ;;  %v390_v42 = vld [vmem:[%s10131_s28 + $0x350] sm:$0xf] }
  0x48   : > { %281 = vst [vmem:[%s10136_s29 + $0xcc] sm:$0xf] %v280_v51  ;;  %v392_v43 = vld [vmem:[%s10131_s28 + $0x358] sm:$0xf]  ;;  %v394_v44 = vld [vmem:[%s10131_s28 + $0x360] sm:$0xf] }
  0x49   : > { %283 = vst [vmem:[%s10136_s29 + $0xd0] sm:$0xf] %v282_v52  ;;  %v396_v45 = vld [vmem:[%s10131_s28 + $0x368] sm:$0xf]  ;;  %v398_v46 = vld [vmem:[%s10131_s28 + $0x370] sm:$0xf] }
  0x4a   : > { %285 = vst [vmem:[%s10136_s29 + $0xd4] sm:$0xf] %v284_v53  ;;  %v400_v47 = vld [vmem:[%s10131_s28 + $0x378] sm:$0xf]  ;;  %v402_v48 = vld [vmem:[%s10131_s28 + $0x380] sm:$0xf] }
  0x4b   : > { %287 = vst [vmem:[%s10136_s29 + $0xd8] sm:$0xf] %v286_v54  ;;  %v404_v49 = vld [vmem:[%s10131_s28 + $0x388] sm:$0xf]  ;;  %v406_v50 = vld [vmem:[%s10131_s28 + $0x390] sm:$0xf] }
  0x4c   : > { %289 = vst [vmem:[%s10136_s29 + $0xdc] sm:$0xf] %v288_v55  ;;  %v408_v51 = vld [vmem:[%s10131_s28 + $0x398] sm:$0xf]  ;;  %v410_v52 = vld [vmem:[%s10131_s28 + $0x3a0] sm:$0xf] }
  0x4d   : > { %291 = vst [vmem:[%s10136_s29 + $0xe0] sm:$0xf] %v290_v56  ;;  %v412_v53 = vld [vmem:[%s10131_s28 + $0x3a8] sm:$0xf]  ;;  %v414_v54 = vld [vmem:[%s10131_s28 + $0x3b0] sm:$0xf] }
  0x4e   : > { %293 = vst [vmem:[%s10136_s29 + $0xe4] sm:$0xf] %v292_v57  ;;  %v416_v55 = vld [vmem:[%s10131_s28 + $0x3b8] sm:$0xf]  ;;  %v418_v56 = vld [vmem:[%s10131_s28 + $0x3c0] sm:$0xf] }
  0x4f   : > { %295 = vst [vmem:[%s10136_s29 + $0xe8] sm:$0xf] %v294_v58  ;;  %v420_v57 = vld [vmem:[%s10131_s28 + $0x3c8] sm:$0xf]  ;;  %v422_v58 = vld [vmem:[%s10131_s28 + $0x3d0] sm:$0xf] }
  0x50   : > { %297 = vst [vmem:[%s10136_s29 + $0xec] sm:$0xf] %v296_v59  ;;  %v424_v59 = vld [vmem:[%s10131_s28 + $0x3d8] sm:$0xf] }
  0x51   : > { %299 = vst [vmem:[%s10136_s29 + $0xf0] sm:$0xf] %v298_v60  ;;  %v426_v60 = vld [vmem:[%s10131_s28 + $0x3e0] sm:$0xf] }
  0x52   : > { %301 = vst [vmem:[%s10136_s29 + $0xf4] sm:$0xf] %v300_v61  ;;  %v428_v61 = vld [vmem:[%s10131_s28 + $0x3e8] sm:$0xf] }
  0x53   : > { %303 = vst [vmem:[%s10136_s29 + $0xf8] sm:$0xf] %v302_v62  ;;  %v430_v62 = vld [vmem:[%s10131_s28 + $0x3f0] sm:$0xf] }
  0x54   : > { %305 = vst [vmem:[%s10136_s29 + $0xfc] sm:$0xf] %v304_v63  ;;  %v432_v63 = vld [vmem:[%s10131_s28 + $0x3f8] sm:$0xf] }
  0x55   : > { %307 = vst [vmem:[%s10136_s29 + $0x100] sm:$0xf] %v306_v0  ;;  %v434_v0 = vld [vmem:[%s10131_s28 + $0x400] sm:$0xf] }
  0x56   : > { %309 = vst [vmem:[%s10136_s29 + $0x104] sm:$0xf] %v308_v1  ;;  %v436_v1 = vld [vmem:[%s10131_s28 + $0x408] sm:$0xf] }
  0x57   : > { %311 = vst [vmem:[%s10136_s29 + $0x108] sm:$0xf] %v310_v2  ;;  %v438_v2 = vld [vmem:[%s10131_s28 + $0x410] sm:$0xf] }
  0x58   : > { %313 = vst [vmem:[%s10136_s29 + $0x10c] sm:$0xf] %v312_v3  ;;  %v440_v3 = vld [vmem:[%s10131_s28 + $0x418] sm:$0xf] }
  0x59   : > { %315 = vst [vmem:[%s10136_s29 + $0x110] sm:$0xf] %v314_v4  ;;  %v442_v4 = vld [vmem:[%s10131_s28 + $0x420] sm:$0xf] }
  0x5a   : > { %317 = vst [vmem:[%s10136_s29 + $0x114] sm:$0xf] %v316_v5  ;;  %v444_v5 = vld [vmem:[%s10131_s28 + $0x428] sm:$0xf] }
  0x5b   : > { %319 = vst [vmem:[%s10136_s29 + $0x118] sm:$0xf] %v318_v6  ;;  %v446_v6 = vld [vmem:[%s10131_s28 + $0x430] sm:$0xf] }
  0x5c   : > { %321 = vst [vmem:[%s10136_s29 + $0x11c] sm:$0xf] %v320_v7  ;;  %v448_v7 = vld [vmem:[%s10131_s28 + $0x438] sm:$0xf] }
  0x5d   : > { %323 = vst [vmem:[%s10136_s29 + $0x120] sm:$0xf] %v322_v8  ;;  %v450_v8 = vld [vmem:[%s10131_s28 + $0x440] sm:$0xf] }
  0x5e   : > { %325 = vst [vmem:[%s10136_s29 + $0x124] sm:$0xf] %v324_v9  ;;  %v452_v9 = vld [vmem:[%s10131_s28 + $0x448] sm:$0xf] }
  0x5f   : > { %327 = vst [vmem:[%s10136_s29 + $0x128] sm:$0xf] %v326_v10  ;;  %v454_v10 = vld [vmem:[%s10131_s28 + $0x450] sm:$0xf] }
  0x60   : > { %329 = vst [vmem:[%s10136_s29 + $0x12c] sm:$0xf] %v328_v11  ;;  %v456_v11 = vld [vmem:[%s10131_s28 + $0x458] sm:$0xf] }
  0x61   : > { %331 = vst [vmem:[%s10136_s29 + $0x130] sm:$0xf] %v330_v12  ;;  %v458_v12 = vld [vmem:[%s10131_s28 + $0x460] sm:$0xf] }
  0x62   : > { %333 = vst [vmem:[%s10136_s29 + $0x134] sm:$0xf] %v332_v13  ;;  %v460_v13 = vld [vmem:[%s10131_s28 + $0x468] sm:$0xf] }
  0x63   : > { %335 = vst [vmem:[%s10136_s29 + $0x138] sm:$0xf] %v334_v14  ;;  %v462_v14 = vld [vmem:[%s10131_s28 + $0x470] sm:$0xf] }
  0x64   : > { %337 = vst [vmem:[%s10136_s29 + $0x13c] sm:$0xf] %v336_v15  ;;  %v464_v15 = vld [vmem:[%s10131_s28 + $0x478] sm:$0xf] }
  0x65   : > { %339 = vst [vmem:[%s10136_s29 + $0x140] sm:$0xf] %v338_v16  ;;  %v466_v16 = vld [vmem:[%s10131_s28 + $0x480] sm:$0xf] }
  0x66   : > { %341 = vst [vmem:[%s10136_s29 + $0x144] sm:$0xf] %v340_v17  ;;  %v468_v17 = vld [vmem:[%s10131_s28 + $0x488] sm:$0xf] }
  0x67   : > { %343 = vst [vmem:[%s10136_s29 + $0x148] sm:$0xf] %v342_v18  ;;  %v470_v18 = vld [vmem:[%s10131_s28 + $0x490] sm:$0xf] }
  0x68   : > { %345 = vst [vmem:[%s10136_s29 + $0x14c] sm:$0xf] %v344_v19  ;;  %v472_v19 = vld [vmem:[%s10131_s28 + $0x498] sm:$0xf] }
  0x69   : > { %347 = vst [vmem:[%s10136_s29 + $0x150] sm:$0xf] %v346_v20  ;;  %v474_v20 = vld [vmem:[%s10131_s28 + $0x4a0] sm:$0xf] }
  0x6a   : > { %349 = vst [vmem:[%s10136_s29 + $0x154] sm:$0xf] %v348_v21  ;;  %v476_v21 = vld [vmem:[%s10131_s28 + $0x4a8] sm:$0xf] }
  0x6b   : > { %351 = vst [vmem:[%s10136_s29 + $0x158] sm:$0xf] %v350_v22  ;;  %v478_v22 = vld [vmem:[%s10131_s28 + $0x4b0] sm:$0xf] }
  0x6c   : > { %353 = vst [vmem:[%s10136_s29 + $0x15c] sm:$0xf] %v352_v23  ;;  %v480_v23 = vld [vmem:[%s10131_s28 + $0x4b8] sm:$0xf] }
  0x6d   : > { %355 = vst [vmem:[%s10136_s29 + $0x160] sm:$0xf] %v354_v24  ;;  %v482_v24 = vld [vmem:[%s10131_s28 + $0x4c0] sm:$0xf] }
  0x6e   : > { %357 = vst [vmem:[%s10136_s29 + $0x164] sm:$0xf] %v356_v25  ;;  %v484_v25 = vld [vmem:[%s10131_s28 + $0x4c8] sm:$0xf] }
  0x6f   : > { %359 = vst [vmem:[%s10136_s29 + $0x168] sm:$0xf] %v358_v26  ;;  %v486_v26 = vld [vmem:[%s10131_s28 + $0x4d0] sm:$0xf] }
  0x70   : > { %361 = vst [vmem:[%s10136_s29 + $0x16c] sm:$0xf] %v360_v27  ;;  %v488_v27 = vld [vmem:[%s10131_s28 + $0x4d8] sm:$0xf] }
  0x71   : > { %363 = vst [vmem:[%s10136_s29 + $0x170] sm:$0xf] %v362_v28  ;;  %v490_v28 = vld [vmem:[%s10131_s28 + $0x4e0] sm:$0xf] }
  0x72   : > { %365 = vst [vmem:[%s10136_s29 + $0x174] sm:$0xf] %v364_v29  ;;  %v492_v29 = vld [vmem:[%s10131_s28 + $0x4e8] sm:$0xf] }
  0x73   : > { %367 = vst [vmem:[%s10136_s29 + $0x178] sm:$0xf] %v366_v30  ;;  %v494_v30 = vld [vmem:[%s10131_s28 + $0x4f0] sm:$0xf] }
  0x74   : > { %369 = vst [vmem:[%s10136_s29 + $0x17c] sm:$0xf] %v368_v31  ;;  %v496_v31 = vld [vmem:[%s10131_s28 + $0x4f8] sm:$0xf] }
  0x75   : > { %371 = vst [vmem:[%s10136_s29 + $0x180] sm:$0xf] %v370_v32  ;;  %v498_v32 = vld [vmem:[%s10131_s28 + $0x500] sm:$0xf] }
  0x76   : > { %373 = vst [vmem:[%s10136_s29 + $0x184] sm:$0xf] %v372_v33  ;;  %v500_v33 = vld [vmem:[%s10131_s28 + $0x508] sm:$0xf] }
  0x77   : > { %375 = vst [vmem:[%s10136_s29 + $0x188] sm:$0xf] %v374_v34  ;;  %v502_v34 = vld [vmem:[%s10131_s28 + $0x510] sm:$0xf] }
  0x78   : > { %377 = vst [vmem:[%s10136_s29 + $0x18c] sm:$0xf] %v376_v35  ;;  %v504_v35 = vld [vmem:[%s10131_s28 + $0x518] sm:$0xf] }
  0x79   : > { %379 = vst [vmem:[%s10136_s29 + $0x190] sm:$0xf] %v378_v36  ;;  %v506_v36 = vld [vmem:[%s10131_s28 + $0x520] sm:$0xf] }
  0x7a   : > { %381 = vst [vmem:[%s10136_s29 + $0x194] sm:$0xf] %v380_v37  ;;  %v508_v37 = vld [vmem:[%s10131_s28 + $0x528] sm:$0xf] }
  0x7b   : > { %383 = vst [vmem:[%s10136_s29 + $0x198] sm:$0xf] %v382_v38  ;;  %v510_v38 = vld [vmem:[%s10131_s28 + $0x530] sm:$0xf] }
  0x7c   : > { %385 = vst [vmem:[%s10136_s29 + $0x19c] sm:$0xf] %v384_v39  ;;  %v512_v39 = vld [vmem:[%s10131_s28 + $0x538] sm:$0xf] }
  0x7d   : > { %387 = vst [vmem:[%s10136_s29 + $0x1a0] sm:$0xf] %v386_v40  ;;  %v514_v40 = vld [vmem:[%s10131_s28 + $0x540] sm:$0xf] }
  0x7e   : > { %389 = vst [vmem:[%s10136_s29 + $0x1a4] sm:$0xf] %v388_v41  ;;  %v516_v41 = vld [vmem:[%s10131_s28 + $0x548] sm:$0xf] }
  0x7f   : > { %391 = vst [vmem:[%s10136_s29 + $0x1a8] sm:$0xf] %v390_v42  ;;  %v518_v42 = vld [vmem:[%s10131_s28 + $0x550] sm:$0xf] }
  0x80   : > { %393 = vst [vmem:[%s10136_s29 + $0x1ac] sm:$0xf] %v392_v43  ;;  %v520_v43 = vld [vmem:[%s10131_s28 + $0x558] sm:$0xf] }
  0x81   : > { %395 = vst [vmem:[%s10136_s29 + $0x1b0] sm:$0xf] %v394_v44  ;;  %v522_v44 = vld [vmem:[%s10131_s28 + $0x560] sm:$0xf] }
  0x82   : > { %397 = vst [vmem:[%s10136_s29 + $0x1b4] sm:$0xf] %v396_v45  ;;  %v524_v45 = vld [vmem:[%s10131_s28 + $0x568] sm:$0xf] }
  0x83   : > { %399 = vst [vmem:[%s10136_s29 + $0x1b8] sm:$0xf] %v398_v46  ;;  %v526_v46 = vld [vmem:[%s10131_s28 + $0x570] sm:$0xf] }
  0x84   : > { %401 = vst [vmem:[%s10136_s29 + $0x1bc] sm:$0xf] %v400_v47  ;;  %v528_v47 = vld [vmem:[%s10131_s28 + $0x578] sm:$0xf] }
  0x85   : > { %403 = vst [vmem:[%s10136_s29 + $0x1c0] sm:$0xf] %v402_v48  ;;  %v530_v48 = vld [vmem:[%s10131_s28 + $0x580] sm:$0xf] }
  0x86   : > { %405 = vst [vmem:[%s10136_s29 + $0x1c4] sm:$0xf] %v404_v49  ;;  %v532_v49 = vld [vmem:[%s10131_s28 + $0x588] sm:$0xf] }
  0x87   : > { %407 = vst [vmem:[%s10136_s29 + $0x1c8] sm:$0xf] %v406_v50  ;;  %v534_v50 = vld [vmem:[%s10131_s28 + $0x590] sm:$0xf] }
  0x88   : > { %409 = vst [vmem:[%s10136_s29 + $0x1cc] sm:$0xf] %v408_v51  ;;  %v536_v51 = vld [vmem:[%s10131_s28 + $0x598] sm:$0xf] }
  0x89   : > { %411 = vst [vmem:[%s10136_s29 + $0x1d0] sm:$0xf] %v410_v52  ;;  %v538_v52 = vld [vmem:[%s10131_s28 + $0x5a0] sm:$0xf] }
  0x8a   : > { %413 = vst [vmem:[%s10136_s29 + $0x1d4] sm:$0xf] %v412_v53  ;;  %v540_v53 = vld [vmem:[%s10131_s28 + $0x5a8] sm:$0xf] }
  0x8b   : > { %415 = vst [vmem:[%s10136_s29 + $0x1d8] sm:$0xf] %v414_v54  ;;  %v542_v54 = vld [vmem:[%s10131_s28 + $0x5b0] sm:$0xf] }
  0x8c   : > { %417 = vst [vmem:[%s10136_s29 + $0x1dc] sm:$0xf] %v416_v55  ;;  %v544_v55 = vld [vmem:[%s10131_s28 + $0x5b8] sm:$0xf] }
  0x8d   : > { %419 = vst [vmem:[%s10136_s29 + $0x1e0] sm:$0xf] %v418_v56  ;;  %v546_v56 = vld [vmem:[%s10131_s28 + $0x5c0] sm:$0xf] }
  0x8e   : > { %421 = vst [vmem:[%s10136_s29 + $0x1e4] sm:$0xf] %v420_v57  ;;  %v548_v57 = vld [vmem:[%s10131_s28 + $0x5c8] sm:$0xf] }
  0x8f   : > { %423 = vst [vmem:[%s10136_s29 + $0x1e8] sm:$0xf] %v422_v58  ;;  %v550_v58 = vld [vmem:[%s10131_s28 + $0x5d0] sm:$0xf] }
  0x90   : > { %425 = vst [vmem:[%s10136_s29 + $0x1ec] sm:$0xf] %v424_v59  ;;  %v552_v59 = vld [vmem:[%s10131_s28 + $0x5d8] sm:$0xf] }
  0x91   : > { %427 = vst [vmem:[%s10136_s29 + $0x1f0] sm:$0xf] %v426_v60  ;;  %v554_v60 = vld [vmem:[%s10131_s28 + $0x5e0] sm:$0xf] }
  0x92   : > { %429 = vst [vmem:[%s10136_s29 + $0x1f4] sm:$0xf] %v428_v61  ;;  %v556_v61 = vld [vmem:[%s10131_s28 + $0x5e8] sm:$0xf] }
  0x93   : > { %431 = vst [vmem:[%s10136_s29 + $0x1f8] sm:$0xf] %v430_v62  ;;  %v558_v62 = vld [vmem:[%s10131_s28 + $0x5f0] sm:$0xf] }
  0x94   : > { %433 = vst [vmem:[%s10136_s29 + $0x1fc] sm:$0xf] %v432_v63  ;;  %v560_v63 = vld [vmem:[%s10131_s28 + $0x5f8] sm:$0xf] }
  0x95   : > { %435 = vst [vmem:[%s10136_s29 + $0x200] sm:$0xf] %v434_v0  ;;  %v562_v0 = vld [vmem:[%s10131_s28 + $0x600] sm:$0xf] }
  0x96   : > { %437 = vst [vmem:[%s10136_s29 + $0x204] sm:$0xf] %v436_v1  ;;  %v564_v1 = vld [vmem:[%s10131_s28 + $0x608] sm:$0xf] }
  0x97   : > { %439 = vst [vmem:[%s10136_s29 + $0x208] sm:$0xf] %v438_v2  ;;  %v566_v2 = vld [vmem:[%s10131_s28 + $0x610] sm:$0xf] }
  0x98   : > { %441 = vst [vmem:[%s10136_s29 + $0x20c] sm:$0xf] %v440_v3  ;;  %v568_v3 = vld [vmem:[%s10131_s28 + $0x618] sm:$0xf] }
  0x99   : > { %443 = vst [vmem:[%s10136_s29 + $0x210] sm:$0xf] %v442_v4  ;;  %v570_v4 = vld [vmem:[%s10131_s28 + $0x620] sm:$0xf] }
  0x9a   : > { %445 = vst [vmem:[%s10136_s29 + $0x214] sm:$0xf] %v444_v5  ;;  %v572_v5 = vld [vmem:[%s10131_s28 + $0x628] sm:$0xf] }
  0x9b   : > { %447 = vst [vmem:[%s10136_s29 + $0x218] sm:$0xf] %v446_v6  ;;  %v574_v6 = vld [vmem:[%s10131_s28 + $0x630] sm:$0xf] }
  0x9c   : > { %449 = vst [vmem:[%s10136_s29 + $0x21c] sm:$0xf] %v448_v7  ;;  %v576_v7 = vld [vmem:[%s10131_s28 + $0x638] sm:$0xf] }
  0x9d   : > { %451 = vst [vmem:[%s10136_s29 + $0x220] sm:$0xf] %v450_v8  ;;  %v578_v8 = vld [vmem:[%s10131_s28 + $0x640] sm:$0xf] }
  0x9e   : > { %453 = vst [vmem:[%s10136_s29 + $0x224] sm:$0xf] %v452_v9  ;;  %v580_v9 = vld [vmem:[%s10131_s28 + $0x648] sm:$0xf] }
  0x9f   : > { %455 = vst [vmem:[%s10136_s29 + $0x228] sm:$0xf] %v454_v10  ;;  %v582_v10 = vld [vmem:[%s10131_s28 + $0x650] sm:$0xf] }
  0xa0   : > { %457 = vst [vmem:[%s10136_s29 + $0x22c] sm:$0xf] %v456_v11  ;;  %v584_v11 = vld [vmem:[%s10131_s28 + $0x658] sm:$0xf] }
  0xa1   : > { %459 = vst [vmem:[%s10136_s29 + $0x230] sm:$0xf] %v458_v12  ;;  %v586_v12 = vld [vmem:[%s10131_s28 + $0x660] sm:$0xf] }
  0xa2   : > { %461 = vst [vmem:[%s10136_s29 + $0x234] sm:$0xf] %v460_v13  ;;  %v588_v13 = vld [vmem:[%s10131_s28 + $0x668] sm:$0xf] }
  0xa3   : > { %463 = vst [vmem:[%s10136_s29 + $0x238] sm:$0xf] %v462_v14  ;;  %v590_v14 = vld [vmem:[%s10131_s28 + $0x670] sm:$0xf] }
  0xa4   : > { %465 = vst [vmem:[%s10136_s29 + $0x23c] sm:$0xf] %v464_v15  ;;  %v592_v15 = vld [vmem:[%s10131_s28 + $0x678] sm:$0xf] }
  0xa5   : > { %467 = vst [vmem:[%s10136_s29 + $0x240] sm:$0xf] %v466_v16  ;;  %v594_v16 = vld [vmem:[%s10131_s28 + $0x680] sm:$0xf] }
  0xa6   : > { %469 = vst [vmem:[%s10136_s29 + $0x244] sm:$0xf] %v468_v17  ;;  %v596_v17 = vld [vmem:[%s10131_s28 + $0x688] sm:$0xf] }
  0xa7   : > { %471 = vst [vmem:[%s10136_s29 + $0x248] sm:$0xf] %v470_v18  ;;  %v598_v18 = vld [vmem:[%s10131_s28 + $0x690] sm:$0xf] }
  0xa8   : > { %473 = vst [vmem:[%s10136_s29 + $0x24c] sm:$0xf] %v472_v19  ;;  %v600_v19 = vld [vmem:[%s10131_s28 + $0x698] sm:$0xf] }
  0xa9   : > { %475 = vst [vmem:[%s10136_s29 + $0x250] sm:$0xf] %v474_v20  ;;  %v602_v20 = vld [vmem:[%s10131_s28 + $0x6a0] sm:$0xf] }
  0xaa   : > { %477 = vst [vmem:[%s10136_s29 + $0x254] sm:$0xf] %v476_v21  ;;  %v604_v21 = vld [vmem:[%s10131_s28 + $0x6a8] sm:$0xf] }
  0xab   : > { %479 = vst [vmem:[%s10136_s29 + $0x258] sm:$0xf] %v478_v22  ;;  %v606_v22 = vld [vmem:[%s10131_s28 + $0x6b0] sm:$0xf] }
  0xac   : > { %481 = vst [vmem:[%s10136_s29 + $0x25c] sm:$0xf] %v480_v23  ;;  %v608_v23 = vld [vmem:[%s10131_s28 + $0x6b8] sm:$0xf] }
  0xad   : > { %483 = vst [vmem:[%s10136_s29 + $0x260] sm:$0xf] %v482_v24  ;;  %v610_v24 = vld [vmem:[%s10131_s28 + $0x6c0] sm:$0xf] }
  0xae   : > { %485 = vst [vmem:[%s10136_s29 + $0x264] sm:$0xf] %v484_v25  ;;  %v612_v25 = vld [vmem:[%s10131_s28 + $0x6c8] sm:$0xf] }
  0xaf   : > { %487 = vst [vmem:[%s10136_s29 + $0x268] sm:$0xf] %v486_v26  ;;  %v614_v26 = vld [vmem:[%s10131_s28 + $0x6d0] sm:$0xf] }
  0xb0   : > { %489 = vst [vmem:[%s10136_s29 + $0x26c] sm:$0xf] %v488_v27  ;;  %v616_v27 = vld [vmem:[%s10131_s28 + $0x6d8] sm:$0xf] }
  0xb1   : > { %491 = vst [vmem:[%s10136_s29 + $0x270] sm:$0xf] %v490_v28  ;;  %v618_v28 = vld [vmem:[%s10131_s28 + $0x6e0] sm:$0xf] }
  0xb2   : > { %493 = vst [vmem:[%s10136_s29 + $0x274] sm:$0xf] %v492_v29  ;;  %v620_v29 = vld [vmem:[%s10131_s28 + $0x6e8] sm:$0xf] }
  0xb3   : > { %495 = vst [vmem:[%s10136_s29 + $0x278] sm:$0xf] %v494_v30  ;;  %v622_v30 = vld [vmem:[%s10131_s28 + $0x6f0] sm:$0xf] }
  0xb4   : > { %497 = vst [vmem:[%s10136_s29 + $0x27c] sm:$0xf] %v496_v31  ;;  %v624_v31 = vld [vmem:[%s10131_s28 + $0x6f8] sm:$0xf] }
  0xb5   : > { %499 = vst [vmem:[%s10136_s29 + $0x280] sm:$0xf] %v498_v32  ;;  %v626_v32 = vld [vmem:[%s10131_s28 + $0x700] sm:$0xf] }
  0xb6   : > { %501 = vst [vmem:[%s10136_s29 + $0x284] sm:$0xf] %v500_v33  ;;  %v628_v33 = vld [vmem:[%s10131_s28 + $0x708] sm:$0xf] }
  0xb7   : > { %503 = vst [vmem:[%s10136_s29 + $0x288] sm:$0xf] %v502_v34  ;;  %v630_v34 = vld [vmem:[%s10131_s28 + $0x710] sm:$0xf] }
  0xb8   : > { %505 = vst [vmem:[%s10136_s29 + $0x28c] sm:$0xf] %v504_v35  ;;  %v632_v35 = vld [vmem:[%s10131_s28 + $0x718] sm:$0xf] }
  0xb9   : > { %507 = vst [vmem:[%s10136_s29 + $0x290] sm:$0xf] %v506_v36  ;;  %v634_v36 = vld [vmem:[%s10131_s28 + $0x720] sm:$0xf] }
  0xba   : > { %509 = vst [vmem:[%s10136_s29 + $0x294] sm:$0xf] %v508_v37  ;;  %v636_v37 = vld [vmem:[%s10131_s28 + $0x728] sm:$0xf] }
  0xbb   : > { %511 = vst [vmem:[%s10136_s29 + $0x298] sm:$0xf] %v510_v38  ;;  %v638_v38 = vld [vmem:[%s10131_s28 + $0x730] sm:$0xf] }
  0xbc   : > { %513 = vst [vmem:[%s10136_s29 + $0x29c] sm:$0xf] %v512_v39  ;;  %v640_v39 = vld [vmem:[%s10131_s28 + $0x738] sm:$0xf] }
  0xbd   : > { %515 = vst [vmem:[%s10136_s29 + $0x2a0] sm:$0xf] %v514_v40  ;;  %v642_v40 = vld [vmem:[%s10131_s28 + $0x740] sm:$0xf] }
  0xbe   : > { %517 = vst [vmem:[%s10136_s29 + $0x2a4] sm:$0xf] %v516_v41  ;;  %v644_v41 = vld [vmem:[%s10131_s28 + $0x748] sm:$0xf] }
  0xbf   : > { %519 = vst [vmem:[%s10136_s29 + $0x2a8] sm:$0xf] %v518_v42  ;;  %v646_v42 = vld [vmem:[%s10131_s28 + $0x750] sm:$0xf] }
  0xc0   : > { %521 = vst [vmem:[%s10136_s29 + $0x2ac] sm:$0xf] %v520_v43  ;;  %v648_v43 = vld [vmem:[%s10131_s28 + $0x758] sm:$0xf] }
  0xc1   : > { %523 = vst [vmem:[%s10136_s29 + $0x2b0] sm:$0xf] %v522_v44  ;;  %v650_v44 = vld [vmem:[%s10131_s28 + $0x760] sm:$0xf] }
  0xc2   : > { %525 = vst [vmem:[%s10136_s29 + $0x2b4] sm:$0xf] %v524_v45  ;;  %v652_v45 = vld [vmem:[%s10131_s28 + $0x768] sm:$0xf] }
  0xc3   : > { %527 = vst [vmem:[%s10136_s29 + $0x2b8] sm:$0xf] %v526_v46  ;;  %v654_v46 = vld [vmem:[%s10131_s28 + $0x770] sm:$0xf] }
  0xc4   : > { %529 = vst [vmem:[%s10136_s29 + $0x2bc] sm:$0xf] %v528_v47  ;;  %v656_v47 = vld [vmem:[%s10131_s28 + $0x778] sm:$0xf] }
  0xc5   : > { %531 = vst [vmem:[%s10136_s29 + $0x2c0] sm:$0xf] %v530_v48  ;;  %v658_v48 = vld [vmem:[%s10131_s28 + $0x780] sm:$0xf] }
  0xc6   : > { %533 = vst [vmem:[%s10136_s29 + $0x2c4] sm:$0xf] %v532_v49  ;;  %v660_v49 = vld [vmem:[%s10131_s28 + $0x788] sm:$0xf] }
  0xc7   : > { %535 = vst [vmem:[%s10136_s29 + $0x2c8] sm:$0xf] %v534_v50  ;;  %v662_v50 = vld [vmem:[%s10131_s28 + $0x790] sm:$0xf] }
  0xc8   : > { %537 = vst [vmem:[%s10136_s29 + $0x2cc] sm:$0xf] %v536_v51  ;;  %v664_v51 = vld [vmem:[%s10131_s28 + $0x798] sm:$0xf] }
  0xc9   : > { %539 = vst [vmem:[%s10136_s29 + $0x2d0] sm:$0xf] %v538_v52  ;;  %v666_v52 = vld [vmem:[%s10131_s28 + $0x7a0] sm:$0xf] }
  0xca   : > { %541 = vst [vmem:[%s10136_s29 + $0x2d4] sm:$0xf] %v540_v53  ;;  %v668_v53 = vld [vmem:[%s10131_s28 + $0x7a8] sm:$0xf] }
  0xcb   : > { %543 = vst [vmem:[%s10136_s29 + $0x2d8] sm:$0xf] %v542_v54  ;;  %v670_v54 = vld [vmem:[%s10131_s28 + $0x7b0] sm:$0xf] }
  0xcc   : > { %545 = vst [vmem:[%s10136_s29 + $0x2dc] sm:$0xf] %v544_v55  ;;  %v672_v55 = vld [vmem:[%s10131_s28 + $0x7b8] sm:$0xf] }
  0xcd   : > { %547 = vst [vmem:[%s10136_s29 + $0x2e0] sm:$0xf] %v546_v56  ;;  %v674_v56 = vld [vmem:[%s10131_s28 + $0x7c0] sm:$0xf] }
  0xce   : > { %549 = vst [vmem:[%s10136_s29 + $0x2e4] sm:$0xf] %v548_v57  ;;  %v676_v57 = vld [vmem:[%s10131_s28 + $0x7c8] sm:$0xf] }
  0xcf   : > { %551 = vst [vmem:[%s10136_s29 + $0x2e8] sm:$0xf] %v550_v58  ;;  %v678_v58 = vld [vmem:[%s10131_s28 + $0x7d0] sm:$0xf] }
  0xd0   : > { %553 = vst [vmem:[%s10136_s29 + $0x2ec] sm:$0xf] %v552_v59  ;;  %v680_v59 = vld [vmem:[%s10131_s28 + $0x7d8] sm:$0xf] }
  0xd1   : > { %555 = vst [vmem:[%s10136_s29 + $0x2f0] sm:$0xf] %v554_v60  ;;  %v682_v60 = vld [vmem:[%s10131_s28 + $0x7e0] sm:$0xf] }
  0xd2   : > { %557 = vst [vmem:[%s10136_s29 + $0x2f4] sm:$0xf] %v556_v61  ;;  %v684_v61 = vld [vmem:[%s10131_s28 + $0x7e8] sm:$0xf] }
  0xd3   : > { %559 = vst [vmem:[%s10136_s29 + $0x2f8] sm:$0xf] %v558_v62  ;;  %v686_v62 = vld [vmem:[%s10131_s28 + $0x7f0] sm:$0xf] }
  0xd4   : > { %561 = vst [vmem:[%s10136_s29 + $0x2fc] sm:$0xf] %v560_v63  ;;  %v688_v63 = vld [vmem:[%s10131_s28 + $0x7f8] sm:$0xf] }
  0xd5   : > { %563 = vst [vmem:[%s10136_s29 + $0x300] sm:$0xf] %v562_v0  ;;  %v690_v0 = vld [vmem:[%s10131_s28 + $0x800] sm:$0xf] }
  0xd6   : > { %565 = vst [vmem:[%s10136_s29 + $0x304] sm:$0xf] %v564_v1  ;;  %v692_v1 = vld [vmem:[%s10131_s28 + $0x808] sm:$0xf] }
  0xd7   : > { %567 = vst [vmem:[%s10136_s29 + $0x308] sm:$0xf] %v566_v2  ;;  %v694_v2 = vld [vmem:[%s10131_s28 + $0x810] sm:$0xf] }
  0xd8   : > { %569 = vst [vmem:[%s10136_s29 + $0x30c] sm:$0xf] %v568_v3  ;;  %v696_v3 = vld [vmem:[%s10131_s28 + $0x818] sm:$0xf] }
  0xd9   : > { %571 = vst [vmem:[%s10136_s29 + $0x310] sm:$0xf] %v570_v4  ;;  %v698_v4 = vld [vmem:[%s10131_s28 + $0x820] sm:$0xf] }
  0xda   : > { %573 = vst [vmem:[%s10136_s29 + $0x314] sm:$0xf] %v572_v5  ;;  %v700_v5 = vld [vmem:[%s10131_s28 + $0x828] sm:$0xf] }
  0xdb   : > { %575 = vst [vmem:[%s10136_s29 + $0x318] sm:$0xf] %v574_v6  ;;  %v702_v6 = vld [vmem:[%s10131_s28 + $0x830] sm:$0xf] }
  0xdc   : > { %577 = vst [vmem:[%s10136_s29 + $0x31c] sm:$0xf] %v576_v7  ;;  %v704_v7 = vld [vmem:[%s10131_s28 + $0x838] sm:$0xf] }
  0xdd   : > { %579 = vst [vmem:[%s10136_s29 + $0x320] sm:$0xf] %v578_v8  ;;  %v706_v8 = vld [vmem:[%s10131_s28 + $0x840] sm:$0xf] }
  0xde   : > { %581 = vst [vmem:[%s10136_s29 + $0x324] sm:$0xf] %v580_v9  ;;  %v708_v9 = vld [vmem:[%s10131_s28 + $0x848] sm:$0xf] }
  0xdf   : > { %583 = vst [vmem:[%s10136_s29 + $0x328] sm:$0xf] %v582_v10  ;;  %v710_v10 = vld [vmem:[%s10131_s28 + $0x850] sm:$0xf] }
  0xe0   : > { %585 = vst [vmem:[%s10136_s29 + $0x32c] sm:$0xf] %v584_v11  ;;  %v712_v11 = vld [vmem:[%s10131_s28 + $0x858] sm:$0xf] }
  0xe1   : > { %587 = vst [vmem:[%s10136_s29 + $0x330] sm:$0xf] %v586_v12  ;;  %v714_v12 = vld [vmem:[%s10131_s28 + $0x860] sm:$0xf] }
  0xe2   : > { %589 = vst [vmem:[%s10136_s29 + $0x334] sm:$0xf] %v588_v13  ;;  %v716_v13 = vld [vmem:[%s10131_s28 + $0x868] sm:$0xf] }
  0xe3   : > { %591 = vst [vmem:[%s10136_s29 + $0x338] sm:$0xf] %v590_v14  ;;  %v718_v14 = vld [vmem:[%s10131_s28 + $0x870] sm:$0xf] }
  0xe4   : > { %593 = vst [vmem:[%s10136_s29 + $0x33c] sm:$0xf] %v592_v15  ;;  %v720_v15 = vld [vmem:[%s10131_s28 + $0x878] sm:$0xf] }
  0xe5   : > { %595 = vst [vmem:[%s10136_s29 + $0x340] sm:$0xf] %v594_v16  ;;  %v722_v16 = vld [vmem:[%s10131_s28 + $0x880] sm:$0xf] }
  0xe6   : > { %597 = vst [vmem:[%s10136_s29 + $0x344] sm:$0xf] %v596_v17  ;;  %v724_v17 = vld [vmem:[%s10131_s28 + $0x888] sm:$0xf] }
  0xe7   : > { %599 = vst [vmem:[%s10136_s29 + $0x348] sm:$0xf] %v598_v18  ;;  %v726_v18 = vld [vmem:[%s10131_s28 + $0x890] sm:$0xf] }
  0xe8   : > { %601 = vst [vmem:[%s10136_s29 + $0x34c] sm:$0xf] %v600_v19  ;;  %v728_v19 = vld [vmem:[%s10131_s28 + $0x898] sm:$0xf] }
  0xe9   : > { %603 = vst [vmem:[%s10136_s29 + $0x350] sm:$0xf] %v602_v20  ;;  %v730_v20 = vld [vmem:[%s10131_s28 + $0x8a0] sm:$0xf] }
  0xea   : > { %605 = vst [vmem:[%s10136_s29 + $0x354] sm:$0xf] %v604_v21  ;;  %v732_v21 = vld [vmem:[%s10131_s28 + $0x8a8] sm:$0xf] }
  0xeb   : > { %607 = vst [vmem:[%s10136_s29 + $0x358] sm:$0xf] %v606_v22  ;;  %v734_v22 = vld [vmem:[%s10131_s28 + $0x8b0] sm:$0xf] }
  0xec   : > { %609 = vst [vmem:[%s10136_s29 + $0x35c] sm:$0xf] %v608_v23  ;;  %v736_v23 = vld [vmem:[%s10131_s28 + $0x8b8] sm:$0xf] }
  0xed   : > { %611 = vst [vmem:[%s10136_s29 + $0x360] sm:$0xf] %v610_v24  ;;  %v738_v24 = vld [vmem:[%s10131_s28 + $0x8c0] sm:$0xf] }
  0xee   : > { %613 = vst [vmem:[%s10136_s29 + $0x364] sm:$0xf] %v612_v25  ;;  %v740_v25 = vld [vmem:[%s10131_s28 + $0x8c8] sm:$0xf] }
  0xef   : > { %615 = vst [vmem:[%s10136_s29 + $0x368] sm:$0xf] %v614_v26  ;;  %v742_v26 = vld [vmem:[%s10131_s28 + $0x8d0] sm:$0xf] }
  0xf0   : > { %617 = vst [vmem:[%s10136_s29 + $0x36c] sm:$0xf] %v616_v27  ;;  %v744_v27 = vld [vmem:[%s10131_s28 + $0x8d8] sm:$0xf] }
  0xf1   : > { %619 = vst [vmem:[%s10136_s29 + $0x370] sm:$0xf] %v618_v28  ;;  %v746_v28 = vld [vmem:[%s10131_s28 + $0x8e0] sm:$0xf] }
  0xf2   : > { %621 = vst [vmem:[%s10136_s29 + $0x374] sm:$0xf] %v620_v29  ;;  %v748_v29 = vld [vmem:[%s10131_s28 + $0x8e8] sm:$0xf] }
  0xf3   : > { %623 = vst [vmem:[%s10136_s29 + $0x378] sm:$0xf] %v622_v30  ;;  %v750_v30 = vld [vmem:[%s10131_s28 + $0x8f0] sm:$0xf] }
  0xf4   : > { %625 = vst [vmem:[%s10136_s29 + $0x37c] sm:$0xf] %v624_v31  ;;  %v752_v31 = vld [vmem:[%s10131_s28 + $0x8f8] sm:$0xf] }
  0xf5   : > { %627 = vst [vmem:[%s10136_s29 + $0x380] sm:$0xf] %v626_v32 }
  0xf6   : > { %629 = vst [vmem:[%s10136_s29 + $0x384] sm:$0xf] %v628_v33 }
  0xf7   : > { %631 = vst [vmem:[%s10136_s29 + $0x388] sm:$0xf] %v630_v34 }
  0xf8   : > { %633 = vst [vmem:[%s10136_s29 + $0x38c] sm:$0xf] %v632_v35 }
  0xf9   : > { %635 = vst [vmem:[%s10136_s29 + $0x390] sm:$0xf] %v634_v36 }
  0xfa   : > { %637 = vst [vmem:[%s10136_s29 + $0x394] sm:$0xf] %v636_v37 }
  0xfb   : > { %639 = vst [vmem:[%s10136_s29 + $0x398] sm:$0xf] %v638_v38 }
  0xfc   : > { %641 = vst [vmem:[%s10136_s29 + $0x39c] sm:$0xf] %v640_v39 }
  0xfd   : > { %643 = vst [vmem:[%s10136_s29 + $0x3a0] sm:$0xf] %v642_v40 }
  0xfe   : > { %645 = vst [vmem:[%s10136_s29 + $0x3a4] sm:$0xf] %v644_v41 }
  0xff   : > { %647 = vst [vmem:[%s10136_s29 + $0x3a8] sm:$0xf] %v646_v42 }
 0x100   : > { %649 = vst [vmem:[%s10136_s29 + $0x3ac] sm:$0xf] %v648_v43 }
 0x101   : > { %651 = vst [vmem:[%s10136_s29 + $0x3b0] sm:$0xf] %v650_v44 }
 0x102   : > { %653 = vst [vmem:[%s10136_s29 + $0x3b4] sm:$0xf] %v652_v45 }
 0x103   : > { %655 = vst [vmem:[%s10136_s29 + $0x3b8] sm:$0xf] %v654_v46 }
 0x104   : > { %657 = vst [vmem:[%s10136_s29 + $0x3bc] sm:$0xf] %v656_v47 }
 0x105   : > { %659 = vst [vmem:[%s10136_s29 + $0x3c0] sm:$0xf] %v658_v48 }
 0x106   : > { %661 = vst [vmem:[%s10136_s29 + $0x3c4] sm:$0xf] %v660_v49 }
 0x107   : > { %663 = vst [vmem:[%s10136_s29 + $0x3c8] sm:$0xf] %v662_v50 }
 0x108   : > { %665 = vst [vmem:[%s10136_s29 + $0x3cc] sm:$0xf] %v664_v51 }
 0x109   : > { %667 = vst [vmem:[%s10136_s29 + $0x3d0] sm:$0xf] %v666_v52 }
 0x10a   : > { %669 = vst [vmem:[%s10136_s29 + $0x3d4] sm:$0xf] %v668_v53 }
 0x10b   : > { %671 = vst [vmem:[%s10136_s29 + $0x3d8] sm:$0xf] %v670_v54 }
 0x10c   : > { %673 = vst [vmem:[%s10136_s29 + $0x3dc] sm:$0xf] %v672_v55 }
 0x10d   : > { %675 = vst [vmem:[%s10136_s29 + $0x3e0] sm:$0xf] %v674_v56 }
 0x10e   : > { %677 = vst [vmem:[%s10136_s29 + $0x3e4] sm:$0xf] %v676_v57 }
 0x10f   : > { %679 = vst [vmem:[%s10136_s29 + $0x3e8] sm:$0xf] %v678_v58 }
 0x110   : > { %681 = vst [vmem:[%s10136_s29 + $0x3ec] sm:$0xf] %v680_v59 }
 0x111   : > { %683 = vst [vmem:[%s10136_s29 + $0x3f0] sm:$0xf] %v682_v60 }
 0x112   : > { %685 = vst [vmem:[%s10136_s29 + $0x3f4] sm:$0xf] %v684_v61 }
 0x113   : > { %687 = vst [vmem:[%s10136_s29 + $0x3f8] sm:$0xf] %v686_v62 }
 0x114   : > { %689 = vst [vmem:[%s10136_s29 + $0x3fc] sm:$0xf] %v688_v63 }
 0x115   : > { %691 = vst [vmem:[%s10136_s29 + $0x400] sm:$0xf] %v690_v0 }
 0x116   : > { %693 = vst [vmem:[%s10136_s29 + $0x404] sm:$0xf] %v692_v1 }
 0x117   : > { %695 = vst [vmem:[%s10136_s29 + $0x408] sm:$0xf] %v694_v2 }
 0x118   : > { %697 = vst [vmem:[%s10136_s29 + $0x40c] sm:$0xf] %v696_v3 }
 0x119   : > { %699 = vst [vmem:[%s10136_s29 + $0x410] sm:$0xf] %v698_v4 }
 0x11a   : > { %701 = vst [vmem:[%s10136_s29 + $0x414] sm:$0xf] %v700_v5 }
 0x11b   : > { %703 = vst [vmem:[%s10136_s29 + $0x418] sm:$0xf] %v702_v6 }
 0x11c   : > { %705 = vst [vmem:[%s10136_s29 + $0x41c] sm:$0xf] %v704_v7 }
 0x11d   : > { %707 = vst [vmem:[%s10136_s29 + $0x420] sm:$0xf] %v706_v8 }
 0x11e   : > { %709 = vst [vmem:[%s10136_s29 + $0x424] sm:$0xf] %v708_v9 }
 0x11f   : > { %711 = vst [vmem:[%s10136_s29 + $0x428] sm:$0xf] %v710_v10 }
 0x120   : > { %713 = vst [vmem:[%s10136_s29 + $0x42c] sm:$0xf] %v712_v11 }
 0x121   : > { %715 = vst [vmem:[%s10136_s29 + $0x430] sm:$0xf] %v714_v12 }
 0x122   : > { %717 = vst [vmem:[%s10136_s29 + $0x434] sm:$0xf] %v716_v13 }
 0x123   : > { %719 = vst [vmem:[%s10136_s29 + $0x438] sm:$0xf] %v718_v14 }
 0x124   : > { %721 = vst [vmem:[%s10136_s29 + $0x43c] sm:$0xf] %v720_v15 }
 0x125   : > { %723 = vst [vmem:[%s10136_s29 + $0x440] sm:$0xf] %v722_v16 }
 0x126   : > { %725 = vst [vmem:[%s10136_s29 + $0x444] sm:$0xf] %v724_v17 }
 0x127   : > { %727 = vst [vmem:[%s10136_s29 + $0x448] sm:$0xf] %v726_v18 }
 0x128   : > { %729 = vst [vmem:[%s10136_s29 + $0x44c] sm:$0xf] %v728_v19 }
 0x129   : > { %731 = vst [vmem:[%s10136_s29 + $0x450] sm:$0xf] %v730_v20 }
 0x12a   : > { %733 = vst [vmem:[%s10136_s29 + $0x454] sm:$0xf] %v732_v21 }
 0x12b   : > { %735 = vst [vmem:[%s10136_s29 + $0x458] sm:$0xf] %v734_v22 }
 0x12c   : > { %737 = vst [vmem:[%s10136_s29 + $0x45c] sm:$0xf] %v736_v23 }
 0x12d   : > { %739 = vst [vmem:[%s10136_s29 + $0x460] sm:$0xf] %v738_v24 }
 0x12e   : > { %741 = vst [vmem:[%s10136_s29 + $0x464] sm:$0xf] %v740_v25 }
 0x12f   : > { %743 = vst [vmem:[%s10136_s29 + $0x468] sm:$0xf] %v742_v26 }
 0x130   : > { %745 = vst [vmem:[%s10136_s29 + $0x46c] sm:$0xf] %v744_v27 }
 0x131   : > { %747 = vst [vmem:[%s10136_s29 + $0x470] sm:$0xf] %v746_v28 }
 0x132   : > { %749 = vst [vmem:[%s10136_s29 + $0x474] sm:$0xf] %v748_v29 }
 0x133   : > { %751 = vst [vmem:[%s10136_s29 + $0x478] sm:$0xf] %v750_v30 }
 0x134   : > { %753 = vst [vmem:[%s10136_s29 + $0x47c] sm:$0xf] %v752_v31 }
 0x135 PF: > { %p7676_p8 = scmp.ge.s32.totalorder %s10061_s16, 1  ;;  %p2536_p9 = scmp.lt.s32.totalorder %s10061_s16, 3 }
 0x137   : > { %p2537_p10 = pnand %p7676_p8, %p2536_p9 }
 0x139   : > { %2540 = sbr.rel (%p2537_p10) target bundleno = 1537 (0x601), region = 80 }
 0x13e   : > { %s2543_s30 = sand.u32 1, %s10045_s12   ;;  %v10719_v32 = vld [vmem:[%s13473_s0 + $0x2] sm:$0x3]  ;;  %v10724_v33 = vld [vmem:[%s13473_s0 + $0x12] sm:$0x3]  ;;  %p2576_p11 = scmp.lt.s32.totalorder %s10053_s14, 1 }
 0x13f   : > { %s9693_s4 = smul.u32 1152, %s2543_s30  ;;  %2717 = vst [vmem:[#allocation1] ss:$9 sm:$0xff] %v10719_v32  ;;  %v10809_v54 = vld [vmem:[%s13473_s0 + $0x22] sm:$0x3]  ;;  %s7677_s5 = sshll.u32 %s2543_s30, 2 }
 0x140   : > { %2720 = vst [vmem:[#allocation1 + $0x1] ss:$9 sm:$0xff] %v10724_v33  ;;  %v10814_v55 = vld [vmem:[%s13473_s0 + $0x32] sm:$0x3]  ;;  %v10819_v56 = vld [vmem:[%s13473_s0 + $0x42] sm:$0x3]  ;;  %s7526_s29 = scalar_lea.vmem (%p10118_p6), %s13476_s3, %s10053_s14 }
 0x141   : > { %s10726_s9 = scalar_lea.vmem [#allocation2], %s9693_s4  ;;  %v10824_v57 = vld [vmem:[%s13473_s0 + $0x52] sm:$0x3]  ;;  %2723 = vst [vmem:[#allocation1 + $0x2] ss:$9 sm:$0xff] %v10809_v54  ;;  %s12309_s12 = scalar_lea.vmem [#allocation3], %s7677_s5 }
 0x142   : > { %v10729_v34 = vld [vmem:[%s10726_s9 + $0xb8] sm:$0xff]  ;;  %v10745_v38 = vld [vmem:[%s10726_s9 + $0xb0] sm:$0xff]  ;;  %v10761_v42 = vld [vmem:[%s10726_s9 + $0xa8] sm:$0xff]  ;;  %2726 = vst [vmem:[#allocation1 + $0x3] ss:$9 sm:$0xff] %v10814_v55  ;;  %s2577_s28 = scalar_select %p2576_p11, %s10053_s14, 1 }
 0x143   : > { %v10732_v35 = vld [vmem:[%s10726_s9 + $0xf8] sm:$0xff]  ;;  %2833 = vmatpush.bf16.msra.mxu0 %v10729_v34  ;;  %v10748_v39 = vld [vmem:[%s10726_s9 + $0xf0] sm:$0xff]  ;;  %v10764_v43 = vld [vmem:[%s10726_s9 + $0xe8] sm:$0xff]  ;;  %2729 = vst [vmem:[#allocation1 + $0x4] ss:$9 sm:$0xff] %v10819_v56 }
 0x144   : > { %v10735_v36 = vld [vmem:[%s10726_s9 + $0x38] sm:$0xff]  ;;  %2847 = vmatpush.bf16.msra.mxu1 %v10732_v35  ;;  %v10753_v40 = vld [vmem:[%s10726_s9 + $0x30] sm:$0xff]  ;;  %v10769_v44 = vld [vmem:[%s10726_s9 + $0x28] sm:$0xff]  ;;  %2732 = vst [vmem:[#allocation1 + $0x5] ss:$9 sm:$0xff] %v10824_v57  ;;  %s11524_s20 = scalar_lea.vmem %s13475_s2, %s2577_s28 }
 0x145   : > { %v10739_v37 = vld [vmem:[%s10726_s9 + $0x78] sm:$0xff]  ;;  %2978 = vmatpush.bf16.msra.mxu2 %v10735_v36  ;;  %v10756_v41 = vld [vmem:[%s10726_s9 + $0x70] sm:$0xff]  ;;  %v10772_v45 = vld [vmem:[%s10726_s9 + $0x68] sm:$0xff] }
 0x146   : > { %2992 = vmatpush.bf16.msra.mxu3 %v10739_v37  ;;  %v10777_v46 = vld [vmem:[%s10726_s9 + $0xa0] sm:$0xff]  ;;  %v10793_v50 = vld [vmem:[%s10726_s9 + $0x98] sm:$0xff]  ;;  %v10830_v58 = vld [vmem:[%s10726_s9 + $0x90] sm:$0xff] }
 0x147   : > { %2834 = vmatpush.bf16.msra.mxu0 %v10745_v38  ;;  %v10780_v47 = vld [vmem:[%s10726_s9 + $0xe0] sm:$0xff]  ;;  %v10796_v51 = vld [vmem:[%s10726_s9 + $0xd8] sm:$0xff]  ;;  %v10833_v59 = vld [vmem:[%s10726_s9 + $0xd0] sm:$0xff] }
 0x148   : > { %2848 = vmatpush.bf16.msra.mxu1 %v10748_v39  ;;  %v10785_v48 = vld [vmem:[%s10726_s9 + $0x20] sm:$0xff]  ;;  %v10801_v52 = vld [vmem:[%s10726_s9 + $0x18] sm:$0xff]  ;;  %v10839_v60 = vld [vmem:[%s10726_s9 + $0x10] sm:$0xff] }
 0x149   : > { %2979 = vmatpush.bf16.msra.mxu2 %v10753_v40  ;;  %v10788_v49 = vld [vmem:[%s10726_s9 + $0x60] sm:$0xff]  ;;  %13702 = vst [vmem:[#allocation4_spill] sm:$0xff] %v10801_v52  ;;  %v10804_v53 = vld [vmem:[%s10726_s9 + $0x58] sm:$0xff]  ;;  %v10842_v61 = vld [vmem:[%s10726_s9 + $0x50] sm:$0xff] }
 0x14a   : > { %2993 = vmatpush.bf16.msra.mxu3 %v10756_v41  ;;  %13703 = vst [vmem:[#allocation5_spill] sm:$0xff] %v10804_v53  ;;  %v10849_v62 = vld [vmem:[%s10726_s9 + $0x88] sm:$0xff]  ;;  %v10863_v2 = vld [vmem:[%s10726_s9 + $0x80] sm:$0xff]  ;;  %v2580_v4 = vld [vmem:[%s13473_s0] sm:$0x3] }
 0x14b   : > { %2835 = vmatpush.bf16.msra.mxu0 %v10761_v42  ;;  %13704 = vst [vmem:[#allocation6_spill] sm:$0xff] %v10839_v60  ;;  %v10852_v63 = vld [vmem:[%s10726_s9 + $0xc8] sm:$0xff]  ;;  %v10866_v3 = vld [vmem:[%s10726_s9 + $0xc0] sm:$0xff]  ;;  %v2733_v8 = vld [vmem:[#allocation1] sm:$0xff] }
 0x14c   : > { %2849 = vmatpush.bf16.msra.mxu1 %v10764_v43  ;;  %13705 = vst [vmem:[#allocation7_spill] sm:$0xff] %v10842_v61  ;;  %v10857_v0 = vld [vmem:[%s10726_s9 + $0x8] sm:$0xff]  ;;  %v10874_v5 = vld [vmem:[%s10726_s9] sm:$0xff]  ;;  %v10889_v10 = vld [vmem:[%s13473_s0 + $0x20] sm:$0x3] }
 0x14d   : > { %2980 = vmatpush.bf16.msra.mxu2 %v10769_v44  ;;  %13706 = vst [vmem:[#allocation8_spill] sm:$0xff] %v10857_v0  ;;  %v10860_v1 = vld [vmem:[%s10726_s9 + $0x48] sm:$0xff]  ;;  %v10877_v6 = vld [vmem:[%s10726_s9 + $0x40] sm:$0xff]  ;;  %v10892_v11 = vld [vmem:[%s10726_s9 + $0x138] sm:$0xff] }
 0x14e   : > { %2994 = vmatpush.bf16.msra.mxu3 %v10772_v45  ;;  %13707 = vst [vmem:[#allocation9_spill] sm:$0xff] %v10860_v1  ;;  %v10882_v7 = vld [vmem:[%s13473_s0 + $0x10] sm:$0x3]  ;;  %v10895_v12 = vld [vmem:[%s10726_s9 + $0x178] sm:$0xff]  ;;  %v10928_v18 = vld [vmem:[%s10726_s9 + $0x130] sm:$0xff] }
 0x14f   : > { %2836 = vmatpush.bf16.msra.mxu0 %v10777_v46  ;;  %13708 = vst [vmem:[#allocation10_spill] sm:$0xff] %v10874_v5  ;;  %v2734_v9 = vld [vmem:[#allocation1 + $0x9] sm:$0xff]  ;;  %v10903_v14 = vld [vmem:[%s10726_s9 + $0x1b8] sm:$0xff]  ;;  %v10931_v19 = vld [vmem:[%s10726_s9 + $0x170] sm:$0xff] }
 0x150   : > { %2850 = vmatpush.bf16.msra.mxu1 %v10780_v47  ;;  %13709 = vst [vmem:[#allocation11_spill] sm:$0xff] %v10877_v6  ;;  %v10900_v13 = vld [vmem:[%s13473_s0 + $0x30] sm:$0x3]  ;;  %v10906_v15 = vld [vmem:[%s10726_s9 + $0x1f8] sm:$0xff]  ;;  %v10937_v20 = vld [vmem:[%s10726_s9 + $0x1b0] sm:$0xff] }
 0x151   : > { %2981 = vmatpush.bf16.msra.mxu2 %v10785_v48  ;;  %2862 = vst [vmem:[#allocation1] ss:$9 sm:$0xff] %v2580_v4  ;;  %v10911_v16 = vld [vmem:[%s13473_s0 + $0x40] sm:$0x3]  ;;  %v10919_v17 = vld [vmem:[%s13473_s0 + $0x50] sm:$0x3] }
 0x152   : > { %2995 = vmatpush.bf16.msra.mxu3 %v10788_v49  ;;  %13710 = vst [vmem:[#allocation12_spill] sm:$0xff] %v10903_v14  ;;  %v10940_v21 = vld [vmem:[%s10726_s9 + $0x1f0] sm:$0xff]  ;;  %v10946_v22 = vld [vmem:[%s10726_s9 + $0x128] sm:$0xff]  ;;  %v10962_v26 = vld [vmem:[%s13473_s0 + $0x4] sm:$0x3] }
 0x153   : > { %2837 = vmatpush.bf16.msra.mxu0 %v10793_v50  ;;  %13711 = vst [vmem:[#allocation13_spill] sm:$0xff] %v10906_v15  ;;  %v10949_v23 = vld [vmem:[%s10726_s9 + $0x168] sm:$0xff]  ;;  %v10965_v27 = vld [vmem:[%s10726_s9 + $0x120] sm:$0xff]  ;;  %v10980_v4 = vld [vmem:[%s13473_s0 + $0x24] sm:$0x3] }
 0x154   : > { %2851 = vmatpush.bf16.msra.mxu1 %v10796_v51  ;;  %2865 = vst [vmem:[#allocation1 + $0x1] ss:$9 sm:$0xff] %v10882_v7  ;;  %v10954_v24 = vld [vmem:[%s10726_s9 + $0x1a8] sm:$0xff]  ;;  %v10968_v28 = vld [vmem:[%s10726_s9 + $0x160] sm:$0xff] }
 0x155   : > { %2982 = vmatpush.bf16.msra.mxu2 %v10801_v52  ;;  %2868 = vst [vmem:[#allocation1 + $0x2] ss:$9 sm:$0xff] %v10889_v10  ;;  %v10957_v25 = vld [vmem:[%s10726_s9 + $0x1e8] sm:$0xff] }
 0x156   : > { %2996 = vmatpush.bf16.msra.mxu3 %v10804_v53  ;;  %2871 = vst [vmem:[#allocation1 + $0x3] ss:$9 sm:$0xff] %v10900_v13  ;;  %v10973_v29 = vld [vmem:[%s13473_s0 + $0x14] sm:$0x3]  ;;  %v11240_v53 = vld [vmem:[%s10726_s9 + $0x2c0] sm:$0xff] }
 0x157   : > { %2838 = vmatpush.bf16.msra.mxu0 %v10830_v58  ;;  %2874 = vst [vmem:[#allocation1 + $0x4] ss:$9 sm:$0xff] %v10911_v16 }
 0x158   : > { %2852 = vmatpush.bf16.msra.mxu1 %v10833_v59  ;;  %13712 = vst [vmem:[#allocation14_spill] sm:$0xff] %v10937_v20 }
 0x159   : > { %2983 = vmatpush.bf16.msra.mxu2 %v10839_v60  ;;  %13713 = vst [vmem:[#allocation15_spill] sm:$0xff] %v10940_v21  ;;  %v11092_v60 = vld [vmem:[%s10726_s9 + $0x2b8] sm:$0xff] }
 0x15a   : > { %2997 = vmatpush.bf16.msra.mxu3 %v10842_v61  ;;  %2877 = vst [vmem:[#allocation1 + $0x5] ss:$9 sm:$0xff] %v10919_v17  ;;  %v11088_v61 = vld [vmem:[%s10726_s9 + $0x278] sm:$0xff] }
 0x15b   : > { %2839 = vmatpush.bf16.msra.mxu0 %v10849_v62  ;;  %13714 = vst [vmem:[#allocation16_spill] sm:$0xff] %v10954_v24 }
 0x15c   : > { %2853 = vmatpush.bf16.msra.mxu1 %v10852_v63  ;;  %13715 = vst [vmem:[#allocation17_spill] sm:$0xff] %v10957_v25 }
 0x15d   : > { %2984 = vmatpush.bf16.msra.mxu2 %v10857_v0  ;;  %13716 = vst [vmem:[#allocation18_spill] sm:$0xff] %v10962_v26  ;;  %v11052_v0 = vld [vmem:[%s10726_s9 + $0x188] sm:$0xff] }
 0x15e   : > { %2998 = vmatpush.bf16.msra.mxu3 %v10860_v1  ;;  %13717 = vst [vmem:[#allocation19_spill] sm:$0xff] %v10968_v28  ;;  %v11049_v1 = vld [vmem:[%s10726_s9 + $0x148] sm:$0xff] }
 0x15f   : > { %2840 = vmatpush.bf16.msra.mxu0 %v10863_v2  ;;  %13729 = vst [vmem:[#allocation31_spill] sm:$0xff] %v11049_v1 }
 0x160   : > { %2854 = vmatpush.bf16.msra.mxu1 %v10866_v3  ;;  %13730 = vst [vmem:[#allocation32_spill] sm:$0xff] %v11052_v0 }
 0x161   : > { %2985 = vmatpush.bf16.msra.mxu2 %v10874_v5  ;;  %v2878_v30 = vld [vmem:[#allocation1] sm:$0xff]  ;;  %v2879_v31 = vld [vmem:[#allocation1 + $0x9] sm:$0xff]  ;;  %13737 = vst [vmem:[#allocation39_spill] sm:$0xff] %v11088_v61 }
 0x162   : > { %2999 = vmatpush.bf16.msra.mxu3 %v10877_v6  ;;  %2841 = vmatmul.bf16.vlgmr.msra.gmra.mxu0 %v2733_v8  ;;  %v10985_v8 = vld [vmem:[%s10726_s9 + $0x1a0] sm:$0xff]  ;;  %3040 = vst [vmem:[#allocation1] ss:$9 sm:$0xff] %v10962_v26  ;;  %v11041_v6 = vld [vmem:[%s10726_s9 + $0x1d0] sm:$0xff]  ;;  %v11046_v5 = vld [vmem:[%s10726_s9 + $0x108] sm:$0xff] }
 0x163   : > { %3156 = vmatpush.bf16.msrb.mxu0 %v10892_v11  ;;  %2855 = vmatmul.bf16.vlgmr.msra.gmra.mxu1 %v2734_v9  ;;  %13718 = vst [vmem:[#allocation20_spill] sm:$0xff] %v10985_v8  ;;  %v10988_v9 = vld [vmem:[%s10726_s9 + $0x1e0] sm:$0xff] }
 0x164   : > { %3170 = vmatpush.bf16.msrb.mxu1 %v10895_v12  ;;  %13719 = vst [vmem:[#allocation21_spill] sm:$0xff] %v10988_v9  ;;  %2986 = vmatmul.bf16.vlgmr.msra.gmra.mxu2 %v2878_v30  ;;  %v11011_v30 = vld [vmem:[%s10726_s9 + $0x118] sm:$0xff] }
 0x165   : > { %3331 = vmatpush.bf16.msrb.mxu2 %v10903_v14  ;;  %3000 = vmatmul.bf16.vlgmr.msra.gmra.mxu3 %v2879_v31  ;;  %3043 = vst [vmem:[#allocation1 + $0x1] ss:$9 sm:$0xff] %v10973_v29  ;;  %v11014_v31 = vld [vmem:[%s10726_s9 + $0x158] sm:$0xff]  ;;  %v11030_v14 = vld [vmem:[%s10726_s9 + $0x110] sm:$0xff] }
 0x166   : > { %3345 = vmatpush.bf16.msrb.mxu3 %v10906_v15  ;;  %3046 = vst [vmem:[#allocation1 + $0x2] ss:$9 sm:$0xff] %v10980_v4  ;;  %v11023_v15 = vld [vmem:[%s10726_s9 + $0x1d8] sm:$0xff] }
 0x167   : > { %3157 = vmatpush.bf16.msrb.mxu0 %v10928_v18  ;;  %13720 = vst [vmem:[#allocation22_spill] sm:$0xff] %v11011_v30 }
 0x168   : > { %3171 = vmatpush.bf16.msrb.mxu1 %v10931_v19  ;;  %13721 = vst [vmem:[#allocation23_spill] sm:$0xff] %v11014_v31 }
 0x169   : > { %3332 = vmatpush.bf16.msrb.mxu2 %v10937_v20  ;;  %v11020_v20 = vld [vmem:[%s10726_s9 + $0x198] sm:$0xff]  ;;  %13723 = vst [vmem:[#allocation25_spill] sm:$0xff] %v11023_v15 }
 0x16a   : > { %3346 = vmatpush.bf16.msrb.mxu3 %v10940_v21  ;;  %v10993_v21 = vld [vmem:[%s13473_s0 + $0x34] sm:$0x3]  ;;  %13722 = vst [vmem:[#allocation24_spill] sm:$0xff] %v11020_v20 }
 0x16b   : > { %3158 = vmatpush.bf16.msrb.mxu0 %v10946_v22  ;;  %3049 = vst [vmem:[#allocation1 + $0x3] ss:$9 sm:$0xff] %v10993_v21 }
 0x16c   : > { %3172 = vmatpush.bf16.msrb.mxu1 %v10949_v23  ;;  %13724 = vst [vmem:[#allocation26_spill] sm:$0xff] %v11030_v14 }
 0x16d   : > { %3333 = vmatpush.bf16.msrb.mxu2 %v10954_v24  ;;  %v10999_v24 = vld [vmem:[%s13473_s0 + $0x44] sm:$0x3]  ;;  %13727 = vst [vmem:[#allocation29_spill] sm:$0xff] %v11041_v6 }
 0x16e   : > { %3347 = vmatpush.bf16.msrb.mxu3 %v10957_v25  ;;  %v11005_v25 = vld [vmem:[%s13473_s0 + $0x54] sm:$0x3]  ;;  %3052 = vst [vmem:[#allocation1 + $0x4] ss:$9 sm:$0xff] %v10999_v24 }
 0x16f   : > { %3159 = vmatpush.bf16.msrb.mxu0 %v10965_v27  ;;  %3055 = vst [vmem:[#allocation1 + $0x5] ss:$9 sm:$0xff] %v11005_v25 }
 0x170   : > { %3173 = vmatpush.bf16.msrb.mxu1 %v10968_v28  ;;  %13728 = vst [vmem:[#allocation30_spill] sm:$0xff] %v11046_v5  ;;  %v11258_v28 = vld [vmem:[%s10726_s9 + $0x370] sm:$0xff] }
 0x171   : > { %3334 = vmatpush.bf16.msrb.mxu2 %v10985_v8  ;;  %v11033_v8 = vld [vmem:[%s10726_s9 + $0x150] sm:$0xff]  ;;  %13738 = vst [vmem:[#allocation40_spill] sm:$0xff] %v11092_v60 }
 0x172   : > { %3348 = vmatpush.bf16.msrb.mxu3 %v10988_v9  ;;  %13725 = vst [vmem:[#allocation27_spill] sm:$0xff] %v11033_v8  ;;  %v11038_v9 = vld [vmem:[%s10726_s9 + $0x190] sm:$0xff] }
 0x173   : > { %3160 = vmatpush.bf16.msrb.mxu0 %v11011_v30  ;;  %13726 = vst [vmem:[#allocation28_spill] sm:$0xff] %v11038_v9  ;;  %v11237_v30 = vld [vmem:[%s10726_s9 + $0x280] sm:$0xff] }
 0x174   : > { %3174 = vmatpush.bf16.msrb.mxu1 %v11014_v31  ;;  %v11108_v31 = vld [vmem:[%s10726_s9 + $0x270] sm:$0xff]  ;;  %13766 = vst [vmem:[#allocation68_spill] sm:$0xff] %v11237_v30 }
 0x175   : > { %3335 = vmatpush.bf16.msrb.mxu2 %v11020_v20  ;;  %13741 = vst [vmem:[#allocation43_spill] sm:$0xff] %v11108_v31 }
 0x176   : > { %3349 = vmatpush.bf16.msrb.mxu3 %v11023_v15  ;;  %v11057_v15 = vld [vmem:[%s10726_s9 + $0x1c8] sm:$0xff]  ;;  %v3056_v20 = vld [vmem:[#allocation1] sm:$0xff]  ;;  %13767 = vst [vmem:[#allocation69_spill] sm:$0xff] %v11240_v53 }
 0x177   : > { %3161 = vmatpush.bf16.msrb.mxu0 %v11030_v14  ;;  %13731 = vst [vmem:[#allocation33_spill] sm:$0xff] %v11057_v15  ;;  %v3057_v14 = vld [vmem:[#allocation1 + $0x9] sm:$0xff] }
 0x178   : > { %3175 = vmatpush.bf16.msrb.mxu1 %v11033_v8  ;;  %3219 = vst [vmem:[#allocation1] ss:$9 sm:$0xff] %v10882_v7  ;;  %v11067_v8 = vld [vmem:[%s10726_s9 + $0x140] sm:$0xff] }
 0x179   : > { %3336 = vmatpush.bf16.msrb.mxu2 %v11038_v9  ;;  %3221 = vst [vmem:[#allocation1 + $0x1] ss:$9 sm:$0xff] %v10889_v10  ;;  %v11064_v9 = vld [vmem:[%s10726_s9 + $0x100] sm:$0xff] }
 0x17a   : > { %3350 = vmatpush.bf16.msrb.mxu3 %v11041_v6  ;;  %13732 = vst [vmem:[#allocation34_spill] sm:$0xff] %v11064_v9  ;;  %v11073_v6 = vld [vmem:[%s13473_s0 + $0x60] sm:$0x3]  ;;  %v11078_v7 = vld [vmem:[%s10726_s9 + $0x180] sm:$0xff] }
 0x17b   : > { %3162 = vmatpush.bf16.msrb.mxu0 %v11046_v5  ;;  %13733 = vst [vmem:[#allocation35_spill] sm:$0xff] %v11067_v8  ;;  %v11085_v5 = vld [vmem:[%s10726_s9 + $0x238] sm:$0xff] }
 0x17c   : > { %3176 = vmatpush.bf16.msrb.mxu1 %v11049_v1  ;;  %3223 = vst [vmem:[#allocation1 + $0x2] ss:$9 sm:$0xff] %v10900_v13  ;;  %v11081_v1 = vld [vmem:[%s10726_s9 + $0x1c0] sm:$0xff] }
 0x17d   : > { %3337 = vmatpush.bf16.msrb.mxu2 %v11052_v0  ;;  %13734 = vst [vmem:[#allocation36_spill] sm:$0xff] %v11078_v7  ;;  %v11095_v0 = vld [vmem:[%s10726_s9 + $0x2f8] sm:$0xff] }
 0x17e   : > { %3351 = vmatpush.bf16.msrb.mxu3 %v11057_v15  ;;  %13735 = vst [vmem:[#allocation37_spill] sm:$0xff] %v11081_v1  ;;  %v11105_v15 = vld [vmem:[%s10726_s9 + $0x230] sm:$0xff] }
 0x17f   : > { %3225 = vst [vmem:[#allocation1 + $0x3] ss:$9 sm:$0xff] %v10911_v16  ;;  %3163 = vmatpush.bf16.msrb.mxu0 %v11064_v9  ;;  %v11229_v9 = vld [vmem:[%s10726_s9 + $0x338] sm:$0xff] }
 0x180   : > { %13736 = vst [vmem:[#allocation38_spill] sm:$0xff] %v11085_v5  ;;  %3177 = vmatpush.bf16.msrb.mxu1 %v11067_v8  ;;  %v11119_v8 = vld [vmem:[%s10726_s9 + $0x228] sm:$0xff] }
 0x181   : > { %3227 = vst [vmem:[#allocation1 + $0x4] ss:$9 sm:$0xff] %v10919_v17  ;;  %3338 = vmatpush.bf16.msrb.mxu2 %v11078_v7  ;;  %v11113_v7 = vld [vmem:[%s10726_s9 + $0x2b0] sm:$0xff] }
 0x182   : > { %13739 = vst [vmem:[#allocation41_spill] sm:$0xff] %v11095_v0  ;;  %3352 = vmatpush.bf16.msrb.mxu3 %v11081_v1  ;;  %3164 = vmatmul.bf16.vlgmr.msrb.gmra.mxu0 %v3056_v20  ;;  %v11116_v1 = vld [vmem:[%s10726_s9 + $0x2f0] sm:$0xff]  ;;  %v11134_v20 = vld [vmem:[%s10726_s9 + $0x2e8] sm:$0xff] }
 0x183   : > { %3230 = vst [vmem:[#allocation1 + $0x5] ss:$9 sm:$0xff] %v11073_v6  ;;  %3506 = vmatpush.bf16.msra.mxu0 %v11085_v5  ;;  %3178 = vmatmul.bf16.vlgmr.msrb.gmra.mxu1 %v3057_v14  ;;  %v11131_v14 = vld [vmem:[%s10726_s9 + $0x2a8] sm:$0xff] }
 0x184   : > { %3520 = vmatpush.bf16.msra.mxu1 %v11088_v61  ;;  %13740 = vst [vmem:[#allocation42_spill] sm:$0xff] %v11105_v15 }
 0x185   : > { %3681 = vmatpush.bf16.msra.mxu2 %v11092_v60  ;;  %13742 = vst [vmem:[#allocation44_spill] sm:$0xff] %v11113_v7  ;;  %v11124_v60 = vld [vmem:[%s10726_s9 + $0x268] sm:$0xff] }
 0x186   : > { %3695 = vmatpush.bf16.msra.mxu3 %v11095_v0  ;;  %13743 = vst [vmem:[#allocation45_spill] sm:$0xff] %v11116_v1  ;;  %v11158_v0 = vld [vmem:[%s10726_s9 + $0x2e0] sm:$0xff] }
 0x187   : > { %13744 = vst [vmem:[#allocation46_spill] sm:$0xff] %v11119_v8  ;;  %3507 = vmatpush.bf16.msra.mxu0 %v11105_v15 }
 0x188   : > { %3521 = vmatpush.bf16.msra.mxu1 %v11108_v31  ;;  %13745 = vst [vmem:[#allocation47_spill] sm:$0xff] %v11124_v60 }
 0x189   : > { %3682 = vmatpush.bf16.msra.mxu2 %v11113_v7  ;;  %13746 = vst [vmem:[#allocation48_spill] sm:$0xff] %v11131_v14  ;;  %v11155_v7 = vld [vmem:[%s10726_s9 + $0x2a0] sm:$0xff] }
 0x18a   : > { %v3231_v5 = vld [vmem:[#allocation1] sm:$0xff]  ;;  %v3232_v61 = vld [vmem:[#allocation1 + $0x9] sm:$0xff]  ;;  %3696 = vmatpush.bf16.msra.mxu3 %v11116_v1  ;;  %13747 = vst [vmem:[#allocation49_spill] sm:$0xff] %v11134_v20 }
 0x18b   : > { %3339 = vmatmul.bf16.vlgmr.msrb.gmra.mxu2 %v3231_v5  ;;  %3394 = vst [vmem:[#allocation1] ss:$9 sm:$0xff] %v10724_v33  ;;  %3353 = vmatmul.bf16.vlgmr.msrb.gmra.mxu3 %v3232_v61  ;;  %v11140_v61 = vld [vmem:[%s13473_s0 + $0x62] sm:$0x3]  ;;  %v11146_v5 = vld [vmem:[%s10726_s9 + $0x220] sm:$0xff] }
 0x18c   : > { %3396 = vst [vmem:[#allocation1 + $0x1] ss:$9 sm:$0xff] %v10809_v54  ;;  %3508 = vmatpush.bf16.msra.mxu0 %v11119_v8  ;;  %3522 = vmatpush.bf16.msra.mxu1 %v11124_v60  ;;  %v11149_v1 = vld [vmem:[%s10726_s9 + $0x260] sm:$0xff]  ;;  %v11164_v60 = vld [vmem:[%s10726_s9 + $0x218] sm:$0xff] }
 0x18d   : > { %3398 = vst [vmem:[#allocation1 + $0x2] ss:$9 sm:$0xff] %v10814_v55  ;;  %3683 = vmatpush.bf16.msra.mxu2 %v11131_v14  ;;  %v11167_v8 = vld [vmem:[%s10726_s9 + $0x258] sm:$0xff] }
 0x18e   : > { %3400 = vst [vmem:[#allocation1 + $0x3] ss:$9 sm:$0xff] %v10819_v56  ;;  %3697 = vmatpush.bf16.msra.mxu3 %v11134_v20  ;;  %v11172_v20 = vld [vmem:[%s10726_s9 + $0x298] sm:$0xff] }
 0x18f   : > { %13748 = vst [vmem:[#allocation50_spill] sm:$0xff] %v11146_v5  ;;  %v11175_v14 = vld [vmem:[%s10726_s9 + $0x2d8] sm:$0xff] }
 0x190   : > { %13749 = vst [vmem:[#allocation51_spill] sm:$0xff] %v11149_v1  ;;  %3509 = vmatpush.bf16.msra.mxu0 %v11146_v5  ;;  %3523 = vmatpush.bf16.msra.mxu1 %v11149_v1  ;;  %v11180_v1 = vld [vmem:[%s10726_s9 + $0x210] sm:$0xff] }
 0x191   : > { %3402 = vst [vmem:[#allocation1 + $0x4] ss:$9 sm:$0xff] %v10824_v57  ;;  %3684 = vmatpush.bf16.msra.mxu2 %v11155_v7  ;;  %v11183_v5 = vld [vmem:[%s10726_s9 + $0x250] sm:$0xff] }
 0x192   : > { %13750 = vst [vmem:[#allocation52_spill] sm:$0xff] %v11155_v7  ;;  %3698 = vmatpush.bf16.msra.mxu3 %v11158_v0  ;;  %v11191_v7 = vld [vmem:[%s10726_s9 + $0x2d0] sm:$0xff] }
 0x193   : > { %13751 = vst [vmem:[#allocation53_spill] sm:$0xff] %v11158_v0  ;;  %v11188_v0 = vld [vmem:[%s10726_s9 + $0x290] sm:$0xff] }
 0x194   : > { %3405 = vst [vmem:[#allocation1 + $0x5] ss:$9 sm:$0xff] %v11140_v61  ;;  %3510 = vmatpush.bf16.msra.mxu0 %v11164_v60  ;;  %3524 = vmatpush.bf16.msra.mxu1 %v11167_v8 }
 0x195   : > { %13752 = vst [vmem:[#allocation54_spill] sm:$0xff] %v11164_v60  ;;  %3685 = vmatpush.bf16.msra.mxu2 %v11172_v20  ;;  %v11223_v60 = vld [vmem:[%s10726_s9 + $0x200] sm:$0xff] }
 0x196   : > { %13753 = vst [vmem:[#allocation55_spill] sm:$0xff] %v11167_v8  ;;  %3699 = vmatpush.bf16.msra.mxu3 %v11175_v14  ;;  %v11198_v8 = vld [vmem:[%s10726_s9 + $0x208] sm:$0xff] }
 0x197   : > { %13754 = vst [vmem:[#allocation56_spill] sm:$0xff] %v11172_v20  ;;  %v11201_v20 = vld [vmem:[%s10726_s9 + $0x248] sm:$0xff] }
 0x198   : > { %13755 = vst [vmem:[#allocation57_spill] sm:$0xff] %v11175_v14  ;;  %3511 = vmatpush.bf16.msra.mxu0 %v11180_v1  ;;  %3525 = vmatpush.bf16.msra.mxu1 %v11183_v5  ;;  %v11207_v14 = vld [vmem:[%s13473_s0 + $0x64] sm:$0x3] }
 0x199   : > { %13756 = vst [vmem:[#allocation58_spill] sm:$0xff] %v11180_v1  ;;  %3686 = vmatpush.bf16.msra.mxu2 %v11188_v0  ;;  %v11216_v1 = vld [vmem:[%s10726_s9 + $0x2c8] sm:$0xff] }
 0x19a   : > { %13757 = vst [vmem:[#allocation59_spill] sm:$0xff] %v11183_v5  ;;  %3700 = vmatpush.bf16.msra.mxu3 %v11191_v7  ;;  %v11213_v5 = vld [vmem:[%s10726_s9 + $0x288] sm:$0xff] }
 0x19b   : > { %v3406_v31 = vld [vmem:[#allocation1] sm:$0xff]  ;;  %v3407_v15 = vld [vmem:[#allocation1 + $0x9] sm:$0xff]  ;;  %13758 = vst [vmem:[#allocation60_spill] sm:$0xff] %v11188_v0 }
 0x19c   : > { %13759 = vst [vmem:[#allocation61_spill] sm:$0xff] %v11191_v7  ;;  %3512 = vmatpush.bf16.msra.mxu0 %v11198_v8  ;;  %3526 = vmatpush.bf16.msra.mxu1 %v11201_v20  ;;  %v11226_v0 = vld [vmem:[%s10726_s9 + $0x240] sm:$0xff]  ;;  %v11232_v7 = vld [vmem:[%s10726_s9 + $0x378] sm:$0xff] }
 0x19d   : > { %3569 = vst [vmem:[#allocation1] ss:$9 sm:$0xff] %v10973_v29  ;;  %3687 = vmatpush.bf16.msra.mxu2 %v11213_v5 }
 0x19e   : > { %3571 = vst [vmem:[#allocation1 + $0x1] ss:$9 sm:$0xff] %v10980_v4  ;;  %3701 = vmatpush.bf16.msra.mxu3 %v11216_v1 }
 0x19f   : > { %13760 = vst [vmem:[#allocation62_spill] sm:$0xff] %v11198_v8  ;;  %v11243_v8 = vld [vmem:[%s10726_s9 + $0x3b8] sm:$0xff] }
 0x1a0   : > { %13761 = vst [vmem:[#allocation63_spill] sm:$0xff] %v11201_v20  ;;  %v11246_v20 = vld [vmem:[%s10726_s9 + $0x3f8] sm:$0xff]  ;;  %3513 = vmatpush.bf16.msra.mxu0 %v11223_v60  ;;  %3527 = vmatpush.bf16.msra.mxu1 %v11226_v0 }
 0x1a1   : > { %3573 = vst [vmem:[#allocation1 + $0x2] ss:$9 sm:$0xff] %v10993_v21  ;;  %3688 = vmatpush.bf16.msra.mxu2 %v11237_v30  ;;  %v11346_v30 = vld [vmem:[%s10726_s9 + $0x3d0] sm:$0xff] }
 0x1a2   : > { %3575 = vst [vmem:[#allocation1 + $0x3] ss:$9 sm:$0xff] %v10999_v24  ;;  %3702 = vmatpush.bf16.msra.mxu3 %v11240_v53  ;;  %v11343_v53 = vld [vmem:[%s10726_s9 + $0x390] sm:$0xff] }
 0x1a3   : > { %13762 = vst [vmem:[#allocation64_spill] sm:$0xff] %v11213_v5  ;;  %v11253_v5 = vld [vmem:[%s10726_s9 + $0x330] sm:$0xff]  ;;  %3514 = vmatmul.bf16.vlgmr.msra.gmra.mxu0 %v3406_v31  ;;  %3528 = vmatmul.bf16.vlgmr.msra.gmra.mxu1 %v3407_v15  ;;  %v11278_v15 = vld [vmem:[%s10726_s9 + $0x328] sm:$0xff]  ;;  %v11306_v31 = vld [vmem:[%s10726_s9 + $0x3e0] sm:$0xff] }
 0x1a4   : > { %13763 = vst [vmem:[#allocation65_spill] sm:$0xff] %v11216_v1  ;;  %3856 = vmatpush.bf16.msrb.mxu0 %v11229_v9  ;;  %3870 = vmatpush.bf16.msrb.mxu1 %v11232_v7 }
 0x1a5   : > { %3577 = vst [vmem:[#allocation1 + $0x4] ss:$9 sm:$0xff] %v11005_v25  ;;  %4031 = vmatpush.bf16.msrb.mxu2 %v11243_v8 }
 0x1a6   : > { %3580 = vst [vmem:[#allocation1 + $0x5] ss:$9 sm:$0xff] %v11207_v14  ;;  %4045 = vmatpush.bf16.msrb.mxu3 %v11246_v20 }
 0x1a7   : > { %13764 = vst [vmem:[#allocation66_spill] sm:$0xff] %v11229_v9  ;;  %v11264_v9 = vld [vmem:[%s10726_s9 + $0x3b0] sm:$0xff] }
 0x1a8   : > { %13765 = vst [vmem:[#allocation67_spill] sm:$0xff] %v11232_v7  ;;  %v11267_v7 = vld [vmem:[%s10726_s9 + $0x3f0] sm:$0xff]  ;;  %3857 = vmatpush.bf16.msrb.mxu0 %v11253_v5  ;;  %3871 = vmatpush.bf16.msrb.mxu1 %v11258_v28 }
 0x1a9   : > { %13768 = vst [vmem:[#allocation70_spill] sm:$0xff] %v11243_v8  ;;  %4032 = vmatpush.bf16.msrb.mxu2 %v11264_v9  ;;  %v11329_v8 = vld [vmem:[%s10726_s9 + $0x310] sm:$0xff] }
 0x1aa   : > { %13769 = vst [vmem:[#allocation71_spill] sm:$0xff] %v11246_v20  ;;  %4046 = vmatpush.bf16.msrb.mxu3 %v11267_v7 }
 0x1ab   : > { %13770 = vst [vmem:[#allocation72_spill] sm:$0xff] %v11264_v9  ;;  %v11317_v9 = vld [vmem:[%s10726_s9 + $0x398] sm:$0xff] }
 0x1ac   : > { %13771 = vst [vmem:[#allocation73_spill] sm:$0xff] %v11267_v7  ;;  %3858 = vmatpush.bf16.msrb.mxu0 %v11278_v15  ;;  %v11314_v7 = vld [vmem:[%s10726_s9 + $0x358] sm:$0xff] }
 0x1ad   : > { %v3581_v1 = vld [vmem:[#allocation1] sm:$0xff]  ;;  %v3582_v52 = vld [vmem:[#allocation1 + $0x9] sm:$0xff]  ;;  %13777 = vst [vmem:[#allocation79_spill] sm:$0xff] %v11306_v31 }
 0x1ae   : > { %3744 = vst [vmem:[#allocation1] ss:$9 sm:$0xff] %v10889_v10  ;;  %3689 = vmatmul.bf16.vlgmr.msra.gmra.mxu2 %v3581_v1  ;;  %3703 = vmatmul.bf16.vlgmr.msra.gmra.mxu3 %v3582_v52  ;;  %v2587_v10 = vld [vmem:[%s13473_s0 + $0x70] sm:$0x3] }
 0x1af   : > { %3746 = vst [vmem:[#allocation1 + $0x1] ss:$9 sm:$0xff] %v10900_v13  ;;  %v11281_v1 = vld [vmem:[%s10726_s9 + $0x368] sm:$0xff] }
 0x1b0   : > { %3748 = vst [vmem:[#allocation1 + $0x2] ss:$9 sm:$0xff] %v10911_v16  ;;  %v11287_v52 = vld [vmem:[%s10726_s9 + $0x3a8] sm:$0xff]  ;;  %3872 = vmatpush.bf16.msrb.mxu1 %v11281_v1  ;;  %v11295_v16 = vld [vmem:[%s10726_s9 + $0x320] sm:$0xff] }
 0x1b1   : > { %3750 = vst [vmem:[#allocation1 + $0x3] ss:$9 sm:$0xff] %v10919_v17  ;;  %v11290_v13 = vld [vmem:[%s10726_s9 + $0x3e8] sm:$0xff]  ;;  %4033 = vmatpush.bf16.msrb.mxu2 %v11287_v52  ;;  %v11303_v17 = vld [vmem:[%s10726_s9 + $0x3a0] sm:$0xff]  ;;  %3859 = vmatpush.bf16.msrb.mxu0 %v11295_v16 }
 0x1b2   : > { %3752 = vst [vmem:[#allocation1 + $0x4] ss:$9 sm:$0xff] %v11073_v6  ;;  %v11298_v6 = vld [vmem:[%s10726_s9 + $0x360] sm:$0xff]  ;;  %4047 = vmatpush.bf16.msrb.mxu3 %v11290_v13 }
 0x1b3   : > { %13772 = vst [vmem:[#allocation74_spill] sm:$0xff] %v11287_v52 }
 0x1b4   : > { %13773 = vst [vmem:[#allocation75_spill] sm:$0xff] %v11290_v13  ;;  %3873 = vmatpush.bf16.msrb.mxu1 %v11298_v6  ;;  %v11322_v13 = vld [vmem:[%s10726_s9 + $0x3d8] sm:$0xff] }
 0x1b5   : > { %3755 = vst [vmem:[#allocation1 + $0x5] ss:$9 sm:$0xff] %v2587_v10  ;;  %v11311_v10 = vld [vmem:[%s10726_s9 + $0x318] sm:$0xff]  ;;  %4034 = vmatpush.bf16.msrb.mxu2 %v11303_v17 }
 0x1b6   : > { %13774 = vst [vmem:[#allocation76_spill] sm:$0xff] %v11295_v16  ;;  %4048 = vmatpush.bf16.msrb.mxu3 %v11306_v31  ;;  %3860 = vmatpush.bf16.msrb.mxu0 %v11311_v10  ;;  %v11338_v31 = vld [vmem:[%s13473_s0 + $0x72] sm:$0x3]  ;;  %v11387_v16 = vld [vmem:[%s10726_s9 + $0x478] sm:$0xff] }
 0x1b7   : > { %13775 = vst [vmem:[#allocation77_spill] sm:$0xff] %v11298_v6  ;;  %v11378_v6 = vld [vmem:[%s10726_s9 + $0x380] sm:$0xff] }
 0x1b8   : > { %13776 = vst [vmem:[#allocation78_spill] sm:$0xff] %v11303_v17  ;;  %3874 = vmatpush.bf16.msrb.mxu1 %v11314_v7  ;;  %v11332_v17 = vld [vmem:[%s10726_s9 + $0x350] sm:$0xff] }
 0x1b9   : > { %13778 = vst [vmem:[#allocation80_spill] sm:$0xff] %v11311_v10  ;;  %4035 = vmatpush.bf16.msrb.mxu2 %v11317_v9  ;;  %v11365_v10 = vld [vmem:[%s10726_s9 + $0x3c8] sm:$0xff] }
 0x1ba   : > { %13779 = vst [vmem:[#allocation81_spill] sm:$0xff] %v11314_v7  ;;  %4049 = vmatpush.bf16.msrb.mxu3 %v11322_v13  ;;  %3861 = vmatpush.bf16.msrb.mxu0 %v11329_v8  ;;  %v11362_v7 = vld [vmem:[%s10726_s9 + $0x388] sm:$0xff] }
 0x1bb   : > { %13780 = vst [vmem:[#allocation82_spill] sm:$0xff] %v11317_v9  ;;  %v11357_v9 = vld [vmem:[%s10726_s9 + $0x348] sm:$0xff] }
 0x1bc   : > { %13781 = vst [vmem:[#allocation83_spill] sm:$0xff] %v11322_v13  ;;  %v3756_v52 = vld [vmem:[#allocation1] sm:$0xff]  ;;  %v3757_v20 = vld [vmem:[#allocation1 + $0x9] sm:$0xff]  ;;  %3875 = vmatpush.bf16.msrb.mxu1 %v11332_v17 }
 0x1bd   : > { %3919 = vst [vmem:[#allocation1] ss:$9 sm:$0xff] %v10809_v54  ;;  %v11354_v13 = vld [vmem:[%s10726_s9 + $0x308] sm:$0xff]  ;;  %4036 = vmatpush.bf16.msrb.mxu2 %v11343_v53 }
 0x1be   : > { %3921 = vst [vmem:[#allocation1 + $0x1] ss:$9 sm:$0xff] %v10814_v55  ;;  %4050 = vmatpush.bf16.msrb.mxu3 %v11346_v30  ;;  %3862 = vmatpush.bf16.msrb.mxu0 %v11354_v13 }
 0x1bf   : > { %13782 = vst [vmem:[#allocation84_spill] sm:$0xff] %v11329_v8  ;;  %v11370_v8 = vld [vmem:[%s10726_s9 + $0x300] sm:$0xff] }
 0x1c0   : > { %13783 = vst [vmem:[#allocation85_spill] sm:$0xff] %v11332_v17  ;;  %3876 = vmatpush.bf16.msrb.mxu1 %v11357_v9  ;;  %v11373_v17 = vld [vmem:[%s10726_s9 + $0x340] sm:$0xff] }
 0x1c1   : > { %3923 = vst [vmem:[#allocation1 + $0x2] ss:$9 sm:$0xff] %v10819_v56  ;;  %4037 = vmatpush.bf16.msrb.mxu2 %v11362_v7 }
 0x1c2   : > { %13784 = vst [vmem:[#allocation86_spill] sm:$0xff] %v11343_v53  ;;  %4051 = vmatpush.bf16.msrb.mxu3 %v11365_v10  ;;  %v11381_v53 = vld [vmem:[%s10726_s9 + $0x3c0] sm:$0xff]  ;;  %3863 = vmatpush.bf16.msrb.mxu0 %v11370_v8 }
 0x1c3   : > { %13785 = vst [vmem:[#allocation87_spill] sm:$0xff] %v11346_v30  ;;  %v11384_v30 = vld [vmem:[%s10726_s9 + $0x438] sm:$0xff] }
 0x1c4   : > { %3925 = vst [vmem:[#allocation1 + $0x3] ss:$9 sm:$0xff] %v10824_v57  ;;  %3877 = vmatpush.bf16.msrb.mxu1 %v11373_v17 }
 0x1c5   : > { %3927 = vst [vmem:[#allocation1 + $0x4] ss:$9 sm:$0xff] %v11140_v61  ;;  %4038 = vmatpush.bf16.msrb.mxu2 %v11378_v6  ;;  %3864 = vmatmul.bf16.vlgmr.msrb.gmra.mxu0 %v3756_v52 }
 0x1c6   : > { %3930 = vst [vmem:[#allocation1 + $0x5] ss:$9 sm:$0xff] %v11338_v31  ;;  %4052 = vmatpush.bf16.msrb.mxu3 %v11381_v53  ;;  %4206 = vmatpush.bf16.msra.mxu0 %v11384_v30 }
 0x1c7   : > { %13786 = vst [vmem:[#allocation88_spill] sm:$0xff] %v11354_v13  ;;  %3878 = vmatmul.bf16.vlgmr.msrb.gmra.mxu1 %v3757_v20 }
 0x1c8   : > { %13787 = vst [vmem:[#allocation89_spill] sm:$0xff] %v11357_v9  ;;  %4220 = vmatpush.bf16.msra.mxu1 %v11387_v16 }
 0x1c9   : > { %13788 = vst [vmem:[#allocation90_spill] sm:$0xff] %v11362_v7  ;;  %v11405_v7 = vld [vmem:[%s10726_s9 + $0x430] sm:$0xff]  ;;  %4258 = vmatpush.bf16.msra.mxu2 %v10729_v34  ;;  %v11420_v34 = vld [vmem:[%s10726_s9 + $0x468] sm:$0xff] }
 0x1ca   : > { %13789 = vst [vmem:[#allocation91_spill] sm:$0xff] %v11365_v10  ;;  %v11399_v10 = vld [vmem:[%s13473_s0 + $0x74] sm:$0x3]  ;;  %4272 = vmatpush.bf16.msra.mxu3 %v10732_v35  ;;  %4207 = vmatpush.bf16.msra.mxu0 %v11405_v7  ;;  %v11427_v35 = vld [vmem:[%s10726_s9 + $0x420] sm:$0xff] }
 0x1cb   : > { %13790 = vst [vmem:[#allocation92_spill] sm:$0xff] %v11378_v6  ;;  %v11408_v6 = vld [vmem:[%s10726_s9 + $0x470] sm:$0xff] }
 0x1cc   : > { %13791 = vst [vmem:[#allocation93_spill] sm:$0xff] %v11381_v53  ;;  %4221 = vmatpush.bf16.msra.mxu1 %v11408_v6  ;;  %v11417_v53 = vld [vmem:[%s10726_s9 + $0x428] sm:$0xff] }
 0x1cd   : > { %v3931_v13 = vld [vmem:[#allocation1] sm:$0xff]  ;;  %v3932_v9 = vld [vmem:[#allocation1 + $0x9] sm:$0xff]  ;;  %4259 = vmatpush.bf16.msra.mxu2 %v10745_v38 }
 0x1ce   : > { %4094 = vst [vmem:[#allocation1] ss:$9 sm:$0xff] %v10980_v4  ;;  %4039 = vmatmul.bf16.vlgmr.msrb.gmra.mxu2 %v3931_v13  ;;  %4053 = vmatmul.bf16.vlgmr.msrb.gmra.mxu3 %v3932_v9  ;;  %v11430_v9 = vld [vmem:[%s10726_s9 + $0x460] sm:$0xff]  ;;  %v11439_v38 = vld [vmem:[%s10726_s9 + $0x418] sm:$0xff] }
 0x1cf   : > { %4096 = vst [vmem:[#allocation1 + $0x1] ss:$9 sm:$0xff] %v10993_v21  ;;  %4273 = vmatpush.bf16.msra.mxu3 %v10748_v39  ;;  %4208 = vmatpush.bf16.msra.mxu0 %v11417_v53  ;;  %v11442_v39 = vld [vmem:[%s10726_s9 + $0x458] sm:$0xff] }
 0x1d0   : > { %4098 = vst [vmem:[#allocation1 + $0x2] ss:$9 sm:$0xff] %v10999_v24  ;;  %4222 = vmatpush.bf16.msra.mxu1 %v11420_v34 }
 0x1d1   : > { %4100 = vst [vmem:[#allocation1 + $0x3] ss:$9 sm:$0xff] %v11005_v25  ;;  %4260 = vmatpush.bf16.msra.mxu2 %v10761_v42  ;;  %v11453_v42 = vld [vmem:[%s10726_s9 + $0x410] sm:$0xff] }
 0x1d2   : > { %4102 = vst [vmem:[#allocation1 + $0x4] ss:$9 sm:$0xff] %v11207_v14 }
 0x1d3   : > { %4105 = vst [vmem:[#allocation1 + $0x5] ss:$9 sm:$0xff] %v11399_v10  ;;  %4274 = vmatpush.bf16.msra.mxu3 %v10764_v43  ;;  %4209 = vmatpush.bf16.msra.mxu0 %v11427_v35  ;;  %v11456_v43 = vld [vmem:[%s10726_s9 + $0x450] sm:$0xff] }
 0x1d4   : > { %4223 = vmatpush.bf16.msra.mxu1 %v11430_v9 }
 0x1d5   : > { %4261 = vmatpush.bf16.msra.mxu2 %v10777_v46  ;;  %v11463_v46 = vld [vmem:[%s10726_s9 + $0x408] sm:$0xff] }
 0x1d7   : > { %4275 = vmatpush.bf16.msra.mxu3 %v10780_v47  ;;  %4210 = vmatpush.bf16.msra.mxu0 %v11439_v38  ;;  %v11466_v47 = vld [vmem:[%s10726_s9 + $0x448] sm:$0xff] }
 0x1d8   : > { %4224 = vmatpush.bf16.msra.mxu1 %v11442_v39 }
 0x1d9   : > { %4262 = vmatpush.bf16.msra.mxu2 %v10793_v50  ;;  %v11473_v50 = vld [vmem:[%s10726_s9 + $0x400] sm:$0xff] }
 0x1da   : > { %v4106_v20 = vld [vmem:[#allocation1] sm:$0xff]  ;;  %v4107_v52 = vld [vmem:[#allocation1 + $0x9] sm:$0xff] }
 0x1db   : > { %4243 = vst [vmem:[#allocation1] ss:$9 sm:$0xff] %v10962_v26  ;;  %4276 = vmatpush.bf16.msra.mxu3 %v10796_v51  ;;  %4211 = vmatpush.bf16.msra.mxu0 %v11453_v42  ;;  %v11476_v51 = vld [vmem:[%s10726_s9 + $0x440] sm:$0xff] }
 0x1dc   : > { %4245 = vst [vmem:[#allocation1 + $0x1] ss:$9 sm:$0xff] %v10973_v29  ;;  %4225 = vmatpush.bf16.msra.mxu1 %v11456_v43 }
 0x1dd   : > { %4247 = vst [vmem:[#allocation1 + $0x2] ss:$9 sm:$0xff] %v10980_v4  ;;  %4263 = vmatpush.bf16.msra.mxu2 %v10830_v58 }
 0x1de   : > { %4249 = vst [vmem:[#allocation1 + $0x3] ss:$9 sm:$0xff] %v10993_v21 }
 0x1df   : > { %4251 = vst [vmem:[#allocation1 + $0x4] ss:$9 sm:$0xff] %v10999_v24  ;;  %4277 = vmatpush.bf16.msra.mxu3 %v10833_v59  ;;  %4212 = vmatpush.bf16.msra.mxu0 %v11463_v46 }
 0x1e0   : > { %4253 = vst [vmem:[#allocation1 + $0x5] ss:$9 sm:$0xff] %v11005_v25  ;;  %4226 = vmatpush.bf16.msra.mxu1 %v11466_v47  ;;  %v2856_v59 = vpop.f32.mrf.mxu1 }
 0x1e1   : > { %4264 = vmatpush.bf16.msra.mxu2 %v10849_v62  ;;  %v11518_v62 = vld [vmem:[%s13473_s0 + $0x36] sm:$0x3] }
 0x1e2   : > { %13795 = vst [vmem:[#allocation97_spill] sm:$0xff] %v11518_v62 }
 0x1e3   : > { %4278 = vmatpush.bf16.msra.mxu3 %v10852_v63  ;;  %4213 = vmatpush.bf16.msra.mxu0 %v11473_v50 }
 0x1e4   : > { %4227 = vmatpush.bf16.msra.mxu1 %v11476_v51 }
 0x1e5   : > { %4265 = vmatpush.bf16.msra.mxu2 %v10863_v2  ;;  %v11531_v2 = vld [vmem:[%s13473_s0 + $0x46] sm:$0x3] }
 0x1e6   : > { %4214 = vmatmul.bf16.vlgmr.msra.gmra.mxu0 %v4106_v20  ;;  %13796 = vst [vmem:[#allocation98_spill] sm:$0xff] %v11531_v2 }
 0x1e7   : > { %v4254_v13 = vld [vmem:[#allocation1] sm:$0xff]  ;;  %v4255_v26 = vld [vmem:[#allocation1 + $0x9] sm:$0xff]  ;;  %4279 = vmatpush.bf16.msra.mxu3 %v10866_v3  ;;  %4301 = vmatpush.bf16.msrb.mxu0 %v10735_v36  ;;  %v11508_v36 = vld [vmem:[%s13473_s0 + $0x16] sm:$0x3] }
 0x1e8   : > { %4286 = vst [vmem:[#allocation1] ss:$9 sm:$0xff] %v10719_v32  ;;  %4315 = vmatpush.bf16.msrb.mxu1 %v10739_v37  ;;  %4266 = vmatmul.bf16.vlgmr.msra.gmra.mxu2 %v4254_v13  ;;  %v11503_v32 = vld [vmem:[%s13473_s0 + $0x6] sm:$0x3]  ;;  %v11539_v3 = vld [vmem:[%s13473_s0 + $0x56] sm:$0x3] }
 0x1e9   : > { %4288 = vst [vmem:[#allocation1 + $0x1] ss:$9 sm:$0xff] %v10724_v33  ;;  %4350 = vmatpush.bf16.msrb.mxu2 %v10892_v11  ;;  %4228 = vmatmul.bf16.vlgmr.msra.gmra.mxu1 %v4107_v52  ;;  %v13800_v11 = vld [vmem:[#allocation5_spill] sm:$0xff]  ;;  %v3001_v52 = vpop.f32.mrf.mxu3  ;;  %v13807_v13 = vld [vmem:[#allocation8_spill] sm:$0xff] }
 0x1ea   : > { %4290 = vst [vmem:[#allocation1 + $0x2] ss:$9 sm:$0xff] %v10809_v54  ;;  %4280 = vmatmul.bf16.vlgmr.msra.gmra.mxu3 %v4255_v26  ;;  %v13806_v26 = vld [vmem:[#allocation27_spill] sm:$0xff] }
 0x1eb   : > { %4292 = vst [vmem:[#allocation1 + $0x3] ss:$9 sm:$0xff] %v10814_v55  ;;  %4364 = vmatpush.bf16.msrb.mxu3 %v10895_v12  ;;  %4302 = vmatpush.bf16.msrb.mxu0 %v10753_v40  ;;  %v11513_v40 = vld [vmem:[%s13473_s0 + $0x26] sm:$0x3] }
 0x1ec   : > { %4294 = vst [vmem:[#allocation1 + $0x4] ss:$9 sm:$0xff] %v10819_v56  ;;  %4316 = vmatpush.bf16.msrb.mxu1 %v10756_v41  ;;  %v2842_v41 = vpop.f32.mrf.mxu0  ;;  %v13801_v12 = vld [vmem:[#allocation22_spill] sm:$0xff] }
 0x1ed   : > { %4296 = vst [vmem:[#allocation1 + $0x5] ss:$9 sm:$0xff] %v10824_v57  ;;  %4351 = vmatpush.bf16.msrb.mxu2 %v10928_v18  ;;  %v2857_v63 = vadd.f32 %v2856_v59, %v2842_v41  ;;  %v13802_v18 = vld [vmem:[#allocation23_spill] sm:$0xff]  ;;  %v13808_v41 = vld [vmem:[#allocation9_spill] sm:$0xff] }
 0x1ee   : > { %13792 = vst [vmem:[#allocation94_spill] sm:$0xff] %v11503_v32 }
 0x1ef   : > { %4365 = vmatpush.bf16.msrb.mxu3 %v10931_v19  ;;  %13793 = vst [vmem:[#allocation95_spill] sm:$0xff] %v11508_v36  ;;  %4303 = vmatpush.bf16.msrb.mxu0 %v10769_v44  ;;  %v13798_v44 = vld [vmem:[#allocation19_spill] sm:$0xff] }
 0x1f0   : > { %13794 = vst [vmem:[#allocation96_spill] sm:$0xff] %v11513_v40  ;;  %4317 = vmatpush.bf16.msrb.mxu1 %v10772_v45  ;;  %v13799_v45 = vld [vmem:[#allocation4_spill] sm:$0xff] }
 0x1f1   : > { %4352 = vmatpush.bf16.msrb.mxu2 %v10946_v22  ;;  %13797 = vst [vmem:[#allocation99_spill] sm:$0xff] %v11539_v3 }
 0x1f3   : > { %4366 = vmatpush.bf16.msrb.mxu3 %v10949_v23  ;;  %4304 = vmatpush.bf16.msrb.mxu0 %v10785_v48  ;;  %v13803_v23 = vld [vmem:[#allocation6_spill] sm:$0xff]  ;;  %v13804_v48 = vld [vmem:[#allocation7_spill] sm:$0xff] }
 0x1f4   : > { %v4297_v37 = vld [vmem:[#allocation1] sm:$0xff]  ;;  %v4298_v58 = vld [vmem:[#allocation1 + $0x9] sm:$0xff]  ;;  %4318 = vmatpush.bf16.msrb.mxu1 %v10788_v49 }
 0x1f5   : > { %4330 = vst [vmem:[#allocation1] ss:$9 sm:$0xff] %v11503_v32  ;;  %4353 = vmatpush.bf16.msrb.mxu2 %v10965_v27  ;;  %v13805_v49 = vld [vmem:[#allocation26_spill] sm:$0xff]  ;;  %v2987_v27 = vpop.f32.mrf.mxu2 }
 0x1f6   : > { %4333 = vst [vmem:[#allocation1 + $0x1] ss:$9 sm:$0xff] %v11508_v36  ;;  %v2988_v20 = vadd.f32 %v2987_v27, %v2857_v63  ;;  %v11569_v63 = vpop.f32.mrf.mxu1  ;;  %v13818_v27 = vld [vmem:[#allocation39_spill] sm:$0xff] }
 0x1f7   : > { %4336 = vst [vmem:[#allocation1 + $0x2] ss:$9 sm:$0xff] %v11513_v40  ;;  %4367 = vmatpush.bf16.msrb.mxu3 %v13798_v44  ;;  %4305 = vmatpush.bf16.msrb.mxu0 %v13799_v45  ;;  %v13810_v44 = vld [vmem:[#allocation31_spill] sm:$0xff]  ;;  %v11567_v45 = vpop.f32.mrf.mxu0 }
 0x1f8   : > { %4339 = vst [vmem:[#allocation1 + $0x3] ss:$9 sm:$0xff] %v11518_v62  ;;  %4319 = vmatpush.bf16.msrb.mxu1 %v13800_v11  ;;  %v3002_v59 = vadd.f32 %v3001_v52, %v2988_v20  ;;  %v13811_v11 = vld [vmem:[#allocation10_spill] sm:$0xff] }
 0x1f9   : > { %4342 = vst [vmem:[#allocation1 + $0x4] ss:$9 sm:$0xff] %v11531_v2  ;;  %4354 = vmatpush.bf16.msrb.mxu2 %v13801_v12  ;;  %v13812_v12 = vld [vmem:[#allocation11_spill] sm:$0xff] }
 0x1fa   : > { %4345 = vst [vmem:[#allocation1 + $0x5] ss:$9 sm:$0xff] %v11539_v3 }
 0x1fb   : > { %4368 = vmatpush.bf16.msrb.mxu3 %v13802_v18  ;;  %4306 = vmatpush.bf16.msrb.mxu0 %v13803_v23  ;;  %v13813_v18 = vld [vmem:[#allocation34_spill] sm:$0xff]  ;;  %v13814_v23 = vld [vmem:[#allocation35_spill] sm:$0xff] }
 0x1fc   : > { %4320 = vmatpush.bf16.msrb.mxu1 %v13804_v48  ;;  %v13815_v48 = vld [vmem:[#allocation12_spill] sm:$0xff] }
 0x1fd   : > { %4355 = vmatpush.bf16.msrb.mxu2 %v13805_v49  ;;  %v13816_v49 = vld [vmem:[#allocation13_spill] sm:$0xff] }
 0x1ff   : > { %4369 = vmatpush.bf16.msrb.mxu3 %v13806_v26  ;;  %4307 = vmatpush.bf16.msrb.mxu0 %v13807_v13  ;;  %v13817_v26 = vld [vmem:[#allocation38_spill] sm:$0xff] }
 0x200   : > { %4321 = vmatpush.bf16.msrb.mxu1 %v13808_v41  ;;  %v13819_v13 = vld [vmem:[#allocation14_spill] sm:$0xff]  ;;  %v13820_v41 = vld [vmem:[#allocation15_spill] sm:$0xff] }
 0x201   : > { %v4346_v19 = vld [vmem:[#allocation1] sm:$0xff]  ;;  %v4347_v22 = vld [vmem:[#allocation1 + $0x9] sm:$0xff] }
 0x202   : > { %4380 = vst [vmem:[#allocation1] ss:$9 sm:$0xff] %v10724_v33  ;;  %v13809_v33 = vld [vmem:[#allocation30_spill] sm:$0xff] }
 0x203   : > { %4382 = vst [vmem:[#allocation1 + $0x1] ss:$9 sm:$0xff] %v10809_v54  ;;  %4356 = vmatpush.bf16.msrb.mxu2 %v13809_v33  ;;  %4370 = vmatpush.bf16.msrb.mxu3 %v13810_v44  ;;  %v13821_v33 = vld [vmem:[#allocation42_spill] sm:$0xff]  ;;  %v13822_v44 = vld [vmem:[#allocation43_spill] sm:$0xff] }
 0x204   : > { %4384 = vst [vmem:[#allocation1 + $0x2] ss:$9 sm:$0xff] %v10814_v55  ;;  %4308 = vmatpush.bf16.msrb.mxu0 %v13811_v11  ;;  %4322 = vmatpush.bf16.msrb.mxu1 %v13812_v12  ;;  %v13823_v11 = vld [vmem:[#allocation16_spill] sm:$0xff]  ;;  %v13824_v12 = vld [vmem:[#allocation17_spill] sm:$0xff] }
 0x205   : > { %4386 = vst [vmem:[#allocation1 + $0x3] ss:$9 sm:$0xff] %v10819_v56 }
 0x206   : > { %4388 = vst [vmem:[#allocation1 + $0x4] ss:$9 sm:$0xff] %v10824_v57 }
 0x207   : > { %4390 = vst [vmem:[#allocation1 + $0x5] ss:$9 sm:$0xff] %v11140_v61  ;;  %4357 = vmatpush.bf16.msrb.mxu2 %v13813_v18  ;;  %4371 = vmatpush.bf16.msrb.mxu3 %v13814_v23  ;;  %v13825_v23 = vld [vmem:[#allocation46_spill] sm:$0xff] }
 0x208   : > { %4395 = vmatpush.bf16.msra.mxu0 %v13815_v48  ;;  %4409 = vmatpush.bf16.msra.mxu1 %v13816_v49  ;;  %v13826_v48 = vld [vmem:[#allocation47_spill] sm:$0xff] }
 0x209   : > { %4309 = vmatmul.bf16.vlgmr.msrb.gmra.mxu0 %v4297_v37  ;;  %4323 = vmatmul.bf16.vlgmr.msrb.gmra.mxu1 %v4298_v58  ;;  %v11590_v37 = vpop.f32.mrf.mxu2  ;;  %v11592_v58 = vpop.f32.mrf.mxu3 }
 0x20a   : > { %4358 = vmatmul.bf16.vlgmr.msrb.gmra.mxu2 %v4346_v19  ;;  %4372 = vmatmul.bf16.vlgmr.msrb.gmra.mxu3 %v4347_v22  ;;  %v3165_v19 = vpop.f32.mrf.mxu0  ;;  %v3179_v22 = vpop.f32.mrf.mxu1 }
 0x20b   : > { %4440 = vmatpush.bf16.msra.mxu2 %v13817_v26  ;;  %4454 = vmatpush.bf16.msra.mxu3 %v13818_v27  ;;  %v3180_v18 = vadd.f32 %v3179_v22, %v3165_v19  ;;  %v13827_v26 = vld [vmem:[#allocation20_spill] sm:$0xff]  ;;  %v13828_v27 = vld [vmem:[#allocation21_spill] sm:$0xff] }
 0x20c   : > { %4396 = vmatpush.bf16.msra.mxu0 %v13819_v13  ;;  %4410 = vmatpush.bf16.msra.mxu1 %v13820_v41  ;;  %v13829_v13 = vld [vmem:[#allocation50_spill] sm:$0xff]  ;;  %v13830_v41 = vld [vmem:[#allocation51_spill] sm:$0xff]  ;;  %v13832_v19 = vld [vmem:[#allocation25_spill] sm:$0xff] }
 0x20d   : > { %v3184_v49 = vadd.f32 %v3180_v18, %v3002_v59  ;;  %v13834_v59 = vld [vmem:[#allocation55_spill] sm:$0xff] }
 0x20e   : > { %v11579_v20 = vld [vmem:[#allocation1] sm:$0xff]  ;;  %v11581_v52 = vld [vmem:[#allocation1 + $0x9] sm:$0xff] }
 0x20f   : > { %4425 = vst [vmem:[#allocation1] ss:$9 sm:$0xff] %v10973_v29  ;;  %4441 = vmatpush.bf16.msra.mxu2 %v13821_v33  ;;  %4455 = vmatpush.bf16.msra.mxu3 %v13822_v44 }
 0x210   : > { %4427 = vst [vmem:[#allocation1 + $0x1] ss:$9 sm:$0xff] %v10980_v4  ;;  %4397 = vmatpush.bf16.msra.mxu0 %v13823_v11  ;;  %4411 = vmatpush.bf16.msra.mxu1 %v13824_v12  ;;  %v13831_v11 = vld [vmem:[#allocation24_spill] sm:$0xff] }
 0x211   : > { %4429 = vst [vmem:[#allocation1 + $0x2] ss:$9 sm:$0xff] %v10993_v21  ;;  %v3340_v22 = vpop.f32.mrf.mxu2  ;;  %v3354_v12 = vpop.f32.mrf.mxu3 }
 0x212   : > { %4431 = vst [vmem:[#allocation1 + $0x3] ss:$9 sm:$0xff] %v10999_v24  ;;  %v3355_v18 = vadd.f32 %v3354_v12, %v3340_v22  ;;  %v13841_v22 = vld [vmem:[#allocation33_spill] sm:$0xff]  ;;  %v13842_v12 = vld [vmem:[#allocation62_spill] sm:$0xff] }
 0x213   : > { %4433 = vst [vmem:[#allocation1 + $0x4] ss:$9 sm:$0xff] %v11005_v25  ;;  %4442 = vmatpush.bf16.msra.mxu2 %v13825_v23  ;;  %4456 = vmatpush.bf16.msra.mxu3 %v13826_v48  ;;  %v13833_v23 = vld [vmem:[#allocation54_spill] sm:$0xff] }
 0x214   : > { %4435 = vst [vmem:[#allocation1 + $0x5] ss:$9 sm:$0xff] %v11207_v14  ;;  %4398 = vmatpush.bf16.msra.mxu0 %v13827_v26  ;;  %4412 = vmatpush.bf16.msra.mxu1 %v13828_v27  ;;  %v11615_v48 = vld [vmem:[%s13473_s0 + $0x66] sm:$0x3]  ;;  %v3359_v26 = vadd.f32 %v3355_v18, %v3184_v49  ;;  %v13836_v27 = vld [vmem:[#allocation28_spill] sm:$0xff]  ;;  %v13843_v49 = vld [vmem:[#allocation63_spill] sm:$0xff] }
 0x215   : > { %13835 = vst [vmem:[#allocation19_spill] sm:$0xff] %v11615_v48 }
 0x217   : > { %4443 = vmatpush.bf16.msra.mxu2 %v13829_v13  ;;  %4457 = vmatpush.bf16.msra.mxu3 %v13830_v41  ;;  %v13837_v13 = vld [vmem:[#allocation29_spill] sm:$0xff]  ;;  %v13838_v41 = vld [vmem:[#allocation58_spill] sm:$0xff] }
 0x218   : > { %4399 = vmatpush.bf16.msra.mxu0 %v13831_v11  ;;  %4413 = vmatpush.bf16.msra.mxu1 %v13832_v19  ;;  %v13839_v11 = vld [vmem:[#allocation59_spill] sm:$0xff]  ;;  %v13840_v19 = vld [vmem:[#allocation32_spill] sm:$0xff] }
 0x21b   : > { %v4436_v33 = vld [vmem:[#allocation1] sm:$0xff]  ;;  %v4437_v44 = vld [vmem:[#allocation1 + $0x9] sm:$0xff]  ;;  %4444 = vmatpush.bf16.msra.mxu2 %v13833_v23  ;;  %4458 = vmatpush.bf16.msra.mxu3 %v13834_v59  ;;  %v13845_v59 = vld [vmem:[#allocation37_spill] sm:$0xff] }
 0x21c   : > { %4470 = vst [vmem:[#allocation1] ss:$9 sm:$0xff] %v11508_v36  ;;  %4400 = vmatpush.bf16.msra.mxu0 %v13836_v27  ;;  %4414 = vmatpush.bf16.msra.mxu1 %v13837_v13  ;;  %v13844_v23 = vld [vmem:[#allocation36_spill] sm:$0xff]  ;;  %v11634_v13 = vpop.f32.mrf.mxu0 }
 0x21d   : > { %4472 = vst [vmem:[#allocation1 + $0x1] ss:$9 sm:$0xff] %v11513_v40 }
 0x21e   : > { %4474 = vst [vmem:[#allocation1 + $0x2] ss:$9 sm:$0xff] %v11518_v62 }
 0x21f   : > { %4476 = vst [vmem:[#allocation1 + $0x3] ss:$9 sm:$0xff] %v11531_v2  ;;  %4445 = vmatpush.bf16.msra.mxu2 %v13838_v41  ;;  %4459 = vmatpush.bf16.msra.mxu3 %v13839_v11  ;;  %v11636_v41 = vpop.f32.mrf.mxu1  ;;  %v13846_v11 = vld [vmem:[#allocation40_spill] sm:$0xff] }
 0x220   : > { %4478 = vst [vmem:[#allocation1 + $0x4] ss:$9 sm:$0xff] %v11539_v3  ;;  %4401 = vmatpush.bf16.msra.mxu0 %v13840_v19  ;;  %4415 = vmatpush.bf16.msra.mxu1 %v13841_v22  ;;  %v13847_v19 = vld [vmem:[#allocation41_spill] sm:$0xff]  ;;  %v13848_v22 = vld [vmem:[#allocation66_spill] sm:$0xff] }
 0x221   : > { %4481 = vst [vmem:[#allocation1 + $0x5] ss:$9 sm:$0xff] %v11615_v48 }
 0x223   : > { %4446 = vmatpush.bf16.msra.mxu2 %v13842_v12  ;;  %4460 = vmatpush.bf16.msra.mxu3 %v13843_v49  ;;  %v13849_v12 = vld [vmem:[#allocation67_spill] sm:$0xff]  ;;  %v13856_v49 = vld [vmem:[#allocation76_spill] sm:$0xff] }
 0x224   : > { %4402 = vmatpush.bf16.msra.mxu0 %v13844_v23  ;;  %4416 = vmatpush.bf16.msra.mxu1 %v13845_v59  ;;  %v13857_v23 = vld [vmem:[#allocation77_spill] sm:$0xff] }
 0x227   : > { %4447 = vmatpush.bf16.msra.mxu2 %v11223_v60  ;;  %4461 = vmatpush.bf16.msra.mxu3 %v11226_v0  ;;  %v13851_v60 = vld [vmem:[#allocation45_spill] sm:$0xff]  ;;  %v3515_v0 = vpop.f32.mrf.mxu0 }
 0x228   : > { %v11630_v18 = vld [vmem:[#allocation1] sm:$0xff]  ;;  %v11632_v27 = vld [vmem:[#allocation1 + $0x9] sm:$0xff]  ;;  %4486 = vmatpush.bf16.msrb.mxu0 %v13846_v11  ;;  %4500 = vmatpush.bf16.msrb.mxu1 %v13847_v19 }
 0x229   : > { %4516 = vst [vmem:[#allocation1] ss:$9 sm:$0xff] %v10809_v54  ;;  %4403 = vmatmul.bf16.vlgmr.msra.gmra.mxu0 %v11579_v20  ;;  %4417 = vmatmul.bf16.vlgmr.msra.gmra.mxu1 %v11581_v52  ;;  %v13850_v54 = vld [vmem:[#allocation44_spill] sm:$0xff]  ;;  %v13853_v52 = vld [vmem:[#allocation49_spill] sm:$0xff] }
 0x22a   : > { %4518 = vst [vmem:[#allocation1 + $0x1] ss:$9 sm:$0xff] %v10814_v55  ;;  %4448 = vmatmul.bf16.vlgmr.msra.gmra.mxu2 %v4436_v33  ;;  %4462 = vmatmul.bf16.vlgmr.msra.gmra.mxu3 %v4437_v44  ;;  %v11656_v55 = vpop.f32.mrf.mxu2  ;;  %v13852_v20 = vld [vmem:[#allocation48_spill] sm:$0xff] }
 0x22b   : > { %4531 = vmatpush.bf16.msrb.mxu2 %v13848_v22  ;;  %4545 = vmatpush.bf16.msrb.mxu3 %v13849_v12  ;;  %4520 = vst [vmem:[#allocation1 + $0x2] ss:$9 sm:$0xff] %v10819_v56  ;;  %v11658_v56 = vpop.f32.mrf.mxu3  ;;  %v13854_v44 = vld [vmem:[#allocation52_spill] sm:$0xff]  ;;  %v13861_v22 = vld [vmem:[#allocation81_spill] sm:$0xff] }
 0x22c   : > { %4522 = vst [vmem:[#allocation1 + $0x3] ss:$9 sm:$0xff] %v10824_v57  ;;  %4487 = vmatpush.bf16.msrb.mxu0 %v13850_v54  ;;  %4501 = vmatpush.bf16.msrb.mxu1 %v13851_v60  ;;  %v3529_v57 = vpop.f32.mrf.mxu1  ;;  %v13860_v19 = vld [vmem:[#allocation80_spill] sm:$0xff]  ;;  %v13863_v60 = vld [vmem:[#allocation61_spill] sm:$0xff] }
 0x22d   : > { %4524 = vst [vmem:[#allocation1 + $0x4] ss:$9 sm:$0xff] %v11140_v61  ;;  %v3530_v61 = vadd.f32 %v3529_v57, %v3515_v0  ;;  %v13862_v54 = vld [vmem:[#allocation60_spill] sm:$0xff]  ;;  %v13865_v57 = vld [vmem:[#allocation85_spill] sm:$0xff] }
 0x22e   : > { %4526 = vst [vmem:[#allocation1 + $0x5] ss:$9 sm:$0xff] %v11338_v31  ;;  %v13864_v0 = vld [vmem:[#allocation84_spill] sm:$0xff] }
 0x22f   : > { %4532 = vmatpush.bf16.msrb.mxu2 %v11253_v5  ;;  %4546 = vmatpush.bf16.msrb.mxu3 %v11258_v28  ;;  %v3534_v31 = vadd.f32 %v3530_v61, %v3359_v26  ;;  %v13855_v28 = vld [vmem:[#allocation53_spill] sm:$0xff] }
 0x230   : > { %4488 = vmatpush.bf16.msrb.mxu0 %v13852_v20  ;;  %4502 = vmatpush.bf16.msrb.mxu1 %v13853_v52  ;;  %v13859_v26 = vld [vmem:[#allocation57_spill] sm:$0xff]  ;;  %v13866_v20 = vld [vmem:[#allocation64_spill] sm:$0xff] }
 0x231   : > { %v13867_v52 = vld [vmem:[#allocation65_spill] sm:$0xff] }
 0x232   : > { %v3690_v59 = vpop.f32.mrf.mxu2 }
 0x233   : > { %4533 = vmatpush.bf16.msrb.mxu2 %v11278_v15  ;;  %4547 = vmatpush.bf16.msrb.mxu3 %v11281_v1  ;;  %v3704_v11 = vpop.f32.mrf.mxu3  ;;  %v13858_v1 = vld [vmem:[#allocation56_spill] sm:$0xff] }
 0x234   : > { %4489 = vmatpush.bf16.msrb.mxu0 %v13854_v44  ;;  %4503 = vmatpush.bf16.msrb.mxu1 %v13855_v28  ;;  %v3705_v15 = vadd.f32 %v3704_v11, %v3690_v59  ;;  %v13868_v28 = vld [vmem:[#allocation88_spill] sm:$0xff]  ;;  %v13872_v59 = vld [vmem:[#allocation69_spill] sm:$0xff]  ;;  %v11701_v11 = vpop.f32.mrf.mxu0 }
 0x235   : > { %v4527_v33 = vld [vmem:[#allocation1] sm:$0xff]  ;;  %v4528_v5 = vld [vmem:[#allocation1 + $0x9] sm:$0xff] }
 0x236   : > { %4561 = vst [vmem:[#allocation1] ss:$9 sm:$0xff] %v10980_v4  ;;  %v3709_v12 = vadd.f32 %v3705_v15, %v3534_v31  ;;  %v13869_v31 = vld [vmem:[#allocation89_spill] sm:$0xff]  ;;  %v11703_v15 = vpop.f32.mrf.mxu1 }
 0x237   : > { %4534 = vmatpush.bf16.msrb.mxu2 %v13856_v49  ;;  %4548 = vmatpush.bf16.msrb.mxu3 %v13857_v23  ;;  %4563 = vst [vmem:[#allocation1 + $0x1] ss:$9 sm:$0xff] %v10993_v21  ;;  %v11696_v49 = vld [vmem:[%s13473_s0 + $0x76] sm:$0x3] }
 0x238   : > { %4565 = vst [vmem:[#allocation1 + $0x2] ss:$9 sm:$0xff] %v10999_v24  ;;  %4490 = vmatpush.bf16.msrb.mxu0 %v13858_v1  ;;  %4504 = vmatpush.bf16.msrb.mxu1 %v13859_v26  ;;  %v13871_v23 = vld [vmem:[#allocation68_spill] sm:$0xff]  ;;  %v13873_v1 = vld [vmem:[#allocation70_spill] sm:$0xff]  ;;  %v13874_v26 = vld [vmem:[#allocation71_spill] sm:$0xff] }
 0x239   : > { %4567 = vst [vmem:[#allocation1 + $0x3] ss:$9 sm:$0xff] %v11005_v25 }
 0x23a   : > { %4569 = vst [vmem:[#allocation1 + $0x4] ss:$9 sm:$0xff] %v11207_v14 }
 0x23b   : > { %4535 = vmatpush.bf16.msrb.mxu2 %v13860_v19  ;;  %4549 = vmatpush.bf16.msrb.mxu3 %v13861_v22  ;;  %4571 = vst [vmem:[#allocation1 + $0x5] ss:$9 sm:$0xff] %v11399_v10  ;;  %v11719_v19 = vpop.f32.mrf.mxu2  ;;  %v11721_v22 = vpop.f32.mrf.mxu3 }
 0x23c   : > { %4491 = vmatpush.bf16.msrb.mxu0 %v13862_v54  ;;  %4505 = vmatpush.bf16.msrb.mxu1 %v13863_v60  ;;  %13870 = vst [vmem:[#allocation4_spill] sm:$0xff] %v11696_v49  ;;  %v13877_v60 = vld [vmem:[#allocation74_spill] sm:$0xff] }
 0x23f   : > { %4536 = vmatpush.bf16.msrb.mxu2 %v13864_v0  ;;  %4550 = vmatpush.bf16.msrb.mxu3 %v13865_v57  ;;  %v13882_v57 = vld [vmem:[#allocation83_spill] sm:$0xff] }
 0x240   : > { %4492 = vmatpush.bf16.msrb.mxu0 %v13866_v20  ;;  %4506 = vmatpush.bf16.msrb.mxu1 %v13867_v52  ;;  %v13883_v52 = vld [vmem:[#allocation86_spill] sm:$0xff] }
 0x242   : > { %v11684_v61 = vld [vmem:[#allocation1] sm:$0xff]  ;;  %v11686_v44 = vld [vmem:[#allocation1 + $0x9] sm:$0xff] }
 0x243   : > { %4537 = vmatpush.bf16.msrb.mxu2 %v13868_v28  ;;  %4551 = vmatpush.bf16.msrb.mxu3 %v13869_v31  ;;  %4606 = vst [vmem:[#allocation1] ss:$9 sm:$0xff] %v11513_v40  ;;  %v13886_v28 = vld [vmem:[#allocation91_spill] sm:$0xff] }
 0x244   : > { %4608 = vst [vmem:[#allocation1 + $0x1] ss:$9 sm:$0xff] %v11518_v62  ;;  %4493 = vmatpush.bf16.msrb.mxu0 %v13871_v23  ;;  %4507 = vmatpush.bf16.msrb.mxu1 %v13872_v59  ;;  %v9738_v23 = vld [vmem:[%s10726_s9 + $0x78] sm:$0xff]  ;;  %v9741_v59 = vld [vmem:[%s10726_s9 + $0x30] sm:$0xff] }
 0x245   : > { %4610 = vst [vmem:[#allocation1 + $0x2] ss:$9 sm:$0xff] %v11531_v2 }
 0x246   : > { %4612 = vst [vmem:[#allocation1 + $0x3] ss:$9 sm:$0xff] %v11539_v3 }
 0x247   : > { %4538 = vmatpush.bf16.msrb.mxu2 %v11370_v8  ;;  %4552 = vmatpush.bf16.msrb.mxu3 %v11373_v17  ;;  %4614 = vst [vmem:[#allocation1 + $0x4] ss:$9 sm:$0xff] %v11615_v48  ;;  %v13875_v8 = vld [vmem:[#allocation72_spill] sm:$0xff]  ;;  %v13876_v17 = vld [vmem:[#allocation73_spill] sm:$0xff] }
 0x248   : > { %4576 = vmatpush.bf16.msra.mxu0 %v13873_v1  ;;  %4590 = vmatpush.bf16.msra.mxu1 %v13874_v26  ;;  %4617 = vst [vmem:[#allocation1 + $0x5] ss:$9 sm:$0xff] %v11696_v49  ;;  %v9742_v1 = vld [vmem:[%s10726_s9 + $0x70] sm:$0xff] }
 0x249   : > { %4494 = vmatmul.bf16.vlgmr.msrb.gmra.mxu0 %v11630_v18  ;;  %4508 = vmatmul.bf16.vlgmr.msrb.gmra.mxu1 %v11632_v27  ;;  %v13878_v27 = vld [vmem:[#allocation75_spill] sm:$0xff] }
 0x24a   : > { %4539 = vmatmul.bf16.vlgmr.msrb.gmra.mxu2 %v4527_v33  ;;  %4553 = vmatmul.bf16.vlgmr.msrb.gmra.mxu3 %v4528_v5  ;;  %v13880_v5 = vld [vmem:[#allocation79_spill] sm:$0xff] }
 0x24b   : > { %4622 = vmatpush.bf16.msra.mxu2 %v11384_v30  ;;  %4636 = vmatpush.bf16.msra.mxu3 %v11387_v16  ;;  %v3865_v30 = vpop.f32.mrf.mxu0  ;;  %v3879_v16 = vpop.f32.mrf.mxu1 }
 0x24c   : > { %4577 = vmatpush.bf16.msra.mxu0 %v13875_v8  ;;  %4591 = vmatpush.bf16.msra.mxu1 %v13876_v17  ;;  %v3880_v33 = vadd.f32 %v3879_v16, %v3865_v30  ;;  %v13889_v17 = vld [vmem:[#allocation18_spill] sm:$0xff] }
 0x24f   : > { %4623 = vmatpush.bf16.msra.mxu2 %v11405_v7  ;;  %4637 = vmatpush.bf16.msra.mxu3 %v11408_v6  ;;  %v4618_v54 = vld [vmem:[#allocation1] sm:$0xff]  ;;  %v4619_v18 = vld [vmem:[#allocation1 + $0x9] sm:$0xff]  ;;  %v3884_v7 = vadd.f32 %v3880_v33, %v3709_v12 }
 0x250   : > { %4578 = vmatpush.bf16.msra.mxu0 %v13877_v60  ;;  %4592 = vmatpush.bf16.msra.mxu1 %v13878_v27  ;;  %4658 = vst [vmem:[#allocation1] ss:$9 sm:$0xff] %v11503_v32  ;;  %v13879_v6 = vld [vmem:[#allocation78_spill] sm:$0xff]  ;;  %v9745_v27 = vld [vmem:[%s10726_s9 + $0x28] sm:$0xff] }
 0x251   : > { %4660 = vst [vmem:[#allocation1 + $0x1] ss:$9 sm:$0xff] %v11508_v36  ;;  %v13881_v12 = vld [vmem:[#allocation82_spill] sm:$0xff]  ;;  %v9746_v33 = vld [vmem:[%s10726_s9 + $0x68] sm:$0xff] }
 0x252   : > { %4662 = vst [vmem:[#allocation1 + $0x2] ss:$9 sm:$0xff] %v11513_v40  ;;  %v12142_v32 = vld [vmem:[%s10726_s9 + $0x78] sm:$0xff] }
 0x253   : > { %4624 = vmatpush.bf16.msra.mxu2 %v11417_v53  ;;  %4638 = vmatpush.bf16.msra.mxu3 %v11420_v34  ;;  %4664 = vst [vmem:[#allocation1 + $0x3] ss:$9 sm:$0xff] %v11518_v62  ;;  %v4040_v53 = vpop.f32.mrf.mxu2  ;;  %v4054_v34 = vpop.f32.mrf.mxu3 }
 0x254   : > { %4579 = vmatpush.bf16.msra.mxu0 %v13879_v6  ;;  %4593 = vmatpush.bf16.msra.mxu1 %v13880_v5  ;;  %4666 = vst [vmem:[#allocation1 + $0x4] ss:$9 sm:$0xff] %v11531_v2  ;;  %v4055_v0 = vadd.f32 %v4054_v34, %v4040_v53  ;;  %v11751_v31 = vpop.f32.mrf.mxu0  ;;  %v9747_v6 = vld [vmem:[%s10726_s9 + $0xa0] sm:$0xff] }
 0x255   : > { %4668 = vst [vmem:[#allocation1 + $0x5] ss:$9 sm:$0xff] %v11539_v3  ;;  %v9748_v5 = vld [vmem:[%s10726_s9 + $0xe0] sm:$0xff] }
 0x256   : > { %v4059_v20 = vadd.f32 %v4055_v0, %v3884_v7  ;;  %v9749_v53 = vld [vmem:[%s10726_s9 + $0x20] sm:$0xff]  ;;  %13909 = vst [vmem:[#allocation14_spill] sm:$0xff] %v12142_v32 }
 0x257   : > { %4625 = vmatpush.bf16.msra.mxu2 %v11427_v35  ;;  %4639 = vmatpush.bf16.msra.mxu3 %v11430_v9  ;;  %v13884_v35 = vld [vmem:[#allocation87_spill] sm:$0xff]  ;;  %v13885_v9 = vld [vmem:[#allocation90_spill] sm:$0xff] }
 0x258   : > { %4580 = vmatpush.bf16.msra.mxu0 %v13881_v12  ;;  %4594 = vmatpush.bf16.msra.mxu1 %v13882_v57  ;;  %v9750_v34 = vld [vmem:[%s10726_s9 + $0x60] sm:$0xff] }
 0x25b   : > { %4626 = vmatpush.bf16.msra.mxu2 %v11439_v38  ;;  %4640 = vmatpush.bf16.msra.mxu3 %v11442_v39  ;;  %v13887_v38 = vld [vmem:[#allocation92_spill] sm:$0xff]  ;;  %v13888_v39 = vld [vmem:[#allocation93_spill] sm:$0xff] }
 0x25c   : > { %4581 = vmatpush.bf16.msra.mxu0 %v13883_v52  ;;  %4595 = vmatpush.bf16.msra.mxu1 %v13884_v35  ;;  %v11767_v26 = vld [vmem:[#allocation1] sm:$0xff]  ;;  %v11769_v8 = vld [vmem:[#allocation1 + $0x9] sm:$0xff] }
 0x25d   : > { %4701 = vst [vmem:[#allocation1] ss:$9 sm:$0xff] %v13889_v17  ;;  %v9752_v52 = vld [vmem:[%s10726_s9 + $0xd8] sm:$0xff]  ;;  %v11798_v35 = vld [vmem:[%s13473_s0 + $0x8] sm:$0x3] }
 0x25e   : > { %4703 = vst [vmem:[#allocation1 + $0x1] ss:$9 sm:$0xff] %v10973_v29  ;;  %v11831_v17 = vld [vmem:[%s13473_s0 + $0x58] sm:$0x3] }
 0x25f   : > { %4627 = vmatpush.bf16.msra.mxu2 %v11453_v42  ;;  %4641 = vmatpush.bf16.msra.mxu3 %v11456_v43  ;;  %v11753_v42 = vpop.f32.mrf.mxu1  ;;  %v9735_v43 = vld [vmem:[%s10726_s9 + $0xb8] sm:$0xff]  ;;  %4705 = vst [vmem:[#allocation1 + $0x2] ss:$9 sm:$0xff] %v10980_v4 }
 0x260   : > { %4582 = vmatpush.bf16.msra.mxu0 %v13885_v9  ;;  %4596 = vmatpush.bf16.msra.mxu1 %v13886_v28  ;;  %4707 = vst [vmem:[#allocation1 + $0x3] ss:$9 sm:$0xff] %v10993_v21  ;;  %v9753_v9 = vld [vmem:[%s10726_s9 + $0x18] sm:$0xff] }
 0x261   : > { %4709 = vst [vmem:[#allocation1 + $0x4] ss:$9 sm:$0xff] %v10999_v24  ;;  %v9754_v28 = vld [vmem:[%s10726_s9 + $0x58] sm:$0xff] }
 0x262   : > { %4711 = vst [vmem:[#allocation1 + $0x5] ss:$9 sm:$0xff] %v11005_v25 }
 0x263   : > { %4628 = vmatpush.bf16.msra.mxu2 %v11463_v46  ;;  %4642 = vmatpush.bf16.msra.mxu3 %v11466_v47  ;;  %v9736_v46 = vld [vmem:[%s10726_s9 + $0xf8] sm:$0xff]  ;;  %v4215_v30 = vpop.f32.mrf.mxu0  ;;  %13890 = vst [vmem:[#allocation5_spill] sm:$0xff] %v11798_v35 }
 0x264   : > { %4583 = vmatpush.bf16.msra.mxu0 %v13887_v38  ;;  %4597 = vmatpush.bf16.msra.mxu1 %v13888_v39  ;;  %v9737_v47 = vld [vmem:[%s10726_s9 + $0x38] sm:$0xff]  ;;  %v11805_v38 = vld [vmem:[%s13473_s0 + $0x18] sm:$0x3]  ;;  %13895 = vst [vmem:[#allocation26_spill] sm:$0xff] %v11831_v17 }
 0x265   : > { %13891 = vst [vmem:[#allocation22_spill] sm:$0xff] %v11805_v38 }
 0x267   : > { %4629 = vmatpush.bf16.msra.mxu2 %v11473_v50  ;;  %4643 = vmatpush.bf16.msra.mxu3 %v11476_v51  ;;  %v9739_v50 = vld [vmem:[%s10726_s9 + $0xb0] sm:$0xff]  ;;  %v4229_v16 = vpop.f32.mrf.mxu1 }
 0x268   : > { %4673 = vmatpush.bf16.msrb.mxu0 %v9735_v43  ;;  %4687 = vmatpush.bf16.msrb.mxu1 %v9736_v46  ;;  %v9740_v51 = vld [vmem:[%s10726_s9 + $0xf0] sm:$0xff]  ;;  %v4230_v60 = vadd.f32 %v4229_v16, %v4215_v30  ;;  %v11810_v46 = vld [vmem:[%s13473_s0 + $0x28] sm:$0x3]  ;;  %v9759_v30 = vld [vmem:[%s10726_s9 + $0x88] sm:$0xff] }
 0x269   : > { %4584 = vmatmul.bf16.vlgmr.msra.gmra.mxu0 %v11684_v61  ;;  %4598 = vmatmul.bf16.vlgmr.msra.gmra.mxu1 %v11686_v44  ;;  %v11771_v61 = vpop.f32.mrf.mxu2  ;;  %v11773_v44 = vpop.f32.mrf.mxu3  ;;  %v4712_v39 = vld [vmem:[#allocation1] sm:$0xff]  ;;  %v4713_v43 = vld [vmem:[#allocation1 + $0x9] sm:$0xff]  ;;  %13892 = vst [vmem:[#allocation23_spill] sm:$0xff] %v11810_v46 }
 0x26a   : > { %4630 = vmatmul.bf16.vlgmr.msra.gmra.mxu2 %v4618_v54  ;;  %4644 = vmatmul.bf16.vlgmr.msra.gmra.mxu3 %v4619_v18  ;;  %v9743_v54 = vld [vmem:[%s10726_s9 + $0xa8] sm:$0xff]  ;;  %v11783_v7 = vadd.f32 %v4230_v60, %v4059_v20  ;;  %v9751_v20 = vld [vmem:[%s10726_s9 + $0x98] sm:$0xff]  ;;  %4745 = vst [vmem:[#allocation1] ss:$9 sm:$0xff] %v11798_v35  ;;  %v9763_v60 = vld [vmem:[%s10726_s9 + $0x80] sm:$0xff] }
 0x26b   : > { %4716 = vmatpush.bf16.msrb.mxu2 %v9737_v47  ;;  %4730 = vmatpush.bf16.msrb.mxu3 %v9738_v23  ;;  %v9744_v18 = vld [vmem:[%s10726_s9 + $0xe8] sm:$0xff]  ;;  %v11815_v47 = vld [vmem:[%s13473_s0 + $0x38] sm:$0x3]  ;;  %4748 = vst [vmem:[#allocation1 + $0x1] ss:$9 sm:$0xff] %v11805_v38  ;;  %v12187_v35 = vld [vmem:[%s10726_s9 + $0x60] sm:$0xff] }
 0x26c   : > { %4674 = vmatpush.bf16.msrb.mxu0 %v9739_v50  ;;  %4688 = vmatpush.bf16.msrb.mxu1 %v9740_v51  ;;  %13893 = vst [vmem:[#allocation6_spill] sm:$0xff] %v11815_v47  ;;  %v9755_v23 = vld [vmem:[%s10726_s9 + $0x90] sm:$0xff]  ;;  %v11823_v51 = vld [vmem:[%s13473_s0 + $0x48] sm:$0x3]  ;;  %v9760_v16 = vld [vmem:[%s10726_s9 + $0xc8] sm:$0xff] }
 0x26d   : > { %v9756_v50 = vld [vmem:[%s10726_s9 + $0xd0] sm:$0xff]  ;;  %13894 = vst [vmem:[#allocation7_spill] sm:$0xff] %v11823_v51 }
 0x26e   : > { %4751 = vst [vmem:[#allocation1 + $0x2] ss:$9 sm:$0xff] %v11810_v46 }
 0x26f   : > { %4717 = vmatpush.bf16.msrb.mxu2 %v9741_v59  ;;  %4731 = vmatpush.bf16.msrb.mxu3 %v9742_v1  ;;  %v9757_v59 = vld [vmem:[%s10726_s9 + $0x10] sm:$0xff]  ;;  %4754 = vst [vmem:[#allocation1 + $0x3] ss:$9 sm:$0xff] %v11815_v47 }
 0x270   : > { %4675 = vmatpush.bf16.msrb.mxu0 %v9743_v54  ;;  %4689 = vmatpush.bf16.msrb.mxu1 %v9744_v18  ;;  %v9758_v1 = vld [vmem:[%s10726_s9 + $0x50] sm:$0xff]  ;;  %4757 = vst [vmem:[#allocation1 + $0x4] ss:$9 sm:$0xff] %v11823_v51  ;;  %v9761_v54 = vld [vmem:[%s10726_s9 + $0x8] sm:$0xff] }
 0x271   : > { %v4267_v0 = vpop.f32.mrf.mxu2  ;;  %v4281_v12 = vpop.f32.mrf.mxu3  ;;  %4760 = vst [vmem:[#allocation1 + $0x5] ss:$9 sm:$0xff] %v11831_v17  ;;  %v9762_v18 = vld [vmem:[%s10726_s9 + $0x48] sm:$0xff] }
 0x272   : > { %v11791_v57 = vadd.f32 %v4281_v12, %v4267_v0  ;;  %v11849_v0 = vpop.f32.mrf.mxu1  ;;  %v9769_v12 = vld [vmem:[%s10726_s9 + $0x1b8] sm:$0xff]  ;;  %13919 = vst [vmem:[#allocation50_spill] sm:$0xff] %v12187_v35 }
 0x273   : > { %4718 = vmatpush.bf16.msrb.mxu2 %v9745_v27  ;;  %4732 = vmatpush.bf16.msrb.mxu3 %v9746_v33  ;;  %v9764_v27 = vld [vmem:[%s10726_s9 + $0xc0] sm:$0xff]  ;;  %v11843_v33 = vpop.f32.mrf.mxu0  ;;  %13897 = vst [vmem:[#allocation8_spill] sm:$0xff] %v11849_v0  ;;  %v9565_v0 = vld [vmem:[%s10726_s9 + $0x88] sm:$0xf0] }
 0x274   : > { %4676 = vmatpush.bf16.msrb.mxu0 %v9747_v6  ;;  %4690 = vmatpush.bf16.msrb.mxu1 %v9748_v5  ;;  %13896 = vst [vmem:[#allocation27_spill] sm:$0xff] %v11843_v33  ;;  %v9765_v6 = vld [vmem:[%s10726_s9] sm:$0xff] }
 0x275   : > { %v9766_v5 = vld [vmem:[%s10726_s9 + $0x40] sm:$0xff] }
 0x277   : > { %4719 = vmatpush.bf16.msrb.mxu2 %v9749_v53  ;;  %4733 = vmatpush.bf16.msrb.mxu3 %v9750_v34  ;;  %v9767_v53 = vld [vmem:[%s10726_s9 + $0x138] sm:$0xff] }
 0x278   : > { %4677 = vmatpush.bf16.msrb.mxu0 %v9751_v20  ;;  %4691 = vmatpush.bf16.msrb.mxu1 %v9752_v52  ;;  %v9768_v34 = vld [vmem:[%s10726_s9 + $0x178] sm:$0xff] }
 0x279   : > { %v9770_v20 = vld [vmem:[%s10726_s9 + $0x1f8] sm:$0xff] }
 0x27a   : > { %v11853_v52 = vld [vmem:[#allocation1] sm:$0xff] }
 0x27b   : > { %4720 = vmatpush.bf16.msrb.mxu2 %v9753_v9  ;;  %4734 = vmatpush.bf16.msrb.mxu3 %v9754_v28  ;;  %v11855_v9 = vld [vmem:[#allocation1 + $0x9] sm:$0xff]  ;;  %v9771_v28 = vld [vmem:[%s10726_s9 + $0x130] sm:$0xff] }
 0x27c   : > { %4678 = vmatpush.bf16.msrb.mxu0 %v9755_v23  ;;  %4692 = vmatpush.bf16.msrb.mxu1 %v9756_v50  ;;  %4795 = vst [vmem:[#allocation1] ss:$9 sm:$0xff] %v10973_v29  ;;  %v9772_v23 = vld [vmem:[%s10726_s9 + $0x170] sm:$0xff]  ;;  %v11863_v50 = vpop.f32.mrf.mxu2 }
 0x27d   : > { %4797 = vst [vmem:[#allocation1 + $0x1] ss:$9 sm:$0xff] %v10980_v4  ;;  %v9774_v29 = vld [vmem:[%s10726_s9 + $0x1f0] sm:$0xff] }
 0x27e   : > { %4799 = vst [vmem:[#allocation1 + $0x2] ss:$9 sm:$0xff] %v10993_v21 }
 0x27f   : > { %4721 = vmatpush.bf16.msrb.mxu2 %v9757_v59  ;;  %4735 = vmatpush.bf16.msrb.mxu3 %v9758_v1  ;;  %v11865_v59 = vpop.f32.mrf.mxu3  ;;  %4801 = vst [vmem:[#allocation1 + $0x3] ss:$9 sm:$0xff] %v10999_v24 }
 0x280   : > { %4679 = vmatpush.bf16.msrb.mxu0 %v9759_v30  ;;  %4693 = vmatpush.bf16.msrb.mxu1 %v9760_v16  ;;  %4803 = vst [vmem:[#allocation1 + $0x4] ss:$9 sm:$0xff] %v11005_v25  ;;  %v9777_v30 = vld [vmem:[%s10726_s9 + $0x1a8] sm:$0xff] }
 0x281   : > { %4805 = vst [vmem:[#allocation1 + $0x5] ss:$9 sm:$0xff] %v11207_v14  ;;  %v9778_v16 = vld [vmem:[%s10726_s9 + $0x1e8] sm:$0xff] }
 0x283   : > { %4722 = vmatpush.bf16.msrb.mxu2 %v9761_v54  ;;  %4736 = vmatpush.bf16.msrb.mxu3 %v9762_v18 }
 0x284   : > { %4680 = vmatpush.bf16.msrb.mxu0 %v9763_v60  ;;  %4694 = vmatpush.bf16.msrb.mxu1 %v9764_v27  ;;  %v9779_v60 = vld [vmem:[%s10726_s9 + $0x120] sm:$0xff] }
 0x285   : > { %v9780_v27 = vld [vmem:[%s10726_s9 + $0x160] sm:$0xff] }
 0x286   : > { %v4324_v54 = vpop.f32.mrf.mxu1 }
 0x287   : > { %4723 = vmatpush.bf16.msrb.mxu2 %v9765_v6  ;;  %4737 = vmatpush.bf16.msrb.mxu3 %v9766_v5  ;;  %v9781_v6 = vld [vmem:[%s10726_s9 + $0x1a0] sm:$0xff] }
 0x288   : > { %4765 = vmatpush.bf16.msra.mxu0 %v9767_v53  ;;  %4779 = vmatpush.bf16.msra.mxu1 %v9768_v34  ;;  %v9782_v5 = vld [vmem:[%s10726_s9 + $0x1e0] sm:$0xff]  ;;  %v4806_v34 = vld [vmem:[#allocation1] sm:$0xff] }
 0x289   : > { %4681 = vmatmul.bf16.vlgmr.msrb.gmra.mxu0 %v11767_v26  ;;  %4695 = vmatmul.bf16.vlgmr.msrb.gmra.mxu1 %v11769_v8  ;;  %v9773_v26 = vld [vmem:[%s10726_s9 + $0x1b0] sm:$0xff]  ;;  %v4310_v8 = vpop.f32.mrf.mxu0 }
 0x28a   : > { %4724 = vmatmul.bf16.vlgmr.msrb.gmra.mxu2 %v4712_v39  ;;  %4738 = vmatmul.bf16.vlgmr.msrb.gmra.mxu3 %v4713_v43  ;;  %v9775_v39 = vld [vmem:[%s10726_s9 + $0x128] sm:$0xff]  ;;  %v4311_v1 = vadd.f32 %v4310_v8, %v11791_v57 }
 0x28b   : > { %4810 = vmatpush.bf16.msra.mxu2 %v9769_v12  ;;  %4824 = vmatpush.bf16.msra.mxu3 %v9770_v20  ;;  %v9776_v43 = vld [vmem:[%s10726_s9 + $0x168] sm:$0xff] }
 0x28c   : > { %4766 = vmatpush.bf16.msra.mxu0 %v9771_v28  ;;  %4780 = vmatpush.bf16.msra.mxu1 %v9772_v23  ;;  %v4325_v18 = vadd.f32 %v4324_v54, %v4311_v1  ;;  %v4807_v12 = vld [vmem:[#allocation1 + $0x9] sm:$0xff]  ;;  %v9783_v28 = vld [vmem:[%s10726_s9 + $0x118] sm:$0xff]  ;;  %v9789_v1 = vld [vmem:[%s10726_s9 + $0x190] sm:$0xff] }
 0x28d   : > { %v4359_v53 = vpop.f32.mrf.mxu2  ;;  %v4373_v57 = vpop.f32.mrf.mxu3  ;;  %4840 = vst [vmem:[#allocation1] ss:$9 sm:$0xff] %v11508_v36  ;;  %v9784_v23 = vld [vmem:[%s10726_s9 + $0x158] sm:$0xff]  ;;  %v9792_v54 = vld [vmem:[%s10726_s9 + $0x148] sm:$0xff] }
 0x28e   : > { %v4374_v20 = vadd.f32 %v4373_v57, %v4359_v53  ;;  %4842 = vst [vmem:[#allocation1 + $0x1] ss:$9 sm:$0xff] %v11513_v40  ;;  %v9795_v57 = vld [vmem:[%s10726_s9 + $0x100] sm:$0xff]  ;;  %v9555_v36 = vld [vmem:[%s10726_s9 + $0x38] sm:$0xff] }
 0x28f   : > { %4811 = vmatpush.bf16.msra.mxu2 %v9773_v26  ;;  %4825 = vmatpush.bf16.msra.mxu3 %v9774_v29  ;;  %v9785_v26 = vld [vmem:[%s10726_s9 + $0x198] sm:$0xff]  ;;  %4844 = vst [vmem:[#allocation1 + $0x2] ss:$9 sm:$0xff] %v11518_v62 }
 0x290   : > { %4767 = vmatpush.bf16.msra.mxu0 %v9775_v39  ;;  %4781 = vmatpush.bf16.msra.mxu1 %v9776_v43  ;;  %v9786_v29 = vld [vmem:[%s10726_s9 + $0x1d8] sm:$0xff]  ;;  %v11888_v8 = vadd.f32 %v4374_v20, %v4325_v18  ;;  %4846 = vst [vmem:[#allocation1 + $0x3] ss:$9 sm:$0xff] %v11531_v2  ;;  %v9787_v39 = vld [vmem:[%s10726_s9 + $0x110] sm:$0xff]  ;;  %v9793_v18 = vld [vmem:[%s10726_s9 + $0x188] sm:$0xff] }
 0x291   : > { %4848 = vst [vmem:[#allocation1 + $0x4] ss:$9 sm:$0xff] %v11539_v3  ;;  %v9788_v43 = vld [vmem:[%s10726_s9 + $0x150] sm:$0xff]  ;;  %v9796_v20 = vld [vmem:[%s10726_s9 + $0x140] sm:$0xff] }
 0x292   : > { %4850 = vst [vmem:[#allocation1 + $0x5] ss:$9 sm:$0xff] %v11615_v48 }
 0x293   : > { %4812 = vmatpush.bf16.msra.mxu2 %v9777_v30  ;;  %4826 = vmatpush.bf16.msra.mxu3 %v9778_v16  ;;  %v9790_v30 = vld [vmem:[%s10726_s9 + $0x1d0] sm:$0xff]  ;;  %v9791_v16 = vld [vmem:[%s10726_s9 + $0x108] sm:$0xff] }
 0x294   : > { %4768 = vmatpush.bf16.msra.mxu0 %v9779_v60  ;;  %4782 = vmatpush.bf16.msra.mxu1 %v9780_v27  ;;  %v9794_v60 = vld [vmem:[%s10726_s9 + $0x1c8] sm:$0xff]  ;;  %v11902_v27 = vpop.f32.mrf.mxu0 }
 0x297   : > { %4813 = vmatpush.bf16.msra.mxu2 %v9781_v6  ;;  %4827 = vmatpush.bf16.msra.mxu3 %v9782_v5  ;;  %v11904_v6 = vpop.f32.mrf.mxu1 }
 0x298   : > { %4769 = vmatpush.bf16.msra.mxu0 %v9783_v28  ;;  %4783 = vmatpush.bf16.msra.mxu1 %v9784_v23  ;;  %v9797_v28 = vld [vmem:[%s10726_s9 + $0x180] sm:$0xff] }
 0x299   : > { %v11906_v5 = vld [vmem:[#allocation1] sm:$0xff]  ;;  %v11908_v53 = vld [vmem:[#allocation1 + $0x9] sm:$0xff] }
 0x29a   : > { %4885 = vst [vmem:[#allocation1] ss:$9 sm:$0xff] %v11805_v38  ;;  %v9798_v23 = vld [vmem:[%s10726_s9 + $0x1c0] sm:$0xff] }
 0x29b   : > { %4814 = vmatpush.bf16.msra.mxu2 %v9785_v26  ;;  %4828 = vmatpush.bf16.msra.mxu3 %v9786_v29  ;;  %4887 = vst [vmem:[#allocation1 + $0x1] ss:$9 sm:$0xff] %v11810_v46  ;;  %v9799_v26 = vld [vmem:[%s10726_s9 + $0x238] sm:$0xff]  ;;  %v12184_v38 = vld [vmem:[%s10726_s9 + $0x20] sm:$0xff] }
 0x29c   : > { %4770 = vmatpush.bf16.msra.mxu0 %v9787_v39  ;;  %4784 = vmatpush.bf16.msra.mxu1 %v9788_v43  ;;  %v9800_v29 = vld [vmem:[%s10726_s9 + $0x278] sm:$0xff]  ;;  %4889 = vst [vmem:[#allocation1 + $0x2] ss:$9 sm:$0xff] %v11815_v47  ;;  %v11922_v39 = vld [vmem:[%s13473_s0 + $0x68] sm:$0x3] }
 0x29d   : > { %13898 = vst [vmem:[#allocation9_spill] sm:$0xff] %v11922_v39  ;;  %v9801_v43 = vld [vmem:[%s10726_s9 + $0x2b8] sm:$0xff] }
 0x29e   : > { %4891 = vst [vmem:[#allocation1 + $0x3] ss:$9 sm:$0xff] %v11823_v51 }
 0x29f   : > { %4815 = vmatpush.bf16.msra.mxu2 %v9789_v1  ;;  %4829 = vmatpush.bf16.msra.mxu3 %v9790_v30  ;;  %v9802_v1 = vld [vmem:[%s10726_s9 + $0x2f8] sm:$0xff]  ;;  %4893 = vst [vmem:[#allocation1 + $0x4] ss:$9 sm:$0xff] %v11831_v17  ;;  %v9803_v30 = vld [vmem:[%s10726_s9 + $0x230] sm:$0xff] }
 0x2a0   : > { %4771 = vmatpush.bf16.msra.mxu0 %v9791_v16  ;;  %4785 = vmatpush.bf16.msra.mxu1 %v9792_v54  ;;  %4896 = vst [vmem:[#allocation1 + $0x5] ss:$9 sm:$0xff] %v11922_v39  ;;  %v9804_v16 = vld [vmem:[%s10726_s9 + $0x270] sm:$0xff]  ;;  %v11933_v54 = vpop.f32.mrf.mxu2 }
 0x2a1   : > { %13918 = vst [vmem:[#allocation21_spill] sm:$0xff] %v12184_v38 }
 0x2a3   : > { %4816 = vmatpush.bf16.msra.mxu2 %v9793_v18  ;;  %4830 = vmatpush.bf16.msra.mxu3 %v9794_v60  ;;  %v11935_v18 = vpop.f32.mrf.mxu3  ;;  %v9807_v60 = vld [vmem:[%s10726_s9 + $0x228] sm:$0xff] }
 0x2a4   : > { %4772 = vmatpush.bf16.msra.mxu0 %v9795_v57  ;;  %4786 = vmatpush.bf16.msra.mxu1 %v9796_v20  ;;  %v9808_v57 = vld [vmem:[%s10726_s9 + $0x268] sm:$0xff] }
 0x2a7   : > { %4817 = vmatpush.bf16.msra.mxu2 %v9797_v28  ;;  %4831 = vmatpush.bf16.msra.mxu3 %v9798_v23  ;;  %v9809_v28 = vld [vmem:[%s10726_s9 + $0x2a8] sm:$0xff] }
 0x2a8   : > { %4855 = vmatpush.bf16.msrb.mxu0 %v9799_v26  ;;  %4869 = vmatpush.bf16.msrb.mxu1 %v9800_v29  ;;  %v9810_v23 = vld [vmem:[%s10726_s9 + $0x2e8] sm:$0xff]  ;;  %v11944_v29 = vld [vmem:[#allocation1] sm:$0xff] }
 0x2a9   : > { %4773 = vmatmul.bf16.vlgmr.msra.gmra.mxu0 %v11853_v52  ;;  %4787 = vmatmul.bf16.vlgmr.msra.gmra.mxu1 %v11855_v9  ;;  %v9805_v52 = vld [vmem:[%s10726_s9 + $0x2b0] sm:$0xff] }
 0x2aa   : > { %4818 = vmatmul.bf16.vlgmr.msra.gmra.mxu2 %v4806_v34  ;;  %4832 = vmatmul.bf16.vlgmr.msra.gmra.mxu3 %v4807_v12  ;;  %v9806_v9 = vld [vmem:[%s10726_s9 + $0x2f0] sm:$0xff]  ;;  %v4404_v34 = vpop.f32.mrf.mxu0  ;;  %v4418_v12 = vpop.f32.mrf.mxu1 }
 0x2ab   : > { %4901 = vmatpush.bf16.msrb.mxu2 %v9801_v43  ;;  %4915 = vmatpush.bf16.msrb.mxu3 %v9802_v1  ;;  %v4419_v20 = vadd.f32 %v4418_v12, %v4404_v34  ;;  %v11946_v43 = vld [vmem:[#allocation1 + $0x9] sm:$0xff]  ;;  %v9815_v34 = vld [vmem:[%s10726_s9 + $0x218] sm:$0xff] }
 0x2ac   : > { %4856 = vmatpush.bf16.msrb.mxu0 %v9803_v30  ;;  %4870 = vmatpush.bf16.msrb.mxu1 %v9804_v16  ;;  %4931 = vst [vmem:[#allocation1] ss:$9 sm:$0xff] %v10980_v4  ;;  %v9811_v1 = vld [vmem:[%s10726_s9 + $0x220] sm:$0xff]  ;;  %v9817_v12 = vld [vmem:[%s10726_s9 + $0x298] sm:$0xff] }
 0x2ad   : > { %v4423_v26 = vadd.f32 %v4419_v20, %v11888_v8  ;;  %v9812_v30 = vld [vmem:[%s10726_s9 + $0x260] sm:$0xff]  ;;  %4933 = vst [vmem:[#allocation1 + $0x1] ss:$9 sm:$0xff] %v10993_v21  ;;  %v4449_v8 = vpop.f32.mrf.mxu2  ;;  %v9816_v21 = vld [vmem:[%s10726_s9 + $0x258] sm:$0xff]  ;;  %v9822_v20 = vld [vmem:[%s10726_s9 + $0x2d0] sm:$0xff] }
 0x2ae   : > { %v9813_v16 = vld [vmem:[%s10726_s9 + $0x2a0] sm:$0xff]  ;;  %4935 = vst [vmem:[#allocation1 + $0x2] ss:$9 sm:$0xff] %v10999_v24  ;;  %v9818_v24 = vld [vmem:[%s10726_s9 + $0x2d8] sm:$0xff] }
 0x2af   : > { %4902 = vmatpush.bf16.msrb.mxu2 %v9805_v52  ;;  %4916 = vmatpush.bf16.msrb.mxu3 %v9806_v9  ;;  %v9814_v52 = vld [vmem:[%s10726_s9 + $0x2e0] sm:$0xff]  ;;  %v4463_v9 = vpop.f32.mrf.mxu3  ;;  %4937 = vst [vmem:[#allocation1 + $0x3] ss:$9 sm:$0xff] %v11005_v25  ;;  %v9819_v25 = vld [vmem:[%s10726_s9 + $0x210] sm:$0xff] }
 0x2b0   : > { %4857 = vmatpush.bf16.msrb.mxu0 %v9807_v60  ;;  %4871 = vmatpush.bf16.msrb.mxu1 %v9808_v57  ;;  %v4464_v4 = vadd.f32 %v4463_v9, %v4449_v8  ;;  %4939 = vst [vmem:[#allocation1 + $0x4] ss:$9 sm:$0xff] %v11207_v14  ;;  %v9820_v14 = vld [vmem:[%s10726_s9 + $0x250] sm:$0xff] }
 0x2b1   : > { %4941 = vst [vmem:[#allocation1 + $0x5] ss:$9 sm:$0xff] %v11399_v10  ;;  %v9821_v57 = vld [vmem:[%s10726_s9 + $0x290] sm:$0xff] }
 0x2b2   : > { %v11962_v60 = vadd.f32 %v4464_v4, %v4423_v26  ;;  %v9824_v26 = vld [vmem:[%s10726_s9 + $0x248] sm:$0xff]  ;;  %v11983_v8 = vpop.f32.mrf.mxu0  ;;  %v11985_v9 = vpop.f32.mrf.mxu1  ;;  %v9829_v4 = vld [vmem:[%s10726_s9 + $0x280] sm:$0xff] }
 0x2b3   : > { %4903 = vmatpush.bf16.msrb.mxu2 %v9809_v28  ;;  %4917 = vmatpush.bf16.msrb.mxu3 %v9810_v23  ;;  %v9823_v23 = vld [vmem:[%s10726_s9 + $0x208] sm:$0xff] }
 0x2b4   : > { %4858 = vmatpush.bf16.msrb.mxu0 %v9811_v1  ;;  %4872 = vmatpush.bf16.msrb.mxu1 %v9812_v30  ;;  %v9825_v1 = vld [vmem:[%s10726_s9 + $0x288] sm:$0xff] }
 0x2b5   : > { %v9826_v30 = vld [vmem:[%s10726_s9 + $0x2c8] sm:$0xff] }
 0x2b7   : > { %4904 = vmatpush.bf16.msrb.mxu2 %v9813_v16  ;;  %4918 = vmatpush.bf16.msrb.mxu3 %v9814_v52  ;;  %v9827_v16 = vld [vmem:[%s10726_s9 + $0x200] sm:$0xff] }
 0x2b8   : > { %4859 = vmatpush.bf16.msrb.mxu0 %v9815_v34  ;;  %4873 = vmatpush.bf16.msrb.mxu1 %v9816_v21  ;;  %v11968_v10 = vld [vmem:[#allocation1] sm:$0xff]  ;;  %v11970_v28 = vld [vmem:[#allocation1 + $0x9] sm:$0xff] }
 0x2b9   : > { %4976 = vst [vmem:[#allocation1] ss:$9 sm:$0xff] %v11513_v40  ;;  %v9828_v52 = vld [vmem:[%s10726_s9 + $0x240] sm:$0xff]  ;;  %v9831_v21 = vld [vmem:[%s10726_s9 + $0x338] sm:$0xff] }
 0x2ba   : > { %4978 = vst [vmem:[#allocation1 + $0x1] ss:$9 sm:$0xff] %v11518_v62  ;;  %v9830_v34 = vld [vmem:[%s10726_s9 + $0x2c0] sm:$0xff] }
 0x2bb   : > { %4905 = vmatpush.bf16.msrb.mxu2 %v9817_v12  ;;  %4919 = vmatpush.bf16.msrb.mxu3 %v9818_v24  ;;  %4980 = vst [vmem:[#allocation1 + $0x2] ss:$9 sm:$0xff] %v11531_v2  ;;  %v9832_v12 = vld [vmem:[%s10726_s9 + $0x378] sm:$0xff]  ;;  %v12126_v2 = vld [vmem:[%s10726_s9 + $0xf0] sm:$0xff] }
 0x2bc   : > { %4860 = vmatpush.bf16.msrb.mxu0 %v9819_v25  ;;  %4874 = vmatpush.bf16.msrb.mxu1 %v9820_v14  ;;  %4982 = vst [vmem:[#allocation1 + $0x3] ss:$9 sm:$0xff] %v11539_v3  ;;  %v9833_v24 = vld [vmem:[%s10726_s9 + $0x3b8] sm:$0xff]  ;;  %v9835_v14 = vld [vmem:[%s10726_s9 + $0x330] sm:$0xff] }
 0x2bd   : > { %4984 = vst [vmem:[#allocation1 + $0x4] ss:$9 sm:$0xff] %v11615_v48  ;;  %v9834_v25 = vld [vmem:[%s10726_s9 + $0x3f8] sm:$0xff]  ;;  %v12123_v3 = vld [vmem:[%s10726_s9 + $0xb0] sm:$0xff] }
 0x2be   : > { %4986 = vst [vmem:[#allocation1 + $0x5] ss:$9 sm:$0xff] %v11696_v49  ;;  %v12114_v49 = vld [vmem:[%s10726_s9 + $0xf8] sm:$0xff] }
 0x2bf   : > { %4906 = vmatpush.bf16.msrb.mxu2 %v9821_v57  ;;  %4920 = vmatpush.bf16.msrb.mxu3 %v9822_v20  ;;  %v9836_v57 = vld [vmem:[%s10726_s9 + $0x370] sm:$0xff]  ;;  %13904 = vst [vmem:[#allocation35_spill] sm:$0xff] %v12114_v49 }
 0x2c0   : > { %4861 = vmatpush.bf16.msrb.mxu0 %v9823_v23  ;;  %4875 = vmatpush.bf16.msrb.mxu1 %v9824_v26  ;;  %v9837_v20 = vld [vmem:[%s10726_s9 + $0x3b0] sm:$0xff]  ;;  %v12002_v26 = vpop.f32.mrf.mxu2  ;;  %13905 = vst [vmem:[#allocation12_spill] sm:$0xff] %v12123_v3 }
 0x2c1   : > { %v9838_v23 = vld [vmem:[%s10726_s9 + $0x3f0] sm:$0xff]  ;;  %13906 = vst [vmem:[#allocation13_spill] sm:$0xff] %v12126_v2 }
 0x2c3   : > { %4907 = vmatpush.bf16.msrb.mxu2 %v9825_v1  ;;  %4921 = vmatpush.bf16.msrb.mxu3 %v9826_v30  ;;  %v9839_v30 = vld [vmem:[%s10726_s9 + $0x328] sm:$0xff] }
 0x2c4   : > { %4862 = vmatpush.bf16.msrb.mxu0 %v9827_v16  ;;  %4876 = vmatpush.bf16.msrb.mxu1 %v9828_v52  ;;  %v9840_v16 = vld [vmem:[%s10726_s9 + $0x368] sm:$0xff] }
 0x2c6   : > { %v4509_v1 = vpop.f32.mrf.mxu1 }
 0x2c7   : > { %4908 = vmatpush.bf16.msrb.mxu2 %v9829_v4  ;;  %4922 = vmatpush.bf16.msrb.mxu3 %v9830_v34  ;;  %v9841_v4 = vld [vmem:[%s10726_s9 + $0x3a8] sm:$0xff] }
 0x2c8   : > { %4946 = vmatpush.bf16.msra.mxu0 %v9831_v21  ;;  %4960 = vmatpush.bf16.msra.mxu1 %v9832_v12  ;;  %v9842_v34 = vld [vmem:[%s10726_s9 + $0x3e8] sm:$0xff]  ;;  %v9843_v12 = vld [vmem:[%s10726_s9 + $0x320] sm:$0xff] }
 0x2c9   : > { %4863 = vmatmul.bf16.vlgmr.msrb.gmra.mxu0 %v11906_v5  ;;  %4877 = vmatmul.bf16.vlgmr.msrb.gmra.mxu1 %v11908_v53  ;;  %v12004_v5 = vpop.f32.mrf.mxu3  ;;  %v12006_v53 = vld [vmem:[#allocation1] sm:$0xff] }
 0x2ca   : > { %4909 = vmatmul.bf16.vlgmr.msrb.gmra.mxu2 %v11944_v29  ;;  %4923 = vmatmul.bf16.vlgmr.msrb.gmra.mxu3 %v11946_v43  ;;  %v12008_v29 = vld [vmem:[#allocation1 + $0x9] sm:$0xff]  ;;  %v4495_v43 = vpop.f32.mrf.mxu0 }
 0x2cb   : > { %4991 = vmatpush.bf16.msra.mxu2 %v9833_v24  ;;  %5005 = vmatpush.bf16.msra.mxu3 %v9834_v25  ;;  %5021 = vst [vmem:[#allocation1] ss:$9 sm:$0xff] %v11810_v46  ;;  %v4510_v52 = vadd.f32 %v4509_v1, %v4495_v43  ;;  %v9844_v24 = vld [vmem:[%s10726_s9 + $0x360] sm:$0xff]  ;;  %v9848_v43 = vld [vmem:[%s10726_s9 + $0x358] sm:$0xff] }
 0x2cc   : > { %4947 = vmatpush.bf16.msra.mxu0 %v9835_v14  ;;  %4961 = vmatpush.bf16.msra.mxu1 %v9836_v57  ;;  %5023 = vst [vmem:[#allocation1 + $0x1] ss:$9 sm:$0xff] %v11815_v47  ;;  %v9845_v25 = vld [vmem:[%s10726_s9 + $0x3a0] sm:$0xff]  ;;  %v9849_v1 = vld [vmem:[%s10726_s9 + $0x398] sm:$0xff] }
 0x2cd   : > { %5025 = vst [vmem:[#allocation1 + $0x2] ss:$9 sm:$0xff] %v11823_v51  ;;  %v4514_v21 = vadd.f32 %v4510_v52, %v11962_v60  ;;  %v9846_v14 = vld [vmem:[%s10726_s9 + $0x3e0] sm:$0xff]  ;;  %v4540_v57 = vpop.f32.mrf.mxu2  ;;  %v9851_v52 = vld [vmem:[%s10726_s9 + $0x310] sm:$0xff] }
 0x2ce   : > { %5027 = vst [vmem:[#allocation1 + $0x3] ss:$9 sm:$0xff] %v11831_v17  ;;  %v9554_v17 = vld [vmem:[%s10726_s9 + $0x30] sm:$0xff] }
 0x2cf   : > { %4992 = vmatpush.bf16.msra.mxu2 %v9837_v20  ;;  %5006 = vmatpush.bf16.msra.mxu3 %v9838_v23  ;;  %5029 = vst [vmem:[#allocation1 + $0x4] ss:$9 sm:$0xff] %v11922_v39  ;;  %v9847_v23 = vld [vmem:[%s10726_s9 + $0x318] sm:$0xff]  ;;  %v9562_v51 = vld [vmem:[%s10726_s9 + $0x70] sm:$0xff] }
 0x2d0   : > { %4948 = vmatpush.bf16.msra.mxu0 %v9839_v30  ;;  %4962 = vmatpush.bf16.msra.mxu1 %v9840_v16  ;;  %v9850_v30 = vld [vmem:[%s10726_s9 + $0x3d8] sm:$0xff] }
 0x2d1   : > { %v4554_v20 = vpop.f32.mrf.mxu3 }
 0x2d2   : > { %v4555_v60 = vadd.f32 %v4554_v20, %v4540_v57  ;;  %v9858_v57 = vld [vmem:[%s10726_s9 + $0x3c8] sm:$0xff]  ;;  %v9859_v20 = vld [vmem:[%s10726_s9 + $0x300] sm:$0xff] }
 0x2d3   : > { %4993 = vmatpush.bf16.msra.mxu2 %v9841_v4  ;;  %5007 = vmatpush.bf16.msra.mxu3 %v9842_v34  ;;  %v9852_v4 = vld [vmem:[%s10726_s9 + $0x350] sm:$0xff] }
 0x2d4   : > { %4949 = vmatpush.bf16.msra.mxu0 %v9843_v12  ;;  %4963 = vmatpush.bf16.msra.mxu1 %v9844_v24  ;;  %v4559_v16 = vadd.f32 %v4555_v60, %v4514_v21  ;;  %v12033_v34 = vld [vmem:[%s13473_s0 + $0x78] sm:$0x3]  ;;  %v9855_v21 = vld [vmem:[%s10726_s9 + $0x308] sm:$0xff]  ;;  %v9860_v60 = vld [vmem:[%s10726_s9 + $0x340] sm:$0xff] }
 0x2d5   : > { %13899 = vst [vmem:[#allocation30_spill] sm:$0xff] %v12033_v34  ;;  %v9853_v12 = vld [vmem:[%s10726_s9 + $0x390] sm:$0xff] }
 0x2d6   : > { %v9854_v24 = vld [vmem:[%s10726_s9 + $0x3d0] sm:$0xff]  ;;  %5032 = vst [vmem:[#allocation1 + $0x5] ss:$9 sm:$0xff] %v12033_v34  ;;  %v12111_v34 = vld [vmem:[%s10726_s9 + $0xb8] sm:$0xff] }
 0x2d7   : > { %4994 = vmatpush.bf16.msra.mxu2 %v9845_v25  ;;  %5008 = vmatpush.bf16.msra.mxu3 %v9846_v14  ;;  %v9856_v25 = vld [vmem:[%s10726_s9 + $0x348] sm:$0xff]  ;;  %13903 = vst [vmem:[#allocation34_spill] sm:$0xff] %v12111_v34 }
 0x2d8   : > { %4950 = vmatpush.bf16.msra.mxu0 %v9847_v23  ;;  %4964 = vmatpush.bf16.msra.mxu1 %v9848_v43  ;;  %v9857_v14 = vld [vmem:[%s10726_s9 + $0x388] sm:$0xff]  ;;  %v12044_v23 = vpop.f32.mrf.mxu0  ;;  %v12046_v43 = vpop.f32.mrf.mxu1 }
 0x2db   : > { %4995 = vmatpush.bf16.msra.mxu2 %v9849_v1  ;;  %5009 = vmatpush.bf16.msra.mxu3 %v9850_v30  ;;  %v9861_v1 = vld [vmem:[%s10726_s9 + $0x380] sm:$0xff] }
 0x2dc   : > { %4951 = vmatpush.bf16.msra.mxu0 %v9851_v52  ;;  %4965 = vmatpush.bf16.msra.mxu1 %v9852_v4  ;;  %v9862_v30 = vld [vmem:[%s10726_s9 + $0x3c0] sm:$0xff]  ;;  %v9863_v52 = vld [vmem:[%s10726_s9 + $0x438] sm:$0xff] }
 0x2dd   : > { %v9864_v4 = vld [vmem:[%s10726_s9 + $0x478] sm:$0xff] }
 0x2df   : > { %4996 = vmatpush.bf16.msra.mxu2 %v9853_v12  ;;  %5010 = vmatpush.bf16.msra.mxu3 %v9854_v24  ;;  %v9865_v12 = vld [vmem:[%s10726_s9 + $0x430] sm:$0xff] }
 0x2e0   : > { %4952 = vmatpush.bf16.msra.mxu0 %v9855_v21  ;;  %4966 = vmatpush.bf16.msra.mxu1 %v9856_v25  ;;  %v9866_v24 = vld [vmem:[%s10726_s9 + $0x470] sm:$0xff]  ;;  %v12058_v21 = vpop.f32.mrf.mxu2  ;;  %v12060_v25 = vpop.f32.mrf.mxu3 }
 0x2e3   : > { %4997 = vmatpush.bf16.msra.mxu2 %v9857_v14  ;;  %5011 = vmatpush.bf16.msra.mxu3 %v9858_v57  ;;  %v9867_v57 = vld [vmem:[%s10726_s9 + $0x428] sm:$0xff] }
 0x2e4   : > { %4953 = vmatpush.bf16.msra.mxu0 %v9859_v20  ;;  %4967 = vmatpush.bf16.msra.mxu1 %v9860_v60  ;;  %v9869_v20 = vld [vmem:[%s10726_s9 + $0x420] sm:$0xff] }
 0x2e5   : > { %v9870_v60 = vld [vmem:[%s10726_s9 + $0x460] sm:$0xff] }
 0x2e6   : > { %v4585_v14 = vpop.f32.mrf.mxu0 }
 0x2e7   : > { %4998 = vmatpush.bf16.msra.mxu2 %v9861_v1  ;;  %5012 = vmatpush.bf16.msra.mxu3 %v9862_v30  ;;  %v12067_v1 = vld [vmem:[%s11524_s20] ss:$0 sm:$0xff] }
 0x2e8   : > { %5037 = vmatpush.bf16.msrb.mxu0 %v9863_v52  ;;  %5051 = vmatpush.bf16.msrb.mxu1 %v9864_v4  ;;  %13900 = vst [vmem:[#allocation31_spill] sm:$0xff] %v12067_v1 }
 0x2e9   : > { %4954 = vmatmul.bf16.vlgmr.msra.gmra.mxu0 %v11968_v10  ;;  %4968 = vmatmul.bf16.vlgmr.msra.gmra.mxu1 %v11970_v28  ;;  %v4599_v10 = vpop.f32.mrf.mxu1  ;;  %v9868_v28 = vld [vmem:[%s10726_s9 + $0x468] sm:$0xff] }
 0x2ea   : > { %4999 = vmatmul.bf16.vlgmr.msra.gmra.mxu2 %v12006_v53  ;;  %5013 = vmatmul.bf16.vlgmr.msra.gmra.mxu3 %v12008_v29  ;;  %v4600_v53 = vadd.f32 %v4599_v10, %v4585_v14 }
 0x2eb   : > { %5272 = vmatpush.bf16.msrb.mxu2 %v12111_v34  ;;  %5286 = vmatpush.bf16.msrb.mxu3 %v12114_v49  ;;  %v12136_v49 = vld [vmem:[%s10726_s9 + $0xa8] sm:$0xff] }
 0x2ec   : > { %5038 = vmatpush.bf16.msrb.mxu0 %v9865_v12  ;;  %5052 = vmatpush.bf16.msrb.mxu1 %v9866_v24  ;;  %v4604_v29 = vadd.f32 %v4600_v53, %v4559_v16  ;;  %v9871_v12 = vld [vmem:[%s10726_s9 + $0x418] sm:$0xff]  ;;  %v4239_v16 = vadd.f32 %v12067_v1, %v11783_v7  ;;  %13907 = vst [vmem:[#allocation38_spill] sm:$0xff] %v12136_v49  ;;  %v12139_v34 = vld [vmem:[%s10726_s9 + $0xe8] sm:$0xff] }
 0x2ed   : > { %v4631_v30 = vpop.f32.mrf.mxu2  ;;  %v4645_v52 = vpop.f32.mrf.mxu3  ;;  %v9872_v24 = vld [vmem:[%s10726_s9 + $0x458] sm:$0xff]  ;;  %13908 = vst [vmem:[#allocation39_spill] sm:$0xff] %v12139_v34 }
 0x2ee   : > { %v4646_v4 = vadd.f32 %v4645_v52, %v4631_v30  ;;  %v4241_v53 = vmax.f32 %v4239_v16, 0.0  ;;  %v9875_v30 = vld [vmem:[%s10726_s9 + $0x408] sm:$0xff]  ;;  %v5033_v7 = vld [vmem:[#allocation1] sm:$0xff] }
 0x2ef   : > { %v9876_v52 = vld [vmem:[%s10726_s9 + $0x448] sm:$0xff]  ;;  %5273 = vmatpush.bf16.msrb.mxu2 %v12123_v3  ;;  %5287 = vmatpush.bf16.msrb.mxu3 %v12126_v2  ;;  %v12150_v2 = vld [vmem:[%s10726_s9 + $0xa0] sm:$0xff] }
 0x2f0   : > { %5039 = vmatpush.bf16.msrb.mxu0 %v9867_v57  ;;  %5053 = vmatpush.bf16.msrb.mxu1 %v9868_v28  ;;  %v4650_v14 = vadd.f32 %v4646_v4, %v4604_v29  ;;  %v9873_v57 = vld [vmem:[%s10726_s9 + $0x410] sm:$0xff]  ;;  %v5034_v29 = vld [vmem:[#allocation1 + $0x9] sm:$0xff]  ;;  %v12082_v4 = vpop.f32.mrf.mxu0  ;;  %13910 = vst [vmem:[#allocation15_spill] sm:$0xff] %v12150_v2 }
 0x2f1   : > { %v9874_v28 = vld [vmem:[%s10726_s9 + $0x450] sm:$0xff]  ;;  %v12084_v16 = vpop.f32.mrf.mxu1  ;;  %v12153_v3 = vld [vmem:[%s10726_s9 + $0xe0] sm:$0xff] }
 0x2f2   : > { %v4652_v10 = vadd.f32 %v12067_v1, %v4650_v14  ;;  %13911 = vst [vmem:[#allocation42_spill] sm:$0xff] %v12153_v3 }
 0x2f3   : > { %5274 = vmatpush.bf16.msrb.mxu2 %v12136_v49  ;;  %5288 = vmatpush.bf16.msrb.mxu3 %v12139_v34  ;;  %v12162_v34 = vld [vmem:[%s10726_s9 + $0x98] sm:$0xff] }
 0x2f4   : > { %5040 = vmatpush.bf16.msrb.mxu0 %v9869_v20  ;;  %5054 = vmatpush.bf16.msrb.mxu1 %v9870_v60  ;;  %v4654_v20 = vmax.f32 %v4652_v10, 0.0  ;;  %13912 = vst [vmem:[#allocation43_spill] sm:$0xff] %v12162_v34  ;;  %v12165_v49 = vld [vmem:[%s10726_s9 + $0xd8] sm:$0xff] }
 0x2f5   : > { %13913 = vst [vmem:[#allocation16_spill] sm:$0xff] %v12165_v49 }
 0x2f6   : > { %v12076_v60 = vmax.f32 %v4241_v53, %v4654_v20 }
 0x2f7   : > { %5275 = vmatpush.bf16.msrb.mxu2 %v12150_v2  ;;  %5289 = vmatpush.bf16.msrb.mxu3 %v12153_v3  ;;  %v12178_v2 = vld [vmem:[%s10726_s9 + $0x90] sm:$0xff] }
 0x2f8   : > { %5041 = vmatpush.bf16.msrb.mxu0 %v9871_v12  ;;  %5055 = vmatpush.bf16.msrb.mxu1 %v9872_v24  ;;  %13901 = vst [vmem:[#allocation10_spill] sm:$0xff] %v12076_v60  ;;  %v9877_v12 = vld [vmem:[%s10726_s9 + $0x400] sm:$0xff]  ;;  %v12181_v3 = vld [vmem:[%s10726_s9 + $0xd0] sm:$0xff] }
 0x2f9   : > { %v9878_v24 = vld [vmem:[%s10726_s9 + $0x440] sm:$0xff]  ;;  %13916 = vst [vmem:[#allocation47_spill] sm:$0xff] %v12178_v2 }
 0x2fa   : > { %13917 = vst [vmem:[#allocation20_spill] sm:$0xff] %v12181_v3 }
 0x2fb   : > { %5276 = vmatpush.bf16.msrb.mxu2 %v12162_v34  ;;  %5290 = vmatpush.bf16.msrb.mxu3 %v12165_v49  ;;  %v8605_v34 = vld [vmem:[%s10726_s9 + $0x88] sm:$0xf] }
 0x2fc   : > { %5042 = vmatpush.bf16.msrb.mxu0 %v9873_v57  ;;  %5056 = vmatpush.bf16.msrb.mxu1 %v9874_v28  ;;  %v12090_v57 = vpop.f32.mrf.mxu2  ;;  %v12092_v28 = vpop.f32.mrf.mxu3  ;;  %v12203_v33 = vor.u32 %v9565_v0, %v8605_v34  ;;  %v4376_v34 = vadd.f32 %v11935_v18, %v11933_v54  ;;  %v3357_v54 = vadd.f32 %v11658_v56, %v11656_v55 }
 0x2fd   : > { %13902 = vst [vmem:[#allocation11_spill] sm:$0xff] %v12092_v28 }
 0x2ff   : > { %5277 = vmatpush.bf16.msrb.mxu2 %v12178_v2  ;;  %5291 = vmatpush.bf16.msrb.mxu3 %v12181_v3  ;;  %v2859_v3 = vadd.f32 %v11569_v63, %v11567_v45  ;;  %v12219_v45 = vld [vmem:[%s10726_s9 + $0xc8] sm:$0xff]  ;;  %v12222_v63 = vld [vmem:[%s10726_s9 + $0x18] sm:$0xff] }
 0x300   : > { %5043 = vmatpush.bf16.msrb.mxu0 %v9875_v30  ;;  %5057 = vmatpush.bf16.msrb.mxu1 %v9876_v52 }
 0x303   : > { %5278 = vmatpush.bf16.msrb.mxu2 %v12203_v33  ;;  %5292 = vmatpush.bf16.msrb.mxu3 %v12219_v45 }
 0x304   : > { %5044 = vmatpush.bf16.msrb.mxu0 %v9877_v12  ;;  %5058 = vmatpush.bf16.msrb.mxu1 %v9878_v24 }
 0x306   : > { %v12086_v14 = vpop.f32.mrf.mxu0  ;;  %v12088_v10 = vpop.f32.mrf.mxu1 }
 0x307   : > { %5045 = vmatmul.bf16.vlgmr.msrb.gmra.mxu0 %v5033_v7  ;;  %5059 = vmatmul.bf16.vlgmr.msrb.gmra.mxu1 %v5034_v29  ;;  %v4697_v2 = vadd.f32 %v12088_v10, %v12086_v14  ;;  %v3182_v14 = vadd.f32 %v11636_v41, %v11634_v13  ;;  %v4466_v13 = vadd.f32 %v12004_v5, %v12002_v26 }
 0x308   : > { %5411 = vmatpush.bf16.msra.mxu0 %v9555_v36  ;;  %5425 = vmatpush.bf16.msra.mxu1 %v12142_v32 }
 0x30c   : > { %5412 = vmatpush.bf16.msra.mxu0 %v9554_v17  ;;  %5426 = vmatpush.bf16.msra.mxu1 %v9562_v51  ;;  %v12168_v17 = vld [vmem:[%s10726_s9 + $0x28] sm:$0xff] }
 0x30d   : > { %v12094_v53 = vpop.f32.mrf.mxu2  ;;  %v12096_v20 = vpop.f32.mrf.mxu3  ;;  %13914 = vst [vmem:[#allocation17_spill] sm:$0xff] %v12168_v17  ;;  %v12171_v51 = vld [vmem:[%s10726_s9 + $0x68] sm:$0xff] }
 0x30e   : > { %v12098_v30 = vpop.f32.mrf.mxu0  ;;  %v12100_v52 = vpop.f32.mrf.mxu1  ;;  %13915 = vst [vmem:[#allocation46_spill] sm:$0xff] %v12171_v51 }
 0x310   : > { %5413 = vmatpush.bf16.msra.mxu0 %v12168_v17  ;;  %5427 = vmatpush.bf16.msra.mxu1 %v12171_v51  ;;  %v4284_v51 = vadd.f32 %v11865_v59, %v11863_v50  ;;  %v2990_v59 = vadd.f32 %v11590_v37, %v2859_v3  ;;  %v4421_v3 = vadd.f32 %v11985_v9, %v11983_v8 }
 0x311   : > { %v4699_v37 = vadd.f32 %v12100_v52, %v12098_v30  ;;  %v3532_v30 = vadd.f32 %v11703_v15, %v11701_v11  ;;  %v3707_v52 = vadd.f32 %v11721_v22, %v11719_v19  ;;  %v4557_v11 = vadd.f32 %v12060_v25, %v12058_v21 }
 0x314   : > { %5414 = vmatpush.bf16.msra.mxu0 %v12184_v38  ;;  %5428 = vmatpush.bf16.msra.mxu1 %v12187_v35  ;;  %v4726_v35 = vadd.f32 %v12094_v53, %v4697_v2  ;;  %v12243_v53 = vld [vmem:[%s10726_s9 + $0x58] sm:$0xff] }
 0x315   : > { %v12102_v12 = vpop.f32.mrf.mxu2  ;;  %v12104_v24 = vpop.f32.mrf.mxu3 }
 0x318   : > { %5415 = vmatpush.bf16.msra.mxu0 %v12222_v63  ;;  %5429 = vmatpush.bf16.msra.mxu1 %v12243_v53 }
 0x326   : > { %v12106_v7 = vpop.f32.mrf.mxu0  ;;  %v12108_v29 = vpop.f32.mrf.mxu1 }
 0x327   : > { %v4789_v2 = vadd.f32 %v12108_v29, %v12106_v7  ;;  %v12258_v29 = vld [vmem:[%s10726_s9 + $0x80] sm:$0xff] }
 0x328   : > { %5279 = vmatpush.bf16.msrb.mxu2 %v12258_v29 }
 0x32d   : > { %v12118_v39 = vpop.f32.mrf.mxu2  ;;  %v12120_v48 = vpop.f32.mrf.mxu3 }
 0x32e   : > { %v12128_v62 = vpop.f32.mrf.mxu0  ;;  %v12130_v40 = vpop.f32.mrf.mxu1 }
 0x32f   : > { %v4791_v15 = vadd.f32 %v12130_v40, %v12128_v62 }
 0x335   : > { %v12155_v32 = vpop.f32.mrf.mxu2  ;;  %v12157_v46 = vpop.f32.mrf.mxu3 }
 0x336   : > { %v4836_v22 = vadd.f32 %v12157_v46, %v12155_v32  ;;  %v13925_v46 = vld [vmem:[#allocation27_spill] sm:$0xff] }
 0x346   : > { %v4864_v36 = vpop.f32.mrf.mxu0  ;;  %v4878_v47 = vpop.f32.mrf.mxu1 }
 0x347   : > { %v4879_v8 = vadd.f32 %v4878_v47, %v4864_v36  ;;  %v4602_v36 = vadd.f32 %v12084_v16, %v12082_v4 }
 0x34d   : > { %v4910_v60 = vpop.f32.mrf.mxu2  ;;  %v4924_v1 = vpop.f32.mrf.mxu3 }
 0x34e   : > { %v12191_v49 = vpop.f32.mrf.mxu0  ;;  %v12193_v17 = vpop.f32.mrf.mxu1  ;;  %v4925_v5 = vadd.f32 %v4924_v1, %v4910_v60  ;;  %v3882_v1 = vadd.f32 %v11753_v42, %v11751_v31  ;;  %v13922_v42 = vld [vmem:[#allocation11_spill] sm:$0xff] }
 0x34f   : > { %13920 = vst [vmem:[#allocation51_spill] sm:$0xff] %v12191_v49 }
 0x350   : > { %13921 = vst [vmem:[#allocation24_spill] sm:$0xff] %v12193_v17  ;;  %v4313_v17 = vadd.f32 %v11902_v27, %v4284_v51  ;;  %v4740_v27 = vadd.f32 %v12096_v20, %v4726_v35  ;;  %v4834_v35 = vadd.f32 %v12120_v48, %v12118_v39  ;;  %v4728_v39 = vadd.f32 %v12102_v12, %v4699_v37  ;;  %v13926_v51 = vld [vmem:[#allocation8_spill] sm:$0xff] }
 0x352   : > { %v4327_v0 = vadd.f32 %v11904_v6, %v4313_v17  ;;  %v3004_v6 = vadd.f32 %v11592_v58, %v2990_v59  ;;  %v4793_v41 = vadd.f32 %v4789_v2, %v4740_v27  ;;  %v4512_v58 = vadd.f32 %v12046_v43, %v12044_v23  ;;  %v12277_v2 = vld [vmem:[%s10726_s9 + $0xc0] sm:$0xff] }
 0x353   : > { %v4742_v19 = vadd.f32 %v12104_v24, %v4728_v39  ;;  %v4232_v59 = vadd.f32 %v13926_v51, %v13925_v46  ;;  %5293 = vmatpush.bf16.msrb.mxu3 %v12277_v2  ;;  %v12329_v46 = vld [vmem:[%s10726_s9 + $0x40] sm:$0xff] }
 0x354   : > { %v4379_v18 = vadd.f32 %v4376_v34, %v4327_v0  ;;  %v3185_v20 = vadd.f32 %v3182_v14, %v3004_v6  ;;  %v4838_v26 = vadd.f32 %v4834_v35, %v4793_v41  ;;  %v12280_v14 = vld [vmem:[%s10726_s9 + $0x10] sm:$0xff] }
 0x355   : > { %v12209_v28 = vpop.f32.mrf.mxu2  ;;  %v12211_v50 = vpop.f32.mrf.mxu3  ;;  %v4794_v25 = vadd.f32 %v4791_v15, %v4742_v19  ;;  %5416 = vmatpush.bf16.msra.mxu0 %v12280_v14  ;;  %v12306_v19 = vld [vmem:[%s10726_s9 + $0x8] sm:$0xff] }
 0x356   : > { %v4424_v48 = vadd.f32 %v4421_v3, %v4379_v18  ;;  %v3360_v47 = vadd.f32 %v3357_v54, %v3185_v20  ;;  %v4883_v23 = vadd.f32 %v4879_v8, %v4838_v26  ;;  %v13923_v4 = vld [vmem:[#allocation51_spill] sm:$0xff] }
 0x357   : > { %v13924_v16 = vld [vmem:[#allocation24_spill] sm:$0xff]  ;;  %v13927_v20 = vld [vmem:[#allocation31_spill] sm:$0xff] }
 0x358   : > { %v4469_v7 = vadd.f32 %v4466_v13, %v4424_v48  ;;  %v3535_v12 = vadd.f32 %v3532_v30, %v3360_v47  ;;  %v4929_v21 = vadd.f32 %v4925_v5, %v4883_v23  ;;  %v4881_v24 = vadd.f32 %v13924_v16, %v13923_v4  ;;  %v12291_v30 = vld [vmem:[%s10726_s9 + $0x138] sm:$0xff] }
 0x359   : > { %5588 = vmatpush.bf16.msra.mxu2 %v12291_v30  ;;  %v13928_v47 = vld [vmem:[#allocation10_spill] sm:$0xff]  ;;  %5417 = vmatpush.bf16.msra.mxu0 %v12306_v19 }
 0x35a   : > { %v4515_v60 = vadd.f32 %v4512_v58, %v4469_v7  ;;  %v3710_v62 = vadd.f32 %v3707_v52, %v3535_v12 }
 0x35c   : > { %v4560_v31 = vadd.f32 %v4557_v11, %v4515_v60  ;;  %v3885_v32 = vadd.f32 %v3882_v1, %v3710_v62 }
 0x35e   : > { %v4605_v0 = vadd.f32 %v4602_v36, %v4560_v31 }
 0x366   : > { %v4955_v38 = vpop.f32.mrf.mxu0  ;;  %v4969_v49 = vpop.f32.mrf.mxu1 }
 0x367   : > { %v4970_v43 = vadd.f32 %v4969_v49, %v4955_v38  ;;  %v4057_v49 = vadd.f32 %v11773_v44, %v11771_v61  ;;  %v4648_v38 = vadd.f32 %v13922_v42, %v12090_v57  ;;  %v4839_v61 = vadd.f32 %v4836_v22, %v4794_v25  ;;  %v12313_v42 = vld [vmem:[%s10726_s9 + $0x48] sm:$0xff] }
 0x368   : > { %v4927_v44 = vadd.f32 %v12211_v50, %v12209_v28  ;;  %v12288_v50 = vld [vmem:[%s10726_s9 + $0x50] sm:$0xff] }
 0x369   : > { %v4974_v17 = vadd.f32 %v4970_v43, %v4929_v21  ;;  %v4060_v37 = vadd.f32 %v4057_v49, %v3885_v32  ;;  %v4651_v54 = vadd.f32 %v4648_v38, %v4605_v0  ;;  %v4884_v18 = vadd.f32 %v4881_v24, %v4839_v61  ;;  %5430 = vmatpush.bf16.msra.mxu1 %v12288_v50  ;;  %v12299_v43 = vld [vmem:[%s10726_s9 + $0x178] sm:$0xff]  ;;  %v12316_v38 = vld [vmem:[%s10726_s9 + $0x130] sm:$0xff]  ;;  %v12325_v32 = vld [vmem:[%s10726_s9] sm:$0xff] }
 0x36a   : > { %5602 = vmatpush.bf16.msra.mxu3 %v12299_v43  ;;  %5589 = vmatpush.bf16.msra.mxu2 %v12316_v38  ;;  %v13929_v0 = vld [vmem:[#allocation5_spill] sm:$0xff]  ;;  %v13932_v61 = vld [vmem:[#allocation6_spill] sm:$0xff] }
 0x36b   : > { %v4235_v8 = vadd.f32 %v4232_v59, %v4060_v37  ;;  %v4653_v48 = vadd.f32 %v13927_v20, %v4651_v54  ;;  %5418 = vmatpush.bf16.msra.mxu0 %v12325_v32  ;;  %v12332_v59 = vld [vmem:[%s10726_s9 + $0x128] sm:$0xff]  ;;  %v13934_v37 = vld [vmem:[#allocation26_spill] sm:$0xff] }
 0x36d   : > { %v5000_v9 = vpop.f32.mrf.mxu2  ;;  %v5014_v10 = vpop.f32.mrf.mxu3  ;;  %v4655_v11 = vmax.f32 %v4653_v48, 0.0  ;;  %5431 = vmatpush.bf16.msra.mxu1 %v12313_v42  ;;  %v12376_v48 = vld [vmem:[%s10726_s9 + $0x118] sm:$0xff] }
 0x36e   : > { %v4957_v55 = vpop.f32.mrf.mxu0  ;;  %v4971_v56 = vpop.f32.mrf.mxu1  ;;  %v5015_v40 = vadd.f32 %v5014_v10, %v5000_v9  ;;  %v4930_v9 = vadd.f32 %v4927_v44, %v4884_v18  ;;  %5590 = vmatpush.bf16.msra.mxu2 %v12332_v59  ;;  %v12342_v44 = vld [vmem:[%s10726_s9 + $0x168] sm:$0xff]  ;;  %v12356_v18 = vld [vmem:[%s10726_s9 + $0x120] sm:$0xff] }
 0x36f   : > { %v4972_v13 = vadd.f32 %v4971_v56, %v4957_v55  ;;  %v4240_v56 = vadd.f32 %v13927_v20, %v4235_v8  ;;  %v12363_v8 = vld [vmem:[%s10726_s9 + $0x1b0] sm:$0xff] }
 0x370   : > { %v5019_v57 = vadd.f32 %v5015_v40, %v4974_v17  ;;  %v12321_v17 = vld [vmem:[%s10726_s9 + $0x170] sm:$0xff] }
 0x371   : > { %v4975_v58 = vadd.f32 %v4972_v13, %v4930_v9  ;;  %v4242_v12 = vmax.f32 %v4240_v56, 0.0  ;;  %5603 = vmatpush.bf16.msra.mxu3 %v12321_v17  ;;  %5432 = vmatpush.bf16.msra.mxu1 %v12329_v46  ;;  %v13935_v13 = vld [vmem:[#allocation94_spill] sm:$0xff]  ;;  %v12366_v9 = vld [vmem:[%s10726_s9 + $0x1f0] sm:$0xff]  ;;  %v13940_v56 = vld [vmem:[#allocation99_spill] sm:$0xff] }
 0x372   : > { %5591 = vmatpush.bf16.msra.mxu2 %v12356_v18 }
 0x373   : > { %v4657_v22 = vmax.f32 %v4242_v12, %v4655_v11  ;;  %v12409_v11 = vld [vmem:[%s13473_s0 + $0xa] sm:$0x3]  ;;  %v12425_v12 = vld [vmem:[%s10726_s9 + $0x108] sm:$0xff] }
 0x374   : > { %13943 = vst [vmem:[#allocation55_spill] sm:$0xff] %v12409_v11 }
 0x375   : > { %v5002_v35 = vpop.f32.mrf.mxu2  ;;  %v5016_v6 = vpop.f32.mrf.mxu3  ;;  %5604 = vmatpush.bf16.msra.mxu3 %v12342_v44 }
 0x376   : > { %v5017_v10 = vadd.f32 %v5016_v6, %v5002_v35  ;;  %v12352_v35 = vld [vmem:[%s10726_s9 + $0x1f8] sm:$0xff]  ;;  %5592 = vmatpush.bf16.msra.mxu2 %v12376_v48 }
 0x377   : > { %5775 = vmatpush.bf16.msrb.mxu1 %v12352_v35 }
 0x378   : > { %v5020_v5 = vadd.f32 %v5017_v10, %v4975_v58  ;;  %v13936_v10 = vld [vmem:[#allocation95_spill] sm:$0xff]  ;;  %v12379_v58 = vld [vmem:[%s10726_s9 + $0x158] sm:$0xff] }
 0x37b   : > { %5776 = vmatpush.bf16.msrb.mxu1 %v12366_v9 }
 0x384   : > { %v5046_v34 = vpop.f32.mrf.mxu0  ;;  %v5060_v27 = vpop.f32.mrf.mxu1 }
 0x385   : > { %v5061_v3 = vadd.f32 %v5060_v27, %v5046_v34  ;;  %v13930_v34 = vld [vmem:[#allocation22_spill] sm:$0xff]  ;;  %v13931_v27 = vld [vmem:[#allocation23_spill] sm:$0xff] }
 0x387   : > { %v5065_v41 = vadd.f32 %v5061_v3, %v5019_v57  ;;  %v12345_v57 = vld [vmem:[%s10726_s9 + $0x1b8] sm:$0xff]  ;;  %v13933_v3 = vld [vmem:[#allocation7_spill] sm:$0xff] }
 0x388   : > { %5761 = vmatpush.bf16.msrb.mxu0 %v12345_v57 }
 0x389   : > { %v5067_v28 = vadd.f32 %v13927_v20, %v5065_v41  ;;  %v12360_v41 = vld [vmem:[%s10726_s9 + $0x160] sm:$0xff] }
 0x38a   : > { %5605 = vmatpush.bf16.msra.mxu3 %v12360_v41 }
 0x38b   : > { %v5069_v39 = vmax.f32 %v5067_v28, 0.0  ;;  %v13938_v28 = vld [vmem:[#allocation97_spill] sm:$0xff] }
 0x38c   : > { %v5048_v26 = vpop.f32.mrf.mxu0  ;;  %v5062_v55 = vpop.f32.mrf.mxu1  ;;  %5762 = vmatpush.bf16.msrb.mxu0 %v12363_v8 }
 0x38d   : > { %v5071_v52 = vmax.f32 %v13928_v47, %v5069_v39  ;;  %v5063_v7 = vadd.f32 %v5062_v55, %v5048_v26  ;;  %v12382_v39 = vld [vmem:[%s10726_s9 + $0x1a8] sm:$0xff]  ;;  %v13939_v26 = vld [vmem:[#allocation98_spill] sm:$0xff]  ;;  %v12397_v47 = vld [vmem:[%s10726_s9 + $0x150] sm:$0xff] }
 0x38e   : > { %v12386_v55 = vld [vmem:[%s10726_s9 + $0x1e8] sm:$0xff]  ;;  %5606 = vmatpush.bf16.msra.mxu3 %v12379_v58 }
 0x38f   : > { %v5074_v15 = vrot.slane %v5071_v52, 2  ;;  %v5066_v23 = vadd.f32 %v5063_v7, %v5020_v5  ;;  %v5077_v60 = vrot.slane %v5071_v52, 4  ;;  %5777 = vmatpush.bf16.msrb.mxu1 %v12386_v55  ;;  %v12394_v5 = vld [vmem:[%s10726_s9 + $0x110] sm:$0xff]  ;;  %v12403_v7 = vld [vmem:[%s10726_s9 + $0x1e0] sm:$0xff] }
 0x390   : > { %5763 = vmatpush.bf16.msrb.mxu0 %v12382_v39  ;;  %13942 = vst [vmem:[#allocation54_spill] sm:$0xff] %v12403_v7  ;;  %5593 = vmatpush.bf16.msra.mxu2 %v12394_v5 }
 0x391   : > { %v5076_v1 = vmax.f32 %v5071_v52, %v5074_v15  ;;  %v5068_v36 = vadd.f32 %v13927_v20, %v5066_v23  ;;  %v13937_v20 = vld [vmem:[#allocation96_spill] sm:$0xff]  ;;  %v12414_v15 = vld [vmem:[%s13473_s0 + $0x1a] sm:$0x3]  ;;  %v12419_v23 = vld [vmem:[%s13473_s0 + $0x2a] sm:$0x3] }
 0x392   : > { %5607 = vmatpush.bf16.msra.mxu3 %v12397_v47 }
 0x393   : > { %v5079_v21 = vmax.f32 %v5076_v1, %v5077_v60  ;;  %v5070_v40 = vmax.f32 %v5068_v36, 0.0  ;;  %5778 = vmatpush.bf16.msrb.mxu1 %v12403_v7  ;;  %v12428_v1 = vld [vmem:[%s10726_s9 + $0x148] sm:$0xff]  ;;  %v12431_v60 = vld [vmem:[%s10726_s9 + $0x198] sm:$0xff] }
 0x394   : > { %13944 = vst [vmem:[#allocation28_spill] sm:$0xff] %v12431_v60  ;;  %5594 = vmatpush.bf16.msra.mxu2 %v12425_v12 }
 0x395   : > { %v5080_v62 = vpack.c.bf16 %v5079_v21, %v5079_v21  ;;  %v5072_v49 = vmax.f32 %v4657_v22, %v5070_v40  ;;  %v12434_v21 = vld [vmem:[%s10726_s9 + $0x1d8] sm:$0xff]  ;;  %v12439_v40 = vld [vmem:[%s13473_s0 + $0x3a] sm:$0x3] }
 0x396   : > { %13945 = vst [vmem:[#allocation29_spill] sm:$0xff] %v12434_v21  ;;  %5608 = vmatpush.bf16.msra.mxu3 %v12428_v1 }
 0x397   : > { %5081 = vst [vmem:[%s12309_s12] sm:$0x1] %v5080_v62  ;;  %v5083_v31 = vrot.slane %v5072_v49, 2  ;;  %v5086_v4 = vrot.slane %v5072_v49, 4  ;;  %v12446_v62 = vld [vmem:[%s13473_s0 + $0x4a] sm:$0x3]  ;;  %5779 = vmatpush.bf16.msrb.mxu1 %v12434_v21  ;;  %v12511_v21 = vld [vmem:[%s10726_s9 + $0x268] sm:$0xff] }
 0x398   : > { %v12451_v49 = vld [vmem:[%s13473_s0 + $0x5a] sm:$0x3]  ;;  %13956 = vst [vmem:[#allocation66_spill] sm:$0xff] %v12511_v21 }
 0x399   : > { %v5085_v25 = vmax.f32 %v5071_v52, %v5083_v31  ;;  %v12400_v52 = vld [vmem:[%s10726_s9 + $0x1a0] sm:$0xff] }
 0x39a   : > { %13941 = vst [vmem:[#allocation25_spill] sm:$0xff] %v12400_v52  ;;  %5764 = vmatpush.bf16.msrb.mxu0 %v12400_v52  ;;  %v12459_v31 = vld [vmem:[%s10726_s9 + $0x100] sm:$0xff]  ;;  %v12683_v52 = vld [vmem:[%s10726_s9 + $0x3b0] sm:$0xff] }
 0x39b   : > { %v5088_v16 = vmax.f32 %v5085_v25, %v5086_v4  ;;  %v12462_v25 = vld [vmem:[%s10726_s9 + $0x140] sm:$0xff]  ;;  %v12465_v4 = vld [vmem:[%s10726_s9 + $0x190] sm:$0xff]  ;;  %5595 = vmatpush.bf16.msra.mxu2 %v12459_v31  ;;  %13993 = vst [vmem:[#allocation87_spill] sm:$0xff] %v12683_v52 }
 0x39c   : > { %13946 = vst [vmem:[#allocation58_spill] sm:$0xff] %v12465_v4  ;;  %5609 = vmatpush.bf16.msra.mxu3 %v12462_v25 }
 0x39d   : > { %v5089_v24 = vpack.c.bf16 %v5088_v16, %v5088_v16  ;;  %v12469_v16 = vld [vmem:[%s10726_s9 + $0x1d0] sm:$0xff] }
 0x39e   : > { %5765 = vmatpush.bf16.msrb.mxu0 %v12431_v60  ;;  %13947 = vst [vmem:[#allocation59_spill] sm:$0xff] %v12469_v16  ;;  %5780 = vmatpush.bf16.msrb.mxu1 %v12469_v16  ;;  %v12504_v16 = vld [vmem:[%s10726_s9 + $0x1c0] sm:$0xff]  ;;  %v12514_v60 = vld [vmem:[%s10726_s9 + $0x2b8] sm:$0xff] }
 0x39f   : > { %5091 = vst [vmem:[#allocation1] sm:$0xff] %v5089_v24  ;;  %v12472_v24 = vld [vmem:[%s10726_s9 + $0x238] sm:$0xff] }
 0x3a0   : > { %13954 = vst [vmem:[#allocation40_spill] sm:$0xff] %v12504_v16 }
 0x3a1   : > { %13957 = vst [vmem:[#allocation67_spill] sm:$0xff] %v12514_v60 }
 0x3a2   : > { %5766 = vmatpush.bf16.msrb.mxu0 %v12465_v4  ;;  %v12508_v4 = vld [vmem:[%s10726_s9 + $0x228] sm:$0xff] }
 0x3a3   : > { %13955 = vst [vmem:[#allocation41_spill] sm:$0xff] %v12508_v4 }
 0x3a6   : > { %v5093_v51 = vld [vmem:[#allocation1 + $0x3] ss:$4 sm:$0xff] }
 0x3a7   : > { %8566 = vst [vmem:[%s12309_s12 + $0x2] sm:$0x1] %v5093_v51  ;;  %v12475_v51 = vld [vmem:[%s10726_s9 + $0x278] sm:$0xff] }
 0x3a8   : > { %5161 = vst [vmem:[#allocation1] ss:$9 sm:$0xff] %v13929_v0 }
 0x3a9   : > { %5163 = vst [vmem:[#allocation1 + $0x1] ss:$9 sm:$0xff] %v13930_v34 }
 0x3aa   : > { %5165 = vst [vmem:[#allocation1 + $0x2] ss:$9 sm:$0xff] %v13931_v27 }
 0x3ab   : > { %5167 = vst [vmem:[#allocation1 + $0x3] ss:$9 sm:$0xff] %v13932_v61 }
 0x3ac   : > { %5169 = vst [vmem:[#allocation1 + $0x4] ss:$9 sm:$0xff] %v13933_v3 }
 0x3ad   : > { %5171 = vst [vmem:[#allocation1 + $0x5] ss:$9 sm:$0xff] %v13934_v37 }
 0x3ae   : > { %13948 = vst [vmem:[#allocation32_spill] sm:$0xff] %v12475_v51 }
 0x3b4   : > { %v5172_v6 = vld [vmem:[#allocation1] sm:$0xff]  ;;  %v5173_v54 = vld [vmem:[#allocation1 + $0x9] sm:$0xff] }
 0x3b5   : > { %5300 = vst [vmem:[#allocation1] ss:$9 sm:$0xff] %v13935_v13  ;;  %5280 = vmatmul.bf16.vlgmr.msrb.gmra.mxu2 %v5172_v6  ;;  %5294 = vmatmul.bf16.vlgmr.msrb.gmra.mxu3 %v5173_v54  ;;  %v12485_v6 = vld [vmem:[%s10726_s9 + $0x188] sm:$0xff]  ;;  %v12492_v13 = vld [vmem:[%s10726_s9 + $0x230] sm:$0xff] }
 0x3b6   : > { %5302 = vst [vmem:[#allocation1 + $0x1] ss:$9 sm:$0xff] %v13936_v10  ;;  %5934 = vmatpush.bf16.msrb.mxu2 %v12472_v24  ;;  %v12488_v54 = vld [vmem:[%s10726_s9 + $0x1c8] sm:$0xff]  ;;  %5948 = vmatpush.bf16.msrb.mxu3 %v12475_v51  ;;  %v12686_v51 = vld [vmem:[%s10726_s9 + $0x3f0] sm:$0xff] }
 0x3b7   : > { %5304 = vst [vmem:[#allocation1 + $0x2] ss:$9 sm:$0xff] %v13937_v20  ;;  %5767 = vmatpush.bf16.msrb.mxu0 %v12485_v6  ;;  %5781 = vmatpush.bf16.msrb.mxu1 %v12488_v54 }
 0x3b8   : > { %5306 = vst [vmem:[#allocation1 + $0x3] ss:$9 sm:$0xff] %v13938_v28 }
 0x3b9   : > { %5308 = vst [vmem:[#allocation1 + $0x4] ss:$9 sm:$0xff] %v13939_v26 }
 0x3ba   : > { %5310 = vst [vmem:[#allocation1 + $0x5] ss:$9 sm:$0xff] %v13940_v56  ;;  %5935 = vmatpush.bf16.msrb.mxu2 %v12492_v13 }
 0x3bb   : > { %13949 = vst [vmem:[#allocation33_spill] sm:$0xff] %v12485_v6  ;;  %5782 = vmatpush.bf16.msrb.mxu1 %v12504_v16  ;;  %v12539_v16 = vld [vmem:[%s10726_s9 + $0x2f0] sm:$0xff] }
 0x3bc   : > { %13950 = vst [vmem:[#allocation62_spill] sm:$0xff] %v12488_v54  ;;  %v12517_v54 = vld [vmem:[%s10726_s9 + $0x2f8] sm:$0xff] }
 0x3bd   : > { %13951 = vst [vmem:[#allocation63_spill] sm:$0xff] %v12492_v13  ;;  %v12617_v13 = vld [vmem:[%s10726_s9 + $0x378] sm:$0xff] }
 0x3be   : > { %13958 = vst [vmem:[#allocation44_spill] sm:$0xff] %v12517_v54  ;;  %5936 = vmatpush.bf16.msrb.mxu2 %v12508_v4 }
 0x3bf   : > { %13962 = vst [vmem:[#allocation52_spill] sm:$0xff] %v12539_v16 }
 0x3c0   : > { %13982 = vst [vmem:[#allocation70_spill] sm:$0xff] %v12617_v13 }
 0x3c1   : > { %v5311_v36 = vld [vmem:[#allocation1] sm:$0xff]  ;;  %v5312_v22 = vld [vmem:[#allocation1 + $0x9] sm:$0xff]  ;;  %13994 = vst [vmem:[#allocation90_spill] sm:$0xff] %v12686_v51 }
 0x3c2   : > { %5472 = vst [vmem:[#allocation1] ss:$9 sm:$0xff] %v12409_v11  ;;  %5419 = vmatmul.bf16.vlgmr.msra.gmra.mxu0 %v5311_v36  ;;  %5433 = vmatmul.bf16.vlgmr.msra.gmra.mxu1 %v5312_v22  ;;  %v12495_v36 = vld [vmem:[%s10726_s9 + $0x270] sm:$0xff]  ;;  %v12501_v22 = vld [vmem:[%s10726_s9 + $0x180] sm:$0xff] }
 0x3c3   : > { %5475 = vst [vmem:[#allocation1 + $0x1] ss:$9 sm:$0xff] %v12414_v15  ;;  %5949 = vmatpush.bf16.msrb.mxu3 %v12495_v36  ;;  %5768 = vmatpush.bf16.msrb.mxu0 %v12501_v22 }
 0x3c4   : > { %5478 = vst [vmem:[#allocation1 + $0x2] ss:$9 sm:$0xff] %v12419_v23  ;;  %6122 = vmatpush.bf16.msra.mxu1 %v12517_v54  ;;  %v12550_v54 = vld [vmem:[%s10726_s9 + $0x258] sm:$0xff] }
 0x3c5   : > { %5481 = vst [vmem:[#allocation1 + $0x3] ss:$9 sm:$0xff] %v12439_v40 }
 0x3c6   : > { %5484 = vst [vmem:[#allocation1 + $0x4] ss:$9 sm:$0xff] %v12446_v62 }
 0x3c7   : > { %5487 = vst [vmem:[#allocation1 + $0x5] ss:$9 sm:$0xff] %v12451_v49  ;;  %5950 = vmatpush.bf16.msrb.mxu3 %v12511_v21  ;;  %6108 = vmatpush.bf16.msra.mxu0 %v12514_v60  ;;  %v13963_v60 = vld [vmem:[#allocation19_spill] sm:$0xff]  ;;  %v12553_v21 = vld [vmem:[%s10726_s9 + $0x2a8] sm:$0xff] }
 0x3c8   : > { %13952 = vst [vmem:[#allocation36_spill] sm:$0xff] %v12495_v36  ;;  %v12528_v36 = vld [vmem:[%s10726_s9 + $0x220] sm:$0xff]  ;;  %6123 = vmatpush.bf16.msra.mxu1 %v12539_v16 }
 0x3c9   : > { %13953 = vst [vmem:[#allocation37_spill] sm:$0xff] %v12501_v22  ;;  %5937 = vmatpush.bf16.msrb.mxu2 %v12528_v36  ;;  %v12547_v22 = vld [vmem:[%s10726_s9 + $0x218] sm:$0xff]  ;;  %v12573_v16 = vld [vmem:[%s10726_s9 + $0x2e0] sm:$0xff] }
 0x3ca   : > { %13959 = vst [vmem:[#allocation45_spill] sm:$0xff] %v12528_v36  ;;  %v12569_v36 = vld [vmem:[%s10726_s9 + $0x2a0] sm:$0xff] }
 0x3cb   : > { %13964 = vst [vmem:[#allocation53_spill] sm:$0xff] %v12547_v22 }
 0x3cc   : > { %13965 = vst [vmem:[#allocation76_spill] sm:$0xff] %v12550_v54 }
 0x3cd   : > { %13966 = vst [vmem:[#allocation77_spill] sm:$0xff] %v12553_v21  ;;  %5938 = vmatpush.bf16.msrb.mxu2 %v12547_v22 }
 0x3ce   : > { %v5488_v6 = vld [vmem:[#allocation1] sm:$0xff]  ;;  %v5489_v7 = vld [vmem:[#allocation1 + $0x9] sm:$0xff]  ;;  %13970 = vst [vmem:[#allocation81_spill] sm:$0xff] %v12569_v36 }
 0x3cf   : > { %5650 = vst [vmem:[#allocation1] ss:$9 sm:$0xff] %v13936_v10  ;;  %5596 = vmatmul.bf16.vlgmr.msra.gmra.mxu2 %v5488_v6  ;;  %v12531_v10 = vld [vmem:[%s10726_s9 + $0x260] sm:$0xff]  ;;  %v12534_v6 = vld [vmem:[%s10726_s9 + $0x2b0] sm:$0xff]  ;;  %5610 = vmatmul.bf16.vlgmr.msra.gmra.mxu3 %v5489_v7  ;;  %v12557_v7 = vld [vmem:[%s10726_s9 + $0x2e8] sm:$0xff] }
 0x3d0   : > { %5652 = vst [vmem:[#allocation1 + $0x1] ss:$9 sm:$0xff] %v13937_v20  ;;  %5951 = vmatpush.bf16.msrb.mxu3 %v12531_v10  ;;  %6109 = vmatpush.bf16.msra.mxu0 %v12534_v6 }
 0x3d1   : > { %5654 = vst [vmem:[#allocation1 + $0x2] ss:$9 sm:$0xff] %v13938_v28  ;;  %6124 = vmatpush.bf16.msra.mxu1 %v12557_v7 }
 0x3d2   : > { %13960 = vst [vmem:[#allocation48_spill] sm:$0xff] %v12531_v10  ;;  %v12566_v10 = vld [vmem:[%s10726_s9 + $0x250] sm:$0xff] }
 0x3d3   : > { %13961 = vst [vmem:[#allocation49_spill] sm:$0xff] %v12534_v6  ;;  %v12563_v6 = vld [vmem:[%s10726_s9 + $0x210] sm:$0xff] }
 0x3d4   : > { %5656 = vst [vmem:[#allocation1 + $0x3] ss:$9 sm:$0xff] %v13939_v26  ;;  %5952 = vmatpush.bf16.msrb.mxu3 %v12550_v54  ;;  %6110 = vmatpush.bf16.msra.mxu0 %v12553_v21  ;;  %v12581_v21 = vld [vmem:[%s10726_s9 + $0x208] sm:$0xff]  ;;  %v12587_v54 = vld [vmem:[%s10726_s9 + $0x298] sm:$0xff] }
 0x3d5   : > { %5658 = vst [vmem:[#allocation1 + $0x4] ss:$9 sm:$0xff] %v13940_v56  ;;  %5939 = vmatpush.bf16.msrb.mxu2 %v12563_v6  ;;  %6125 = vmatpush.bf16.msra.mxu1 %v12573_v16 }
 0x3d6   : > { %5660 = vst [vmem:[#allocation1 + $0x5] ss:$9 sm:$0xff] %v13963_v60 }
 0x3d7   : > { %13967 = vst [vmem:[#allocation56_spill] sm:$0xff] %v12557_v7  ;;  %v12584_v7 = vld [vmem:[%s10726_s9 + $0x248] sm:$0xff] }
 0x3d8   : > { %13968 = vst [vmem:[#allocation57_spill] sm:$0xff] %v12563_v6  ;;  %5953 = vmatpush.bf16.msrb.mxu3 %v12566_v10  ;;  %6111 = vmatpush.bf16.msra.mxu0 %v12569_v36  ;;  %v13976_v36 = vld [vmem:[#allocation9_spill] sm:$0xff] }
 0x3d9   : > { %13969 = vst [vmem:[#allocation80_spill] sm:$0xff] %v12566_v10  ;;  %5940 = vmatpush.bf16.msrb.mxu2 %v12581_v21  ;;  %v12601_v10 = vld [vmem:[%s10726_s9 + $0x200] sm:$0xff]  ;;  %v12607_v6 = vld [vmem:[%s10726_s9 + $0x290] sm:$0xff] }
 0x3da   : > { %13971 = vst [vmem:[#allocation60_spill] sm:$0xff] %v12573_v16  ;;  %v12604_v16 = vld [vmem:[%s10726_s9 + $0x240] sm:$0xff] }
 0x3db   : > { %13972 = vst [vmem:[#allocation61_spill] sm:$0xff] %v12581_v21  ;;  %v12614_v21 = vld [vmem:[%s10726_s9 + $0x338] sm:$0xff] }
 0x3dc   : > { %13973 = vst [vmem:[#allocation84_spill] sm:$0xff] %v12584_v7  ;;  %5954 = vmatpush.bf16.msrb.mxu3 %v12584_v7  ;;  %6112 = vmatpush.bf16.msra.mxu0 %v12587_v54  ;;  %v12632_v7 = vld [vmem:[%s10726_s9 + $0x330] sm:$0xff] }
 0x3dd   : > { %v5661_v4 = vld [vmem:[#allocation1] sm:$0xff]  ;;  %v5662_v22 = vld [vmem:[#allocation1 + $0x9] sm:$0xff]  ;;  %13974 = vst [vmem:[#allocation85_spill] sm:$0xff] %v12587_v54  ;;  %5941 = vmatpush.bf16.msrb.mxu2 %v12601_v10 }
 0x3de   : > { %5823 = vst [vmem:[#allocation1] ss:$9 sm:$0xff] %v13930_v34  ;;  %5769 = vmatmul.bf16.vlgmr.msrb.gmra.mxu0 %v5661_v4  ;;  %v12592_v4 = vld [vmem:[%s10726_s9 + $0x2d8] sm:$0xff]  ;;  %5783 = vmatmul.bf16.vlgmr.msrb.gmra.mxu1 %v5662_v22  ;;  %v12611_v22 = vld [vmem:[%s10726_s9 + $0x2d0] sm:$0xff]  ;;  %v12625_v54 = vld [vmem:[%s10726_s9 + $0x288] sm:$0xff] }
 0x3df   : > { %5825 = vst [vmem:[#allocation1 + $0x1] ss:$9 sm:$0xff] %v13931_v27  ;;  %6126 = vmatpush.bf16.msra.mxu1 %v12592_v4 }
 0x3e0   : > { %5827 = vst [vmem:[#allocation1 + $0x2] ss:$9 sm:$0xff] %v13932_v61  ;;  %5955 = vmatpush.bf16.msrb.mxu3 %v12604_v16  ;;  %6113 = vmatpush.bf16.msra.mxu0 %v12607_v6 }
 0x3e1   : > { %13975 = vst [vmem:[#allocation64_spill] sm:$0xff] %v12592_v4  ;;  %6281 = vmatpush.bf16.msra.mxu2 %v12614_v21  ;;  %v12628_v4 = vld [vmem:[%s10726_s9 + $0x2c8] sm:$0xff] }
 0x3e2   : > { %5829 = vst [vmem:[#allocation1 + $0x3] ss:$9 sm:$0xff] %v13933_v3 }
 0x3e3   : > { %5831 = vst [vmem:[#allocation1 + $0x4] ss:$9 sm:$0xff] %v13934_v37  ;;  %6127 = vmatpush.bf16.msra.mxu1 %v12611_v22 }
 0x3e4   : > { %5833 = vst [vmem:[#allocation1 + $0x5] ss:$9 sm:$0xff] %v13976_v36  ;;  %6295 = vmatpush.bf16.msra.mxu3 %v12617_v13  ;;  %6114 = vmatpush.bf16.msra.mxu0 %v12625_v54  ;;  %v12645_v13 = vld [vmem:[%s10726_s9 + $0x2c0] sm:$0xff] }
 0x3e5   : > { %13977 = vst [vmem:[#allocation65_spill] sm:$0xff] %v12601_v10  ;;  %v12635_v10 = vld [vmem:[%s10726_s9 + $0x370] sm:$0xff]  ;;  %6282 = vmatpush.bf16.msra.mxu2 %v12632_v7 }
 0x3e6   : > { %13978 = vst [vmem:[#allocation88_spill] sm:$0xff] %v12604_v16 }
 0x3e7   : > { %13979 = vst [vmem:[#allocation89_spill] sm:$0xff] %v12607_v6  ;;  %6128 = vmatpush.bf16.msra.mxu1 %v12628_v4 }
 0x3e8   : > { %13980 = vst [vmem:[#allocation68_spill] sm:$0xff] %v12611_v22  ;;  %v12642_v22 = vld [vmem:[%s10726_s9 + $0x280] sm:$0xff]  ;;  %6296 = vmatpush.bf16.msra.mxu3 %v12635_v10 }
 0x3e9   : > { %13981 = vst [vmem:[#allocation69_spill] sm:$0xff] %v12614_v21  ;;  %v12650_v21 = vld [vmem:[%s13473_s0 + $0x6a] sm:$0x3]  ;;  %6115 = vmatpush.bf16.msra.mxu0 %v12642_v22 }
 0x3ea   : > { %13983 = vst [vmem:[#allocation71_spill] sm:$0xff] %v12625_v54  ;;  %v12666_v54 = vld [vmem:[%s10726_s9 + $0x3f8] sm:$0xff] }
 0x3eb   : > { %13984 = vst [vmem:[#allocation72_spill] sm:$0xff] %v12628_v4  ;;  %v5834_v16 = vld [vmem:[#allocation1] sm:$0xff]  ;;  %v5835_v6 = vld [vmem:[#allocation1 + $0x9] sm:$0xff]  ;;  %6129 = vmatpush.bf16.msra.mxu1 %v12645_v13 }
 0x3ec   : > { %13985 = vst [vmem:[#allocation73_spill] sm:$0xff] %v12632_v7  ;;  %5942 = vmatmul.bf16.vlgmr.msrb.gmra.mxu2 %v5834_v16  ;;  %5956 = vmatmul.bf16.vlgmr.msrb.gmra.mxu3 %v5835_v6  ;;  %v12656_v16 = vld [vmem:[%s10726_s9 + $0x328] sm:$0xff]  ;;  %v12663_v4 = vld [vmem:[%s10726_s9 + $0x3b8] sm:$0xff]  ;;  %v12678_v7 = vld [vmem:[%s10726_s9 + $0x360] sm:$0xff] }
 0x3ed   : > { %13986 = vst [vmem:[#allocation74_spill] sm:$0xff] %v12635_v10  ;;  %v12659_v6 = vld [vmem:[%s10726_s9 + $0x368] sm:$0xff]  ;;  %6283 = vmatpush.bf16.msra.mxu2 %v12656_v16  ;;  %v12675_v10 = vld [vmem:[%s10726_s9 + $0x320] sm:$0xff]  ;;  %6454 = vmatpush.bf16.msrb.mxu0 %v12663_v4 }
 0x3ee   : > { %5996 = vst [vmem:[#allocation1] ss:$9 sm:$0xff] %v12414_v15  ;;  %6297 = vmatpush.bf16.msra.mxu3 %v12659_v6 }
 0x3ef   : > { %5998 = vst [vmem:[#allocation1 + $0x1] ss:$9 sm:$0xff] %v12419_v23  ;;  %6468 = vmatpush.bf16.msrb.mxu1 %v12666_v54 }
 0x3f0   : > { %13987 = vst [vmem:[#allocation75_spill] sm:$0xff] %v12642_v22  ;;  %v12694_v22 = vld [vmem:[%s10726_s9 + $0x358] sm:$0xff] }
 0x3f1   : > { %13988 = vst [vmem:[#allocation78_spill] sm:$0xff] %v12645_v13  ;;  %6284 = vmatpush.bf16.msra.mxu2 %v12675_v10  ;;  %v12691_v13 = vld [vmem:[%s10726_s9 + $0x318] sm:$0xff]  ;;  %6455 = vmatpush.bf16.msrb.mxu0 %v12683_v52  ;;  %v12712_v52 = vld [vmem:[%s10726_s9 + $0x350] sm:$0xff] }
 0x3f2   : > { %6000 = vst [vmem:[#allocation1 + $0x2] ss:$9 sm:$0xff] %v12439_v40  ;;  %6298 = vmatpush.bf16.msra.mxu3 %v12678_v7 }
 0x3f3   : > { %13989 = vst [vmem:[#allocation79_spill] sm:$0xff] %v12659_v6  ;;  %6469 = vmatpush.bf16.msrb.mxu1 %v12686_v51  ;;  %v12709_v51 = vld [vmem:[%s10726_s9 + $0x310] sm:$0xff] }
 0x3f4   : > { %6002 = vst [vmem:[#allocation1 + $0x3] ss:$9 sm:$0xff] %v12446_v62 }
 0x3f5   : > { %13990 = vst [vmem:[#allocation82_spill] sm:$0xff] %v12663_v4  ;;  %v12702_v4 = vld [vmem:[%s10726_s9 + $0x3e8] sm:$0xff]  ;;  %6285 = vmatpush.bf16.msra.mxu2 %v12691_v13 }
 0x3f6   : > { %13991 = vst [vmem:[#allocation83_spill] sm:$0xff] %v12666_v54  ;;  %v12699_v54 = vld [vmem:[%s10726_s9 + $0x3a8] sm:$0xff]  ;;  %6299 = vmatpush.bf16.msra.mxu3 %v12694_v22 }
 0x3f7   : > { %6004 = vst [vmem:[#allocation1 + $0x4] ss:$9 sm:$0xff] %v12451_v49  ;;  %6456 = vmatpush.bf16.msrb.mxu0 %v12699_v54  ;;  %6470 = vmatpush.bf16.msrb.mxu1 %v12702_v4 }
 0x3f8   : > { %6007 = vst [vmem:[#allocation1 + $0x5] ss:$9 sm:$0xff] %v12650_v21 }
 0x3f9   : > { %13992 = vst [vmem:[#allocation86_spill] sm:$0xff] %v12675_v10  ;;  %6286 = vmatpush.bf16.msra.mxu2 %v12709_v51 }
 0x3fa   : > { %13995 = vst [vmem:[#allocation91_spill] sm:$0xff] %v12699_v54  ;;  %6300 = vmatpush.bf16.msra.mxu3 %v12712_v52  ;;  %v12759_v54 = vld [vmem:[%s10726_s9 + $0x438] sm:$0xff] }
 0x3fb   : > { %13996 = vst [vmem:[#allocation92_spill] sm:$0xff] %v12702_v4  ;;  %v12748_v4 = vld [vmem:[%s10726_s9 + $0x340] sm:$0xff] }
 0x3fc   : > { %13997 = vst [vmem:[#allocation93_spill] sm:$0xff] %v12709_v51 }
 0x3fd   : > { %13998 = vst [vmem:[#allocation18_spill] sm:$0xff] %v12712_v52 }
 0x3fe   : > { %14007 = vst [vmem:[#allocation5_spill] sm:$0xff] %v12748_v4 }
 0x3ff   : > { %v6008_v6 = vld [vmem:[#allocation1] sm:$0xff]  ;;  %v6009_v10 = vld [vmem:[#allocation1 + $0x9] sm:$0xff]  ;;  %14010 = vst [vmem:[#allocation6_spill] sm:$0xff] %v12759_v54 }
 0x400   : > { %6170 = vst [vmem:[#allocation1] ss:$9 sm:$0xff] %v13937_v20  ;;  %6116 = vmatmul.bf16.vlgmr.msra.gmra.mxu0 %v6008_v6  ;;  %6130 = vmatmul.bf16.vlgmr.msra.gmra.mxu1 %v6009_v10  ;;  %v12718_v20 = vld [vmem:[%s10726_s9 + $0x3a0] sm:$0xff]  ;;  %v14001_v10 = vld [vmem:[#allocation4_spill] sm:$0xff] }
 0x401   : > { %6172 = vst [vmem:[#allocation1 + $0x1] ss:$9 sm:$0xff] %v13938_v28  ;;  %v12721_v28 = vld [vmem:[%s10726_s9 + $0x3e0] sm:$0xff]  ;;  %v12732_v6 = vld [vmem:[%s10726_s9 + $0x348] sm:$0xff]  ;;  %6457 = vmatpush.bf16.msrb.mxu0 %v12718_v20 }
 0x402   : > { %6174 = vst [vmem:[#allocation1 + $0x2] ss:$9 sm:$0xff] %v13939_v26  ;;  %v12729_v26 = vld [vmem:[%s10726_s9 + $0x308] sm:$0xff]  ;;  %6471 = vmatpush.bf16.msrb.mxu1 %v12721_v28  ;;  %6301 = vmatpush.bf16.msra.mxu3 %v12732_v6 }
 0x403   : > { %13999 = vst [vmem:[#allocation11_spill] sm:$0xff] %v12718_v20  ;;  %6287 = vmatpush.bf16.msra.mxu2 %v12729_v26  ;;  %v12753_v20 = vld [vmem:[%s10726_s9 + $0x390] sm:$0xff] }
 0x404   : > { %14000 = vst [vmem:[#allocation51_spill] sm:$0xff] %v12721_v28  ;;  %v12756_v28 = vld [vmem:[%s10726_s9 + $0x3d0] sm:$0xff] }
 0x405   : > { %6176 = vst [vmem:[#allocation1 + $0x3] ss:$9 sm:$0xff] %v13940_v56  ;;  %v12737_v56 = vld [vmem:[%s10726_s9 + $0x398] sm:$0xff] }
 0x406   : > { %6178 = vst [vmem:[#allocation1 + $0x4] ss:$9 sm:$0xff] %v13963_v60  ;;  %v12740_v60 = vld [vmem:[%s10726_s9 + $0x3d8] sm:$0xff]  ;;  %6458 = vmatpush.bf16.msrb.mxu0 %v12737_v56  ;;  %6302 = vmatpush.bf16.msra.mxu3 %v12748_v4  ;;  %v12780_v4 = vld [vmem:[%s10726_s9 + $0x430] sm:$0xff] }
 0x407   : > { %6180 = vst [vmem:[#allocation1 + $0x5] ss:$9 sm:$0xff] %v14001_v10  ;;  %v12745_v10 = vld [vmem:[%s10726_s9 + $0x300] sm:$0xff]  ;;  %6472 = vmatpush.bf16.msrb.mxu1 %v12740_v60 }
 0x408   : > { %14002 = vst [vmem:[#allocation24_spill] sm:$0xff] %v12729_v26  ;;  %v12762_v26 = vld [vmem:[%s10726_s9 + $0x478] sm:$0xff]  ;;  %6288 = vmatpush.bf16.msra.mxu2 %v12745_v10 }
 0x409   : > { %14003 = vst [vmem:[#allocation27_spill] sm:$0xff] %v12732_v6 }
 0x40a   : > { %14004 = vst [vmem:[#allocation8_spill] sm:$0xff] %v12737_v56  ;;  %6459 = vmatpush.bf16.msrb.mxu0 %v12753_v20  ;;  %v12774_v56 = vld [vmem:[%s10726_s9 + $0x3c8] sm:$0xff]  ;;  %6642 = vmatpush.bf16.msrb.mxu3 %v12762_v26 }
 0x40b   : > { %14005 = vst [vmem:[#allocation31_spill] sm:$0xff] %v12740_v60  ;;  %6473 = vmatpush.bf16.msrb.mxu1 %v12756_v28  ;;  %v12771_v60 = vld [vmem:[%s10726_s9 + $0x388] sm:$0xff] }
 0x40c   : > { %14006 = vst [vmem:[#allocation10_spill] sm:$0xff] %v12745_v10  ;;  %6628 = vmatpush.bf16.msrb.mxu2 %v12759_v54  ;;  %v12783_v10 = vld [vmem:[%s10726_s9 + $0x470] sm:$0xff] }
 0x40d   : > { %14008 = vst [vmem:[#allocation22_spill] sm:$0xff] %v12753_v20  ;;  %v12791_v20 = vld [vmem:[%s10726_s9 + $0x380] sm:$0xff] }
 0x40e   : > { %14009 = vst [vmem:[#allocation23_spill] sm:$0xff] %v12756_v28  ;;  %v6181_v6 = vld [vmem:[#allocation1] sm:$0xff]  ;;  %v6182_v52 = vld [vmem:[#allocation1 + $0x9] sm:$0xff]  ;;  %6460 = vmatpush.bf16.msrb.mxu0 %v12771_v60  ;;  %6643 = vmatpush.bf16.msrb.mxu3 %v12783_v10 }
 0x40f   : > { %14011 = vst [vmem:[#allocation7_spill] sm:$0xff] %v12762_v26  ;;  %6289 = vmatmul.bf16.vlgmr.msra.gmra.mxu2 %v6181_v6  ;;  %6303 = vmatmul.bf16.vlgmr.msra.gmra.mxu3 %v6182_v52  ;;  %v14016_v28 = vld [vmem:[#allocation30_spill] sm:$0xff]  ;;  %v12794_v26 = vld [vmem:[%s10726_s9 + $0x3c0] sm:$0xff]  ;;  %v12799_v6 = vld [vmem:[%s10726_s9 + $0x428] sm:$0xff] }
 0x410   : > { %6343 = vst [vmem:[#allocation1] ss:$9 sm:$0xff] %v13931_v27  ;;  %6474 = vmatpush.bf16.msrb.mxu1 %v12774_v56  ;;  %6629 = vmatpush.bf16.msrb.mxu2 %v12780_v4  ;;  %v12802_v52 = vld [vmem:[%s10726_s9 + $0x468] sm:$0xff] }
 0x411   : > { %6345 = vst [vmem:[#allocation1 + $0x1] ss:$9 sm:$0xff] %v13932_v61 }
 0x412   : > { %14012 = vst [vmem:[#allocation26_spill] sm:$0xff] %v12771_v60  ;;  %6461 = vmatpush.bf16.msrb.mxu0 %v12791_v20  ;;  %6644 = vmatpush.bf16.msrb.mxu3 %v12802_v52  ;;  %v12812_v60 = vld [vmem:[%s10726_s9 + $0x460] sm:$0xff] }
 0x413   : > { %14013 = vst [vmem:[#allocation94_spill] sm:$0xff] %v12774_v56  ;;  %v12809_v56 = vld [vmem:[%s10726_s9 + $0x420] sm:$0xff] }
 0x414   : > { %6347 = vst [vmem:[#allocation1 + $0x2] ss:$9 sm:$0xff] %v13933_v3  ;;  %6475 = vmatpush.bf16.msrb.mxu1 %v12794_v26  ;;  %6630 = vmatpush.bf16.msrb.mxu2 %v12799_v6 }
 0x415   : > { %14014 = vst [vmem:[#allocation95_spill] sm:$0xff] %v12780_v4  ;;  %v14023_v4 = vld [vmem:[#allocation34_spill] sm:$0xff] }
 0x416   : > { %14015 = vst [vmem:[#allocation96_spill] sm:$0xff] %v12783_v10  ;;  %6677 = vmatpush.bf16.msra.mxu0 %v14023_v4  ;;  %v14024_v10 = vld [vmem:[#allocation35_spill] sm:$0xff]  ;;  %6645 = vmatpush.bf16.msrb.mxu3 %v12812_v60  ;;  %v12829_v4 = vld [vmem:[%s13473_s0 + $0x7a] sm:$0x3] }
 0x417   : > { %6349 = vst [vmem:[#allocation1 + $0x3] ss:$9 sm:$0xff] %v13934_v37 }
 0x418   : > { %6351 = vst [vmem:[#allocation1 + $0x4] ss:$9 sm:$0xff] %v13976_v36  ;;  %6691 = vmatpush.bf16.msra.mxu1 %v14024_v10  ;;  %6631 = vmatpush.bf16.msrb.mxu2 %v12809_v56  ;;  %v12840_v10 = vld [vmem:[%s10726_s9 + $0x410] sm:$0xff] }
 0x419   : > { %6353 = vst [vmem:[#allocation1 + $0x5] ss:$9 sm:$0xff] %v14016_v28 }
 0x41a   : > { %14017 = vst [vmem:[#allocation97_spill] sm:$0xff] %v12791_v20  ;;  %v12824_v20 = vld [vmem:[%s10726_s9 + $0x458] sm:$0xff] }
 0x41b   : > { %14018 = vst [vmem:[#allocation98_spill] sm:$0xff] %v12794_v26  ;;  %v12821_v26 = vld [vmem:[%s10726_s9 + $0x418] sm:$0xff]  ;;  %6646 = vmatpush.bf16.msrb.mxu3 %v12824_v20 }
 0x41c   : > { %14019 = vst [vmem:[#allocation99_spill] sm:$0xff] %v12799_v6  ;;  %6632 = vmatpush.bf16.msrb.mxu2 %v12821_v26 }
 0x41d   : > { %14020 = vst [vmem:[#allocation19_spill] sm:$0xff] %v12802_v52  ;;  %v12853_v52 = vld [vmem:[%s10726_s9 + $0x448] sm:$0xff] }
 0x41e   : > { %14021 = vst [vmem:[#allocation9_spill] sm:$0xff] %v12809_v56  ;;  %v14031_v56 = vld [vmem:[#allocation38_spill] sm:$0xff] }
 0x41f   : > { %14022 = vst [vmem:[#allocation4_spill] sm:$0xff] %v12812_v60  ;;  %v12843_v60 = vld [vmem:[%s10726_s9 + $0x450] sm:$0xff] }
 0x420   : > { %v6354_v54 = vld [vmem:[#allocation1] sm:$0xff]  ;;  %v6355_v51 = vld [vmem:[#allocation1 + $0x9] sm:$0xff]  ;;  %14025 = vst [vmem:[#allocation30_spill] sm:$0xff] %v12821_v26  ;;  %6633 = vmatpush.bf16.msrb.mxu2 %v12840_v10  ;;  %6647 = vmatpush.bf16.msrb.mxu3 %v12843_v60 }
 0x421   : > { %6516 = vst [vmem:[#allocation1] ss:$9 sm:$0xff] %v12419_v23  ;;  %6462 = vmatmul.bf16.vlgmr.msrb.gmra.mxu0 %v6354_v54  ;;  %6476 = vmatmul.bf16.vlgmr.msrb.gmra.mxu1 %v6355_v51  ;;  %v14028_v51 = vld [vmem:[#allocation12_spill] sm:$0xff]  ;;  %v14029_v54 = vld [vmem:[#allocation13_spill] sm:$0xff]  ;;  %v14033_v26 = vld [vmem:[#allocation15_spill] sm:$0xff] }
 0x422   : > { %6518 = vst [vmem:[#allocation1 + $0x1] ss:$9 sm:$0xff] %v12439_v40  ;;  %6678 = vmatpush.bf16.msra.mxu0 %v14028_v51  ;;  %6692 = vmatpush.bf16.msra.mxu1 %v14029_v54  ;;  %v14032_v51 = vld [vmem:[#allocation39_spill] sm:$0xff]  ;;  %v12850_v54 = vld [vmem:[%s10726_s9 + $0x408] sm:$0xff] }
 0x423   : > { %14026 = vst [vmem:[#allocation34_spill] sm:$0xff] %v12824_v20  ;;  %v14034_v20 = vld [vmem:[#allocation42_spill] sm:$0xff] }
 0x424   : > { %14027 = vst [vmem:[#allocation35_spill] sm:$0xff] %v12829_v4  ;;  %6634 = vmatpush.bf16.msrb.mxu2 %v12850_v54  ;;  %6648 = vmatpush.bf16.msrb.mxu3 %v12853_v52 }
 0x425   : > { %6520 = vst [vmem:[#allocation1 + $0x2] ss:$9 sm:$0xff] %v12446_v62 }
 0x426   : > { %6522 = vst [vmem:[#allocation1 + $0x3] ss:$9 sm:$0xff] %v12451_v49  ;;  %6679 = vmatpush.bf16.msra.mxu0 %v14031_v56  ;;  %6693 = vmatpush.bf16.msra.mxu1 %v14032_v51  ;;  %v12861_v56 = vld [vmem:[%s10726_s9 + $0x400] sm:$0xff] }
 0x427   : > { %6524 = vst [vmem:[#allocation1 + $0x4] ss:$9 sm:$0xff] %v12650_v21  ;;  %v12864_v51 = vld [vmem:[%s10726_s9 + $0x440] sm:$0xff] }
 0x428   : > { %6527 = vst [vmem:[#allocation1 + $0x5] ss:$9 sm:$0xff] %v12829_v4  ;;  %6635 = vmatpush.bf16.msrb.mxu2 %v12861_v56  ;;  %6649 = vmatpush.bf16.msrb.mxu3 %v12864_v51 }
 0x429   : > { %14030 = vst [vmem:[#allocation12_spill] sm:$0xff] %v12843_v60  ;;  %v14037_v60 = vld [vmem:[#allocation43_spill] sm:$0xff] }
 0x42a   : > { %6680 = vmatpush.bf16.msra.mxu0 %v14033_v26  ;;  %6694 = vmatpush.bf16.msra.mxu1 %v14034_v20  ;;  %14035 = vst [vmem:[#allocation13_spill] sm:$0xff] %v12861_v56  ;;  %v14038_v26 = vld [vmem:[#allocation16_spill] sm:$0xff]  ;;  %v14039_v20 = vld [vmem:[#allocation47_spill] sm:$0xff]  ;;  %v12885_v56 = vld [vmem:[%s10726_s9 + $0x30] sm:$0xff] }
 0x42b   : > { %14036 = vst [vmem:[#allocation38_spill] sm:$0xff] %v12864_v51  ;;  %v12889_v51 = vld [vmem:[%s10726_s9 + $0x70] sm:$0xff] }
 0x42e   : > { %6681 = vmatpush.bf16.msra.mxu0 %v14037_v60  ;;  %6695 = vmatpush.bf16.msra.mxu1 %v14038_v26  ;;  %v12878_v60 = vld [vmem:[%s10726_s9 + $0x38] sm:$0xff] }
 0x42f   : > { %v6528_v6 = vld [vmem:[#allocation1] sm:$0xff]  ;;  %v6529_v4 = vld [vmem:[#allocation1 + $0x9] sm:$0xff]  ;;  %6720 = vmatpush.bf16.msra.mxu2 %v12878_v60 }
 0x430   : > { %6662 = vst [vmem:[#allocation1] ss:$9 sm:$0xff] %v12409_v11  ;;  %v14040_v11 = vld [vmem:[#allocation20_spill] sm:$0xff]  ;;  %v14041_v26 = vld [vmem:[#allocation14_spill] sm:$0xff]  ;;  %6636 = vmatmul.bf16.vlgmr.msrb.gmra.mxu2 %v6528_v6  ;;  %6650 = vmatmul.bf16.vlgmr.msrb.gmra.mxu3 %v6529_v4  ;;  %v14042_v6 = vld [vmem:[#allocation17_spill] sm:$0xff] }
 0x431   : > { %6664 = vst [vmem:[#allocation1 + $0x1] ss:$9 sm:$0xff] %v12414_v15  ;;  %6734 = vmatpush.bf16.msra.mxu3 %v14041_v26  ;;  %v14055_v4 = vld [vmem:[#allocation58_spill] sm:$0xff]  ;;  %v14056_v26 = vld [vmem:[#allocation59_spill] sm:$0xff] }
 0x432   : > { %6666 = vst [vmem:[#allocation1 + $0x2] ss:$9 sm:$0xff] %v12419_v23  ;;  %6682 = vmatpush.bf16.msra.mxu0 %v14039_v20  ;;  %6696 = vmatpush.bf16.msra.mxu1 %v14040_v11 }
 0x433   : > { %6668 = vst [vmem:[#allocation1 + $0x3] ss:$9 sm:$0xff] %v12439_v40  ;;  %6721 = vmatpush.bf16.msra.mxu2 %v12885_v56 }
 0x434   : > { %6670 = vst [vmem:[#allocation1 + $0x4] ss:$9 sm:$0xff] %v12446_v62 }
 0x435   : > { %6672 = vst [vmem:[#allocation1 + $0x5] ss:$9 sm:$0xff] %v12451_v49  ;;  %6735 = vmatpush.bf16.msra.mxu3 %v12889_v51 }
 0x436   : > { %6683 = vmatpush.bf16.msra.mxu0 %v12203_v33  ;;  %6697 = vmatpush.bf16.msra.mxu1 %v12219_v45  ;;  %v14043_v45 = vld [vmem:[#allocation46_spill] sm:$0xff] }
 0x437   : > { %6722 = vmatpush.bf16.msra.mxu2 %v14042_v6  ;;  %v14058_v6 = vld [vmem:[#allocation48_spill] sm:$0xff] }
 0x439   : > { %6736 = vmatpush.bf16.msra.mxu3 %v14043_v45 }
 0x43a   : > { %6684 = vmatpush.bf16.msra.mxu0 %v12258_v29  ;;  %6698 = vmatpush.bf16.msra.mxu1 %v12277_v2  ;;  %v14044_v29 = vld [vmem:[#allocation21_spill] sm:$0xff]  ;;  %v14045_v2 = vld [vmem:[#allocation50_spill] sm:$0xff] }
 0x43b   : > { %6723 = vmatpush.bf16.msra.mxu2 %v14044_v29 }
 0x43c   : > { %v6673_v11 = vld [vmem:[#allocation1] sm:$0xff]  ;;  %v6674_v20 = vld [vmem:[#allocation1 + $0x9] sm:$0xff] }
 0x43d   : > { %6705 = vst [vmem:[#allocation1] ss:$9 sm:$0xff] %v13929_v0  ;;  %6685 = vmatmul.bf16.vlgmr.msra.gmra.mxu0 %v6673_v11  ;;  %6699 = vmatmul.bf16.vlgmr.msra.gmra.mxu1 %v6674_v20  ;;  %v12946_v0 = vld [vmem:[%s13473_s0 + $0x5c] sm:$0x3] }
 0x43e   : > { %6707 = vst [vmem:[#allocation1 + $0x1] ss:$9 sm:$0xff] %v13930_v34  ;;  %6769 = vmatpush.bf16.msrb.mxu0 %v12291_v30  ;;  %6783 = vmatpush.bf16.msrb.mxu1 %v12299_v43  ;;  %v12915_v30 = vld [vmem:[%s13473_s0 + $0xc] sm:$0x3]  ;;  %v12920_v43 = vld [vmem:[%s13473_s0 + $0x1c] sm:$0x3] }
 0x43f   : > { %6709 = vst [vmem:[#allocation1 + $0x2] ss:$9 sm:$0xff] %v13931_v27  ;;  %6737 = vmatpush.bf16.msra.mxu3 %v14045_v2  ;;  %6724 = vmatpush.bf16.msra.mxu2 %v12222_v63  ;;  %v12925_v63 = vld [vmem:[%s13473_s0 + $0x2c] sm:$0x3]  ;;  %v14057_v20 = vld [vmem:[#allocation45_spill] sm:$0xff] }
 0x440   : > { %6711 = vst [vmem:[#allocation1 + $0x3] ss:$9 sm:$0xff] %v13932_v61  ;;  %v14059_v2 = vld [vmem:[#allocation33_spill] sm:$0xff] }
 0x441   : > { %6713 = vst [vmem:[#allocation1 + $0x4] ss:$9 sm:$0xff] %v13933_v3 }
 0x442   : > { %6715 = vst [vmem:[#allocation1 + $0x5] ss:$9 sm:$0xff] %v13934_v37  ;;  %6770 = vmatpush.bf16.msrb.mxu0 %v12316_v38  ;;  %6784 = vmatpush.bf16.msrb.mxu1 %v12321_v17 }
 0x443   : > { %6738 = vmatpush.bf16.msra.mxu3 %v12243_v53  ;;  %6725 = vmatpush.bf16.msra.mxu2 %v12280_v14  ;;  %v12932_v53 = vld [vmem:[%s13473_s0 + $0x3c] sm:$0x3]  ;;  %v5281_v14 = vpop.f32.mrf.mxu2 }
 0x446   : > { %6771 = vmatpush.bf16.msrb.mxu0 %v12332_v59  ;;  %6785 = vmatpush.bf16.msrb.mxu1 %v12342_v44  ;;  %v12940_v59 = vld [vmem:[%s13473_s0 + $0x4c] sm:$0x3] }
 0x447   : > { %6739 = vmatpush.bf16.msra.mxu3 %v12288_v50  ;;  %v5295_v50 = vpop.f32.mrf.mxu3  ;;  %6726 = vmatpush.bf16.msra.mxu2 %v12306_v19 }
 0x448   : > { %v5296_v44 = vadd.f32 %v5295_v50, %v5281_v14  ;;  %v14061_v14 = vld [vmem:[#allocation53_spill] sm:$0xff]  ;;  %v14062_v50 = vld [vmem:[#allocation76_spill] sm:$0xff] }
 0x449   : > { %v6716_v38 = vld [vmem:[#allocation1] sm:$0xff]  ;;  %v6717_v17 = vld [vmem:[#allocation1 + $0x9] sm:$0xff] }
 0x44a   : > { %6749 = vst [vmem:[#allocation1] ss:$9 sm:$0xff] %v12915_v30  ;;  %6772 = vmatpush.bf16.msrb.mxu0 %v12356_v18  ;;  %6786 = vmatpush.bf16.msrb.mxu1 %v12360_v41  ;;  %v5420_v18 = vpop.f32.mrf.mxu0 }
 0x44b   : > { %6752 = vst [vmem:[#allocation1 + $0x1] ss:$9 sm:$0xff] %v12920_v43  ;;  %6740 = vmatpush.bf16.msra.mxu3 %v12313_v42  ;;  %6727 = vmatpush.bf16.msra.mxu2 %v12325_v32  ;;  %v5421_v19 = vadd.f32 %v5420_v18, %v5296_v44  ;;  %v5434_v42 = vpop.f32.mrf.mxu1  ;;  %v12976_v32 = vpop.f32.mrf.mxu2  ;;  %v14063_v18 = vld [vmem:[#allocation37_spill] sm:$0xff] }
 0x44c   : > { %6755 = vst [vmem:[#allocation1 + $0x2] ss:$9 sm:$0xff] %v12925_v63 }
 0x44d   : > { %6758 = vst [vmem:[#allocation1 + $0x3] ss:$9 sm:$0xff] %v12932_v53 }
 0x44e   : > { %6761 = vst [vmem:[#allocation1 + $0x4] ss:$9 sm:$0xff] %v12940_v59  ;;  %6773 = vmatpush.bf16.msrb.mxu0 %v12376_v48  ;;  %6787 = vmatpush.bf16.msrb.mxu1 %v12379_v58  ;;  %v5435_v58 = vadd.f32 %v5434_v42, %v5421_v19  ;;  %v14064_v19 = vld [vmem:[#allocation40_spill] sm:$0xff] }
 0x44f   : > { %6764 = vst [vmem:[#allocation1 + $0x5] ss:$9 sm:$0xff] %v12946_v0  ;;  %6741 = vmatpush.bf16.msra.mxu3 %v12329_v46  ;;  %6814 = vmatpush.bf16.msrb.mxu2 %v12345_v57  ;;  %v14046_v46 = vld [vmem:[#allocation32_spill] sm:$0xff]  ;;  %v14047_v57 = vld [vmem:[#allocation25_spill] sm:$0xff] }
 0x450   : > { %6728 = vmatmul.bf16.vlgmr.msra.gmra.mxu2 %v6716_v38  ;;  %v14060_v38 = vld [vmem:[#allocation62_spill] sm:$0xff] }
 0x452   : > { %6774 = vmatpush.bf16.msrb.mxu0 %v12394_v5  ;;  %6788 = vmatpush.bf16.msrb.mxu1 %v12397_v47  ;;  %v14051_v47 = vld [vmem:[#allocation28_spill] sm:$0xff] }
 0x453   : > { %6828 = vmatpush.bf16.msrb.mxu3 %v12352_v35  ;;  %6815 = vmatpush.bf16.msrb.mxu2 %v12363_v8  ;;  %v14048_v35 = vld [vmem:[#allocation54_spill] sm:$0xff]  ;;  %v14049_v8 = vld [vmem:[#allocation63_spill] sm:$0xff] }
 0x454   : > { %6742 = vmatmul.bf16.vlgmr.msra.gmra.mxu3 %v6717_v17 }
 0x456   : > { %v6765_v41 = vld [vmem:[#allocation1] sm:$0xff]  ;;  %v6766_v48 = vld [vmem:[#allocation1 + $0x9] sm:$0xff]  ;;  %6775 = vmatpush.bf16.msrb.mxu0 %v12425_v12  ;;  %6789 = vmatpush.bf16.msrb.mxu1 %v12428_v1  ;;  %v14052_v12 = vld [vmem:[#allocation29_spill] sm:$0xff] }
 0x457   : > { %6799 = vst [vmem:[#allocation1] ss:$9 sm:$0xff] %v13930_v34  ;;  %6829 = vmatpush.bf16.msrb.mxu3 %v12366_v9  ;;  %6816 = vmatpush.bf16.msrb.mxu2 %v12382_v39  ;;  %v12980_v34 = vpop.f32.mrf.mxu3  ;;  %v14050_v9 = vld [vmem:[#allocation36_spill] sm:$0xff]  ;;  %v12986_v39 = vpop.f32.mrf.mxu0  ;;  %v14053_v1 = vld [vmem:[#allocation41_spill] sm:$0xff] }
 0x458   : > { %6801 = vst [vmem:[#allocation1 + $0x1] ss:$9 sm:$0xff] %v13931_v27 }
 0x459   : > { %6803 = vst [vmem:[#allocation1 + $0x2] ss:$9 sm:$0xff] %v13932_v61 }
 0x45a   : > { %6805 = vst [vmem:[#allocation1 + $0x3] ss:$9 sm:$0xff] %v13933_v3  ;;  %6776 = vmatpush.bf16.msrb.mxu0 %v12459_v31  ;;  %6790 = vmatpush.bf16.msrb.mxu1 %v12462_v25  ;;  %v14054_v31 = vld [vmem:[#allocation66_spill] sm:$0xff]  ;;  %v12993_v25 = vpop.f32.mrf.mxu1 }
 0x45b   : > { %6807 = vst [vmem:[#allocation1 + $0x4] ss:$9 sm:$0xff] %v13934_v37  ;;  %6830 = vmatpush.bf16.msrb.mxu3 %v12386_v55  ;;  %6817 = vmatpush.bf16.msrb.mxu2 %v14047_v57  ;;  %v14067_v57 = vld [vmem:[#allocation67_spill] sm:$0xff] }
 0x45c   : > { %6809 = vst [vmem:[#allocation1 + $0x5] ss:$9 sm:$0xff] %v13976_v36 }
 0x45d   : > { %6777 = vmatmul.bf16.vlgmr.msrb.gmra.mxu0 %v6765_v41  ;;  %6791 = vmatmul.bf16.vlgmr.msrb.gmra.mxu1 %v6766_v48 }
 0x45e   : > { %6859 = vmatpush.bf16.msra.mxu0 %v12472_v24  ;;  %6873 = vmatpush.bf16.msra.mxu1 %v14046_v46  ;;  %v5597_v24 = vpop.f32.mrf.mxu2  ;;  %v14065_v46 = vld [vmem:[#allocation57_spill] sm:$0xff] }
 0x45f   : > { %6831 = vmatpush.bf16.msrb.mxu3 %v14048_v35  ;;  %6818 = vmatpush.bf16.msrb.mxu2 %v14051_v47  ;;  %v5611_v11 = vpop.f32.mrf.mxu3  ;;  %v5770_v17 = vpop.f32.mrf.mxu0  ;;  %v14068_v35 = vld [vmem:[#allocation44_spill] sm:$0xff] }
 0x460   : > { %v5612_v45 = vadd.f32 %v5611_v11, %v5597_v24  ;;  %v14073_v11 = vld [vmem:[#allocation65_spill] sm:$0xff] }
 0x462   : > { %6860 = vmatpush.bf16.msra.mxu0 %v14049_v8  ;;  %6874 = vmatpush.bf16.msra.mxu1 %v14050_v9  ;;  %v5616_v29 = vadd.f32 %v5612_v45, %v5435_v58  ;;  %v5784_v44 = vpop.f32.mrf.mxu1  ;;  %v14066_v58 = vld [vmem:[#allocation80_spill] sm:$0xff]  ;;  %v13020_v9 = vld [vmem:[%s13473_s0 + $0x6c] sm:$0x3]  ;;  %v14075_v45 = vld [vmem:[#allocation77_spill] sm:$0xff] }
 0x463   : > { %v6810_v55 = vld [vmem:[#allocation1] sm:$0xff]  ;;  %v6811_v5 = vld [vmem:[#allocation1 + $0x9] sm:$0xff]  ;;  %6832 = vmatpush.bf16.msrb.mxu3 %v14052_v12  ;;  %6819 = vmatpush.bf16.msrb.mxu2 %v14055_v4  ;;  %v5785_v42 = vadd.f32 %v5784_v44, %v5770_v17  ;;  %v14069_v12 = vld [vmem:[#allocation61_spill] sm:$0xff] }
 0x464   : > { %6844 = vst [vmem:[#allocation1] ss:$9 sm:$0xff] %v12414_v15  ;;  %v14079_v44 = vld [vmem:[#allocation81_spill] sm:$0xff] }
 0x465   : > { %6846 = vst [vmem:[#allocation1 + $0x1] ss:$9 sm:$0xff] %v12419_v23  ;;  %v5789_v8 = vadd.f32 %v5785_v42, %v5616_v29  ;;  %v14076_v29 = vld [vmem:[#allocation56_spill] sm:$0xff] }
 0x466   : > { %6861 = vmatpush.bf16.msra.mxu0 %v14053_v1  ;;  %6875 = vmatpush.bf16.msra.mxu1 %v14054_v31  ;;  %6848 = vst [vmem:[#allocation1 + $0x2] ss:$9 sm:$0xff] %v12439_v40  ;;  %v5599_v47 = vpop.f32.mrf.mxu2  ;;  %v14070_v1 = vld [vmem:[#allocation84_spill] sm:$0xff] }
 0x467   : > { %6850 = vst [vmem:[#allocation1 + $0x3] ss:$9 sm:$0xff] %v12446_v62  ;;  %6833 = vmatpush.bf16.msrb.mxu3 %v14056_v26  ;;  %6820 = vmatpush.bf16.msrb.mxu2 %v14059_v2  ;;  %v5613_v31 = vpop.f32.mrf.mxu3  ;;  %v5772_v24 = vpop.f32.mrf.mxu0  ;;  %v14077_v2 = vld [vmem:[#allocation69_spill] sm:$0xff] }
 0x468   : > { %6852 = vst [vmem:[#allocation1 + $0x4] ss:$9 sm:$0xff] %v12451_v49 }
 0x469   : > { %6854 = vst [vmem:[#allocation1 + $0x5] ss:$9 sm:$0xff] %v12650_v21 }
 0x46a   : > { %6862 = vmatpush.bf16.msra.mxu0 %v14057_v20  ;;  %6876 = vmatpush.bf16.msra.mxu1 %v14058_v6  ;;  %v5786_v4 = vpop.f32.mrf.mxu1  ;;  %v14074_v20 = vld [vmem:[#allocation88_spill] sm:$0xff]  ;;  %v5298_v6 = vadd.f32 %v12980_v34, %v12976_v32  ;;  %v14081_v32 = vld [vmem:[#allocation73_spill] sm:$0xff]  ;;  %v14082_v34 = vld [vmem:[#allocation74_spill] sm:$0xff] }
 0x46b   : > { %6834 = vmatpush.bf16.msrb.mxu3 %v14060_v38  ;;  %6821 = vmatpush.bf16.msrb.mxu2 %v14063_v18  ;;  %v5787_v26 = vadd.f32 %v5786_v4, %v5772_v24  ;;  %v14078_v38 = vld [vmem:[#allocation70_spill] sm:$0xff]  ;;  %v14080_v18 = vld [vmem:[#allocation60_spill] sm:$0xff]  ;;  %v14089_v24 = vld [vmem:[#allocation71_spill] sm:$0xff] }
 0x46e   : > { %6863 = vmatpush.bf16.msra.mxu0 %v14061_v14  ;;  %6877 = vmatpush.bf16.msra.mxu1 %v14062_v50  ;;  %v5423_v50 = vadd.f32 %v12986_v39, %v5298_v6 }
 0x46f   : > { %6835 = vmatpush.bf16.msrb.mxu3 %v14064_v19  ;;  %6905 = vmatpush.bf16.msra.mxu2 %v14067_v57  ;;  %v5943_v19 = vpop.f32.mrf.mxu2  ;;  %v5957_v42 = vpop.f32.mrf.mxu3  ;;  %v14085_v57 = vld [vmem:[#allocation79_spill] sm:$0xff] }
 0x470   : > { %v6855_v41 = vld [vmem:[#allocation1] sm:$0xff]  ;;  %v6856_v48 = vld [vmem:[#allocation1 + $0x9] sm:$0xff]  ;;  %6822 = vmatmul.bf16.vlgmr.msrb.gmra.mxu2 %v6810_v55  ;;  %v14071_v55 = vld [vmem:[#allocation49_spill] sm:$0xff]  ;;  %v5437_v39 = vadd.f32 %v12993_v25, %v5423_v50 }
 0x471   : > { %6889 = vst [vmem:[#allocation1] ss:$9 sm:$0xff] %v12920_v43  ;;  %v14098_v50 = vld [vmem:[#allocation24_spill] sm:$0xff] }
 0x472   : > { %6864 = vmatpush.bf16.msra.mxu0 %v14065_v46  ;;  %6878 = vmatpush.bf16.msra.mxu1 %v14066_v58  ;;  %6891 = vst [vmem:[#allocation1 + $0x1] ss:$9 sm:$0xff] %v12925_v63  ;;  %v14083_v46 = vld [vmem:[#allocation85_spill] sm:$0xff]  ;;  %v14084_v58 = vld [vmem:[#allocation64_spill] sm:$0xff] }
 0x473   : > { %6919 = vmatpush.bf16.msra.mxu3 %v14068_v35  ;;  %6893 = vst [vmem:[#allocation1 + $0x2] ss:$9 sm:$0xff] %v12932_v53  ;;  %6906 = vmatpush.bf16.msra.mxu2 %v14071_v55 }
 0x474   : > { %6836 = vmatmul.bf16.vlgmr.msrb.gmra.mxu3 %v6811_v5  ;;  %6895 = vst [vmem:[#allocation1 + $0x3] ss:$9 sm:$0xff] %v12940_v59  ;;  %v14072_v5 = vld [vmem:[#allocation52_spill] sm:$0xff] }
 0x475   : > { %6897 = vst [vmem:[#allocation1 + $0x4] ss:$9 sm:$0xff] %v12946_v0 }
 0x476   : > { %6865 = vmatpush.bf16.msra.mxu0 %v14069_v12  ;;  %6879 = vmatpush.bf16.msra.mxu1 %v14070_v1  ;;  %6900 = vst [vmem:[#allocation1 + $0x5] ss:$9 sm:$0xff] %v13020_v9  ;;  %v14088_v12 = vld [vmem:[#allocation86_spill] sm:$0xff] }
 0x477   : > { %6920 = vmatpush.bf16.msra.mxu3 %v14072_v5  ;;  %6907 = vmatpush.bf16.msra.mxu2 %v14075_v45  ;;  %v14093_v45 = vld [vmem:[#allocation93_spill] sm:$0xff] }
 0x47a   : > { %6866 = vmatpush.bf16.msra.mxu0 %v14073_v11  ;;  %6880 = vmatpush.bf16.msra.mxu1 %v14074_v20  ;;  %v14091_v11 = vld [vmem:[#allocation75_spill] sm:$0xff]  ;;  %v14092_v20 = vld [vmem:[#allocation78_spill] sm:$0xff] }
 0x47b   : > { %6921 = vmatpush.bf16.msra.mxu3 %v14076_v29  ;;  %6908 = vmatpush.bf16.msra.mxu2 %v14079_v44  ;;  %v14096_v29 = vld [vmem:[#allocation83_spill] sm:$0xff] }
 0x47c   : > { %v14099_v44 = vld [vmem:[#allocation27_spill] sm:$0xff] }
 0x47d   : > { %6867 = vmatmul.bf16.vlgmr.msra.gmra.mxu0 %v6855_v41  ;;  %6881 = vmatmul.bf16.vlgmr.msra.gmra.mxu1 %v6856_v48  ;;  %v6901_v17 = vld [vmem:[#allocation1] sm:$0xff]  ;;  %v6902_v14 = vld [vmem:[#allocation1 + $0x9] sm:$0xff]  ;;  %v5614_v41 = vadd.f32 %v5613_v31, %v5599_v47  ;;  %v5958_v48 = vadd.f32 %v5957_v42, %v5943_v19  ;;  %v6117_v35 = vpop.f32.mrf.mxu0  ;;  %v14086_v47 = vld [vmem:[#allocation89_spill] sm:$0xff] }
 0x47e   : > { %6950 = vmatpush.bf16.msrb.mxu0 %v14077_v2  ;;  %6964 = vmatpush.bf16.msrb.mxu1 %v14078_v38  ;;  %6935 = vst [vmem:[#allocation1] ss:$9 sm:$0xff] %v13931_v27  ;;  %v14097_v2 = vld [vmem:[#allocation35_spill] sm:$0xff]  ;;  %v14103_v19 = vld [vmem:[#allocation5_spill] sm:$0xff] }
 0x47f   : > { %6922 = vmatpush.bf16.msra.mxu3 %v14080_v18  ;;  %6937 = vst [vmem:[#allocation1 + $0x1] ss:$9 sm:$0xff] %v13932_v61  ;;  %6909 = vmatpush.bf16.msra.mxu2 %v14083_v46  ;;  %v5962_v27 = vadd.f32 %v5958_v48, %v5789_v8  ;;  %v5617_v61 = vadd.f32 %v5614_v41, %v5437_v39  ;;  %v5945_v8 = vpop.f32.mrf.mxu2  ;;  %v14100_v18 = vld [vmem:[#allocation87_spill] sm:$0xff]  ;;  %v14105_v39 = vld [vmem:[#allocation92_spill] sm:$0xff]  ;;  %v13089_v46 = vld [vmem:[%s13473_s0 + $0x7c] sm:$0x3] }
 0x480   : > { %6939 = vst [vmem:[#allocation1 + $0x2] ss:$9 sm:$0xff] %v13933_v3  ;;  %v6131_v3 = vpop.f32.mrf.mxu1  ;;  %v14104_v48 = vld [vmem:[#allocation91_spill] sm:$0xff] }
 0x481   : > { %6941 = vst [vmem:[#allocation1 + $0x3] ss:$9 sm:$0xff] %v13934_v37  ;;  %v14087_v37 = vld [vmem:[#allocation68_spill] sm:$0xff]  ;;  %v6132_v25 = vadd.f32 %v6131_v3, %v6117_v35  ;;  %v5790_v1 = vadd.f32 %v5787_v26, %v5617_v61  ;;  %v14110_v35 = vld [vmem:[#allocation95_spill] sm:$0xff] }
 0x482   : > { %6951 = vmatpush.bf16.msrb.mxu0 %v14081_v32  ;;  %6965 = vmatpush.bf16.msrb.mxu1 %v14082_v34  ;;  %6943 = vst [vmem:[#allocation1 + $0x4] ss:$9 sm:$0xff] %v13976_v36  ;;  %v5959_v36 = vpop.f32.mrf.mxu3  ;;  %v14101_v32 = vld [vmem:[#allocation90_spill] sm:$0xff]  ;;  %v14111_v3 = vld [vmem:[#allocation96_spill] sm:$0xff] }
 0x483   : > { %6923 = vmatpush.bf16.msra.mxu3 %v14084_v58  ;;  %6945 = vst [vmem:[#allocation1 + $0x5] ss:$9 sm:$0xff] %v14016_v28  ;;  %6910 = vmatpush.bf16.msra.mxu2 %v14086_v47  ;;  %v6136_v31 = vadd.f32 %v6132_v25, %v5962_v27  ;;  %v14090_v28 = vld [vmem:[#allocation72_spill] sm:$0xff]  ;;  %v14102_v34 = vld [vmem:[#allocation10_spill] sm:$0xff]  ;;  %v14108_v58 = vld [vmem:[#allocation11_spill] sm:$0xff] }
 0x484   : > { %v14109_v27 = vld [vmem:[#allocation51_spill] sm:$0xff]  ;;  %v14112_v25 = vld [vmem:[#allocation8_spill] sm:$0xff] }
 0x486   : > { %6952 = vmatpush.bf16.msrb.mxu0 %v12656_v16  ;;  %6966 = vmatpush.bf16.msrb.mxu1 %v14085_v57  ;;  %v5960_v16 = vadd.f32 %v5959_v36, %v5945_v8 }
 0x487   : > { %6924 = vmatpush.bf16.msra.mxu3 %v14087_v37  ;;  %6911 = vmatpush.bf16.msra.mxu2 %v14089_v24 }
 0x488   : > { %v5963_v55 = vadd.f32 %v5960_v16, %v5790_v1  ;;  %v6133_v26 = vpop.f32.mrf.mxu1  ;;  %v14114_v1 = vld [vmem:[#allocation99_spill] sm:$0xff] }
 0x489   : > { %v14115_v16 = vld [vmem:[#allocation19_spill] sm:$0xff] }
 0x48a   : > { %6953 = vmatpush.bf16.msrb.mxu0 %v14088_v12  ;;  %6967 = vmatpush.bf16.msrb.mxu1 %v12678_v7  ;;  %v6946_v5 = vld [vmem:[#allocation1] sm:$0xff]  ;;  %v6947_v4 = vld [vmem:[#allocation1 + $0x9] sm:$0xff]  ;;  %v6119_v7 = vpop.f32.mrf.mxu0 }
 0x48b   : > { %6925 = vmatpush.bf16.msra.mxu3 %v14090_v28  ;;  %6980 = vst [vmem:[#allocation1] ss:$9 sm:$0xff] %v12419_v23  ;;  %6912 = vmatpush.bf16.msra.mxu2 %v14091_v11  ;;  %v6134_v6 = vadd.f32 %v6133_v26, %v6119_v7  ;;  %v14113_v12 = vld [vmem:[#allocation31_spill] sm:$0xff]  ;;  %v14118_v11 = vld [vmem:[#allocation9_spill] sm:$0xff] }
 0x48c   : > { %6982 = vst [vmem:[#allocation1 + $0x1] ss:$9 sm:$0xff] %v12439_v40 }
 0x48d   : > { %6984 = vst [vmem:[#allocation1 + $0x2] ss:$9 sm:$0xff] %v12446_v62  ;;  %v6137_v38 = vadd.f32 %v6134_v6, %v5963_v55  ;;  %v14116_v55 = vld [vmem:[#allocation22_spill] sm:$0xff] }
 0x48e   : > { %6954 = vmatpush.bf16.msrb.mxu0 %v12691_v13  ;;  %6968 = vmatpush.bf16.msrb.mxu1 %v12694_v22  ;;  %6986 = vst [vmem:[#allocation1 + $0x3] ss:$9 sm:$0xff] %v12451_v49  ;;  %v14094_v13 = vld [vmem:[#allocation18_spill] sm:$0xff] }
 0x48f   : > { %6926 = vmatpush.bf16.msra.mxu3 %v14092_v20  ;;  %6988 = vst [vmem:[#allocation1 + $0x4] ss:$9 sm:$0xff] %v12650_v21  ;;  %v14095_v22 = vld [vmem:[#allocation82_spill] sm:$0xff]  ;;  %6913 = vmatmul.bf16.vlgmr.msra.gmra.mxu2 %v6901_v17  ;;  %v14119_v20 = vld [vmem:[#allocation4_spill] sm:$0xff] }
 0x490   : > { %6995 = vmatpush.bf16.msrb.mxu2 %v14095_v22  ;;  %6990 = vst [vmem:[#allocation1 + $0x5] ss:$9 sm:$0xff] %v14097_v2  ;;  %v14106_v17 = vld [vmem:[#allocation6_spill] sm:$0xff] }
 0x491   : > { %v14121_v22 = vld [vmem:[#allocation94_spill] sm:$0xff] }
 0x492   : > { %6955 = vmatpush.bf16.msrb.mxu0 %v14093_v45  ;;  %6969 = vmatpush.bf16.msrb.mxu1 %v14094_v13  ;;  %v6290_v57 = vpop.f32.mrf.mxu2  ;;  %v6304_v61 = vpop.f32.mrf.mxu3  ;;  %v14120_v13 = vld [vmem:[#allocation26_spill] sm:$0xff] }
 0x493   : > { %7009 = vmatpush.bf16.msrb.mxu3 %v14096_v29  ;;  %v6305_v47 = vadd.f32 %v6304_v61, %v6290_v57  ;;  %v9888_v57 = vld [vmem:[%s10726_s9 + $0x78] sm:$0xff]  ;;  %v9889_v61 = vld [vmem:[%s10726_s9 + $0xa0] sm:$0xff] }
 0x494   : > { %6927 = vmatmul.bf16.vlgmr.msra.gmra.mxu3 %v6902_v14  ;;  %6996 = vmatpush.bf16.msrb.mxu2 %v14100_v18  ;;  %v14107_v14 = vld [vmem:[#allocation7_spill] sm:$0xff]  ;;  %v14123_v18 = vld [vmem:[#allocation34_spill] sm:$0xff] }
 0x495   : > { %v6309_v37 = vadd.f32 %v6305_v47, %v6136_v31 }
 0x496   : > { %6956 = vmatpush.bf16.msrb.mxu0 %v14098_v50  ;;  %6970 = vmatpush.bf16.msrb.mxu1 %v14099_v44  ;;  %v14122_v44 = vld [vmem:[#allocation30_spill] sm:$0xff] }
 0x497   : > { %7010 = vmatpush.bf16.msrb.mxu3 %v14101_v32  ;;  %v6991_v42 = vld [vmem:[#allocation1] sm:$0xff]  ;;  %v6992_v41 = vld [vmem:[#allocation1 + $0x9] sm:$0xff]  ;;  %v14124_v32 = vld [vmem:[#allocation97_spill] sm:$0xff] }
 0x498   : > { %6997 = vmatpush.bf16.msrb.mxu2 %v14104_v48  ;;  %7025 = vst [vmem:[#allocation1] ss:$9 sm:$0xff] %v12925_v63  ;;  %v9882_v48 = vld [vmem:[%s10726_s9 + $0xb8] sm:$0xff] }
 0x499   : > { %7027 = vst [vmem:[#allocation1 + $0x1] ss:$9 sm:$0xff] %v12932_v53 }
 0x49a   : > { %6957 = vmatpush.bf16.msrb.mxu0 %v14102_v34  ;;  %6971 = vmatpush.bf16.msrb.mxu1 %v14103_v19  ;;  %7029 = vst [vmem:[#allocation1 + $0x2] ss:$9 sm:$0xff] %v12940_v59  ;;  %v6306_v7 = vpop.f32.mrf.mxu3  ;;  %v14125_v34 = vld [vmem:[#allocation98_spill] sm:$0xff]  ;;  %v14126_v19 = vld [vmem:[#allocation12_spill] sm:$0xff] }
 0x49b   : > { %7011 = vmatpush.bf16.msrb.mxu3 %v14105_v39  ;;  %7031 = vst [vmem:[#allocation1 + $0x3] ss:$9 sm:$0xff] %v12946_v0  ;;  %v9883_v39 = vld [vmem:[%s10726_s9 + $0xf8] sm:$0xff] }
 0x49c   : > { %6998 = vmatpush.bf16.msrb.mxu2 %v14108_v58  ;;  %7033 = vst [vmem:[#allocation1 + $0x4] ss:$9 sm:$0xff] %v13020_v9  ;;  %v9884_v58 = vld [vmem:[%s10726_s9 + $0xb0] sm:$0xff] }
 0x49d   : > { %6958 = vmatmul.bf16.vlgmr.msrb.gmra.mxu0 %v6946_v5  ;;  %6972 = vmatmul.bf16.vlgmr.msrb.gmra.mxu1 %v6947_v4  ;;  %7036 = vst [vmem:[#allocation1 + $0x5] ss:$9 sm:$0xff] %v13089_v46  ;;  %v14117_v5 = vld [vmem:[#allocation23_spill] sm:$0xff]  ;;  %v6292_v4 = vpop.f32.mrf.mxu2 }
 0x49e   : > { %7041 = vmatpush.bf16.msra.mxu0 %v14106_v17  ;;  %7055 = vmatpush.bf16.msra.mxu1 %v14107_v14  ;;  %v6463_v8 = vpop.f32.mrf.mxu0  ;;  %v6477_v36 = vpop.f32.mrf.mxu1  ;;  %v6307_v6 = vadd.f32 %v6306_v7, %v6292_v4  ;;  %v13179_v4 = vld [vmem:[%s13473_s0 + $0x3e] sm:$0x3]  ;;  %v13184_v7 = vld [vmem:[%s13473_s0 + $0x4e] sm:$0x3] }
 0x49f   : > { %7012 = vmatpush.bf16.msrb.mxu3 %v14109_v27  ;;  %v6478_v24 = vadd.f32 %v6477_v36, %v6463_v8  ;;  %v14127_v27 = vld [vmem:[#allocation55_spill] sm:$0xff]  ;;  %v13159_v36 = vld [vmem:[%s13473_s0 + $0x1e] sm:$0x3] }
 0x4a0   : > { %6999 = vmatpush.bf16.msrb.mxu2 %v14112_v25  ;;  %v6310_v45 = vadd.f32 %v6307_v6, %v6137_v38 }
 0x4a1   : > { %v13102_v28 = vadd.f32 %v6478_v24, %v6309_v37  ;;  %v7726_v37 = vld [vmem:[%s13473_s0 + $0xe] sm:$0x3] }
 0x4a2   : > { %7042 = vmatpush.bf16.msra.mxu0 %v14110_v35  ;;  %7056 = vmatpush.bf16.msra.mxu1 %v14111_v3  ;;  %v9890_v35 = vld [vmem:[%s10726_s9 + $0xe0] sm:$0xff] }
 0x4a3   : > { %7013 = vmatpush.bf16.msrb.mxu3 %v14113_v12 }
 0x4a4   : > { %7000 = vmatpush.bf16.msrb.mxu2 %v14116_v55  ;;  %v7037_v31 = vld [vmem:[#allocation1] sm:$0xff]  ;;  %v7038_v26 = vld [vmem:[#allocation1 + $0x9] sm:$0xff] }
 0x4a5   : > { %7077 = vst [vmem:[#allocation1] ss:$9 sm:$0xff] %v12915_v30  ;;  %v9893_v55 = vld [vmem:[%s10726_s9 + $0x28] sm:$0xff] }
 0x4a6   : > { %7043 = vmatpush.bf16.msra.mxu0 %v14114_v1  ;;  %7057 = vmatpush.bf16.msra.mxu1 %v14115_v16  ;;  %7079 = vst [vmem:[#allocation1 + $0x1] ss:$9 sm:$0xff] %v12920_v43  ;;  %v6465_v29 = vpop.f32.mrf.mxu0  ;;  %v6479_v50 = vpop.f32.mrf.mxu1  ;;  %v9892_v1 = vld [vmem:[%s10726_s9 + $0xd8] sm:$0xff] }
 0x4a7   : > { %7014 = vmatpush.bf16.msrb.mxu3 %v14117_v5  ;;  %7081 = vst [vmem:[#allocation1 + $0x2] ss:$9 sm:$0xff] %v12925_v63  ;;  %v6480_v30 = vadd.f32 %v6479_v50, %v6465_v29  ;;  %v9894_v5 = vld [vmem:[%s10726_s9 + $0x68] sm:$0xff] }
 0x4a8   : > { %7001 = vmatpush.bf16.msrb.mxu2 %v14120_v13  ;;  %7083 = vst [vmem:[#allocation1 + $0x3] ss:$9 sm:$0xff] %v12932_v53  ;;  %v9898_v13 = vld [vmem:[%s10726_s9 + $0x60] sm:$0xff] }
 0x4a9   : > { %7085 = vst [vmem:[#allocation1 + $0x4] ss:$9 sm:$0xff] %v12940_v59  ;;  %v13118_v38 = vadd.f32 %v6480_v30, %v6310_v45  ;;  %v9897_v45 = vld [vmem:[%s10726_s9 + $0x20] sm:$0xff] }
 0x4aa   : > { %7044 = vmatpush.bf16.msra.mxu0 %v14118_v11  ;;  %7058 = vmatpush.bf16.msra.mxu1 %v14119_v20  ;;  %7087 = vst [vmem:[#allocation1 + $0x5] ss:$9 sm:$0xff] %v12946_v0  ;;  %v9896_v11 = vld [vmem:[%s10726_s9 + $0xd0] sm:$0xff] }
 0x4ab   : > { %7015 = vmatpush.bf16.msrb.mxu3 %v14121_v22 }
 0x4ac   : > { %7002 = vmatpush.bf16.msrb.mxu2 %v14124_v32  ;;  %v9900_v32 = vld [vmem:[%s10726_s9 + $0x18] sm:$0xff] }
 0x4ae   : > { %7045 = vmatpush.bf16.msra.mxu0 %v14122_v44  ;;  %7059 = vmatpush.bf16.msra.mxu1 %v14123_v18  ;;  %v9899_v18 = vld [vmem:[%s10726_s9 + $0xc8] sm:$0xff] }
 0x4af   : > { %7016 = vmatpush.bf16.msrb.mxu3 %v14125_v34  ;;  %7003 = vmatmul.bf16.vlgmr.msrb.gmra.mxu2 %v6991_v42  ;;  %v14129_v42 = vld [vmem:[#allocation38_spill] sm:$0xff] }
 0x4b0   : > { %7092 = vmatpush.bf16.msra.mxu2 %v9882_v48  ;;  %v9901_v34 = vld [vmem:[%s10726_s9 + $0x58] sm:$0xff]  ;;  %v9903_v48 = vld [vmem:[%s10726_s9 + $0xc0] sm:$0xff] }
 0x4b1   : > { %v13128_v17 = vld [vmem:[#allocation1] sm:$0xff]  ;;  %v13130_v14 = vld [vmem:[#allocation1 + $0x9] sm:$0xff] }
 0x4b2   : > { %7046 = vmatpush.bf16.msra.mxu0 %v12840_v10  ;;  %7060 = vmatpush.bf16.msra.mxu1 %v14126_v19  ;;  %v9885_v10 = vld [vmem:[%s10726_s9 + $0xf0] sm:$0xff]  ;;  %7120 = vst [vmem:[#allocation1] ss:$9 sm:$0xff] %v14127_v27  ;;  %v9902_v19 = vld [vmem:[%s10726_s9 + $0x80] sm:$0xff]  ;;  %v9907_v27 = vld [vmem:[%s10726_s9 + $0x178] sm:$0xff] }
 0x4b3   : > { %7106 = vmatpush.bf16.msra.mxu3 %v9883_v39  ;;  %7122 = vst [vmem:[#allocation1 + $0x1] ss:$9 sm:$0xff] %v12414_v15  ;;  %v6637_v3 = vpop.f32.mrf.mxu2  ;;  %v6651_v47 = vpop.f32.mrf.mxu3  ;;  %v9905_v39 = vld [vmem:[%s10726_s9 + $0x50] sm:$0xff] }
 0x4b4   : > { %7017 = vmatmul.bf16.vlgmr.msrb.gmra.mxu3 %v6992_v41  ;;  %7093 = vmatpush.bf16.msra.mxu2 %v9884_v58  ;;  %7124 = vst [vmem:[#allocation1 + $0x2] ss:$9 sm:$0xff] %v12419_v23  ;;  %v9887_v41 = vld [vmem:[%s10726_s9 + $0xe8] sm:$0xff] }
 0x4b5   : > { %7126 = vst [vmem:[#allocation1 + $0x3] ss:$9 sm:$0xff] %v12439_v40 }
 0x4b6   : > { %7047 = vmatpush.bf16.msra.mxu0 %v12850_v54  ;;  %7061 = vmatpush.bf16.msra.mxu1 %v12853_v52  ;;  %v14128_v54 = vld [vmem:[#allocation13_spill] sm:$0xff]  ;;  %v9886_v52 = vld [vmem:[%s10726_s9 + $0xa8] sm:$0xff]  ;;  %7128 = vst [vmem:[#allocation1 + $0x4] ss:$9 sm:$0xff] %v12446_v62 }
 0x4b7   : > { %7107 = vmatpush.bf16.msra.mxu3 %v9885_v10  ;;  %7130 = vst [vmem:[#allocation1 + $0x5] ss:$9 sm:$0xff] %v12451_v49  ;;  %v9906_v10 = vld [vmem:[%s10726_s9 + $0x138] sm:$0xff] }
 0x4b8   : > { %7094 = vmatpush.bf16.msra.mxu2 %v9886_v52  ;;  %v9913_v52 = vld [vmem:[%s10726_s9 + $0x40] sm:$0xff] }
 0x4ba   : > { %7048 = vmatpush.bf16.msra.mxu0 %v14128_v54  ;;  %7062 = vmatpush.bf16.msra.mxu1 %v14129_v42  ;;  %v6686_v12 = vpop.f32.mrf.mxu0  ;;  %v6700_v8 = vpop.f32.mrf.mxu1  ;;  %v9908_v54 = vld [vmem:[%s10726_s9 + $0x8] sm:$0xff] }
 0x4bb   : > { %7108 = vmatpush.bf16.msra.mxu3 %v9887_v41  ;;  %v6639_v20 = vpop.f32.mrf.mxu2  ;;  %v6653_v6 = vpop.f32.mrf.mxu3  ;;  %v9909_v42 = vld [vmem:[%s10726_s9 + $0x48] sm:$0xff] }
 0x4bc   : > { %7095 = vmatpush.bf16.msra.mxu2 %v9889_v61  ;;  %v6654_v22 = vadd.f32 %v6653_v6, %v6639_v20  ;;  %v9914_v41 = vld [vmem:[%s10726_s9 + $0x128] sm:$0xff]  ;;  %v9916_v61 = vld [vmem:[%s10726_s9 + $0x1b8] sm:$0xff] }
 0x4bd   : > { %7049 = vmatmul.bf16.vlgmr.msra.gmra.mxu0 %v7037_v31  ;;  %7063 = vmatmul.bf16.vlgmr.msra.gmra.mxu1 %v7038_v26  ;;  %v13190_v31 = vld [vmem:[%s13473_s0 + $0x5e] sm:$0x3] }
 0x4be   : > { %7135 = vmatpush.bf16.msrb.mxu0 %v12878_v60  ;;  %7149 = vmatpush.bf16.msrb.mxu1 %v9888_v57  ;;  %v6652_v60 = vadd.f32 %v6651_v47, %v6637_v3  ;;  %v13165_v16 = vld [vmem:[#allocation1] sm:$0xff]  ;;  %v13167_v24 = vld [vmem:[#allocation1 + $0x9] sm:$0xff]  ;;  %v9895_v26 = vld [vmem:[%s10726_s9 + $0x90] sm:$0xff]  ;;  %v13201_v29 = vadd.f32 %v6654_v22, %v13118_v38 }
 0x4bf   : > { %7109 = vmatpush.bf16.msra.mxu3 %v9890_v35  ;;  %7164 = vst [vmem:[#allocation1] ss:$9 sm:$0xff] %v7726_v37  ;;  %v9904_v38 = vld [vmem:[%s10726_s9 + $0x10] sm:$0xff]  ;;  %v9915_v57 = vld [vmem:[%s10726_s9 + $0x168] sm:$0xff]  ;;  %v9917_v35 = vld [vmem:[%s10726_s9 + $0x1f8] sm:$0xff] }
 0x4c0   : > { %v13154_v25 = vadd.f32 %v6652_v60, %v13102_v28  ;;  %v13172_v28 = vld [vmem:[%s13473_s0 + $0x2e] sm:$0x3]  ;;  %7167 = vst [vmem:[#allocation1 + $0x1] ss:$9 sm:$0xff] %v13159_v36 }
 0x4c1   : > { %7170 = vst [vmem:[#allocation1 + $0x2] ss:$9 sm:$0xff] %v13172_v28  ;;  %v9918_v3 = vld [vmem:[%s10726_s9 + $0x120] sm:$0xff] }
 0x4c2   : > { %7136 = vmatpush.bf16.msrb.mxu0 %v12885_v56  ;;  %7150 = vmatpush.bf16.msrb.mxu1 %v12889_v51  ;;  %v9891_v56 = vld [vmem:[%s10726_s9 + $0x98] sm:$0xff]  ;;  %v13163_v51 = vadd.f32 %v6700_v8, %v6686_v12  ;;  %7173 = vst [vmem:[#allocation1 + $0x3] ss:$9 sm:$0xff] %v13179_v4  ;;  %v6688_v50 = vpop.f32.mrf.mxu0  ;;  %v6702_v44 = vpop.f32.mrf.mxu1  ;;  %v9919_v47 = vld [vmem:[%s10726_s9 + $0x160] sm:$0xff] }
 0x4c3   : > { %7096 = vmatpush.bf16.msra.mxu2 %v9891_v56  ;;  %7110 = vmatpush.bf16.msra.mxu3 %v9892_v1  ;;  %7176 = vst [vmem:[#allocation1 + $0x4] ss:$9 sm:$0xff] %v13184_v7  ;;  %v13205_v30 = vadd.f32 %v6702_v44, %v6688_v50  ;;  %v9920_v56 = vld [vmem:[%s10726_s9 + $0x1b0] sm:$0xff]  ;;  %v9928_v44 = vld [vmem:[%s10726_s9 + $0x1a0] sm:$0xff] }
 0x4c4   : > { %7179 = vst [vmem:[#allocation1 + $0x5] ss:$9 sm:$0xff] %v13190_v31  ;;  %v9921_v1 = vld [vmem:[%s10726_s9 + $0x1f0] sm:$0xff] }
 0x4c6   : > { %7137 = vmatpush.bf16.msrb.mxu0 %v9893_v55  ;;  %7151 = vmatpush.bf16.msrb.mxu1 %v9894_v5 }
 0x4c7   : > { %7097 = vmatpush.bf16.msra.mxu2 %v9895_v26  ;;  %7111 = vmatpush.bf16.msra.mxu3 %v9896_v11  ;;  %v9922_v26 = vld [vmem:[%s10726_s9 + $0x118] sm:$0xff] }
 0x4c8   : > { %v9923_v11 = vld [vmem:[%s10726_s9 + $0x158] sm:$0xff] }
 0x4ca   : > { %7138 = vmatpush.bf16.msrb.mxu0 %v9897_v45  ;;  %7152 = vmatpush.bf16.msrb.mxu1 %v9898_v13  ;;  %v9926_v45 = vld [vmem:[%s10726_s9 + $0x110] sm:$0xff] }
 0x4cb   : > { %7098 = vmatpush.bf16.msra.mxu2 %v12203_v33  ;;  %7112 = vmatpush.bf16.msra.mxu3 %v9899_v18  ;;  %v13213_v33 = vld [vmem:[#allocation1] sm:$0xff]  ;;  %v13215_v58 = vld [vmem:[#allocation1 + $0x9] sm:$0xff]  ;;  %v9927_v13 = vld [vmem:[%s10726_s9 + $0x150] sm:$0xff] }
 0x4cc   : > { %7214 = vst [vmem:[#allocation1] ss:$9 sm:$0xff] %v12414_v15  ;;  %v9910_v15 = vld [vmem:[%s10726_s9 + $0x130] sm:$0xff]  ;;  %v9929_v18 = vld [vmem:[%s10726_s9 + $0x1e0] sm:$0xff] }
 0x4cd   : > { %7216 = vst [vmem:[#allocation1 + $0x1] ss:$9 sm:$0xff] %v12419_v23 }
 0x4ce   : > { %7139 = vmatpush.bf16.msrb.mxu0 %v9900_v32  ;;  %7153 = vmatpush.bf16.msrb.mxu1 %v9901_v34  ;;  %7218 = vst [vmem:[#allocation1 + $0x2] ss:$9 sm:$0xff] %v12439_v40 }
 0x4cf   : > { %7099 = vmatpush.bf16.msra.mxu2 %v9902_v19  ;;  %7113 = vmatpush.bf16.msra.mxu3 %v9903_v48  ;;  %7220 = vst [vmem:[#allocation1 + $0x3] ss:$9 sm:$0xff] %v12446_v62 }
 0x4d0   : > { %7222 = vst [vmem:[#allocation1 + $0x4] ss:$9 sm:$0xff] %v12451_v49 }
 0x4d1   : > { %7224 = vst [vmem:[#allocation1 + $0x5] ss:$9 sm:$0xff] %v12650_v21 }
 0x4d2   : > { %7140 = vmatpush.bf16.msrb.mxu0 %v9904_v38  ;;  %7154 = vmatpush.bf16.msrb.mxu1 %v9905_v39  ;;  %v9930_v38 = vld [vmem:[%s10726_s9 + $0x108] sm:$0xff] }
 0x4d3   : > { %7184 = vmatpush.bf16.msrb.mxu2 %v9906_v10  ;;  %7198 = vmatpush.bf16.msrb.mxu3 %v9907_v27  ;;  %v6729_v60 = vpop.f32.mrf.mxu2  ;;  %v9931_v39 = vld [vmem:[%s10726_s9 + $0x148] sm:$0xff]  ;;  %v9932_v27 = vld [vmem:[%s10726_s9 + $0x198] sm:$0xff] }
 0x4d4   : > { %7100 = vmatmul.bf16.vlgmr.msra.gmra.mxu2 %v13128_v17  ;;  %7114 = vmatmul.bf16.vlgmr.msra.gmra.mxu3 %v13130_v14  ;;  %v9911_v17 = vld [vmem:[%s10726_s9 + $0x170] sm:$0xff]  ;;  %v9912_v14 = vld [vmem:[%s10726_s9] sm:$0xff] }
 0x4d6   : > { %7141 = vmatpush.bf16.msrb.mxu0 %v9908_v54  ;;  %7155 = vmatpush.bf16.msrb.mxu1 %v9909_v42  ;;  %v9933_v54 = vld [vmem:[%s10726_s9 + $0x1d8] sm:$0xff] }
 0x4d7   : > { %7185 = vmatpush.bf16.msrb.mxu2 %v9910_v15  ;;  %7199 = vmatpush.bf16.msrb.mxu3 %v9911_v17  ;;  %v6743_v37 = vpop.f32.mrf.mxu3  ;;  %v9934_v17 = vld [vmem:[%s10726_s9 + $0x100] sm:$0xff] }
 0x4d8   : > { %v13241_v12 = vld [vmem:[#allocation1] sm:$0xff]  ;;  %v13243_v8 = vld [vmem:[#allocation1 + $0x9] sm:$0xff] }
 0x4d9   : > { %7259 = vst [vmem:[#allocation1] ss:$9 sm:$0xff] %v12920_v43  ;;  %v9925_v43 = vld [vmem:[%s10726_s9 + $0x1e8] sm:$0xff] }
 0x4da   : > { %7142 = vmatpush.bf16.msrb.mxu0 %v9912_v14  ;;  %7156 = vmatpush.bf16.msrb.mxu1 %v9913_v52  ;;  %7261 = vst [vmem:[#allocation1 + $0x1] ss:$9 sm:$0xff] %v12925_v63  ;;  %v6778_v55 = vpop.f32.mrf.mxu0  ;;  %v6792_v5 = vpop.f32.mrf.mxu1  ;;  %v9935_v14 = vld [vmem:[%s10726_s9 + $0x140] sm:$0xff] }
 0x4db   : > { %7186 = vmatpush.bf16.msrb.mxu2 %v9914_v41  ;;  %7200 = vmatpush.bf16.msrb.mxu3 %v9915_v57  ;;  %7263 = vst [vmem:[#allocation1 + $0x2] ss:$9 sm:$0xff] %v12932_v53  ;;  %v6793_v20 = vadd.f32 %v6792_v5, %v6778_v55  ;;  %v6731_v22 = vpop.f32.mrf.mxu2  ;;  %v13283_v52 = vld [vmem:[%s13473_s0 + $0x6e] sm:$0x3]  ;;  %v9936_v41 = vld [vmem:[%s10726_s9 + $0x190] sm:$0xff]  ;;  %v9949_v55 = vld [vmem:[%s10726_s9 + $0x2f8] sm:$0xff] }
 0x4dc   : > { %7265 = vst [vmem:[#allocation1 + $0x3] ss:$9 sm:$0xff] %v12940_v59  ;;  %v6732_v32 = vadd.f32 %v6731_v22, %v13205_v30  ;;  %v9937_v57 = vld [vmem:[%s10726_s9 + $0x1d0] sm:$0xff]  ;;  %v9950_v5 = vld [vmem:[%s10726_s9 + $0x220] sm:$0xff]  ;;  %v9957_v22 = vld [vmem:[%s10726_s9 + $0x2e8] sm:$0xff] }
 0x4dd   : > { %7143 = vmatmul.bf16.vlgmr.msrb.gmra.mxu0 %v13165_v16  ;;  %7157 = vmatmul.bf16.vlgmr.msrb.gmra.mxu1 %v13167_v24  ;;  %v6730_v16 = vadd.f32 %v6729_v60, %v13163_v51  ;;  %v9924_v51 = vld [vmem:[%s10726_s9 + $0x1a8] sm:$0xff]  ;;  %7267 = vst [vmem:[#allocation1 + $0x4] ss:$9 sm:$0xff] %v12946_v0  ;;  %v9943_v60 = vld [vmem:[%s10726_s9 + $0x270] sm:$0xff] }
 0x4de   : > { %7229 = vmatpush.bf16.msra.mxu0 %v9916_v61  ;;  %7243 = vmatpush.bf16.msra.mxu1 %v9917_v35  ;;  %7269 = vst [vmem:[#allocation1 + $0x5] ss:$9 sm:$0xff] %v13020_v9  ;;  %v9939_v61 = vld [vmem:[%s10726_s9 + $0x278] sm:$0xff]  ;;  %v9940_v35 = vld [vmem:[%s10726_s9 + $0x188] sm:$0xff] }
 0x4df   : > { %7187 = vmatpush.bf16.msrb.mxu2 %v9918_v3  ;;  %7201 = vmatpush.bf16.msrb.mxu3 %v9919_v47  ;;  %v6744_v24 = vadd.f32 %v6743_v37, %v6730_v16  ;;  %v6745_v50 = vpop.f32.mrf.mxu3  ;;  %v9941_v3 = vld [vmem:[%s10726_s9 + $0x1c8] sm:$0xff]  ;;  %v9942_v47 = vld [vmem:[%s10726_s9 + $0x230] sm:$0xff]  ;;  %v9944_v37 = vld [vmem:[%s10726_s9 + $0x180] sm:$0xff] }
 0x4e0   : > { %v6746_v34 = vadd.f32 %v6745_v50, %v6732_v32  ;;  %v9961_v32 = vld [vmem:[%s10726_s9 + $0x2e0] sm:$0xff] }
 0x4e1   : > { %v13257_v6 = vadd.f32 %v6793_v20, %v6744_v24  ;;  %v9948_v24 = vld [vmem:[%s10726_s9 + $0x2b8] sm:$0xff] }
 0x4e2   : > { %7230 = vmatpush.bf16.msra.mxu0 %v9920_v56  ;;  %7244 = vmatpush.bf16.msra.mxu1 %v9921_v1  ;;  %v6780_v19 = vpop.f32.mrf.mxu0  ;;  %v6794_v48 = vpop.f32.mrf.mxu1  ;;  %v9945_v56 = vld [vmem:[%s10726_s9 + $0x1c0] sm:$0xff] }
 0x4e3   : > { %7188 = vmatpush.bf16.msrb.mxu2 %v9922_v26  ;;  %7202 = vmatpush.bf16.msrb.mxu3 %v9923_v11  ;;  %v6795_v10 = vadd.f32 %v6794_v48, %v6780_v19  ;;  %v9951_v26 = vld [vmem:[%s10726_s9 + $0x260] sm:$0xff] }
 0x4e5   : > { %v13269_v42 = vld [vmem:[#allocation1] sm:$0xff]  ;;  %v13271_v30 = vld [vmem:[#allocation1 + $0x9] sm:$0xff]  ;;  %v13273_v15 = vadd.f32 %v6795_v10, %v6746_v34 }
 0x4e6   : > { %7231 = vmatpush.bf16.msra.mxu0 %v9924_v51  ;;  %7245 = vmatpush.bf16.msra.mxu1 %v9925_v43  ;;  %7304 = vst [vmem:[#allocation1] ss:$9 sm:$0xff] %v13159_v36  ;;  %v9938_v36 = vld [vmem:[%s10726_s9 + $0x238] sm:$0xff] }
 0x4e7   : > { %7189 = vmatpush.bf16.msrb.mxu2 %v9926_v45  ;;  %7203 = vmatpush.bf16.msrb.mxu3 %v9927_v13  ;;  %7306 = vst [vmem:[#allocation1 + $0x1] ss:$9 sm:$0xff] %v13172_v28  ;;  %v9954_v43 = vld [vmem:[%s10726_s9 + $0x218] sm:$0xff]  ;;  %v9956_v13 = vld [vmem:[%s10726_s9 + $0x2a8] sm:$0xff] }
 0x4e8   : > { %7308 = vst [vmem:[#allocation1 + $0x2] ss:$9 sm:$0xff] %v13179_v4 }
 0x4e9   : > { %7310 = vst [vmem:[#allocation1 + $0x3] ss:$9 sm:$0xff] %v13184_v7 }
 0x4ea   : > { %7232 = vmatpush.bf16.msra.mxu0 %v9928_v44  ;;  %7246 = vmatpush.bf16.msra.mxu1 %v9929_v18  ;;  %7312 = vst [vmem:[#allocation1 + $0x4] ss:$9 sm:$0xff] %v13190_v31  ;;  %v9960_v18 = vld [vmem:[%s10726_s9 + $0x2a0] sm:$0xff] }
 0x4eb   : > { %7190 = vmatpush.bf16.msrb.mxu2 %v9930_v38  ;;  %7204 = vmatpush.bf16.msrb.mxu3 %v9931_v39  ;;  %7315 = vst [vmem:[#allocation1 + $0x5] ss:$9 sm:$0xff] %v13283_v52 }
 0x4ee   : > { %7233 = vmatpush.bf16.msra.mxu0 %v9932_v27  ;;  %7247 = vmatpush.bf16.msra.mxu1 %v9933_v54  ;;  %v9962_v27 = vld [vmem:[%s10726_s9 + $0x208] sm:$0xff] }
 0x4ef   : > { %7191 = vmatpush.bf16.msrb.mxu2 %v9934_v17  ;;  %7205 = vmatpush.bf16.msrb.mxu3 %v9935_v14  ;;  %v9963_v54 = vld [vmem:[%s10726_s9 + $0x248] sm:$0xff]  ;;  %v9964_v14 = vld [vmem:[%s10726_s9 + $0x298] sm:$0xff] }
 0x4f2   : > { %7234 = vmatpush.bf16.msra.mxu0 %v9936_v41  ;;  %7248 = vmatpush.bf16.msra.mxu1 %v9937_v57  ;;  %v13302_v1 = vld [vmem:[#allocation1] sm:$0xff]  ;;  %v13304_v16 = vld [vmem:[#allocation1 + $0x9] sm:$0xff]  ;;  %v9969_v57 = vld [vmem:[%s10726_s9 + $0x2d0] sm:$0xff] }
 0x4f3   : > { %7274 = vmatpush.bf16.msra.mxu2 %v9938_v36  ;;  %7288 = vmatpush.bf16.msra.mxu3 %v9939_v61  ;;  %7350 = vst [vmem:[#allocation1] ss:$9 sm:$0xff] %v12419_v23  ;;  %v6823_v11 = vpop.f32.mrf.mxu2  ;;  %v9952_v23 = vld [vmem:[%s10726_s9 + $0x2b0] sm:$0xff]  ;;  %v9967_v41 = vld [vmem:[%s10726_s9 + $0x240] sm:$0xff]  ;;  %v9970_v36 = vld [vmem:[%s10726_s9 + $0x338] sm:$0xff] }
 0x4f4   : > { %7192 = vmatmul.bf16.vlgmr.msrb.gmra.mxu2 %v13213_v33  ;;  %7206 = vmatmul.bf16.vlgmr.msrb.gmra.mxu3 %v13215_v58  ;;  %v9946_v33 = vld [vmem:[%s10726_s9 + $0x228] sm:$0xff]  ;;  %7352 = vst [vmem:[#allocation1 + $0x1] ss:$9 sm:$0xff] %v12439_v40  ;;  %v9974_v61 = vld [vmem:[%s10726_s9 + $0x330] sm:$0xff] }
 0x4f5   : > { %v9947_v58 = vld [vmem:[%s10726_s9 + $0x268] sm:$0xff]  ;;  %7354 = vst [vmem:[#allocation1 + $0x2] ss:$9 sm:$0xff] %v12446_v62 }
 0x4f6   : > { %7235 = vmatpush.bf16.msra.mxu0 %v9940_v35  ;;  %7249 = vmatpush.bf16.msra.mxu1 %v9941_v3  ;;  %7356 = vst [vmem:[#allocation1 + $0x3] ss:$9 sm:$0xff] %v12451_v49  ;;  %v9955_v49 = vld [vmem:[%s10726_s9 + $0x258] sm:$0xff]  ;;  %v9975_v35 = vld [vmem:[%s10726_s9 + $0x370] sm:$0xff] }
 0x4f7   : > { %7275 = vmatpush.bf16.msra.mxu2 %v9942_v47  ;;  %7289 = vmatpush.bf16.msra.mxu3 %v9943_v60  ;;  %v6837_v20 = vpop.f32.mrf.mxu3  ;;  %7358 = vst [vmem:[#allocation1 + $0x4] ss:$9 sm:$0xff] %v12650_v21  ;;  %v9958_v21 = vld [vmem:[%s10726_s9 + $0x210] sm:$0xff] }
 0x4f8   : > { %7360 = vst [vmem:[#allocation1 + $0x5] ss:$9 sm:$0xff] %v14097_v2  ;;  %v9959_v2 = vld [vmem:[%s10726_s9 + $0x250] sm:$0xff] }
 0x4f9   : > { %v7733_v60 = vld [vmem:[%s13473_s0 + $0x7e] sm:$0x3] }
 0x4fa   : > { %7236 = vmatpush.bf16.msra.mxu0 %v9944_v37  ;;  %7250 = vmatpush.bf16.msra.mxu1 %v9945_v56  ;;  %v6868_v62 = vpop.f32.mrf.mxu0  ;;  %v6882_v51 = vpop.f32.mrf.mxu1  ;;  %v9978_v37 = vld [vmem:[%s10726_s9 + $0x328] sm:$0xff] }
 0x4fb   : > { %7276 = vmatpush.bf16.msra.mxu2 %v9946_v33  ;;  %7290 = vmatpush.bf16.msra.mxu3 %v9947_v58  ;;  %v6883_v45 = vadd.f32 %v6882_v51, %v6868_v62  ;;  %v9979_v56 = vld [vmem:[%s10726_s9 + $0x368] sm:$0xff]  ;;  %v9983_v33 = vld [vmem:[%s10726_s9 + $0x360] sm:$0xff]  ;;  %v9991_v62 = vld [vmem:[%s10726_s9 + $0x350] sm:$0xff] }
 0x4fd   : > { %7237 = vmatmul.bf16.vlgmr.msra.gmra.mxu0 %v13241_v12  ;;  %7251 = vmatmul.bf16.vlgmr.msra.gmra.mxu1 %v13243_v8  ;;  %v9953_v12 = vld [vmem:[%s10726_s9 + $0x2f0] sm:$0xff]  ;;  %v6838_v8 = vadd.f32 %v6837_v20, %v6823_v11  ;;  %v9987_v11 = vld [vmem:[%s10726_s9 + $0x358] sm:$0xff] }
 0x4fe   : > { %7320 = vmatpush.bf16.msrb.mxu0 %v9948_v24  ;;  %7334 = vmatpush.bf16.msrb.mxu1 %v9949_v55  ;;  %v9984_v24 = vld [vmem:[%s10726_s9 + $0x3b0] sm:$0xff] }
 0x4ff   : > { %7277 = vmatpush.bf16.msra.mxu2 %v9950_v5  ;;  %7291 = vmatpush.bf16.msra.mxu3 %v9951_v26  ;;  %v6842_v40 = vadd.f32 %v6838_v8, %v13257_v6  ;;  %v6825_v6 = vpop.f32.mrf.mxu2  ;;  %v6839_v44 = vpop.f32.mrf.mxu3  ;;  %v13331_v19 = vld [vmem:[#allocation1] sm:$0xff]  ;;  %v13333_v48 = vld [vmem:[#allocation1 + $0x9] sm:$0xff]  ;;  %v9985_v55 = vld [vmem:[%s10726_s9 + $0x3f0] sm:$0xff] }
 0x500   : > { %v6840_v34 = vadd.f32 %v6839_v44, %v6825_v6  ;;  %7395 = vst [vmem:[#allocation1] ss:$9 sm:$0xff] %v12925_v63  ;;  %v9965_v63 = vld [vmem:[%s10726_s9 + $0x2d8] sm:$0xff]  ;;  %v9995_v6 = vld [vmem:[%s10726_s9 + $0x348] sm:$0xff] }
 0x501   : > { %v13325_v50 = vadd.f32 %v6883_v45, %v6842_v40  ;;  %7397 = vst [vmem:[#allocation1 + $0x1] ss:$9 sm:$0xff] %v12932_v53  ;;  %v9966_v53 = vld [vmem:[%s10726_s9 + $0x200] sm:$0xff]  ;;  %v9986_v26 = vld [vmem:[%s10726_s9 + $0x318] sm:$0xff]  ;;  %v9990_v40 = vld [vmem:[%s10726_s9 + $0x310] sm:$0xff] }
 0x502   : > { %7321 = vmatpush.bf16.msrb.mxu0 %v9952_v23  ;;  %7335 = vmatpush.bf16.msrb.mxu1 %v9953_v12  ;;  %v6843_v38 = vadd.f32 %v6840_v34, %v13273_v15  ;;  %v6870_v39 = vpop.f32.mrf.mxu0  ;;  %v6884_v10 = vpop.f32.mrf.mxu1  ;;  %7399 = vst [vmem:[#allocation1 + $0x2] ss:$9 sm:$0xff] %v12940_v59  ;;  %v9968_v59 = vld [vmem:[%s10726_s9 + $0x290] sm:$0xff]  ;;  %v9988_v23 = vld [vmem:[%s10726_s9 + $0x3a8] sm:$0xff]  ;;  %v9993_v45 = vld [vmem:[%s10726_s9 + $0x3e0] sm:$0xff] }
 0x503   : > { %7278 = vmatpush.bf16.msra.mxu2 %v9954_v43  ;;  %7292 = vmatpush.bf16.msra.mxu3 %v9955_v49  ;;  %v6885_v17 = vadd.f32 %v6884_v10, %v6870_v39  ;;  %7401 = vst [vmem:[#allocation1 + $0x3] ss:$9 sm:$0xff] %v12946_v0  ;;  %v9971_v0 = vld [vmem:[%s10726_s9 + $0x378] sm:$0xff]  ;;  %v9989_v12 = vld [vmem:[%s10726_s9 + $0x3e8] sm:$0xff]  ;;  %v9992_v49 = vld [vmem:[%s10726_s9 + $0x3a0] sm:$0xff] }
 0x504   : > { %7403 = vst [vmem:[#allocation1 + $0x4] ss:$9 sm:$0xff] %v13020_v9  ;;  %v9972_v9 = vld [vmem:[%s10726_s9 + $0x288] sm:$0xff]  ;;  %v9999_v39 = vld [vmem:[%s10726_s9 + $0x340] sm:$0xff]  ;;  %v10000_v10 = vld [vmem:[%s10726_s9 + $0x390] sm:$0xff] }
 0x505   : > { %v13344_v15 = vadd.f32 %v6885_v17, %v6843_v38  ;;  %7405 = vst [vmem:[#allocation1 + $0x5] ss:$9 sm:$0xff] %v13089_v46  ;;  %v9973_v46 = vld [vmem:[%s10726_s9 + $0x2c8] sm:$0xff]  ;;  %v9998_v38 = vld [vmem:[%s10726_s9 + $0x300] sm:$0xff]  ;;  %v10003_v17 = vld [vmem:[%s10726_s9 + $0x478] sm:$0xff] }
 0x506   : > { %7322 = vmatpush.bf16.msrb.mxu0 %v9956_v13  ;;  %7336 = vmatpush.bf16.msrb.mxu1 %v9957_v22 }
 0x507   : > { %7279 = vmatpush.bf16.msra.mxu2 %v9958_v21  ;;  %7293 = vmatpush.bf16.msra.mxu3 %v9959_v2  ;;  %v9994_v2 = vld [vmem:[%s10726_s9 + $0x308] sm:$0xff] }
 0x50a   : > { %7323 = vmatpush.bf16.msrb.mxu0 %v9960_v18  ;;  %7337 = vmatpush.bf16.msrb.mxu1 %v9961_v32  ;;  %v9996_v18 = vld [vmem:[%s10726_s9 + $0x398] sm:$0xff] }
 0x50b   : > { %7280 = vmatpush.bf16.msra.mxu2 %v9962_v27  ;;  %7294 = vmatpush.bf16.msra.mxu3 %v9963_v54  ;;  %v9997_v32 = vld [vmem:[%s10726_s9 + $0x3d8] sm:$0xff]  ;;  %v10001_v27 = vld [vmem:[%s10726_s9 + $0x3d0] sm:$0xff] }
 0x50c   : > { %v13360_v3 = vld [vmem:[#allocation1] sm:$0xff]  ;;  %v13362_v47 = vld [vmem:[#allocation1 + $0x9] sm:$0xff] }
 0x50d   : > { %7440 = vst [vmem:[#allocation1] ss:$9 sm:$0xff] %v13172_v28  ;;  %v9980_v28 = vld [vmem:[%s10726_s9 + $0x3b8] sm:$0xff] }
 0x50e   : > { %7324 = vmatpush.bf16.msrb.mxu0 %v9964_v14  ;;  %7338 = vmatpush.bf16.msrb.mxu1 %v9965_v63  ;;  %7442 = vst [vmem:[#allocation1 + $0x1] ss:$9 sm:$0xff] %v13179_v4  ;;  %v9981_v4 = vld [vmem:[%s10726_s9 + $0x3f8] sm:$0xff]  ;;  %v10004_v14 = vld [vmem:[%s10726_s9 + $0x388] sm:$0xff] }
 0x50f   : > { %7281 = vmatpush.bf16.msra.mxu2 %v9966_v53  ;;  %7295 = vmatpush.bf16.msra.mxu3 %v9967_v41  ;;  %7444 = vst [vmem:[#allocation1 + $0x2] ss:$9 sm:$0xff] %v13184_v7  ;;  %v9982_v7 = vld [vmem:[%s10726_s9 + $0x320] sm:$0xff]  ;;  %v10002_v54 = vld [vmem:[%s10726_s9 + $0x438] sm:$0xff]  ;;  %v10005_v63 = vld [vmem:[%s10726_s9 + $0x3c8] sm:$0xff] }
 0x510   : > { %7446 = vst [vmem:[#allocation1 + $0x3] ss:$9 sm:$0xff] %v13190_v31  ;;  %v10007_v53 = vld [vmem:[%s10726_s9 + $0x470] sm:$0xff]  ;;  %v10008_v41 = vld [vmem:[%s10726_s9 + $0x380] sm:$0xff] }
 0x511   : > { %7448 = vst [vmem:[#allocation1 + $0x4] ss:$9 sm:$0xff] %v13283_v52 }
 0x512   : > { %7325 = vmatpush.bf16.msrb.mxu0 %v9968_v59  ;;  %7339 = vmatpush.bf16.msrb.mxu1 %v9969_v57  ;;  %7451 = vst [vmem:[#allocation1 + $0x5] ss:$9 sm:$0xff] %v7733_v60  ;;  %v6914_v31 = vpop.f32.mrf.mxu2  ;;  %v10009_v59 = vld [vmem:[%s10726_s9 + $0x3c0] sm:$0xff]  ;;  %v10010_v57 = vld [vmem:[%s10726_s9 + $0x428] sm:$0xff]  ;;  %v10015_v60 = vld [vmem:[%s10726_s9 + $0x458] sm:$0xff] }
 0x513   : > { %7365 = vmatpush.bf16.msrb.mxu2 %v9970_v36  ;;  %7379 = vmatpush.bf16.msrb.mxu3 %v9971_v0  ;;  %v10013_v36 = vld [vmem:[%s10726_s9 + $0x460] sm:$0xff] }
 0x514   : > { %7282 = vmatmul.bf16.vlgmr.msra.gmra.mxu2 %v13269_v42  ;;  %7296 = vmatmul.bf16.vlgmr.msra.gmra.mxu3 %v13271_v30  ;;  %v9976_v42 = vld [vmem:[%s10726_s9 + $0x280] sm:$0xff] }
 0x515   : > { %v9977_v30 = vld [vmem:[%s10726_s9 + $0x2c0] sm:$0xff] }
 0x516   : > { %7326 = vmatpush.bf16.msrb.mxu0 %v9972_v9  ;;  %7340 = vmatpush.bf16.msrb.mxu1 %v9973_v46 }
 0x517   : > { %7366 = vmatpush.bf16.msrb.mxu2 %v9974_v61  ;;  %7380 = vmatpush.bf16.msrb.mxu3 %v9975_v35  ;;  %v6928_v58 = vpop.f32.mrf.mxu3 }
 0x518   : > { %v6929_v52 = vadd.f32 %v6928_v58, %v6914_v31 }
 0x51a   : > { %7327 = vmatpush.bf16.msrb.mxu0 %v9976_v42  ;;  %7341 = vmatpush.bf16.msrb.mxu1 %v9977_v30  ;;  %v6973_v5 = vpop.f32.mrf.mxu1  ;;  %v6916_v51 = vpop.f32.mrf.mxu2  ;;  %v10014_v30 = vld [vmem:[%s10726_s9 + $0x418] sm:$0xff] }
 0x51b   : > { %7367 = vmatpush.bf16.msrb.mxu2 %v9978_v37  ;;  %7381 = vmatpush.bf16.msrb.mxu3 %v9979_v56 }
 0x51d   : > { %7328 = vmatmul.bf16.vlgmr.msrb.gmra.mxu0 %v13302_v1  ;;  %7342 = vmatmul.bf16.vlgmr.msrb.gmra.mxu1 %v13304_v16  ;;  %v6933_v1 = vadd.f32 %v6929_v52, %v13325_v50  ;;  %v6959_v16 = vpop.f32.mrf.mxu0 }
 0x51e   : > { %7410 = vmatpush.bf16.msra.mxu0 %v9980_v28  ;;  %7424 = vmatpush.bf16.msra.mxu1 %v9981_v4  ;;  %v6974_v20 = vadd.f32 %v6973_v5, %v6959_v16  ;;  %v10017_v4 = vld [vmem:[%s10726_s9 + $0x410] sm:$0xff]  ;;  %v10019_v5 = vld [vmem:[%s10726_s9 + $0x408] sm:$0xff] }
 0x51f   : > { %7368 = vmatpush.bf16.msrb.mxu2 %v9982_v7  ;;  %7382 = vmatpush.bf16.msrb.mxu3 %v9983_v33  ;;  %v6930_v43 = vpop.f32.mrf.mxu3  ;;  %v10018_v7 = vld [vmem:[%s10726_s9 + $0x450] sm:$0xff] }
 0x520   : > { %v13389_v8 = vadd.f32 %v6974_v20, %v6933_v1  ;;  %v6931_v13 = vadd.f32 %v6930_v43, %v6916_v51 }
 0x522   : > { %7411 = vmatpush.bf16.msra.mxu0 %v9984_v24  ;;  %7425 = vmatpush.bf16.msra.mxu1 %v9985_v55  ;;  %v6934_v22 = vadd.f32 %v6931_v13, %v13344_v15  ;;  %v6975_v21 = vpop.f32.mrf.mxu1  ;;  %v10006_v15 = vld [vmem:[%s10726_s9 + $0x430] sm:$0xff] }
 0x523   : > { %7369 = vmatpush.bf16.msrb.mxu2 %v9986_v26  ;;  %7383 = vmatpush.bf16.msrb.mxu3 %v9987_v11  ;;  %v10020_v26 = vld [vmem:[%s10726_s9 + $0x448] sm:$0xff] }
 0x525   : > { %v6961_v50 = vpop.f32.mrf.mxu0 }
 0x526   : > { %7412 = vmatpush.bf16.msra.mxu0 %v9988_v23  ;;  %7426 = vmatpush.bf16.msra.mxu1 %v9989_v12  ;;  %v6976_v44 = vadd.f32 %v6975_v21, %v6961_v50 }
 0x527   : > { %7370 = vmatpush.bf16.msrb.mxu2 %v9990_v40  ;;  %7384 = vmatpush.bf16.msrb.mxu3 %v9991_v62  ;;  %v10022_v40 = vld [vmem:[%s10726_s9 + $0x440] sm:$0xff] }
 0x528   : > { %v6979_v34 = vadd.f32 %v6976_v44, %v6934_v22  ;;  %v7453_v62 = vld [vmem:[#allocation1 + $0x9] sm:$0xff] }
 0x52a   : > { %7413 = vmatpush.bf16.msra.mxu0 %v9992_v49  ;;  %7427 = vmatpush.bf16.msra.mxu1 %v9993_v45  ;;  %v7452_v49 = vld [vmem:[#allocation1] sm:$0xff] }
 0x52b   : > { %7371 = vmatpush.bf16.msrb.mxu2 %v9994_v2  ;;  %7385 = vmatpush.bf16.msrb.mxu3 %v9995_v6 }
 0x52e   : > { %7414 = vmatpush.bf16.msra.mxu0 %v9996_v18  ;;  %7428 = vmatpush.bf16.msra.mxu1 %v9997_v32 }
 0x52f   : > { %7372 = vmatpush.bf16.msrb.mxu2 %v9998_v38  ;;  %7386 = vmatpush.bf16.msrb.mxu3 %v9999_v39 }
 0x532   : > { %7415 = vmatpush.bf16.msra.mxu0 %v10000_v10  ;;  %7429 = vmatpush.bf16.msra.mxu1 %v10001_v27  ;;  %v7004_v0 = vpop.f32.mrf.mxu2 }
 0x533   : > { %7456 = vmatpush.bf16.msra.mxu2 %v10002_v54  ;;  %7470 = vmatpush.bf16.msra.mxu3 %v10003_v17 }
 0x534   : > { %7373 = vmatmul.bf16.vlgmr.msrb.gmra.mxu2 %v13331_v19  ;;  %7387 = vmatmul.bf16.vlgmr.msrb.gmra.mxu3 %v13333_v48  ;;  %v10011_v19 = vld [vmem:[%s10726_s9 + $0x468] sm:$0xff]  ;;  %v10012_v48 = vld [vmem:[%s10726_s9 + $0x420] sm:$0xff] }
 0x536   : > { %7416 = vmatpush.bf16.msra.mxu0 %v10004_v14  ;;  %7430 = vmatpush.bf16.msra.mxu1 %v10005_v63 }
 0x537   : > { %7457 = vmatpush.bf16.msra.mxu2 %v10006_v15  ;;  %7471 = vmatpush.bf16.msra.mxu3 %v10007_v53  ;;  %v7018_v9 = vpop.f32.mrf.mxu3 }
 0x538   : > { %v7019_v46 = vadd.f32 %v7018_v9, %v7004_v0 }
 0x53a   : > { %7417 = vmatpush.bf16.msra.mxu0 %v10008_v41  ;;  %7431 = vmatpush.bf16.msra.mxu1 %v10009_v59  ;;  %v7023_v61 = vadd.f32 %v7019_v46, %v13389_v8  ;;  %v7050_v35 = vpop.f32.mrf.mxu0  ;;  %v7064_v42 = vpop.f32.mrf.mxu1  ;;  %v10021_v8 = vld [vmem:[%s10726_s9 + $0x400] sm:$0xff] }
 0x53b   : > { %7458 = vmatpush.bf16.msra.mxu2 %v10010_v57  ;;  %7472 = vmatpush.bf16.msra.mxu3 %v10011_v19  ;;  %v7006_v33 = vpop.f32.mrf.mxu2 }
 0x53d   : > { %7418 = vmatmul.bf16.vlgmr.msra.gmra.mxu0 %v13360_v3  ;;  %7432 = vmatmul.bf16.vlgmr.msra.gmra.mxu1 %v13362_v47  ;;  %v7065_v3 = vadd.f32 %v7064_v42, %v7050_v35  ;;  %v13424_v47 = vld [vmem:[%s11524_s20] ss:$0 sm:$0xff] }
 0x53e   : > { %v6658_v37 = vadd.f32 %v13424_v47, %v13154_v25  ;;  %v6659_v20 = vadd.f32 %v13424_v47, %v13201_v29 }
 0x53f   : > { %7459 = vmatpush.bf16.msra.mxu2 %v10012_v48  ;;  %7473 = vmatpush.bf16.msra.mxu3 %v10013_v36  ;;  %v7069_v56 = vadd.f32 %v7065_v3, %v7023_v61  ;;  %v7020_v31 = vpop.f32.mrf.mxu3 }
 0x540   : > { %v7021_v58 = vadd.f32 %v7020_v31, %v7006_v33  ;;  %v6660_v24 = vmax.f32 %v6658_v37, 0.0  ;;  %v6661_v51 = vmax.f32 %v6659_v20, 0.0 }
 0x541   : > { %v7071_v28 = vadd.f32 %v13424_v47, %v7069_v56 }
 0x542   : > { %v7024_v52 = vadd.f32 %v7021_v58, %v6979_v34  ;;  %v7052_v1 = vpop.f32.mrf.mxu0  ;;  %v7066_v16 = vpop.f32.mrf.mxu1 }
 0x543   : > { %7460 = vmatpush.bf16.msra.mxu2 %v10014_v30  ;;  %7474 = vmatpush.bf16.msra.mxu3 %v10015_v60  ;;  %v7073_v55 = vmax.f32 %v7071_v28, 0.0  ;;  %v7067_v11 = vadd.f32 %v7066_v16, %v7052_v1 }
 0x545   : > { %v13431_v25 = vmax.f32 %v6660_v24, %v7073_v55  ;;  %v7070_v23 = vadd.f32 %v7067_v11, %v7024_v52 }
 0x547   : > { %7461 = vmatpush.bf16.msra.mxu2 %v10017_v4  ;;  %7475 = vmatpush.bf16.msra.mxu3 %v10018_v7  ;;  %v7072_v12 = vadd.f32 %v13424_v47, %v7070_v23 }
 0x549   : > { %v7074_v43 = vmax.f32 %v7072_v12, 0.0 }
 0x54b   : > { %7462 = vmatpush.bf16.msra.mxu2 %v10019_v5  ;;  %7476 = vmatpush.bf16.msra.mxu3 %v10020_v26  ;;  %v13440_v45 = vmax.f32 %v6661_v51, %v7074_v43 }
 0x54f   : > { %7463 = vmatpush.bf16.msra.mxu2 %v10021_v8  ;;  %7477 = vmatpush.bf16.msra.mxu3 %v10022_v40 }
 0x552   : > { %7464 = vmatmul.bf16.vlgmr.msra.gmra.mxu2 %v7452_v49  ;;  %7478 = vmatmul.bf16.vlgmr.msra.gmra.mxu3 %v7453_v62 }
 0x557   : > { %v7101_v13 = vpop.f32.mrf.mxu2  ;;  %v7115_v22 = vpop.f32.mrf.mxu3 }
 0x558   : > { %v7116_v59 = vadd.f32 %v7115_v22, %v7101_v13 }
 0x55a   : > { %v7144_v50 = vpop.f32.mrf.mxu0  ;;  %v7158_v21 = vpop.f32.mrf.mxu1 }
 0x55b   : > { %v7145_v57 = vadd.f32 %v7144_v50, %v7116_v59 }
 0x55d   : > { %v7159_v0 = vadd.f32 %v7158_v21, %v7145_v57 }
 0x55f   : > { %v7103_v29 = vpop.f32.mrf.mxu2  ;;  %v7117_v2 = vpop.f32.mrf.mxu3 }
 0x560   : > { %v7118_v9 = vadd.f32 %v7117_v2, %v7103_v29 }
 0x562   : > { %v7146_v18 = vpop.f32.mrf.mxu0  ;;  %v7160_v32 = vpop.f32.mrf.mxu1 }
 0x563   : > { %v7147_v30 = vadd.f32 %v7146_v18, %v7118_v9 }
 0x565   : > { %v7161_v56 = vadd.f32 %v7160_v32, %v7147_v30 }
 0x577   : > { %v7193_v6 = vpop.f32.mrf.mxu2  ;;  %v7207_v44 = vpop.f32.mrf.mxu3 }
 0x578   : > { %v7208_v19 = vadd.f32 %v7207_v44, %v7193_v6 }
 0x57a   : > { %v7238_v34 = vpop.f32.mrf.mxu0  ;;  %v7252_v38 = vpop.f32.mrf.mxu1  ;;  %v7212_v35 = vadd.f32 %v7208_v19, %v7159_v0 }
 0x57b   : > { %v7253_v42 = vadd.f32 %v7252_v38, %v7238_v34 }
 0x57d   : > { %v7257_v3 = vadd.f32 %v7253_v42, %v7212_v35 }
 0x57f   : > { %v7195_v39 = vpop.f32.mrf.mxu2  ;;  %v7209_v10 = vpop.f32.mrf.mxu3 }
 0x580   : > { %v7210_v37 = vadd.f32 %v7209_v10, %v7195_v39 }
 0x582   : > { %v7240_v17 = vpop.f32.mrf.mxu0  ;;  %v7254_v14 = vpop.f32.mrf.mxu1  ;;  %v7213_v24 = vadd.f32 %v7210_v37, %v7161_v56 }
 0x583   : > { %v7255_v55 = vadd.f32 %v7254_v14, %v7240_v17 }
 0x585   : > { %v7258_v5 = vadd.f32 %v7255_v55, %v7213_v24 }
 0x597   : > { %v7283_v27 = vpop.f32.mrf.mxu2  ;;  %v7297_v54 = vpop.f32.mrf.mxu3 }
 0x598   : > { %v7298_v60 = vadd.f32 %v7297_v54, %v7283_v27 }
 0x59a   : > { %v7329_v63 = vpop.f32.mrf.mxu0  ;;  %v7343_v15 = vpop.f32.mrf.mxu1  ;;  %v7302_v28 = vadd.f32 %v7298_v60, %v7257_v3 }
 0x59b   : > { %v7344_v4 = vadd.f32 %v7343_v15, %v7329_v63 }
 0x59d   : > { %v7348_v1 = vadd.f32 %v7344_v4, %v7302_v28 }
 0x59f   : > { %v7285_v53 = vpop.f32.mrf.mxu2  ;;  %v7299_v41 = vpop.f32.mrf.mxu3 }
 0x5a0   : > { %v7300_v16 = vadd.f32 %v7299_v41, %v7285_v53 }
 0x5a2   : > { %v7331_v46 = vpop.f32.mrf.mxu0  ;;  %v7345_v61 = vpop.f32.mrf.mxu1  ;;  %v7303_v20 = vadd.f32 %v7300_v16, %v7258_v5 }
 0x5a3   : > { %v7346_v23 = vadd.f32 %v7345_v61, %v7331_v46 }
 0x5a5   : > { %v7349_v13 = vadd.f32 %v7346_v23, %v7303_v20 }
 0x5b7   : > { %v7374_v48 = vpop.f32.mrf.mxu2  ;;  %v7388_v36 = vpop.f32.mrf.mxu3 }
 0x5b8   : > { %v7389_v52 = vadd.f32 %v7388_v36, %v7374_v48  ;;  %v7547_v48 = vld [vmem:[%s12309_s12 + $0x2] sm:$0x1] (%p10118_p6) }
 0x5b9   : > { %7548 = vst [vmem:[%s7526_s29 + $0x4] sm:$0x1] (%p10118_p6), %v7547_v48 }
 0x5ba   : > { %v7419_v7 = vpop.f32.mrf.mxu0  ;;  %v7433_v33 = vpop.f32.mrf.mxu1  ;;  %v7393_v26 = vadd.f32 %v7389_v52, %v7348_v1 }
 0x5bb   : > { %v7434_v11 = vadd.f32 %v7433_v33, %v7419_v7 }
 0x5bd   : > { %v7438_v40 = vadd.f32 %v7434_v11, %v7393_v26 }
 0x5bf   : > { %v7376_v31 = vpop.f32.mrf.mxu2  ;;  %v7390_v58 = vpop.f32.mrf.mxu3 }
 0x5c0   : > { %v7391_v62 = vadd.f32 %v7390_v58, %v7376_v31 }
 0x5c2   : > { %v7421_v43 = vpop.f32.mrf.mxu0  ;;  %v7435_v49 = vpop.f32.mrf.mxu1  ;;  %v7394_v50 = vadd.f32 %v7391_v62, %v7349_v13 }
 0x5c3   : > { %v7436_v21 = vadd.f32 %v7435_v49, %v7421_v43 }
 0x5c5   : > { %v7439_v18 = vadd.f32 %v7436_v21, %v7394_v50 }
 0x5d5   : > { %v7465_v12 = vpop.f32.mrf.mxu2  ;;  %v7479_v8 = vpop.f32.mrf.mxu3 }
 0x5d6   : > { %v7480_v51 = vadd.f32 %v7479_v8, %v7465_v12 }
 0x5d8   : > { %v7484_v22 = vadd.f32 %v7480_v51, %v7438_v40 }
 0x5da   : > { %v7486_v29 = vadd.f32 %v13424_v47, %v7484_v22 }
 0x5dc   : > { %v7488_v2 = vmax.f32 %v7486_v29, 0.0 }
 0x5dd   : > { %v7467_v6 = vpop.f32.mrf.mxu2  ;;  %v7481_v44 = vpop.f32.mrf.mxu3 }
 0x5de   : > { %v7490_v32 = vmax.f32 %v13431_v25, %v7488_v2  ;;  %v7482_v34 = vadd.f32 %v7481_v44, %v7467_v6 }
 0x5e0   : > { %v7493_v38 = vrot.slane %v7490_v32, 2  ;;  %v7485_v39 = vadd.f32 %v7482_v34, %v7439_v18  ;;  %v7496_v27 = vrot.slane %v7490_v32, 4 }
 0x5e2   : > { %v7495_v10 = vmax.f32 %v7490_v32, %v7493_v38  ;;  %v7487_v54 = vadd.f32 %v13424_v47, %v7485_v39  ;;  %v7543_v47 = vld [vmem:[%s12309_s12] sm:$0x1] (%p10118_p6) }
 0x5e3   : > { %7544 = vst [vmem:[%s7526_s29] sm:$0x1] (%p10118_p6), %v7543_v47 }
 0x5e4   : > { %v7498_v17 = vmax.f32 %v7495_v10, %v7496_v27  ;;  %v7489_v14 = vmax.f32 %v7487_v54, 0.0 }
 0x5e6   : > { %v7499_v63 = vpack.c.bf16 %v7498_v17, %v7498_v17  ;;  %v7491_v15 = vmax.f32 %v13440_v45, %v7489_v14 }
 0x5e8   : > { %9399 = vst [vmem:[%s12309_s12 + $0x1] sm:$0x1] %v7499_v63  ;;  %v7503_v53 = vrot.slane %v7491_v15, 2  ;;  %v7506_v59 = vrot.slane %v7491_v15, 4 }
 0x5ea   : > { %v7505_v41 = vmax.f32 %v7490_v32, %v7503_v53 }
 0x5ec   : > { %v7508_v57 = vmax.f32 %v7505_v41, %v7506_v59 }
 0x5ee   : > { %v7509_v19 = vpack.c.bf16 %v7508_v57, %v7508_v57 }
 0x5ef   : > { %v7545_v45 = vld [vmem:[%s12309_s12 + $0x1] sm:$0x1] (%p10118_p6) }
 0x5f0   : > { %7511 = vst [vmem:[#allocation1] sm:$0xff] %v7509_v19 }
 0x5f1   : > { %7546 = vst [vmem:[%s7526_s29 + $0x2] sm:$0x1] (%p10118_p6), %v7545_v45 }
 0x5f4   : > { %7523 = sbr.rel (!%p10118_p6) target bundleno = 1537 (0x601), region = 88 }
 0x5f7   : > { %v7513_v25 = vld [vmem:[#allocation1 + $0x3] ss:$4 sm:$0xff] }
 0x5f8   : > { %9400 = vst [vmem:[%s12309_s12 + $0x3] sm:$0x1] %v7513_v25 }
 0x5ff   : > { %v7549_v36 = vld [vmem:[%s12309_s12 + $0x3] sm:$0x1] }
 0x600   : > { %7550 = vst [vmem:[%s7526_s29 + $0x6] sm:$0x1] %v7549_v36 }
 0x601 PF: > { %s13_s16 = sadd.s32 1, %s10061_s16   ;;  %s14130_s12 = smov %s10049_s13 }
 0x602   : > { %p10_p12 = scmp.ge.s32.totalorder %s13_s16, 4   ;;  %s14131_s13 = smov %s10123_s22 }
 0x603   : > { %s14132_s14 = smov %s10057_s15  ;;  %s14133_s15 = smov %s14135_s17 }
 0x604   :  { %12 = sbr.rel (!%p10_p12) target bundleno = 3 (0x3), region = 453 }

</bundles_post_ra>
